<compile_context>
chip_gen: v7x
topology: tpu7x:2x2x1
jax: 0.10.0
libtpu: 0.0.40
codegen_flags: <defaults>
</compile_context>

<pallas_src>
import math
import numpy as np
import jax
import jax.numpy as jnp
from jax import lax
from jax.experimental import pallas as pl
from jax.experimental.pallas import tpu as pltpu

# ----------------------------------------------------------------------------
# MBSTOI constants (identical to the PyTorch module)
# ----------------------------------------------------------------------------
GRIDCOARSENESS = 1
FS_SIGNAL = 10000            # CONFIG.fs (chosen equal to fs -> resample is identity)
FS = 10000
N_FRAME = 256
HOP = N_FRAME // 2
K_FFT = 512
J_BANDS = 15
MN = 150
N_INT = 30                   # frames per intermediate intelligibility window
DYN_RANGE = 40
TAU_MIN, TAU_MAX = -0.001, 0.001
NTAUS = math.ceil(100 / GRIDCOARSENESS)
GAMMA_MIN, GAMMA_MAX = -20, 20
NGAMMAS = math.ceil(40 / GRIDCOARSENESS)
SIGMA_DELTA_0 = 65e-6
SIGMA_EPSILON_0 = 1.5
ALPHA_0_DB = 13
TAU_0 = 1.6e-3
P_EXP = 1.6

NTP = 128                    # tau axis padded to a full lane tile
NGNT = NGAMMAS * NTP         # flattened (gamma-major, tau-minor) grid size
TM_EC = 128                  # frame-window tile (lane-dense outputs, fits v7x VMEM)

# all 36 unordered signal pairs (signal order: Lx, Rx, Ly, Ry, Rrx, Irx, Rry, Iry)
_PAIRS = [(a, b) for a in range(8) for b in range(a, 8)]
_PIDX = {p: i for i, p in enumerate(_PAIRS)}
_NPAIR_PAD = 40              # pad 36 -> 40 (multiple of 8) for the transpose


# ----------------------------------------------------------------------------
# Host-side glue (parameter setup / dynamic-shape preprocessing)
# ----------------------------------------------------------------------------
def thirdoct(fs, nfft, num_bands, min_freq):
    """Third-octave band matrix (same as clarity MBSTOI baseline)."""
    f = np.linspace(0, fs, nfft + 1)[: nfft // 2 + 1]
    k = np.arange(num_bands).astype(float)
    cf = np.power(2.0 ** (1.0 / 3.0), k) * min_freq
    freq_low = min_freq * np.power(2.0, (2 * k - 1) / 6)
    freq_high = min_freq * np.power(2.0, (2 * k + 1) / 6)
    obm = np.zeros((num_bands, len(f)))
    fids = np.zeros((num_bands, 2))
    for i in range(len(cf)):
        fl_ii = int(np.argmin(np.square(f - freq_low[i])))
        freq_low[i] = f[fl_ii]
        fh_ii = int(np.argmin(np.square(f - freq_high[i])))
        freq_high[i] = f[fh_ii]
        obm[i, fl_ii:fh_ii] = 1.0
        fids[i, :] = [fl_ii + 1, fh_ii]
    return obm, cf[np.newaxis, :], fids, freq_low, freq_high


def _hann(n):
    return np.hanning(n + 2)[1:-1].astype(np.float32)


def _signal_to_frames_np(x, framelen, hop):
    w = _hann(framelen)
    nf = (x.shape[0] - framelen) // hop + 1
    idx = hop * np.arange(nf)[:, None] + np.arange(framelen)[None, :]
    frames = x[idx][:-1]                # matches torch [..., :-1]
    return frames * w[None, :]          # (nf-1, framelen)


def _detect_silent_np(x, dyn_range, framelen, hop):
    EPS = 1e-8
    fr = _signal_to_frames_np(x, framelen, hop)
    e = 20.0 * np.log10(np.linalg.norm(fr, axis=1) + EPS)
    mask = (np.max(e) - dyn_range - e) < 0
    return mask, fr


def _remove_silent_frames_np(xl, xr, yl, yr, dyn_range, framelen, hop):
    mxl, xl_f = _detect_silent_np(xl, dyn_range, framelen, hop)
    mxr, xr_f = _detect_silent_np(xr, dyn_range, framelen, hop)
    yl_f = _signal_to_frames_np(yl, framelen, hop)
    yr_f = _signal_to_frames_np(yr, framelen, hop)
    keep = np.logical_or(mxl, mxr)
    xl_f, xr_f, yl_f, yr_f = xl_f[keep], xr_f[keep], yl_f[keep], yr_f[keep]
    nk = xl_f.shape[0]
    n_sil = (nk - 1) * hop + framelen

    def ola(fr):
        out = np.zeros(n_sil, np.float32)
        for i in range(nk):
            out[i * hop:i * hop + framelen] += fr[i]
        return out

    return ola(xl_f), ola(xr_f), ola(yl_f), ola(yr_f)


def _stft_reim(x_np, n_fft, win_length, hop):
    """torch.stft(center=False, onesided) equivalent -> real/imag (F, T) f32."""
    win = np.zeros(n_fft, np.float32)
    padl = (n_fft - win_length) // 2
    win[padl:padl + win_length] = _hann(win_length)
    t_frames = (x_np.shape[0] - n_fft) // hop + 1
    idx = hop * np.arange(t_frames)[:, None] + np.arange(n_fft)[None, :]
    frames = jnp.asarray(x_np[idx] * win[None, :], jnp.float32)
    spec = jnp.fft.rfft(frames, axis=-1)   # (T, F)  -- no Pallas FFT primitive
    return (jnp.real(spec).T.astype(jnp.float32),
            jnp.imag(spec).T.astype(jnp.float32))


def _build_basis(cf):
    """Rank-9 basis grids B (J, 9, NG*NTP) for the EC stage (host NumPy, f64)."""
    assert NTAUS <= NTP
    taus = np.linspace(TAU_MIN, TAU_MAX, NTAUS)
    # pad tau axis by replicating the last tau (never changes max/argmax/min)
    taus_p = np.concatenate([taus, np.full(NTP - NTAUS, taus[-1])])
    gammas0 = np.linspace(GAMMA_MIN, GAMMA_MAX, NGAMMAS)
    sigma_epsilon = (np.sqrt(2.0) * SIGMA_EPSILON_0
                     * (1.0 + (np.abs(gammas0) / ALPHA_0_DB) ** P_EXP) / 20.0)
    gammas = gammas0 / 20.0
    sigma_delta = np.sqrt(2.0) * SIGMA_DELTA_0 * (1.0 + np.abs(taus_p) / TAU_0)
    ln10sq = np.log(10.0) ** 2
    epsexp = np.exp(2.0 * ln10sq * sigma_epsilon ** 2)
    p2g = 10.0 ** (2.0 * gammas)
    m2g = 10.0 ** (-2.0 * gammas)

    B = np.zeros((J_BANDS, 9, NGAMMAS, NTP), np.float64)
    for j in range(J_BANDS):
        w = float(cf[j])
        cos1 = np.cos(w * taus_p)
        sin1 = np.sin(w * taus_p)
        cos2 = np.cos(2.0 * w * taus_p)
        sin2 = np.sin(2.0 * w * taus_p)
        delt = np.exp(-(w ** 2) * sigma_delta ** 2)
        epsdel = np.exp(0.5 * (ln10sq * sigma_epsilon[:, None] ** 2
                               - (w ** 2) * sigma_delta[None, :] ** 2))   # (NG, NTP)
        epsdp = epsdel * (10.0 ** gammas)[:, None]
        epsdm = epsdel * (10.0 ** (-gammas))[:, None]
        B[j, 0] = (epsexp * p2g)[:, None]
        B[j, 1] = (epsexp * m2g)[:, None]
        B[j, 2] = 1.0
        B[j, 3] = -2.0 * epsdp * cos1[None, :]
        B[j, 4] = -2.0 * epsdp * sin1[None, :]
        B[j, 5] = -2.0 * epsdm * cos1[None, :]
        B[j, 6] = -2.0 * epsdm * sin1[None, :]
        B[j, 7] = 2.0 * delt[None, :] * cos2[None, :]
        B[j, 8] = 2.0 * delt[None, :] * sin2[None, :]
    return B.reshape(J_BANDS, 9, NGNT).astype(np.float32)


# ----------------------------------------------------------------------------
# Pallas kernel B: fused channel construction + third-octave band matmul
# ----------------------------------------------------------------------------
def _band_kernel(h_ref, xlr_ref, xli_ref, xrr_ref, xri_ref,
                 ylr_ref, yli_ref, yrr_ref, yri_ref, o_ref):
    hi = lax.Precision.HIGHEST
    H = h_ref[...]                               # (J, F)
    xlr = xlr_ref[...]; xli = xli_ref[...]
    xrr = xrr_ref[...]; xri = xri_ref[...]
    ylr = ylr_ref[...]; yli = yli_ref[...]
    yrr = yrr_ref[...]; yri = yri_ref[...]
    chans = (xlr * xlr + xli * xli,              # |Xl|^2
             xrr * xrr + xri * xri,              # |Xr|^2
             ylr * ylr + yli * yli,              # |Yl|^2
             yrr * yrr + yri * yri,              # |Yr|^2
             xrr * xlr + xri * xli,              # Re(conj(Xr) Xl)
             xrr * xli - xri * xlr,              # Im(conj(Xr) Xl)
             yrr * ylr + yri * yli,              # Re(conj(Yr) Yl)
             yrr * yli - yri * ylr)              # Im(conj(Yr) Yl)
    for c, ch in enumerate(chans):
        o_ref[:, c, :] = jnp.dot(H, ch, preferred_element_type=jnp.float32,
                                 precision=hi)


def band_aggregate(H, reims, tn=128):
    f_bins, tpad = reims[0].shape
    jb = H.shape[0]
    return pl.pallas_call(
        _band_kernel,
        grid=(tpad // tn,),
        in_specs=[pl.BlockSpec((jb, f_bins), lambda i: (0, 0))]
                 + [pl.BlockSpec((f_bins, tn), lambda i: (0, i))] * 8,
        out_specs=pl.BlockSpec((jb, 8, tn), lambda i: (0, 0, i)),
        out_shape=jax.ShapeDtypeStruct((jb, 8, tpad), jnp.float32),
        compiler_params=pltpu.CompilerParams(
            dimension_semantics=("parallel",)),
    )(H, *reims)


# ----------------------------------------------------------------------------
# Pallas kernel A: fused EC + better-ear stage, grid over (band, window tile)
# ----------------------------------------------------------------------------
def _ec_be_kernel(bands_ref, basis_ref, out_ref):
    tm = out_ref.shape[2]                        # window tile size
    ngnt = basis_ref.shape[2]
    ntp = ngnt // NGAMMAS
    n = N_INT
    hi = lax.Precision.HIGHEST

    mt = pl.program_id(1)
    start = pl.multiple_of(mt * tm, tm)
    sigs = bands_ref[0, :, pl.ds(start, 2 * tm)]          # (8, 2*tm) lane-dense
    bmat = basis_ref[0]                                    # (9, NGNT)

    # ---- centered windowed cross-sums for all 36 signal pairs (MXU) ----
    t_i = lax.broadcasted_iota(jnp.int32, (2 * tm, tm), 0)
    m_i = lax.broadcasted_iota(jnp.int32, (2 * tm, tm), 1)
    wmat = jnp.logical_and(t_i >= m_i, t_i < m_i + n).astype(jnp.float32)

    A = jnp.dot(sigs, wmat, preferred_element_type=jnp.float32, precision=hi)  # (8, tm)
    prods = jnp.concatenate(
        [sigs[a:a + 1, :] * sigs[b:b + 1, :] for (a, b) in _PAIRS], axis=0)     # (36, 2tm)
    s_raw = jnp.dot(prods, wmat, preferred_element_type=jnp.float32,
                    precision=hi)                                               # (36, tm)
    a_a = jnp.concatenate([A[a:a + 1, :] for (a, _b) in _PAIRS], axis=0)
    a_b = jnp.concatenate([A[b:b + 1, :] for (_a, b) in _PAIRS], axis=0)
    S = s_raw - a_a * a_b * (1.0 / n)                                           # (36, tm)
    S = jnp.concatenate(
        [S, jnp.zeros((_NPAIR_PAD - len(_PAIRS), tm), jnp.float32)], axis=0)    # (40, tm)
    St = S.T                                                                    # (tm, 40)

    def sc(a, b):
        k = _PIDX[(a, b) if a <= b else (b, a)]
        return St[:, k:k + 1]                                                   # (tm, 1)

    # ---- rank-9 coefficients for the three EC grids ----
    def coeffs_xy():
        return [sc(0, 2), sc(1, 3),
                sc(0, 3) + sc(1, 2) + 2.0 * (sc(4, 6) + sc(5, 7)),
                sc(0, 6) + sc(2, 4), sc(0, 7) + sc(2, 5),
                sc(1, 6) + sc(3, 4), sc(1, 7) + sc(3, 5),
                sc(4, 6) - sc(5, 7), sc(4, 7) + sc(5, 6)]

    def coeffs_auto(a, b, rr, ri):
        return [sc(a, a), sc(b, b),
                2.0 * sc(a, b) + 2.0 * (sc(rr, rr) + sc(ri, ri)),
                2.0 * sc(a, rr), 2.0 * sc(a, ri),
                2.0 * sc(b, rr), 2.0 * sc(b, ri),
                sc(rr, rr) - sc(ri, ri), 2.0 * sc(rr, ri)]

    c_xy = jnp.concatenate(coeffs_xy(), axis=1)                      # (tm, 9)
    c_xx = jnp.concatenate(coeffs_auto(0, 1, 4, 5), axis=1)
    c_yy = jnp.concatenate(coeffs_auto(2, 3, 6, 7), axis=1)

    exy = jnp.dot(c_xy, bmat, preferred_element_type=jnp.float32, precision=hi)
    exx = jnp.dot(c_xx, bmat, preferred_element_type=jnp.float32, precision=hi)
    eyy = jnp.dot(c_yy, bmat, preferred_element_type=jnp.float32, precision=hi)

    # ---- degenerate detection: every gamma has a ~zero |exx*eyy| over taus ----
    z = (jnp.abs(exx * eyy) < 1e-40).astype(jnp.float32)             # (tm, NGNT)
    row_g = lax.broadcasted_iota(jnp.int32, (ngnt, NGAMMAS), 0) // ntp
    col_g = lax.broadcasted_iota(jnp.int32, (ngnt, NGAMMAS), 1)
    gsel = (row_g == col_g).astype(jnp.float32)                      # (NGNT, NG)
    zg = jnp.dot(z, gsel, preferred_element_type=jnp.float32)        # (tm, NG)
    small = (jnp.sum((zg > 0.5).astype(jnp.float32), axis=1, keepdims=True)
             > NGAMMAS - 0.5)                                        # (tm, 1)

    # ---- max / first-occurrence argmax over the flat (gamma, tau) grid ----
    p = exx * pl.reciprocal(eyy, approx=False)                       # EUP
    pmax = jnp.max(p, axis=1, keepdims=True)                         # (tm, 1)
    lane = lax.broadcasted_iota(jnp.int32, (tm, ngnt), 1)
    idx = jnp.min(jnp.where(p == pmax, lane, ngnt), axis=1, keepdims=True)
    selm = lane == idx
    exy_s = jnp.sum(jnp.where(selm, exy, 0.0), axis=1, keepdims=True)
    exx_s = jnp.sum(jnp.where(selm, exx, 0.0), axis=1, keepdims=True)
    eyy_s = jnp.sum(jnp.where(selm, eyy, 0.0), axis=1, keepdims=True)
    d_col = exy_s * lax.rsqrt(exx_s * eyy_s)
    d_col = jnp.where(small, -1.0, d_col)
    pm_col = jnp.where(small, 0.0, pmax)

    # ---- better-ear (STOI) metrics: byproducts of the same windowed sums ----
    s00 = sc(0, 0); s11 = sc(1, 1); s22 = sc(2, 2); s33 = sc(3, 3)
    s02 = sc(0, 2); s13 = sc(1, 3)
    pow_l = s00 / (s22 + 1e-10)
    pow_r = s11 / (s33 + 1e-10)
    den_l = jnp.sqrt(jnp.maximum(s00, 0.0)) * jnp.sqrt(jnp.maximum(s22, 0.0)) + 1e-10
    den_r = jnp.sqrt(jnp.maximum(s11, 0.0)) * jnp.sqrt(jnp.maximum(s33, 0.0)) + 1e-10
    dl_col = jnp.where(den_l < 1e-6, 0.0, s02 / den_l)
    dr_col = jnp.where(den_r < 1e-6, 0.0, s13 / den_r)

    zero = jnp.zeros_like(d_col)
    met = jnp.concatenate(
        [d_col, pm_col, pow_l, pow_r, dl_col, dr_col, zero, zero], axis=1)  # (tm, 8)
    out_ref[0] = met.T                                                       # (8, tm)


def ec_be_stage(bands, basis, tm=TM_EC):
    jb, _, tpad = bands.shape
    ngnt = basis.shape[2]
    mtiles = tpad // tm - 1
    mp = mtiles * tm
    return pl.pallas_call(
        _ec_be_kernel,
        grid=(jb, mtiles),
        in_specs=[pl.BlockSpec((1, 8, tpad), lambda j, m: (j, 0, 0)),
                  pl.BlockSpec((1, 9, ngnt), lambda j, m: (j, 0, 0))],
        out_specs=pl.BlockSpec((1, 8, tm), lambda j, m: (j, 0, m)),
        out_shape=jax.ShapeDtypeStruct((jb, 8, mp), jnp.float32),
        compiler_params=pltpu.CompilerParams(
            dimension_semantics=("parallel", "parallel"),
            vmem_limit_bytes=48 * 1024 * 1024),
    )(bands, basis)


# ----------------------------------------------------------------------------
# Full MBSTOI forward
# ----------------------------------------------------------------------------
def mbstoi_forward(xl, xr, yl, yr):
    fs = FS
    xl = np.asarray(xl, np.float32); xr = np.asarray(xr, np.float32)
    yl = np.asarray(yl, np.float32); yr = np.asarray(yr, np.float32)

    # resample approximation (identity since FS_SIGNAL == fs, kept for fidelity)
    def res(x):
        k = FS_SIGNAL / fs
        idx = np.asarray([round(i * k) for i in range(math.floor(x.shape[0] / k))],
                         np.int64)
        return x[idx]
    xl, xr, yl, yr = res(xl), res(xr), res(yl), res(yr)

    xl, xr, yl, yr = _remove_silent_frames_np(xl, xr, yl, yr,
                                              DYN_RANGE, N_FRAME, HOP)

    H, cf_raw, _fids, _fl, _fh = thirdoct(fs, K_FFT, J_BANDS, MN)
    cf = 2.0 * math.pi * cf_raw.flatten()                  # (J,)

    xl_re, xl_im = _stft_reim(xl, K_FFT, N_FRAME, HOP)     # (F, T)
    xr_re, xr_im = _stft_reim(xr, K_FFT, N_FRAME, HOP)
    yl_re, yl_im = _stft_reim(yl, K_FFT, N_FRAME, HOP)
    yr_re, yr_im = _stft_reim(yr, K_FFT, N_FRAME, HOP)
    T = xl_re.shape[1]
    assert T > N_INT, "signal too short for MBSTOI"
    M = T - N_INT + 1
    Ms = T - N_INT
    tm = TM_EC
    mtiles = -(-M // tm)
    mp = mtiles * tm
    tpad = mp + tm                                          # room for sliding window

    def pad_t(a):
        return jnp.pad(a, ((0, 0), (0, tpad - T)))

    reims = [pad_t(a) for a in (xl_re, xl_im, xr_re, xr_im,
                                yl_re, yl_im, yr_re, yr_im)]

    # ---- kernel B: fused channel construction + band aggregation ----
    bands = band_aggregate(jnp.asarray(H, jnp.float32), reims)       # (J, 8, Tpad)
    # global per-(band,channel) centering: exactly cancels in the windowed
    # covariances, but conditions the f32 sum-of-products computation.
    bands = bands - jnp.mean(bands[:, :, :T], axis=2, keepdims=True)

    # ---- kernel A: fused EC + better-ear stage ----
    basis = jnp.asarray(_build_basis(cf))                             # (J, 9, NGNT)
    met = ec_be_stage(bands, basis, tm)                               # (J, 8, Mp)

    d_ec = met[:, 0, :M]
    p_ec_max = met[:, 1, :M]
    zcol = jnp.zeros((J_BANDS, 1), jnp.float32)
    pw_l = jnp.concatenate([met[:, 2, :Ms], zcol], axis=1)
    pw_r = jnp.concatenate([met[:, 3, :Ms], zcol], axis=1)
    dl_i = jnp.concatenate([met[:, 4, :Ms], zcol], axis=1)
    dr_i = jnp.concatenate([met[:, 5, :Ms], zcol], axis=1)

    p_be_max = jnp.maximum(pw_l, pw_r)
    dbe_interm = jnp.where(pw_l > pw_r, dl_i, dr_i)
    d = jnp.where(p_be_max > p_ec_max, dbe_interm, d_ec)
    return jnp.mean(d)


# ----------------------------------------------------------------------------
if __name__ == "__main__":
    key = jax.random.PRNGKey(0)
    k1, k2, k3, k4 = jax.random.split(key, 4)
    L = 5120                                   # ~0.5 s @ 10 kHz (small test size)
    clean = jax.random.normal(k1, (L,), jnp.float32)
    diffuse = jax.random.normal(k2, (L,), jnp.float32)
    xl = clean
    xr = 0.8 * clean + 0.2 * diffuse
    yl = clean + 0.4 * jax.random.normal(k3, (L,), jnp.float32)
    yr = xr + 0.4 * jax.random.normal(k4, (L,), jnp.float32)

    sii = mbstoi_forward(xl, xr, yl, yr)
    sii = jax.block_until_ready(sii)
    assert np.isfinite(float(sii))
    print("KERNEL_OK")
</pallas_src>

<mosaic_0001>
module attributes {stable_mosaic.version = 11 : i64} {
  func.func @_band_kernel(%arg0: i32, %arg1: memref<15x257xf32, #tpu.memory_space<vmem>>, %arg2: memref<257x128xf32, #tpu.memory_space<vmem>>, %arg3: memref<257x128xf32, #tpu.memory_space<vmem>>, %arg4: memref<257x128xf32, #tpu.memory_space<vmem>>, %arg5: memref<257x128xf32, #tpu.memory_space<vmem>>, %arg6: memref<257x128xf32, #tpu.memory_space<vmem>>, %arg7: memref<257x128xf32, #tpu.memory_space<vmem>>, %arg8: memref<257x128xf32, #tpu.memory_space<vmem>>, %arg9: memref<257x128xf32, #tpu.memory_space<vmem>>, %arg10: memref<15x8x128xf32, #tpu.memory_space<vmem>>) attributes {dimension_semantics = [#tpu.dimension_semantics<parallel>], iteration_bounds = array<i64: 2>, scalar_prefetch = 0 : i64, scratch_operands = 0 : i64, tpu.core_type = #tpu.core_type<tc>, window_params = [{pipeline_mode = #tpu.pipeline_mode<synchronous>, transform_indices = @transform_0, window_bounds = array<i64: 15, 257>}, {transform_indices = @transform_1, window_bounds = array<i64: 257, 128>}, {transform_indices = @transform_2, window_bounds = array<i64: 257, 128>}, {transform_indices = @transform_3, window_bounds = array<i64: 257, 128>}, {transform_indices = @transform_4, window_bounds = array<i64: 257, 128>}, {transform_indices = @transform_5, window_bounds = array<i64: 257, 128>}, {transform_indices = @transform_6, window_bounds = array<i64: 257, 128>}, {transform_indices = @transform_7, window_bounds = array<i64: 257, 128>}, {transform_indices = @transform_8, window_bounds = array<i64: 257, 128>}, {transform_indices = @transform_9, window_bounds = array<i64: 15, 8, 128>}]} {
    %c0 = arith.constant 0 : index
    %c0_0 = arith.constant 0 : index
    %0 = vector.load %arg1[%c0, %c0_0] : memref<15x257xf32, #tpu.memory_space<vmem>>, vector<15x257xf32>
    %c0_1 = arith.constant 0 : index
    %c0_2 = arith.constant 0 : index
    %1 = vector.load %arg2[%c0_1, %c0_2] : memref<257x128xf32, #tpu.memory_space<vmem>>, vector<257x128xf32>
    %c0_3 = arith.constant 0 : index
    %c0_4 = arith.constant 0 : index
    %2 = vector.load %arg3[%c0_3, %c0_4] : memref<257x128xf32, #tpu.memory_space<vmem>>, vector<257x128xf32>
    %c0_5 = arith.constant 0 : index
    %c0_6 = arith.constant 0 : index
    %3 = vector.load %arg4[%c0_5, %c0_6] : memref<257x128xf32, #tpu.memory_space<vmem>>, vector<257x128xf32>
    %c0_7 = arith.constant 0 : index
    %c0_8 = arith.constant 0 : index
    %4 = vector.load %arg5[%c0_7, %c0_8] : memref<257x128xf32, #tpu.memory_space<vmem>>, vector<257x128xf32>
    %c0_9 = arith.constant 0 : index
    %c0_10 = arith.constant 0 : index
    %5 = vector.load %arg6[%c0_9, %c0_10] : memref<257x128xf32, #tpu.memory_space<vmem>>, vector<257x128xf32>
    %c0_11 = arith.constant 0 : index
    %c0_12 = arith.constant 0 : index
    %6 = vector.load %arg7[%c0_11, %c0_12] : memref<257x128xf32, #tpu.memory_space<vmem>>, vector<257x128xf32>
    %c0_13 = arith.constant 0 : index
    %c0_14 = arith.constant 0 : index
    %7 = vector.load %arg8[%c0_13, %c0_14] : memref<257x128xf32, #tpu.memory_space<vmem>>, vector<257x128xf32>
    %c0_15 = arith.constant 0 : index
    %c0_16 = arith.constant 0 : index
    %8 = vector.load %arg9[%c0_15, %c0_16] : memref<257x128xf32, #tpu.memory_space<vmem>>, vector<257x128xf32>
    %9 = arith.mulf %1, %1 : vector<257x128xf32>
    %10 = arith.mulf %2, %2 : vector<257x128xf32>
    %11 = arith.addf %9, %10 : vector<257x128xf32>
    %12 = arith.mulf %3, %3 : vector<257x128xf32>
    %13 = arith.mulf %4, %4 : vector<257x128xf32>
    %14 = arith.addf %12, %13 : vector<257x128xf32>
    %15 = arith.mulf %5, %5 : vector<257x128xf32>
    %16 = arith.mulf %6, %6 : vector<257x128xf32>
    %17 = arith.addf %15, %16 : vector<257x128xf32>
    %18 = arith.mulf %7, %7 : vector<257x128xf32>
    %19 = arith.mulf %8, %8 : vector<257x128xf32>
    %20 = arith.addf %18, %19 : vector<257x128xf32>
    %21 = arith.mulf %3, %1 : vector<257x128xf32>
    %22 = arith.mulf %4, %2 : vector<257x128xf32>
    %23 = arith.addf %21, %22 : vector<257x128xf32>
    %24 = arith.mulf %3, %2 : vector<257x128xf32>
    %25 = arith.mulf %4, %1 : vector<257x128xf32>
    %26 = arith.subf %24, %25 : vector<257x128xf32>
    %27 = arith.mulf %7, %5 : vector<257x128xf32>
    %28 = arith.mulf %8, %6 : vector<257x128xf32>
    %29 = arith.addf %27, %28 : vector<257x128xf32>
    %30 = arith.mulf %7, %6 : vector<257x128xf32>
    %31 = arith.mulf %8, %5 : vector<257x128xf32>
    %32 = arith.subf %30, %31 : vector<257x128xf32>
    %cst = arith.constant dense<0.000000e+00> : vector<15x128xf32>
    %33 = tpu.matmul %0, %11, %cst {dimension_numbers = #tpu.dot_dimension_numbers<[1], [0], [0], [1], [0, 0, 1, 1], [], []>, precision = #tpu.contract_precision<fp32>} : vector<15x257xf32>, vector<257x128xf32>, vector<15x128xf32> -> vector<15x128xf32>
    %c0_17 = arith.constant 0 : index
    %c0_18 = arith.constant 0 : index
    %c0_19 = arith.constant 0 : index
    %34 = vector.load %arg10[%c0_17, %c0_18, %c0_19] : memref<15x8x128xf32, #tpu.memory_space<vmem>>, vector<15x1x128xf32>
    %35 = vector.shape_cast %34 : vector<15x1x128xf32> to vector<15x128xf32>
    %36 = vector.shape_cast %33 : vector<15x128xf32> to vector<15x1x128xf32>
    tpu.vector_store %arg10[%c0_17, %c0_18, %c0_19], %36 {strides = array<i32>} : memref<15x8x128xf32, #tpu.memory_space<vmem>>, vector<15x1x128xf32>,
    %cst_20 = arith.constant dense<0.000000e+00> : vector<15x128xf32>
    %37 = tpu.matmul %0, %14, %cst_20 {dimension_numbers = #tpu.dot_dimension_numbers<[1], [0], [0], [1], [0, 0, 1, 1], [], []>, precision = #tpu.contract_precision<fp32>} : vector<15x257xf32>, vector<257x128xf32>, vector<15x128xf32> -> vector<15x128xf32>
    %c0_21 = arith.constant 0 : index
    %c1 = arith.constant 1 : index
    %c0_22 = arith.constant 0 : index
    %38 = vector.load %arg10[%c0_21, %c1, %c0_22] : memref<15x8x128xf32, #tpu.memory_space<vmem>>, vector<15x1x128xf32>
    %39 = vector.shape_cast %38 : vector<15x1x128xf32> to vector<15x128xf32>
    %40 = vector.shape_cast %37 : vector<15x128xf32> to vector<15x1x128xf32>
    tpu.vector_store %arg10[%c0_21, %c1, %c0_22], %40 {strides = array<i32>} : memref<15x8x128xf32, #tpu.memory_space<vmem>>, vector<15x1x128xf32>,
    %cst_23 = arith.constant dense<0.000000e+00> : vector<15x128xf32>
    %41 = tpu.matmul %0, %17, %cst_23 {dimension_numbers = #tpu.dot_dimension_numbers<[1], [0], [0], [1], [0, 0, 1, 1], [], []>, precision = #tpu.contract_precision<fp32>} : vector<15x257xf32>, vector<257x128xf32>, vector<15x128xf32> -> vector<15x128xf32>
    %c0_24 = arith.constant 0 : index
    %c2 = arith.constant 2 : index
    %c0_25 = arith.constant 0 : index
    %42 = vector.load %arg10[%c0_24, %c2, %c0_25] : memref<15x8x128xf32, #tpu.memory_space<vmem>>, vector<15x1x128xf32>
    %43 = vector.shape_cast %42 : vector<15x1x128xf32> to vector<15x128xf32>
    %44 = vector.shape_cast %41 : vector<15x128xf32> to vector<15x1x128xf32>
    tpu.vector_store %arg10[%c0_24, %c2, %c0_25], %44 {strides = array<i32>} : memref<15x8x128xf32, #tpu.memory_space<vmem>>, vector<15x1x128xf32>,
    %cst_26 = arith.constant dense<0.000000e+00> : vector<15x128xf32>
    %45 = tpu.matmul %0, %20, %cst_26 {dimension_numbers = #tpu.dot_dimension_numbers<[1], [0], [0], [1], [0, 0, 1, 1], [], []>, precision = #tpu.contract_precision<fp32>} : vector<15x257xf32>, vector<257x128xf32>, vector<15x128xf32> -> vector<15x128xf32>
    %c0_27 = arith.constant 0 : index
    %c3 = arith.constant 3 : index
    %c0_28 = arith.constant 0 : index
    %46 = vector.load %arg10[%c0_27, %c3, %c0_28] : memref<15x8x128xf32, #tpu.memory_space<vmem>>, vector<15x1x128xf32>
    %47 = vector.shape_cast %46 : vector<15x1x128xf32> to vector<15x128xf32>
    %48 = vector.shape_cast %45 : vector<15x128xf32> to vector<15x1x128xf32>
    tpu.vector_store %arg10[%c0_27, %c3, %c0_28], %48 {strides = array<i32>} : memref<15x8x128xf32, #tpu.memory_space<vmem>>, vector<15x1x128xf32>,
    %cst_29 = arith.constant dense<0.000000e+00> : vector<15x128xf32>
    %49 = tpu.matmul %0, %23, %cst_29 {dimension_numbers = #tpu.dot_dimension_numbers<[1], [0], [0], [1], [0, 0, 1, 1], [], []>, precision = #tpu.contract_precision<fp32>} : vector<15x257xf32>, vector<257x128xf32>, vector<15x128xf32> -> vector<15x128xf32>
    %c0_30 = arith.constant 0 : index
    %c4 = arith.constant 4 : index
    %c0_31 = arith.constant 0 : index
    %50 = vector.load %arg10[%c0_30, %c4, %c0_31] : memref<15x8x128xf32, #tpu.memory_space<vmem>>, vector<15x1x128xf32>
    %51 = vector.shape_cast %50 : vector<15x1x128xf32> to vector<15x128xf32>
    %52 = vector.shape_cast %49 : vector<15x128xf32> to vector<15x1x128xf32>
    tpu.vector_store %arg10[%c0_30, %c4, %c0_31], %52 {strides = array<i32>} : memref<15x8x128xf32, #tpu.memory_space<vmem>>, vector<15x1x128xf32>,
    %cst_32 = arith.constant dense<0.000000e+00> : vector<15x128xf32>
    %53 = tpu.matmul %0, %26, %cst_32 {dimension_numbers = #tpu.dot_dimension_numbers<[1], [0], [0], [1], [0, 0, 1, 1], [], []>, precision = #tpu.contract_precision<fp32>} : vector<15x257xf32>, vector<257x128xf32>, vector<15x128xf32> -> vector<15x128xf32>
    %c0_33 = arith.constant 0 : index
    %c5 = arith.constant 5 : index
    %c0_34 = arith.constant 0 : index
    %54 = vector.load %arg10[%c0_33, %c5, %c0_34] : memref<15x8x128xf32, #tpu.memory_space<vmem>>, vector<15x1x128xf32>
    %55 = vector.shape_cast %54 : vector<15x1x128xf32> to vector<15x128xf32>
    %56 = vector.shape_cast %53 : vector<15x128xf32> to vector<15x1x128xf32>
    tpu.vector_store %arg10[%c0_33, %c5, %c0_34], %56 {strides = array<i32>} : memref<15x8x128xf32, #tpu.memory_space<vmem>>, vector<15x1x128xf32>,
    %cst_35 = arith.constant dense<0.000000e+00> : vector<15x128xf32>
    %57 = tpu.matmul %0, %29, %cst_35 {dimension_numbers = #tpu.dot_dimension_numbers<[1], [0], [0], [1], [0, 0, 1, 1], [], []>, precision = #tpu.contract_precision<fp32>} : vector<15x257xf32>, vector<257x128xf32>, vector<15x128xf32> -> vector<15x128xf32>
    %c0_36 = arith.constant 0 : index
    %c6 = arith.constant 6 : index
    %c0_37 = arith.constant 0 : index
    %58 = vector.load %arg10[%c0_36, %c6, %c0_37] : memref<15x8x128xf32, #tpu.memory_space<vmem>>, vector<15x1x128xf32>
    %59 = vector.shape_cast %58 : vector<15x1x128xf32> to vector<15x128xf32>
    %60 = vector.shape_cast %57 : vector<15x128xf32> to vector<15x1x128xf32>
    tpu.vector_store %arg10[%c0_36, %c6, %c0_37], %60 {strides = array<i32>} : memref<15x8x128xf32, #tpu.memory_space<vmem>>, vector<15x1x128xf32>,
    %cst_38 = arith.constant dense<0.000000e+00> : vector<15x128xf32>
    %61 = tpu.matmul %0, %32, %cst_38 {dimension_numbers = #tpu.dot_dimension_numbers<[1], [0], [0], [1], [0, 0, 1, 1], [], []>, precision = #tpu.contract_precision<fp32>} : vector<15x257xf32>, vector<257x128xf32>, vector<15x128xf32> -> vector<15x128xf32>
    %c0_39 = arith.constant 0 : index
    %c7 = arith.constant 7 : index
    %c0_40 = arith.constant 0 : index
    %62 = vector.load %arg10[%c0_39, %c7, %c0_40] : memref<15x8x128xf32, #tpu.memory_space<vmem>>, vector<15x1x128xf32>
    %63 = vector.shape_cast %62 : vector<15x1x128xf32> to vector<15x128xf32>
    %64 = vector.shape_cast %61 : vector<15x128xf32> to vector<15x1x128xf32>
    tpu.vector_store %arg10[%c0_39, %c7, %c0_40], %64 {strides = array<i32>} : memref<15x8x128xf32, #tpu.memory_space<vmem>>, vector<15x1x128xf32>,
    return
  }
  func.func @transform_0(%arg0: i32) -> (i32, i32) {
    %c0_i32 = arith.constant 0 : i32
    %c0_i32_0 = arith.constant 0 : i32
    %c0_i32_1 = arith.constant 0 : i32
    return %c0_i32, %c0_i32_0 : i32, i32
  }
  func.func @transform_1(%arg0: i32) -> (i32, i32) {
    %c0_i32 = arith.constant 0 : i32
    %c0_i32_0 = arith.constant 0 : i32
    return %c0_i32, %arg0 : i32, i32
  }
  func.func @transform_2(%arg0: i32) -> (i32, i32) {
    %c0_i32 = arith.constant 0 : i32
    %c0_i32_0 = arith.constant 0 : i32
    return %c0_i32, %arg0 : i32, i32
  }
  func.func @transform_3(%arg0: i32) -> (i32, i32) {
    %c0_i32 = arith.constant 0 : i32
    %c0_i32_0 = arith.constant 0 : i32
    return %c0_i32, %arg0 : i32, i32
  }
  func.func @transform_4(%arg0: i32) -> (i32, i32) {
    %c0_i32 = arith.constant 0 : i32
    %c0_i32_0 = arith.constant 0 : i32
    return %c0_i32, %arg0 : i32, i32
  }
  func.func @transform_5(%arg0: i32) -> (i32, i32) {
    %c0_i32 = arith.constant 0 : i32
    %c0_i32_0 = arith.constant 0 : i32
    return %c0_i32, %arg0 : i32, i32
  }
  func.func @transform_6(%arg0: i32) -> (i32, i32) {
    %c0_i32 = arith.constant 0 : i32
    %c0_i32_0 = arith.constant 0 : i32
    return %c0_i32, %arg0 : i32, i32
  }
  func.func @transform_7(%arg0: i32) -> (i32, i32) {
    %c0_i32 = arith.constant 0 : i32
    %c0_i32_0 = arith.constant 0 : i32
    return %c0_i32, %arg0 : i32, i32
  }
  func.func @transform_8(%arg0: i32) -> (i32, i32) {
    %c0_i32 = arith.constant 0 : i32
    %c0_i32_0 = arith.constant 0 : i32
    return %c0_i32, %arg0 : i32, i32
  }
  func.func @transform_9(%arg0: i32) -> (i32, i32, i32) {
    %c0_i32 = arith.constant 0 : i32
    %c0_i32_0 = arith.constant 0 : i32
    %c0_i32_1 = arith.constant 0 : i32
    return %c0_i32, %c0_i32_0, %arg0 : i32, i32, i32
  }
}

</mosaic_0001>

<bundles_post_ra>
// kernel: tpu_custom_call.1
= control target key start
LH: loop header
LB: loop body
LE: loop exit
PB: predicated region body
PF: predicated region fallthrough
CT: control target
= control target key end

     0   :  { %s25796_s0 = inlined_call_operand.hbm [shape: f32[15,257], index: 0, kind: input, shape index: {}]   ;;  %s25797_s1 = inlined_call_operand.hbm [shape: f32[257,256], index: 1, kind: input, shape index: {}]   ;;  %s25798_s2 = inlined_call_operand.hbm [shape: f32[257,256], index: 2, kind: input, shape index: {}]   ;;  %s25799_s3 = inlined_call_operand.hbm [shape: f32[257,256], index: 3, kind: input, shape index: {}]   ;;  %s25800_s4 = inlined_call_operand.hbm [shape: f32[257,256], index: 4, kind: input, shape index: {}]   ;;  %s25801_s5 = inlined_call_operand.hbm [shape: f32[257,256], index: 5, kind: input, shape index: {}]   ;;  %s25802_s6 = inlined_call_operand.hbm [shape: f32[257,256], index: 6, kind: input, shape index: {}]   ;;  %s25803_s7 = inlined_call_operand.hbm [shape: f32[257,256], index: 7, kind: input, shape index: {}]   ;;  %s25804_s8 = inlined_call_operand.hbm [shape: f32[257,256], index: 8, kind: input, shape index: {}]   ;;  %s25805_s9 = inlined_call_operand.hbm [shape: f32[15,8,256], index: 9, kind: output, shape index: {}]  }
   0x1   :  { %26352 = sst [smem:[#allocation117_spill]] %s25797_s1 }
   0x2   :  { %26353 = sst [smem:[#allocation118_spill]] %s25798_s2 }
   0x3   :  { %26354 = sst [smem:[#allocation119_spill]] %s25799_s3 }
   0x4   :  { %26355 = sst [smem:[#allocation120_spill]] %s25801_s5 }
   0x5   :  { %26356 = sst [smem:[#allocation121_spill]] %s25803_s7 }
   0x6   :  { %14 = vsyncpa [#allocation3], 0 }
   0x7   :  { %15 = vsyncpa [#allocation6], 0 }
   0x8   :  { %17 = vsyncpa [#allocation6 + $0x1], 0 }
   0x9   :  { %18 = vsyncpa [#allocation9], 0 }
   0xa   :  { %20 = vsyncpa [#allocation9 + $0x1], 0 }
   0xb   :  { %21 = vsyncpa [#allocation12], 0 }
   0xc   :  { %23 = vsyncpa [#allocation12 + $0x1], 0 }
   0xd   :  { %24 = vsyncpa [#allocation15], 0 }
   0xe   :  { %26 = vsyncpa [#allocation15 + $0x1], 0 }
   0xf   :  { %27 = vsyncpa [#allocation4], 0 }
  0x10   :  { %29 = vsyncpa [#allocation4 + $0x1], 0  ;;  %s19150_s30 = smov 0   ;;  %s19152_s10 = smov 0  }
  0x11   :  { %s19154_s11 = smov 0   ;;  %s19156_s12 = smov 0  }
  0x12 LB: > { %26357 = sst [smem:[#allocation24_spill]] %s19075_s11  ;;  %s19171_s13 = sadd.s32 1, %s19079_s12   ;;  %s19079_s12 = sphi %s19156_s12, %s27569_s12   ;;  %s19075_s11 = sphi %s19154_s11, %s27571_s11   ;;  %s19071_s10 = sphi %s19152_s10, %s27573_s10   ;;  %s19067_s30 = sphi %s19150_s30, %s27572_s30  }
  0x13   : > { %26358 = sst [smem:[#allocation25_spill]] %s19079_s12  ;;  %s63_s14 = sadd.s32 1, %s19075_s11 }
  0x14   : > { %26359 = sst [smem:[#allocation26_spill]] %s19171_s13  ;;  %s60_s15 = ssub.s32 %s19079_s12, %s19171_s13 }
  0x15   : > { %p25806_p0 = scmp.ne.s32.totalorder %s19075_s11, %s19071_s10  ;;  %p61_p1 = scmp.eq.s32.totalorder %s60_s15, 0 }
  0x16   : > { %p71_p2 = scmp.eq.s32.totalorder %s19079_s12, 0  ;;  %p18242_p4 = scmp.lt.s32.totalorder %s19079_s12, 2 }
  0x17   : > { %s19182_s16 = scalar_select %p61_p1, %s19075_s11, %s63_s14  }
  0x18   : > { %p72_p5 = por %p71_p2, %p25806_p0  ;;  %s19188_s17 = sand.u32 1, %s19079_s12  }
  0x19   : > { %26360 = sst [smem:[#allocation27_spill]] %s19182_s16  ;;  %s323_s18 = sand.u32 1, %s19075_s11  }
  0x1a   : > { %s19191_s19 = smul.u32 264, %s323_s18  ;;  %s19194_s20 = sshll.u32 %s19079_s12, 7 }
  0x1b   : > { %s26361_s1 = sld [smem:[#allocation117_spill]]  ;;  %p19202_p6 = pnand %p18242_p4, %p72_p5 }
  0x1c   : > { %s325_s25 = scalar_lea.vmem [#allocation5], %s19191_s19  ;;  %s25809_s27 = scalar_lea.sflag [#allocation6], %s19188_s17 }
  0x1d   : > { %s26362_s24 = scalar_select %p19202_p6, 1, 0 }
  0x1e   : > { %s331_s26 = sshll.u32 %s325_s25, 4  ;;  %p19214_p8 = pneg %p19202_p6  ;;  %s19207_s26 = int_to_ptr.vmem [resolvable:$true] %s331_s26 }
  0x20   : > { %s26363_s29 = scalar_select %p19214_p8, 1, 0 }
  0x21   : > { %s19200_s23 = scalar_lea.hbm %s26361_s1, %s19194_s20  ;;  %s18734_s18 = scalar_lea.hbm %s26361_s1, 8448 }
  0x22   : > { %s18729_s28 = scalar_lea.hbm %s19200_s23, 4224  ;;  %p18735_p11 = scmp.lt.u32.totalorder %s19200_s23, %s26361_s1 }
  0x23   : > { %p18730_p7 = scmp.ne.s32.totalorder %s19200_s23, %s18729_s28  ;;  %p18736_p12 = scmp.lt.u32.totalorder %s18734_s18, %s18729_s28 }
  0x24   : > { %p18738_p1 = scmp.lt.u32.totalorder %s18729_s28, %s19200_s23 }
  0x25   : > { %p18732_p9 = pnand %p19214_p8, %p18730_p7  ;;  %p18737_p13 = por %p18736_p12, %p18735_p11 }
  0x27   : > { %p18733_p10 = pneg %p18732_p9  ;;  %p18739_p2 = por %p18738_p1, %p18737_p13 }
  0x29   : > { %p18740_p4 = pnand %p18739_p2, %p18733_p10 }
  0x2b   : > { %18743 = shalt.err (!%p18740_p4)
}
  0x2c   : > { %s18744_s25 = scalar_lea.vmem %s19207_s26, 4224  ;;  %s19081_s14 = smov [#allocation5]  }
  0x2d   : > { %p18745_p5 = scmp.ne.s32.totalorder %s19207_s26, %s18744_s25  ;;  %s18749_s15 = sshll.u32 %s19081_s14, 4  ;;  %s18750_s15 = int_to_ptr.vmem [resolvable:$false] %s18749_s15 }
  0x2e   : > { %s18751_s21 = scalar_lea.vmem %s18750_s15, 8448  ;;  %p18752_p3 = scmp.lt.s32.totalorder %s19207_s26, %s18750_s15 }
  0x2f   : > { %p18747_p7 = pnand %p18745_p5, %p19214_p8  ;;  %p18753_p0 = scmp.lt.s32.totalorder %s18751_s21, %s18744_s25 }
  0x31   : > { %p18748_p9 = pneg %p18747_p7  ;;  %p18754_p11 = por %p18753_p0, %p18752_p3 }
  0x33   : > { %p18755_p12 = pnand %p18754_p11, %p18748_p9 }
  0x35   : > { %18758 = shalt.err (!%p18755_p12)
}
  0x36   : > { %s25813_s28 = smov 256   ;;  %s25815_s18 = smov 128  }
  0x37   : > { %s25817_s22 = smov 8   ;;  %s26364_s3 = sld [smem:[#allocation119_spill]] }
  0x38   : > { %18215 = dma.hbm_to_vmem [thread:$0]  (!%p19202_p6), %s19200_s23, 4224, %s19207_s26, %s25809_s27, %s25813_s28, %s25815_s18, %s25817_s22  }
  0x39   : > { %s365_s21 = scalar_lea.vmem [#allocation8], %s19191_s19  ;;  %s25810_s16 = scalar_lea.sflag [#allocation9], %s19188_s17 }
  0x3a   : > { %s371_s1 = sshll.u32 %s365_s21, 4  ;;  %s19249_s1 = int_to_ptr.vmem [resolvable:$true] %s371_s1 }
  0x3d   : > { %s19246_s15 = scalar_lea.hbm %s26364_s3, %s19194_s20  ;;  %s18764_s25 = scalar_lea.hbm %s26364_s3, 8448 }
  0x3e   : > { %s18759_s13 = scalar_lea.hbm %s19246_s15, 4224  ;;  %p18765_p13 = scmp.lt.u32.totalorder %s19246_s15, %s26364_s3 }
  0x3f   : > { %p18760_p0 = scmp.ne.s32.totalorder %s19246_s15, %s18759_s13  ;;  %p18766_p1 = scmp.lt.u32.totalorder %s18764_s25, %s18759_s13 }
  0x40   : > { %p18768_p4 = scmp.lt.u32.totalorder %s18759_s13, %s19246_s15 }
  0x41   : > { %p18762_p3 = pnand %p18760_p0, %p19214_p8  ;;  %p18767_p2 = por %p18766_p1, %p18765_p13 }
  0x43   : > { %p18763_p10 = pneg %p18762_p3  ;;  %p18769_p5 = por %p18768_p4, %p18767_p2 }
  0x45   : > { %p18770_p7 = pnand %p18769_p5, %p18763_p10 }
  0x47   : > { %18773 = shalt.err (!%p18770_p7)
}
  0x48   : > { %s18774_s21 = scalar_lea.vmem %s19249_s1, 4224  ;;  %s19085_s23 = smov [#allocation8]  }
  0x49   : > { %p18775_p9 = scmp.ne.s32.totalorder %s19249_s1, %s18774_s21  ;;  %s18779_s26 = sshll.u32 %s19085_s23, 4  ;;  %s18780_s26 = int_to_ptr.vmem [resolvable:$false] %s18779_s26 }
  0x4a   : > { %s18781_s27 = scalar_lea.vmem %s18780_s26, 8448  ;;  %p18782_p0 = scmp.lt.s32.totalorder %s19249_s1, %s18780_s26 }
  0x4b   : > { %p18777_p11 = pnand %p18775_p9, %p19214_p8  ;;  %p18783_p3 = scmp.lt.s32.totalorder %s18781_s27, %s18774_s21 }
  0x4d   : > { %p18778_p12 = pneg %p18777_p11  ;;  %p18784_p13 = por %p18783_p3, %p18782_p0 }
  0x4f   : > { %p18785_p1 = pnand %p18784_p13, %p18778_p12 }
  0x51   : > { %18788 = shalt.err (!%p18785_p1)
}
  0x52   : > { %18221 = dma.hbm_to_vmem [thread:$0]  (!%p19202_p6), %s19246_s15, 4224, %s19249_s1, %s25810_s16, %s25813_s28, %s25815_s18, %s25817_s22  }
  0x53   : > { %s26365_s5 = sld [smem:[#allocation120_spill]]  ;;  %s405_s21 = scalar_lea.vmem [#allocation11], %s19191_s19 }
  0x54   : > { %s411_s23 = sshll.u32 %s405_s21, 4  ;;  %s25811_s26 = scalar_lea.sflag [#allocation12], %s19188_s17  ;;  %s19285_s23 = int_to_ptr.vmem [resolvable:$true] %s411_s23 }
  0x59   : > { %s19282_s14 = scalar_lea.hbm %s26365_s5, %s19194_s20  ;;  %s18794_s13 = scalar_lea.hbm %s26365_s5, 8448 }
  0x5a   : > { %s18789_s27 = scalar_lea.hbm %s19282_s14, 4224  ;;  %p18795_p5 = scmp.lt.u32.totalorder %s19282_s14, %s26365_s5 }
  0x5b   : > { %p18790_p10 = scmp.ne.s32.totalorder %s19282_s14, %s18789_s27  ;;  %p18796_p7 = scmp.lt.u32.totalorder %s18794_s13, %s18789_s27 }
  0x5c   : > { %p18798_p11 = scmp.lt.u32.totalorder %s18789_s27, %s19282_s14 }
  0x5d   : > { %p18792_p2 = pnand %p18790_p10, %p19214_p8  ;;  %p18797_p9 = por %p18796_p7, %p18795_p5 }
  0x5f   : > { %p18793_p4 = pneg %p18792_p2  ;;  %p18799_p12 = por %p18798_p11, %p18797_p9 }
  0x61   : > { %p18800_p0 = pnand %p18799_p12, %p18793_p4 }
  0x63   : > { %18803 = shalt.err (!%p18800_p0)
}
  0x64   : > { %s18804_s21 = scalar_lea.vmem %s19285_s23, 4224  ;;  %s19086_s1 = smov [#allocation11]  }
  0x65   : > { %p18805_p3 = scmp.ne.s32.totalorder %s19285_s23, %s18804_s21  ;;  %s18809_s15 = sshll.u32 %s19086_s1, 4  ;;  %s18810_s15 = int_to_ptr.vmem [resolvable:$false] %s18809_s15 }
  0x66   : > { %s18811_s16 = scalar_lea.vmem %s18810_s15, 8448  ;;  %p18812_p10 = scmp.lt.s32.totalorder %s19285_s23, %s18810_s15 }
  0x67   : > { %p18807_p13 = pnand %p18805_p3, %p19214_p8  ;;  %p18813_p2 = scmp.lt.s32.totalorder %s18811_s16, %s18804_s21 }
  0x69   : > { %p18808_p1 = pneg %p18807_p13  ;;  %p18814_p5 = por %p18813_p2, %p18812_p10 }
  0x6b   : > { %p18815_p7 = pnand %p18814_p5, %p18808_p1 }
  0x6d   : > { %18818 = shalt.err (!%p18815_p7)
}
  0x6e   : > { %18227 = dma.hbm_to_vmem [thread:$0]  (!%p19202_p6), %s19282_s14, 4224, %s19285_s23, %s25811_s26, %s25813_s28, %s25815_s18, %s25817_s22  }
  0x6f   : > { %s26366_s7 = sld [smem:[#allocation121_spill]]  ;;  %s445_s21 = scalar_lea.vmem [#allocation14], %s19191_s19 }
  0x70   : > { %s451_s1 = sshll.u32 %s445_s21, 4  ;;  %s25812_s15 = scalar_lea.sflag [#allocation15], %s19188_s17  ;;  %s19321_s1 = int_to_ptr.vmem [resolvable:$true] %s451_s1 }
  0x75   : > { %s19318_s25 = scalar_lea.hbm %s26366_s7, %s19194_s20  ;;  %s18824_s27 = scalar_lea.hbm %s26366_s7, 8448 }
  0x76   : > { %s18819_s16 = scalar_lea.hbm %s19318_s25, 4224  ;;  %p18825_p12 = scmp.lt.u32.totalorder %s19318_s25, %s26366_s7 }
  0x77   : > { %p18820_p4 = scmp.ne.s32.totalorder %s19318_s25, %s18819_s16  ;;  %p18826_p0 = scmp.lt.u32.totalorder %s18824_s27, %s18819_s16 }
  0x78   : > { %p18828_p13 = scmp.lt.u32.totalorder %s18819_s16, %s19318_s25 }
  0x79   : > { %p18822_p9 = pnand %p18820_p4, %p19214_p8  ;;  %p18827_p3 = por %p18826_p0, %p18825_p12 }
  0x7b   : > { %p18823_p11 = pneg %p18822_p9  ;;  %p18829_p1 = por %p18828_p13, %p18827_p3 }
  0x7d   : > { %p18830_p10 = pnand %p18829_p1, %p18823_p11 }
  0x7f   : > { %18833 = shalt.err (!%p18830_p10)
}
  0x80   : > { %s18834_s21 = scalar_lea.vmem %s19321_s1, 4224  ;;  %s19087_s14 = smov [#allocation14]  }
  0x81   : > { %p18835_p2 = scmp.ne.s32.totalorder %s19321_s1, %s18834_s21  ;;  %s18839_s23 = sshll.u32 %s19087_s14, 4  ;;  %s18840_s23 = int_to_ptr.vmem [resolvable:$false] %s18839_s23 }
  0x82   : > { %s18841_s26 = scalar_lea.vmem %s18840_s23, 8448  ;;  %p18842_p4 = scmp.lt.s32.totalorder %s19321_s1, %s18840_s23 }
  0x83   : > { %p18837_p5 = pnand %p18835_p2, %p19214_p8  ;;  %p18843_p9 = scmp.lt.s32.totalorder %s18841_s26, %s18834_s21 }
  0x85   : > { %p18838_p7 = pneg %p18837_p5  ;;  %p18844_p12 = por %p18843_p9, %p18842_p4 }
  0x87   : > { %p18845_p0 = pnand %p18844_p12, %p18838_p7 }
  0x89   : > { %18848 = shalt.err (!%p18845_p0)
}
  0x8a   : > { %18233 = dma.hbm_to_vmem [thread:$0]  (!%p19202_p6), %s19318_s25, 4224, %s19321_s1, %s25812_s15, %s25813_s28, %s25815_s18, %s25817_s22  }
  0x8b   : > { %s19351_s16 = sadd.s32 4294967295, %s19079_s12   ;;  %s14255_s27 = sadd.s32 4294967294, %s19079_s12  }
  0x8c   : > { %p76_p11 = scmp.ne.s32.totalorder %s19071_s10, %s19067_s30  ;;  %p25819_p3 = scmp.eq.s32.totalorder %s19351_s16, 0 }
  0x8d   : > { %p282_p13 = scmp.eq.s32.totalorder %s19351_s16, 1  ;;  %p288_p1 = scmp.eq.s32.totalorder %s14255_s27, 1 }
  0x8e   : > { %p19360_p10 = por %p25819_p3, %p76_p11  ;;  %p14256_p2 = scmp.ge.s32.totalorder %s19079_s12, 1 }
  0x8f   : > { %p26368_p5 = scmp.ne.s32.totalorder %s19075_s11, %s19071_s10  ;;  %p19372_p4 = por %p288_p1, %p76_p11 }
  0x90   : > { %s26367_s13 = scalar_select %p19360_p10, 1, 0 }
  0x91   : > { %p19368_p7 = por %p282_p13, %p26368_p5  ;;  %p295_p9 = scmp.lt.s32.totalorder %s19079_s12, 3 }
  0x92   : > { %s26370_s1 = scalar_select %p19372_p4, 1, 0 }
  0x93   : > { %s26369_s25 = scalar_select %p19368_p7, 1, 0 }
  0x94   : > { %26371 = sst [smem:[#allocation28_spill]] %s26370_s1  ;;  %p19377_p12 = pnand %p14256_p2, %p295_p9 }
  0x95   : > { %s19088_s14 = smov [#allocation2]   ;;  %s26373_s2 = sld [smem:[#allocation118_spill]] }
  0x96   : > { %s26372_s21 = scalar_select %p19377_p12, 1, 0 }
  0x97   : > { %s307_s23 = sshll.u32 %s19088_s14, 4  ;;  %p18208_p0 = pneg %p19377_p12  ;;  %s19381_s23 = int_to_ptr.vmem [resolvable:$true] %s307_s23 }
  0x98   : > { %s345_s28 = scalar_lea.vmem [#allocation7], %s19191_s19 }
  0x99   : > { %s351_s18 = sshll.u32 %s345_s28, 4  ;;  %p19394_p11 = pnand %p18208_p0, %p25819_p3  ;;  %s19398_s18 = int_to_ptr.vmem [resolvable:$true] %s351_s18 }
  0x9b   : > { %s19389_s15 = scalar_lea.hbm %s26373_s2, %s19194_s20  ;;  %s18854_s3 = scalar_lea.hbm %s26373_s2, 8448 }
  0x9c   : > { %s26374_s22 = scalar_select %p19394_p11, 1, 0 }
  0x9d   : > { %s18849_s14 = scalar_lea.hbm %s19389_s15, 4224  ;;  %p18855_p5 = scmp.lt.u32.totalorder %s19389_s15, %s26373_s2 }
  0x9e   : > { %p18850_p13 = scmp.ne.s32.totalorder %s19389_s15, %s18849_s14  ;;  %p18856_p9 = scmp.lt.u32.totalorder %s18854_s3, %s18849_s14 }
  0x9f   : > { %p18858_p3 = scmp.lt.u32.totalorder %s18849_s14, %s19389_s15 }
  0xa0   : > { %p18852_p1 = pnand %p18850_p13, %p19214_p8  ;;  %p18857_p0 = por %p18856_p9, %p18855_p5 }
  0xa2   : > { %p18853_p2 = pneg %p18852_p1  ;;  %p18859_p4 = por %p18858_p3, %p18857_p0 }
  0xa4   : > { %p18860_p7 = pnand %p18859_p4, %p18853_p2 }
  0xa6   : > { %18863 = shalt.err (!%p18860_p7)
}
  0xa7   : > { %s18864_s28 = scalar_lea.vmem %s19398_s18, 4224  ;;  %s19089_s26 = smov [#allocation7]  }
  0xa8   : > { %p18865_p13 = scmp.ne.s32.totalorder %s19398_s18, %s18864_s28  ;;  %s18869_s27 = sshll.u32 %s19089_s26, 4  ;;  %s18870_s27 = int_to_ptr.vmem [resolvable:$false] %s18869_s27 }
  0xa9   : > { %s18871_s5 = scalar_lea.vmem %s18870_s27, 8448  ;;  %p18872_p12 = scmp.lt.s32.totalorder %s19398_s18, %s18870_s27 }
  0xaa   : > { %p18867_p1 = pnand %p18865_p13, %p19214_p8  ;;  %p18873_p11 = scmp.lt.s32.totalorder %s18871_s5, %s18864_s28 }
  0xac   : > { %p18868_p10 = pneg %p18867_p1  ;;  %p18874_p5 = por %p18873_p11, %p18872_p12 }
  0xae   : > { %p18875_p9 = pnand %p18874_p5, %p18868_p10 }
  0xb0   : > { %18878 = shalt.err (!%p18875_p9)
}
  0xb1   : > { %s26375_s3 = smov 8   ;;  %s26376_s7 = smov 128  }
  0xb2   : > { %s26377_s14 = smov 256   ;;  %s26378_s2 = scalar_lea.sflag [#allocation6], %s19188_s17 }
  0xb3   : > { %18218 = dma.hbm_to_vmem [thread:$0]  (!%p19202_p6), %s19389_s15, 4224, %s19398_s18, %s26378_s2, %s26377_s14, %s26376_s7, %s26375_s3  }
  0xb4   : > { %s18879_s12 = scalar_lea.hbm %s25796_s0, 768  ;;  %p26379_p10 = scmp.ne.s32.totalorder %s26374_s22, 0 }
  0xb5   : > { %p18880_p3 = scmp.ne.s32.totalorder %s25796_s0, %s18879_s12  ;;  %p18886_p11 = scmp.lt.u32.totalorder %s18879_s12, %s25796_s0 }
  0xb6   : > { %p18881_p7 = pneg %p26379_p10 }
  0xb8   : > { %p18882_p4 = pnand %p18881_p7, %p18880_p3 }
  0xba   : > { %p18883_p12 = pneg %p18882_p4 }
  0xbc   : > { %p18888_p2 = pnand %p18886_p11, %p18883_p12 }
  0xbe   : > { %18891 = shalt.err (!%p18888_p2)
}
  0xbf   : > { %s18892_s2 = scalar_lea.vmem %s19381_s23, 768  ;;  %p18900_p5 = scmp.lt.s32.totalorder %s19381_s23, %s19381_s23 }
  0xc0   : > { %p18893_p0 = scmp.ne.s32.totalorder %s19381_s23, %s18892_s2  ;;  %p18901_p9 = scmp.lt.s32.totalorder %s18892_s2, %s18892_s2 }
  0xc2   : > { %p18895_p13 = pnand %p18893_p0, %p18881_p7  ;;  %p18902_p6 = por %p18901_p9, %p18900_p5 }
  0xc4   : > { %p18896_p1 = pneg %p18895_p13 }
  0xc6   : > { %p18903_p8 = pnand %p18902_p6, %p18896_p1 }
  0xc8   : > { %18906 = shalt.err (!%p18903_p8)
}
  0xc9   : > { %s19090_s11 = smov 384   ;;  %s19091_s12 = smov 24  }
  0xca   : > { %18211 = dma.hbm_to_vmem [thread:$0]  (!%p26379_p10), %s25796_s0, 768, %s19381_s23, [#allocation3], %s19090_s11, %s19090_s11, %s19091_s12  }
  0xcb   : > { %s19451_s27 = scalar_lea.hbm %s25800_s4, %s19194_s20  ;;  %s385_s28 = scalar_lea.vmem [#allocation10], %s19191_s19 }
  0xcc   : > { %s391_s5 = sshll.u32 %s385_s28, 4  ;;  %s18907_s2 = scalar_lea.hbm %s19451_s27, 4224  ;;  %s19454_s5 = int_to_ptr.vmem [resolvable:$true] %s391_s5 }
  0xcd   : > { %p18908_p6 = scmp.ne.s32.totalorder %s19451_s27, %s18907_s2  ;;  %p26380_p8 = scmp.ne.s32.totalorder %s26363_s29, 0 }
  0xce   : > { %s18912_s11 = scalar_lea.hbm %s25800_s4, 8448  ;;  %p18913_p10 = scmp.lt.u32.totalorder %s19451_s27, %s25800_s4 }
  0xcf   : > { %p18910_p3 = pnand %p18908_p6, %p26380_p8  ;;  %p18914_p4 = scmp.lt.u32.totalorder %s18912_s11, %s18907_s2 }
  0xd0   : > { %p18916_p11 = scmp.lt.u32.totalorder %s18907_s2, %s19451_s27 }
  0xd1   : > { %p18911_p7 = pneg %p18910_p3  ;;  %p18915_p12 = por %p18914_p4, %p18913_p10 }
  0xd3   : > { %p18917_p2 = por %p18916_p11, %p18915_p12 }
  0xd5   : > { %p18918_p0 = pnand %p18917_p2, %p18911_p7 }
  0xd7   : > { %18921 = shalt.err (!%p18918_p0)
}
  0xd8   : > { %s18922_s15 = scalar_lea.vmem %s19454_s5, 4224  ;;  %s19092_s1 = smov [#allocation10]  }
  0xd9   : > { %p18923_p13 = scmp.ne.s32.totalorder %s19454_s5, %s18922_s15  ;;  %s18927_s26 = sshll.u32 %s19092_s1, 4  ;;  %s18928_s26 = int_to_ptr.vmem [resolvable:$false] %s18927_s26 }
  0xda   : > { %s18929_s28 = scalar_lea.vmem %s18928_s26, 8448  ;;  %p18930_p9 = scmp.lt.s32.totalorder %s19454_s5, %s18928_s26 }
  0xdb   : > { %p18925_p1 = pnand %p18923_p13, %p26380_p8  ;;  %p18931_p6 = scmp.lt.s32.totalorder %s18929_s28, %s18922_s15 }
  0xdd   : > { %p18926_p5 = pneg %p18925_p1  ;;  %p18932_p3 = por %p18931_p6, %p18930_p9 }
  0xdf   : > { %p18933_p10 = pnand %p18932_p3, %p18926_p5 }
  0xe1   : > { %18936 = shalt.err (!%p18933_p10)
}
  0xe2   : > { %p26381_p7 = scmp.ne.s32.totalorder %s26362_s24, 0  ;;  %s26382_s2 = scalar_lea.sflag [#allocation9], %s19188_s17 }
  0xe3   : > { %s19486_s11 = scalar_lea.hbm %s25802_s6, %s19194_s20  ;;  %s425_s12 = scalar_lea.vmem [#allocation13], %s19191_s19 }
  0xe4   : > { %18224 = dma.hbm_to_vmem [thread:$0]  (!%p26381_p7), %s19451_s27, 4224, %s19454_s5, %s26382_s2, %s26377_s14, %s26376_s7, %s26375_s3  }
  0xe5   : > { %s431_s18 = sshll.u32 %s425_s12, 4  ;;  %s18937_s15 = scalar_lea.hbm %s19486_s11, 4224  ;;  %s19489_s18 = int_to_ptr.vmem [resolvable:$true] %s431_s18 }
  0xe6   : > { %p18938_p4 = scmp.ne.s32.totalorder %s19486_s11, %s18937_s15  ;;  %s18942_s5 = scalar_lea.hbm %s25802_s6, 8448 }
  0xe7   : > { %p18943_p2 = scmp.lt.u32.totalorder %s19486_s11, %s25802_s6  ;;  %p18944_p0 = scmp.lt.u32.totalorder %s18942_s5, %s18937_s15 }
  0xe8   : > { %p18940_p12 = pnand %p18938_p4, %p26380_p8  ;;  %p18946_p1 = scmp.lt.u32.totalorder %s18937_s15, %s19486_s11 }
  0xe9   : > { %p18945_p13 = por %p18944_p0, %p18943_p2 }
  0xea   : > { %p18941_p11 = pneg %p18940_p12 }
  0xeb   : > { %p18947_p5 = por %p18946_p1, %p18945_p13 }
  0xed   : > { %p18948_p9 = pnand %p18947_p5, %p18941_p11 }
  0xef   : > { %18951 = shalt.err (!%p18948_p9)
}
  0xf0   : > { %s18952_s2 = scalar_lea.vmem %s19489_s18, 4224  ;;  %s19093_s22 = smov [#allocation13]  }
  0xf1   : > { %p18953_p6 = scmp.ne.s32.totalorder %s19489_s18, %s18952_s2  ;;  %s18957_s23 = sshll.u32 %s19093_s22, 4  ;;  %s18958_s23 = int_to_ptr.vmem [resolvable:$false] %s18957_s23 }
  0xf2   : > { %s18959_s12 = scalar_lea.vmem %s18958_s23, 8448  ;;  %p18960_p4 = scmp.lt.s32.totalorder %s19489_s18, %s18958_s23 }
  0xf3   : > { %p18955_p3 = pnand %p18953_p6, %p26380_p8  ;;  %p18961_p12 = scmp.lt.s32.totalorder %s18959_s12, %s18952_s2 }
  0xf5   : > { %p18956_p10 = pneg %p18955_p3  ;;  %p18962_p2 = por %p18961_p12, %p18960_p4 }
  0xf7   : > { %p18963_p0 = pnand %p18962_p2, %p18956_p10 }
  0xf9   : > { %18966 = shalt.err (!%p18963_p0)
}
  0xfa   : > { %s26383_s15 = scalar_lea.sflag [#allocation12], %s19188_s17  ;;  %s19521_s5 = scalar_lea.hbm %s25804_s8, %s19194_s20 }
  0xfb   : > { %18230 = dma.hbm_to_vmem [thread:$0]  (!%p26381_p7), %s19486_s11, 4224, %s19489_s18, %s26383_s15, %s26377_s14, %s26376_s7, %s26375_s3  }
  0xfc   : > { %s465_s26 = scalar_lea.vmem [#allocation16], %s19191_s19  ;;  %s18967_s2 = scalar_lea.hbm %s19521_s5, 4224 }
  0xfd   : > { %s471_s28 = sshll.u32 %s465_s26, 4  ;;  %p18968_p11 = scmp.ne.s32.totalorder %s19521_s5, %s18967_s2  ;;  %s19524_s28 = int_to_ptr.vmem [resolvable:$true] %s471_s28 }
  0xfe   : > { %s18972_s18 = scalar_lea.hbm %s25804_s8, 8448  ;;  %p18973_p5 = scmp.lt.u32.totalorder %s19521_s5, %s25804_s8 }
  0xff   : > { %p18970_p13 = pnand %p18968_p11, %p26380_p8  ;;  %p18974_p9 = scmp.lt.u32.totalorder %s18972_s18, %s18967_s2 }
 0x100   : > { %p18976_p3 = scmp.lt.u32.totalorder %s18967_s2, %s19521_s5 }
 0x101   : > { %p18971_p1 = pneg %p18970_p13  ;;  %p18975_p6 = por %p18974_p9, %p18973_p5 }
 0x103   : > { %p18977_p10 = por %p18976_p3, %p18975_p6 }
 0x105   : > { %p18978_p4 = pnand %p18977_p10, %p18971_p1 }
 0x107   : > { %18981 = shalt.err (!%p18978_p4)
}
 0x108   : > { %s18982_s19 = scalar_lea.vmem %s19524_s28, 4224  ;;  %s19094_s12 = smov [#allocation16]  }
 0x109   : > { %p18983_p12 = scmp.ne.s32.totalorder %s19524_s28, %s18982_s19  ;;  %s18987_s15 = sshll.u32 %s19094_s12, 4  ;;  %s18988_s15 = int_to_ptr.vmem [resolvable:$false] %s18987_s15 }
 0x10a   : > { %s18989_s1 = scalar_lea.vmem %s18988_s15, 8448  ;;  %p18990_p11 = scmp.lt.s32.totalorder %s19524_s28, %s18988_s15 }
 0x10b   : > { %p18985_p2 = pnand %p18983_p12, %p26380_p8  ;;  %p18991_p13 = scmp.lt.s32.totalorder %s18989_s1, %s18982_s19 }
 0x10d   : > { %p18986_p0 = pneg %p18985_p2  ;;  %p18992_p5 = por %p18991_p13, %p18990_p11 }
 0x10f   : > { %p18993_p9 = pnand %p18992_p5, %p18986_p0 }
 0x111   : > { %18996 = shalt.err (!%p18993_p9)
}
 0x112   : > { %s26384_s27 = scalar_lea.sflag [#allocation15], %s19188_s17  ;;  %p26385_p8 = scmp.ne.s32.totalorder %s26372_s21, 0 }
 0x113   : > { %18236 = dma.hbm_to_vmem [thread:$0]  (!%p26381_p7), %s19521_s5, 4224, %s19524_s28, %s26384_s27, %s26377_s14, %s26376_s7, %s26375_s3  }
 0x114   : > { %483 = sbr.rel (%p26385_p8) target bundleno = 1595 (0x63b), region = 56 }
 0x11b   : > { %p26386_p1 = scmp.eq.s32.totalorder %s19351_s16, 0 }
 0x11d   : > { %19042 = dma.done.wait (%p26386_p1), [#allocation3], 768   ;;  %p26387_p6 = pmov %p26386_p1 }
 0x11e   : > { %s489_s24 = sand.u32 1, %s19351_s16   ;;  %s19560_s29 = sand.u32 1, %s19071_s10  }
 0x11f   : > { %19044 = vsyncadd (%p26387_p6), [#allocation3], 4294966528  ;;  %s19563_s17 = smul.u32 264, %s19560_s29  ;;  %s490_s3 = scalar_lea.sflag [#allocation6], %s489_s24 }
 0x120   : > { %p26388_p7 = scmp.ne.s32.totalorder %s26367_s13, 0 }
 0x121   : > { %s19566_s7 = scalar_lea.vmem [#allocation5], %s19563_s17 }
 0x122   : > { %19046 = dma.done.wait (%p26388_p7), %s490_s3, 8448  }
 0x123   : > { %19048 = vsyncadd (%p26388_p7), %s490_s3, 4294958848  ;;  %s19573_s21 = scalar_lea.vmem [#allocation7], %s19563_s17  ;;  %s508_s14 = scalar_lea.sflag [#allocation9], %s489_s24 }
 0x124   : > { %s19576_s5 = scalar_lea.vmem [#allocation8], %s19563_s17 }
 0x125   : > { %19050 = dma.done.wait (%p26388_p7), %s508_s14, 8448  }
 0x126   : > { %19052 = vsyncadd (%p26388_p7), %s508_s14, 4294958848  ;;  %s19583_s26 = scalar_lea.vmem [#allocation10], %s19563_s17  ;;  %s526_s28 = scalar_lea.sflag [#allocation12], %s489_s24 }
 0x127   : > { %s19586_s2 = scalar_lea.vmem [#allocation11], %s19563_s17 }
 0x128   : > { %19054 = dma.done.wait (%p26388_p7), %s526_s28, 8448  }
 0x129   : > { %19056 = vsyncadd (%p26388_p7), %s526_s28, 4294958848  ;;  %s19593_s22 = scalar_lea.vmem [#allocation13], %s19563_s17  ;;  %s544_s11 = scalar_lea.sflag [#allocation15], %s489_s24 }
 0x12a   : > { %s19596_s18 = scalar_lea.vmem [#allocation14], %s19563_s17 }
 0x12b   : > { %19058 = dma.done.wait (%p26388_p7), %s544_s11, 8448  }
 0x12c   : > { %19060 = vsyncadd (%p26388_p7), %s544_s11, 4294958848  ;;  %v648_v0 = vld [vmem:[%s19566_s7 + $0x80] sm:$0xff]  ;;  %v649_v1 = vld [vmem:[%s19566_s7 + $0x88] sm:$0xff]  ;;  %vm1688_vm0 = vcmask 7168   ;;  %vm1695_vm1 = vcmask 1040384   ;;  %s21472_s13 = scalar_lea.vmem [#allocation16], %s19563_s17 }
 0x12d   : > { %v681_v2 = vld [vmem:[%s19573_s21 + $0x80] sm:$0xff]  ;;  %v682_v3 = vld [vmem:[%s19573_s21 + $0x88] sm:$0xff]  ;;  %v912_v4 = vmul.f32 %v648_v0, %v648_v0  ;;  %v913_v5 = vmul.f32 %v649_v1, %v649_v1  ;;  %v632_v7 = vld [vmem:[%s19566_s7] sm:$0xff]  ;;  %s18185_s23 = smul.u32 120, %s19560_s29  ;;  %s14333_s19 = sshll.u32 %s19351_s16, 7 }
 0x12e   : > { %v945_v6 = vmul.f32 %v681_v2, %v681_v2  ;;  %v633_v8 = vld [vmem:[%s19566_s7 + $0x8] sm:$0xff]  ;;  %v946_v9 = vmul.f32 %v682_v3, %v682_v3  ;;  %v665_v10 = vld [vmem:[%s19573_s21] sm:$0xff]  ;;  %v666_v11 = vld [vmem:[%s19573_s21 + $0x8] sm:$0xff]  ;;  %v896_v12 = vmul.f32 %v632_v7, %v632_v7  ;;  %s25743_s1 = scalar_lea.hbm %s25805_s9, %s14333_s19  ;;  %s14009_s27 = scalar_lea.sflag [#allocation4], %s19560_s29 }
 0x12f   : > { %v897_v13 = vmul.f32 %v633_v8, %v633_v8  ;;  %v650_v14 = vld [vmem:[%s19566_s7 + $0x90] sm:$0xff]  ;;  %v929_v16 = vmul.f32 %v665_v10, %v665_v10  ;;  %v930_v17 = vmul.f32 %v666_v11, %v666_v11  ;;  %v651_v18 = vld [vmem:[%s19566_s7 + $0x98] sm:$0xff]  ;;  %v683_v19 = vld [vmem:[%s19573_s21 + $0x90] sm:$0xff]  ;;  %s21848_s20 = scalar_lea.vmem [#allocation17], %s18185_s23  ;;  %p27564_p10 = scmp.ne.s32.totalorder %s26369_s25, 0 }
 0x130   : > { %v978_v15 = vadd.f32 %v945_v6, %v912_v4  ;;  %v684_v20 = vld [vmem:[%s19573_s21 + $0x98] sm:$0xff]  ;;  %v914_v21 = vmul.f32 %v650_v14, %v650_v14  ;;  %v979_v22 = vadd.f32 %v946_v9, %v913_v5  ;;  %v915_v23 = vmul.f32 %v651_v18, %v651_v18  ;;  %v634_v26 = vld [vmem:[%s19566_s7 + $0x10] sm:$0xff]  ;;  %v635_v27 = vld [vmem:[%s19566_s7 + $0x18] sm:$0xff]  ;;  %s14021_s12 = sshll.u32 %s21848_s20, 4  ;;  %s19096_s17 = smov [#allocation17]   ;;  %s25747_s12 = int_to_ptr.vmem [resolvable:$true] %s14021_s12 }
 0x131   : > { %v947_v24 = vmul.f32 %v683_v19, %v683_v19  ;;  %v948_v25 = vmul.f32 %v684_v20, %v684_v20  ;;  %v667_v28 = vld [vmem:[%s19573_s21 + $0x10] sm:$0xff]  ;;  %v962_v30 = vadd.f32 %v929_v16, %v896_v12  ;;  %v963_v31 = vadd.f32 %v930_v17, %v897_v13  ;;  %v668_v32 = vld [vmem:[%s19573_s21 + $0x18] sm:$0xff]  ;;  %v685_v47 = vld [vmem:[%s19573_s21 + $0xa0] sm:$0xff]  ;;  %s18997_s24 = scalar_lea.vmem %s25747_s12, 1920  ;;  %s19001_s3 = sshll.u32 %s19096_s17, 4  ;;  %s19002_s3 = int_to_ptr.vmem [resolvable:$false] %s19001_s3 }
 0x132   : > { %v1748_v29 = vand.u32 4294901760, %v978_v15  ;;  %v898_v33 = vmul.f32 %v634_v26, %v634_v26  ;;  %v1751_v34 = vand.u32 4294901760, %v979_v22  ;;  %v899_v37 = vmul.f32 %v635_v27, %v635_v27  ;;  %v652_v38 = vld [vmem:[%s19566_s7 + $0xa0] sm:$0xff]  ;;  %v653_v46 = vld [vmem:[%s19566_s7 + $0xa8] sm:$0xff]  ;;  %v686_v48 = vld [vmem:[%s19573_s21 + $0xa8] sm:$0xff]  ;;  %p18998_p3 = scmp.ne.s32.totalorder %s25747_s12, %s18997_s24  ;;  %p19004_p2 = scmp.lt.s32.totalorder %s25747_s12, %s19002_s3 }
 0x133   : > { %v980_v35 = vadd.f32 %v947_v24, %v914_v21  ;;  %v981_v36 = vadd.f32 %v948_v25, %v915_v23  ;;  %v1700_v39 = vand.u32 4294901760, %v962_v30  ;;  %v1703_v40 = vand.u32 4294901760, %v963_v31  ;;  %v636_v57 = vld [vmem:[%s19566_s7 + $0x20] sm:$0xff]  ;;  %v637_v62 = vld [vmem:[%s19566_s7 + $0x28] sm:$0xff]  ;;  %v669_v3 = vld [vmem:[%s19573_s21 + $0x20] sm:$0xff] }
 0x134   : > { %v931_v41 = vmul.f32 %v667_v28, %v667_v28  ;;  %v932_v42 = vmul.f32 %v668_v32, %v668_v32  ;;  %v19619_v43 = vpack.c.bf16 %v1751_v34, %v1748_v29  ;;  %v916_v52 = vmul.f32 %v652_v38, %v652_v38  ;;  %v670_v4 = vld [vmem:[%s19573_s21 + $0x28] sm:$0xff]  ;;  %v654_v21 = vld [vmem:[%s19566_s7 + $0xb0] sm:$0xff]  ;;  %v687_v27 = vld [vmem:[%s19573_s21 + $0xb0] sm:$0xff]  ;;  %p18999_p4 = pnand %p18998_p3, %p27564_p10 }
 0x135   : > { %v1754_v44 = vand.u32 4294901760, %v980_v35  ;;  %v1757_v45 = vand.u32 4294901760, %v981_v36  ;;  %v19624_v49 = vpack.c.bf16 %v1703_v40, %v1700_v39  ;;  %v19626_v50 = vsub.f32 %v962_v30, %v1700_v39  ;;  %v688_v32 = vld [vmem:[%s19573_s21 + $0xb8] sm:$0xff] }
 0x136   : > { %v964_v51 = vadd.f32 %v931_v41, %v898_v33  ;;  %16545 = vmatprep.subr.bf16.mxu0 %v19619_v43  ;;  %v19629_v53 = vsub.f32 %v963_v31, %v1703_v40  ;;  %v965_v56 = vadd.f32 %v932_v42, %v899_v37  ;;  %v917_v59 = vmul.f32 %v653_v46, %v653_v46  ;;  %v638_v41 = vld [vmem:[%s19566_s7 + $0x30] sm:$0xff]  ;;  %p19000_p12 = pneg %p18999_p4 }
 0x137   : > { %v19631_v54 = vpack.c.bf16 %v1757_v45, %v1754_v44  ;;  %v19633_v55 = vsub.f32 %v980_v35, %v1754_v44  ;;  %16547 = vmatpush3.bf16.msra.mxu0 %v19624_v49  ;;  %v949_v60 = vmul.f32 %v685_v47, %v685_v47  ;;  %v950_v61 = vmul.f32 %v686_v48, %v686_v48  ;;  %v639_v47 = vld [vmem:[%s19566_s7 + $0x38] sm:$0xff]  ;;  %v671_v48 = vld [vmem:[%s19573_s21 + $0x30] sm:$0xff] }
 0x138   : > { %v1706_v58 = vand.u32 4294901760, %v964_v51  ;;  %v19639_v63 = vsub.f32 %v981_v36, %v1757_v45  ;;  %v1709_v0 = vand.u32 4294901760, %v965_v56  ;;  %v19641_v1 = vsub.f32 %v978_v15, %v1748_v29 }
 0x139   : > { %16549 = vmatprep.subr.bf16.mxu0 %v19631_v54  ;;  %v19643_v2 = vsub.f32 %v979_v22, %v1751_v34  ;;  %v982_v6 = vadd.f32 %v949_v60, %v916_v52  ;;  %v983_v7 = vadd.f32 %v950_v61, %v917_v59  ;;  %v900_v8 = vmul.f32 %v636_v57, %v636_v57  ;;  %v655_v22 = vld [vmem:[%s19566_s7 + $0xb8] sm:$0xff] }
 0x13a   : > { %v19647_v5 = vsub.f32 %v964_v51, %v1706_v58  ;;  %v19649_v9 = vpack.c.bf16 %v1709_v0, %v1706_v58  ;;  %v25849_v10 = vand.u32 4294901760, %v19641_v1  ;;  %v901_v12 = vmul.f32 %v637_v62, %v637_v62  ;;  %v672_v58 = vld [vmem:[%s19573_s21 + $0x38] sm:$0xff] }
 0x13b   : > { %v25848_v11 = vand.u32 4294901760, %v19643_v2  ;;  %v1760_v13 = vand.u32 4294901760, %v982_v6  ;;  %v1763_v14 = vand.u32 4294901760, %v983_v7  ;;  %v933_v15 = vmul.f32 %v669_v3, %v669_v3 }
 0x13c   : > { %v934_v16 = vmul.f32 %v670_v4, %v670_v4  ;;  %16551 = vmatpush3.bf16.msra.mxu0 %v19649_v9  ;;  %v1942_v17 = vsub.f32 %v19641_v1, %v25849_v10  ;;  %v25847_v19 = vand.u32 4294901760, %v19626_v50  ;;  %v25844_v20 = vand.u32 4294901760, %v19629_v53 }
 0x13d   : > { %v1949_v18 = vsub.f32 %v19643_v2, %v25848_v11  ;;  %v19664_v23 = vsub.f32 %v965_v56, %v1709_v0  ;;  %v19666_v24 = vpack.c.bf16 %v1763_v14, %v1760_v13  ;;  %v19668_v25 = vsub.f32 %v982_v6, %v1760_v13  ;;  %v679_v11 = vld [vmem:[%s19573_s21 + $0x70] sm:$0xff] }
 0x13e   : > { %v966_v26 = vadd.f32 %v933_v15, %v900_v8  ;;  %v1943_v28 = vand.u32 4294901760, %v1942_v17  ;;  %v967_v30 = vadd.f32 %v934_v16, %v901_v12  ;;  %v1830_v31 = vsub.f32 %v19626_v50, %v25847_v19  ;;  %v647_v19 = vld [vmem:[%s19566_s7 + $0x78] sm:$0xff] }
 0x13f   : > { %v1950_v29 = vand.u32 4294901760, %v1949_v18  ;;  %16553 = vmatprep.subr.bf16.mxu0 %v19666_v24  ;;  %v1837_v34 = vsub.f32 %v19629_v53, %v25844_v20  ;;  %v918_v35 = vmul.f32 %v654_v21, %v654_v21  ;;  %v919_v36 = vmul.f32 %v655_v22, %v655_v22  ;;  %v657_v21 = vld [vmem:[%s19566_s7 + $0xc8] sm:$0xff]  ;;  %v689_v22 = vld [vmem:[%s19573_s21 + $0xc0] sm:$0xff]  ;;  %v695_v20 = vld [vmem:[%s19573_s21 + $0xf0] sm:$0xff] }
 0x140   : > { %v1712_v33 = vand.u32 4294901760, %v966_v26  ;;  %v1715_v38 = vand.u32 4294901760, %v967_v30  ;;  %v1831_v39 = vand.u32 4294901760, %v1830_v31  ;;  %v951_v40 = vmul.f32 %v687_v27, %v687_v27  ;;  %v690_v31 = vld [vmem:[%s19573_s21 + $0xc8] sm:$0xff] }
 0x141   : > { %v16576_v37 = vpack.c.bf16 %v1950_v29, %v1943_v28  ;;  %v19680_v42 = vsub.f32 %v983_v7, %v1763_v14  ;;  %v1838_v44 = vand.u32 4294901760, %v1837_v34  ;;  %v952_v45 = vmul.f32 %v688_v32, %v688_v32  ;;  %v656_v14 = vld [vmem:[%s19566_s7 + $0xc0] sm:$0xff] }
 0x142   : > { %v25843_v46 = vand.u32 4294901760, %v19633_v55  ;;  %v19685_v51 = vpack.c.bf16 %v1715_v38, %v1712_v33  ;;  %v19687_v52 = vsub.f32 %v966_v26, %v1712_v33  ;;  %v984_v56 = vadd.f32 %v951_v40, %v918_v35 }
 0x143   : > { %16577 = vmatprep.subr.bf16.mxu1 %v16576_v37  ;;  %v25841_v57 = vand.u32 4294901760, %v19639_v63  ;;  %v16578_v59 = vpack.c.bf16 %v1838_v44, %v1831_v39  ;;  %v985_v60 = vadd.f32 %v952_v45, %v919_v36  ;;  %v902_v62 = vmul.f32 %v638_v41, %v638_v41  ;;  %v640_v39 = vld [vmem:[%s19566_s7 + $0x40] sm:$0xff] }
 0x144   : > { %v1956_v61 = vsub.f32 %v19633_v55, %v25843_v46  ;;  %16555 = vmatpush3.bf16.msra.mxu0 %v19685_v51  ;;  %v1766_v0 = vand.u32 4294901760, %v984_v56  ;;  %v903_v4 = vmul.f32 %v639_v47, %v639_v47  ;;  %v935_v6 = vmul.f32 %v671_v48, %v671_v48  ;;  %v641_v47 = vld [vmem:[%s19566_s7 + $0x48] sm:$0xff]  ;;  %v673_v48 = vld [vmem:[%s19573_s21 + $0x40] sm:$0xff]  ;;  %v663_v46 = vld [vmem:[%s19566_s7 + $0xf8] sm:$0xff] }
 0x145   : > { %v1963_v3 = vsub.f32 %v19639_v63, %v25841_v57  ;;  %16579 = vmatpush3.bf16.msra.mxu1 %v16578_v59  ;;  %v1769_v7 = vand.u32 4294901760, %v985_v60  ;;  %v936_v12 = vmul.f32 %v672_v58, %v672_v58  ;;  %v25839_v13 = vand.u32 4294901760, %v19647_v5 }
 0x146   : > { %v1957_v8 = vand.u32 4294901760, %v1956_v61  ;;  %v19700_v15 = vsub.f32 %v967_v30, %v1715_v38  ;;  %v968_v17 = vadd.f32 %v935_v6, %v902_v62  ;;  %v25838_v18 = vand.u32 4294901760, %v19664_v23  ;;  %v674_v62 = vld [vmem:[%s19573_s21 + $0x48] sm:$0xff] }
 0x147   : > { %v1964_v16 = vand.u32 4294901760, %v1963_v3  ;;  %v19705_v26 = vpack.c.bf16 %v1769_v7, %v1766_v0  ;;  %v19707_v27 = vsub.f32 %v984_v56, %v1766_v0  ;;  %v969_v28 = vadd.f32 %v936_v12, %v903_v4 }
 0x148   : > { %v1844_v29 = vsub.f32 %v19647_v5, %v25839_v13  ;;  %v1718_v32 = vand.u32 4294901760, %v968_v17  ;;  %v1851_v33 = vsub.f32 %v19664_v23, %v25838_v18  ;;  %v920_v34 = vmul.f32 %v656_v14, %v656_v14  ;;  %v677_v18 = vld [vmem:[%s19573_s21 + $0x60] sm:$0xff] }
 0x149   : > { %v16580_v30 = vpack.c.bf16 %v1964_v16, %v1957_v8  ;;  %16557 = vmatprep.subr.bf16.mxu0 %v19705_v26  ;;  %v1721_v35 = vand.u32 4294901760, %v969_v28  ;;  %v921_v37 = vmul.f32 %v657_v21, %v657_v21  ;;  %v953_v38 = vmul.f32 %v689_v22, %v689_v22  ;;  %v658_v22 = vld [vmem:[%s19566_s7 + $0xd0] sm:$0xff] }
 0x14a   : > { %v1845_v36 = vand.u32 4294901760, %v1844_v29  ;;  %v19718_v40 = vsub.f32 %v985_v60, %v1769_v7  ;;  %v1852_v41 = vand.u32 4294901760, %v1851_v33  ;;  %v954_v44 = vmul.f32 %v690_v31, %v690_v31  ;;  %v659_v33 = vld [vmem:[%s19566_s7 + $0xd8] sm:$0xff] }
 0x14b   : > { %16581 = vmatprep.subr.bf16.mxu1 %v16580_v30  ;;  %v25837_v45 = vand.u32 4294901760, %v19668_v25  ;;  %v19723_v56 = vpack.c.bf16 %v1721_v35, %v1718_v32  ;;  %v19725_v58 = vsub.f32 %v968_v17, %v1718_v32  ;;  %v986_v59 = vadd.f32 %v953_v38, %v920_v34  ;;  %v691_v34 = vld [vmem:[%s19573_s21 + $0xd0] sm:$0xff] }
 0x14c   : > { %v25834_v61 = vand.u32 4294901760, %v19680_v42  ;;  %v16582_v0 = vpack.c.bf16 %v1852_v41, %v1845_v36  ;;  %v987_v3 = vadd.f32 %v954_v44, %v921_v37  ;;  %v904_v4 = vmul.f32 %v640_v39, %v640_v39  ;;  %v692_v41 = vld [vmem:[%s19573_s21 + $0xd8] sm:$0xff] }
 0x14d   : > { %v1970_v60 = vsub.f32 %v19668_v25, %v25837_v45  ;;  %16559 = vmatpush3.bf16.msra.mxu0 %v19723_v56  ;;  %v1772_v6 = vand.u32 4294901760, %v986_v59  ;;  %v905_v8 = vmul.f32 %v641_v47, %v641_v47  ;;  %v937_v12 = vmul.f32 %v673_v48, %v673_v48  ;;  %v645_v45 = vld [vmem:[%s19566_s7 + $0x68] sm:$0xff] }
 0x14e   : > { %v1977_v7 = vsub.f32 %v19680_v42, %v25834_v61  ;;  %16583 = vmatpush3.bf16.msra.mxu1 %v16582_v0  ;;  %v1775_v14 = vand.u32 4294901760, %v987_v3  ;;  %v938_v17 = vmul.f32 %v674_v62, %v674_v62  ;;  %v25833_v21 = vand.u32 4294901760, %v19687_v52  ;;  %v693_v61 = vld [vmem:[%s19573_s21 + $0xe0] sm:$0xff] }
 0x14f   : > { %v1971_v16 = vand.u32 4294901760, %v1970_v60  ;;  %v19738_v29 = vsub.f32 %v969_v28, %v1721_v35  ;;  %v970_v30 = vadd.f32 %v937_v12, %v904_v4  ;;  %v25831_v32 = vand.u32 4294901760, %v19700_v15  ;;  %v642_v60 = vld [vmem:[%s19566_s7 + $0x50] sm:$0xff]  ;;  %v643_v12 = vld [vmem:[%s19566_s7 + $0x58] sm:$0xff] }
 0x150   : > { %v1978_v31 = vand.u32 4294901760, %v1977_v7  ;;  %v19743_v36 = vpack.c.bf16 %v1775_v14, %v1772_v6  ;;  %v19745_v37 = vsub.f32 %v986_v59, %v1772_v6  ;;  %v971_v38 = vadd.f32 %v938_v17, %v905_v8 }
 0x151   : > { %v1858_v39 = vsub.f32 %v19687_v52, %v25833_v21  ;;  %v1724_v35 = vand.u32 4294901760, %v970_v30  ;;  %v1865_v44 = vsub.f32 %v19700_v15, %v25831_v32  ;;  %v922_v47 = vmul.f32 %v658_v22, %v658_v22  ;;  %v661_v21 = vld [vmem:[%s19566_s7 + $0xe8] sm:$0xff] }
 0x152   : > { %v16584_v28 = vpack.c.bf16 %v1978_v31, %v1971_v16  ;;  %16561 = vmatprep.subr.bf16.mxu0 %v19743_v36  ;;  %v1727_v48 = vand.u32 4294901760, %v971_v38  ;;  %v923_v62 = vmul.f32 %v659_v33, %v659_v33  ;;  %v955_v0 = vmul.f32 %v691_v34, %v691_v34  ;;  %v675_v16 = vld [vmem:[%s19573_s21 + $0x50] sm:$0xff]  ;;  %v676_v33 = vld [vmem:[%s19573_s21 + $0x58] sm:$0xff] }
 0x153   : > { %v1859_v59 = vand.u32 4294901760, %v1858_v39  ;;  %v19756_v4 = vsub.f32 %v987_v3, %v1775_v14  ;;  %v1866_v6 = vand.u32 4294901760, %v1865_v44  ;;  %v956_v7 = vmul.f32 %v692_v41, %v692_v41 }
 0x154   : > { %16585 = vmatprep.subr.bf16.mxu1 %v16584_v28  ;;  %v25832_v8 = vand.u32 4294901760, %v19707_v27  ;;  %v19761_v17 = vpack.c.bf16 %v1727_v48, %v1724_v35  ;;  %v19763_v22 = vsub.f32 %v970_v30, %v1724_v35  ;;  %v988_v31 = vadd.f32 %v955_v0, %v922_v47  ;;  %v660_v0 = vld [vmem:[%s19566_s7 + $0xe0] sm:$0xff] }
 0x155   : > { %v25835_v32 = vand.u32 4294901760, %v19718_v40  ;;  %v16586_v34 = vpack.c.bf16 %v1866_v6, %v1859_v59  ;;  %v989_v39 = vadd.f32 %v956_v7, %v923_v62  ;;  %v906_v14 = vmul.f32 %v642_v60, %v642_v60 }
 0x156   : > { %v1984_v3 = vsub.f32 %v19707_v27, %v25832_v8  ;;  %16563 = vmatpush3.bf16.msra.mxu0 %v19761_v17  ;;  %v1778_v41 = vand.u32 4294901760, %v988_v31  ;;  %v907_v28 = vmul.f32 %v643_v12, %v643_v12  ;;  %v939_v35 = vmul.f32 %v675_v16, %v675_v16 }
 0x157   : > { %v1991_v30 = vsub.f32 %v19718_v40, %v25835_v32  ;;  %16587 = vmatpush3.bf16.msra.mxu1 %v16586_v34  ;;  %v1781_v44 = vand.u32 4294901760, %v989_v39  ;;  %v940_v59 = vmul.f32 %v676_v33, %v676_v33  ;;  %v25836_v62 = vand.u32 4294901760, %v19725_v58  ;;  %v694_v34 = vld [vmem:[%s19573_s21 + $0xe8] sm:$0xff] }
 0x158   : > { %v1985_v47 = vand.u32 4294901760, %v1984_v3  ;;  %v19776_v60 = vsub.f32 %v971_v38, %v1727_v48  ;;  %v972_v7 = vadd.f32 %v939_v35, %v906_v14  ;;  %v25840_v8 = vand.u32 4294901760, %v19738_v29  ;;  %v644_v35 = vld [vmem:[%s19566_s7 + $0x60] sm:$0xff] }
 0x159   : > { %v1992_v6 = vand.u32 4294901760, %v1991_v30  ;;  %v19781_v32 = vpack.c.bf16 %v1781_v44, %v1778_v41  ;;  %v19783_v12 = vsub.f32 %v988_v31, %v1778_v41  ;;  %v973_v16 = vadd.f32 %v940_v59, %v907_v28 }
 0x15a   : > { %v1872_v33 = vsub.f32 %v19725_v58, %v25836_v62  ;;  %v1730_v48 = vand.u32 4294901760, %v972_v7  ;;  %v1879_v3 = vsub.f32 %v19738_v29, %v25840_v8  ;;  %v924_v14 = vmul.f32 %v660_v0, %v660_v0 }
 0x15b   : > { %v16588_v38 = vpack.c.bf16 %v1992_v6, %v1985_v47  ;;  %16565 = vmatprep.subr.bf16.mxu0 %v19781_v32  ;;  %v1733_v30 = vand.u32 4294901760, %v973_v16  ;;  %v925_v41 = vmul.f32 %v661_v21, %v661_v21  ;;  %v957_v28 = vmul.f32 %v693_v61, %v693_v61  ;;  %v678_v21 = vld [vmem:[%s19573_s21 + $0x68] sm:$0xff] }
 0x15c   : > { %v1873_v31 = vand.u32 4294901760, %v1872_v33  ;;  %v19794_v59 = vsub.f32 %v989_v39, %v1781_v44  ;;  %v1880_v62 = vand.u32 4294901760, %v1879_v3  ;;  %v958_v47 = vmul.f32 %v694_v34, %v694_v34 }
 0x15d   : > { %16589 = vmatprep.subr.bf16.mxu1 %v16588_v38  ;;  %v25842_v6 = vand.u32 4294901760, %v19745_v37  ;;  %v19799_v13 = vpack.c.bf16 %v1733_v30, %v1730_v48  ;;  %v19801_v0 = vsub.f32 %v972_v7, %v1730_v48  ;;  %v990_v8 = vadd.f32 %v957_v28, %v924_v14 }
 0x15e   : > { %v25845_v57 = vand.u32 4294901760, %v19756_v4  ;;  %v16590_v61 = vpack.c.bf16 %v1880_v62, %v1873_v31  ;;  %v991_v33 = vadd.f32 %v958_v47, %v925_v41  ;;  %v908_v44 = vmul.f32 %v644_v35, %v644_v35  ;;  %v662_v41 = vld [vmem:[%s19566_s7 + $0xf0] sm:$0xff] }
 0x15f   : > { %26389 = vst [vmem:[#allocation29_spill] sm:$0xff] %v19799_v13  ;;  %v1998_v39 = vsub.f32 %v19745_v37, %v25842_v6  ;;  %16567 = vmatpush3.bf16.msra.mxu0 %v19799_v13  ;;  %v1784_v34 = vand.u32 4294901760, %v990_v8  ;;  %v909_v38 = vmul.f32 %v645_v45, %v645_v45  ;;  %v941_v48 = vmul.f32 %v677_v18, %v677_v18 }
 0x160   : > { %v2005_v7 = vsub.f32 %v19756_v4, %v25845_v57  ;;  %16591 = vmatpush3.bf16.msra.mxu1 %v16590_v61  ;;  %v1787_v62 = vand.u32 4294901760, %v991_v33  ;;  %v942_v14 = vmul.f32 %v678_v21, %v678_v21  ;;  %v25846_v31 = vand.u32 4294901760, %v19763_v22  ;;  %v696_v61 = vld [vmem:[%s19573_s21 + $0xf8] sm:$0xff] }
 0x161   : > { %v1999_v3 = vand.u32 4294901760, %v1998_v39  ;;  %v19814_v28 = vsub.f32 %v973_v16, %v1733_v30  ;;  %v974_v47 = vadd.f32 %v941_v48, %v908_v44  ;;  %v25850_v6 = vand.u32 4294901760, %v19776_v60  ;;  %v646_v48 = vld [vmem:[%s19566_s7 + $0x70] sm:$0xff] }
 0x162   : > { %v2006_v35 = vand.u32 4294901760, %v2005_v7  ;;  %v19819_v57 = vpack.c.bf16 %v1787_v62, %v1784_v34  ;;  %v19821_v18 = vsub.f32 %v990_v8, %v1784_v34  ;;  %v975_v45 = vadd.f32 %v942_v14, %v909_v38 }
 0x163   : > { %v1886_v21 = vsub.f32 %v19763_v22, %v25846_v31  ;;  %v1736_v30 = vand.u32 4294901760, %v974_v47  ;;  %v1893_v39 = vsub.f32 %v19776_v60, %v25850_v6  ;;  %v926_v44 = vmul.f32 %v662_v41, %v662_v41 }
 0x164   : > { %26390 = vst [vmem:[#allocation30_spill] sm:$0xff] %v19819_v57  ;;  %v16592_v16 = vpack.c.bf16 %v2006_v35, %v1999_v3  ;;  %16569 = vmatprep.subr.bf16.mxu0 %v19819_v57  ;;  %v1739_v7 = vand.u32 4294901760, %v975_v45  ;;  %v927_v34 = vmul.f32 %v663_v46, %v663_v46  ;;  %v959_v38 = vmul.f32 %v695_v20, %v695_v20 }
 0x165   : > { %v1887_v8 = vand.u32 4294901760, %v1886_v21  ;;  %v19832_v14 = vsub.f32 %v991_v33, %v1787_v62  ;;  %v1894_v31 = vand.u32 4294901760, %v1893_v39  ;;  %v960_v3 = vmul.f32 %v696_v61, %v696_v61  ;;  %v680_v21 = vld [vmem:[%s19573_s21 + $0x78] sm:$0xff] }
 0x166   : > { %16593 = vmatprep.subr.bf16.mxu1 %v16592_v16  ;;  %v25853_v35 = vand.u32 4294901760, %v19783_v12  ;;  %v19837_v10 = vpack.c.bf16 %v1739_v7, %v1736_v30  ;;  %v19839_v41 = vsub.f32 %v974_v47, %v1736_v30  ;;  %v992_v6 = vadd.f32 %v959_v38, %v926_v44 }
 0x167   : > { %v25858_v57 = vand.u32 4294901760, %v19794_v59  ;;  %v16594_v46 = vpack.c.bf16 %v1894_v31, %v1887_v8  ;;  %v993_v20 = vadd.f32 %v960_v3, %v927_v34  ;;  %v910_v62 = vmul.f32 %v646_v48, %v646_v48  ;;  %v627_v8 = vld [vmem:[#allocation2 + $0x8] sm:$0xff] }
 0x168   : > { %26391 = vst [vmem:[#allocation31_spill] sm:$0xff] %v19837_v10  ;;  %v2012_v33 = vsub.f32 %v19783_v12, %v25853_v35  ;;  %16571 = vmatpush3.bf16.msra.mxu0 %v19837_v10  ;;  %v1790_v61 = vand.u32 4294901760, %v992_v6  ;;  %v911_v47 = vmul.f32 %v647_v19, %v647_v19  ;;  %v943_v30 = vmul.f32 %v679_v11, %v679_v11 }
 0x169   : > { %v2019_v16 = vsub.f32 %v19794_v59, %v25858_v57  ;;  %16595 = vmatpush3.bf16.msra.mxu1 %v16594_v46  ;;  %v1793_v39 = vand.u32 4294901760, %v993_v20  ;;  %v944_v38 = vmul.f32 %v680_v21, %v680_v21  ;;  %v25862_v31 = vand.u32 4294901760, %v19801_v0 }
 0x16a   : > { %v2013_v44 = vand.u32 4294901760, %v2012_v33  ;;  %v19851_v34 = vsub.f32 %v975_v45, %v1739_v7  ;;  %v976_v48 = vadd.f32 %v943_v30, %v910_v62  ;;  %v25859_v35 = vand.u32 4294901760, %v19814_v28 }
 0x16b   : > { %v2020_v3 = vand.u32 4294901760, %v2019_v16  ;;  %v19854_v10 = vpack.c.bf16 %v1793_v39, %v1790_v61  ;;  %v19856_v13 = vsub.f32 %v992_v6, %v1790_v61  ;;  %v977_v57 = vadd.f32 %v944_v38, %v911_v47  ;;  %v626_v61 = vld [vmem:[#allocation2] sm:$0xff] }
 0x16c   : > { %v1900_v11 = vsub.f32 %v19801_v0, %v25862_v31  ;;  %v1742_v21 = vand.u32 4294901760, %v976_v48  ;;  %v1907_v45 = vsub.f32 %v19814_v28, %v25859_v35  ;;  %v19864_v7 = vand.u32 4294901760, %v627_v8 }
 0x16d   : > { %26392 = vst [vmem:[#allocation32_spill] sm:$0xff] %v19854_v10  ;;  %v16596_v19 = vpack.c.bf16 %v2020_v3, %v2013_v44  ;;  %16573 = vmatprep.subr.bf16.mxu0 %v19854_v10  ;;  %v1745_v46 = vand.u32 4294901760, %v977_v57  ;;  %v25860_v6 = vand.u32 4294901760, %v19821_v18  ;;  %v25861_v62 = vand.u32 4294901760, %v19832_v14  ;;  %v629_v10 = vld [vmem:[#allocation2 + $0x18] sm:$0x7f] }
 0x16e   : > { %26393 = vst [vmem:[#allocation33_spill] sm:$0xff] %v19864_v7  ;;  %v1901_v33 = vand.u32 4294901760, %v1900_v11  ;;  %v19869_v16 = vsub.f32 %v993_v20, %v1793_v39  ;;  %v1908_v47 = vand.u32 4294901760, %v1907_v45  ;;  %v19872_v30 = vsub.f32 %v627_v8, %v19864_v7  ;;  %2051 = vmatprep.mubr.f32.mxu1 %v19864_v7 }
 0x16f   : > { %16597 = vmatprep.subr.bf16.mxu1 %v16596_v19  ;;  %v16608_v44 = vpack.c.bf16 %v19643_v2, %v19641_v1  ;;  %v19877_v38 = vpack.c.bf16 %v1745_v46, %v1742_v21  ;;  %v19879_v3 = vsub.f32 %v976_v48, %v1742_v21  ;;  %v2026_v11 = vsub.f32 %v19821_v18, %v25860_v6 }
 0x170   : > { %26394 = vst [vmem:[#allocation34_spill] sm:$0xff] %v19872_v30  ;;  %v2033_v20 = vsub.f32 %v19832_v14, %v25861_v62  ;;  %v16598_v39 = vpack.c.bf16 %v1908_v47, %v1901_v33  ;;  %v19888_v8 = vand.u32 4294901760, %v19872_v30  ;;  %v19890_v19 = vand.u32 4294901760, %v626_v61 }
 0x171   : > { %26395 = vst [vmem:[#allocation35_spill] sm:$0xff] %v19877_v38  ;;  %v25863_v45 = vand.u32 4294901760, %v19839_v41  ;;  %16575 = vmatpush3.bf16.msra.mxu0 %v19877_v38  ;;  %v19894_v48 = vsub.f32 %v977_v57, %v1745_v46  ;;  %v2027_v21 = vand.u32 4294901760, %v2026_v11  ;;  %v25864_v6 = vand.u32 4294901760, %v19851_v34 }
 0x172   : > { %26396 = vst [vmem:[#allocation36_spill] sm:$0xff] %v19888_v8  ;;  %26397 = vst [vmem:[#allocation37_spill] sm:$0xff] %v19890_v19  ;;  %v2034_v35 = vand.u32 4294901760, %v2033_v20  ;;  %16599 = vmatpush3.bf16.msra.mxu1 %v16598_v39  ;;  %v1798_v62 = vsub.f32 %v19872_v30, %v19888_v8  ;;  %16609 = vmatprep.subr.bf16.mxu0 %v16608_v44  ;;  %v19900_v33 = vsub.f32 %v626_v61, %v19890_v19 }
 0x173   : > { %v1914_v47 = vsub.f32 %v19839_v41, %v25863_v45  ;;  %v25867_v31 = vand.u32 4294901760, %v19856_v13  ;;  %v1921_v46 = vsub.f32 %v19851_v34, %v25864_v6  ;;  %v25868_v11 = vand.u32 4294901760, %v19869_v16 }
 0x174   : > { %26398 = vst [vmem:[#allocation38_spill] sm:$0xff] %v19900_v33  ;;  %v16600_v57 = vpack.c.bf16 %v2034_v35, %v2027_v21  ;;  %v19910_v20 = vand.u32 4294901760, %v1798_v62  ;;  %v19913_v44 = vand.u32 4294901760, %v19900_v33  ;;  %v25880_v21 = vand.u32 4294901760, %v19879_v3 }
 0x175   : > { %v1915_v61 = vand.u32 4294901760, %v1914_v47  ;;  %v2040_v39 = vsub.f32 %v19856_v13, %v25867_v31  ;;  %v1922_v45 = vand.u32 4294901760, %v1921_v46  ;;  %v2047_v35 = vsub.f32 %v19869_v16, %v25868_v11 }
 0x176   : > { %26399 = vst [vmem:[#allocation39_spill] sm:$0xff] %v19910_v20  ;;  %26400 = vst [vmem:[#allocation40_spill] sm:$0xff] %v19913_v44  ;;  %16601 = vmatprep.subr.bf16.mxu1 %v16600_v57  ;;  %v25879_v6 = vand.u32 4294901760, %v19894_v48  ;;  %1800 = vmatprep.mubr.f32.mxu0 %v19910_v20  ;;  %v1804_v62 = vsub.f32 %v19900_v33, %v19913_v44  ;;  %v16610_v47 = vpack.c.bf16 %v19629_v53, %v19626_v50  ;;  %v630_v44 = vld [vmem:[#allocation2 + $0x20] sm:$0x7f] }
 0x177   : > { %v2041_v7 = vand.u32 4294901760, %v2040_v39  ;;  %v16602_v31 = vpack.c.bf16 %v1922_v45, %v1915_v61  ;;  %v2048_v57 = vand.u32 4294901760, %v2047_v35  ;;  %v1928_v46 = vsub.f32 %v19879_v3, %v25880_v21 }
 0x178   : > { %v1935_v11 = vsub.f32 %v19894_v48, %v25879_v6  ;;  %v19934_v38 = vand.u32 4294901760, %v1804_v62  ;;  %v16612_v20 = vpack.c.bf16 %v19639_v63, %v19633_v55  ;;  %v16614_v61 = vpack.c.bf16 %v19664_v23, %v19647_v5 }
 0x179   : > { %16603 = vmatpush3.bf16.msra.mxu1 %v16602_v31  ;;  %v16604_v33 = vpack.c.bf16 %v2048_v57, %v2041_v7  ;;  %v1929_v39 = vand.u32 4294901760, %v1928_v46  ;;  %v16616_v62 = vpack.c.bf16 %v19680_v42, %v19668_v25  ;;  %v19943_v6 = vand.u32 4294901760, %v630_v44 }
 0x17a   : > { %26401 = vst [vmem:[#allocation41_spill] sm:$0xff] %v19934_v38  ;;  %v1936_v45 = vand.u32 4294901760, %v1935_v11  ;;  %1806 = vmatmul.mubr.f32.vlgmr.msra.gmra.mrb[0].mxu0 %v19934_v38  ;;  %v19945_v21 = vand.u32 4294901760, %v629_v10  ;;  %v16618_v31 = vpack.c.bf16 %v19700_v15, %v19687_v52  ;;  %v16620_v7 = vpack.c.bf16 %v19718_v40, %v19707_v27 }
 0x17b   : > { %16611 = vmatpush3.bf16.msra.mxu0 %v16610_v47  ;;  %16605 = vmatprep.subr.bf16.mxu1 %v16604_v33  ;;  %26402 = vst [vmem:[#allocation42_spill] sm:$0xff] %v19943_v6  ;;  %v26404_v11 = vand.u32 4294901760, %v19641_v1  ;;  %v26405_v47 = vand.u32 4294901760, %v19643_v2  ;;  %v26406_v57 = vand.u32 4294901760, %v19626_v50  ;;  %v26407_v46 = vand.u32 4294901760, %v19629_v53 }
 0x17c   : > { %v16606_v35 = vpack.c.bf16 %v1936_v45, %v1929_v39  ;;  %26403 = vst [vmem:[#allocation43_spill] sm:$0xff] %v19945_v21  ;;  %16613 = vmatprep.subr.bf16.mxu0 %v16612_v20  ;;  %v19964_v20 = vsub.f32 %v630_v44, %v19943_v6  ;;  %v19967_v45 = vsub.f32 %v629_v10, %v19945_v21  ;;  %v26410_v38 = vand.u32 4294901760, %v19633_v55 }
 0x17d   : > { %v19955_v33 = vpack.c.bf16 %v26405_v47, %v26404_v11  ;;  %v19961_v39 = vpack.c.bf16 %v26407_v46, %v26406_v57  ;;  %v26411_v1 = vand.u32 4294901760, %v19639_v63  ;;  %v26412_v11 = vand.u32 4294901760, %v19647_v5 }
 0x17e   : > { %16607 = vmatpush3.bf16.msra.mxu1 %v16606_v35  ;;  %26408 = vst [vmem:[#allocation44_spill] sm:$0xff] %v19964_v20  ;;  %26409 = vst [vmem:[#allocation45_spill] sm:$0xff] %v19967_v45  ;;  %v26413_v50 = vand.u32 4294901760, %v19664_v23  ;;  %v26414_v44 = vand.u32 4294901760, %v19668_v25  ;;  %v26415_v35 = vand.u32 4294901760, %v19680_v42  ;;  %v26416_v55 = vand.u32 4294901760, %v19687_v52 }
 0x17f   : > { %v19973_v2 = vpack.c.bf16 %v26411_v1, %v26410_v38  ;;  %16641 = vmatprep.subr.bf16.mxu1 %v19619_v43  ;;  %v26417_v63 = vand.u32 4294901760, %v19700_v15  ;;  %v26418_v5 = vand.u32 4294901760, %v19707_v27  ;;  %v26419_v23 = vand.u32 4294901760, %v19718_v40  ;;  %16615 = vmatpush3.bf16.msra.mxu0 %v16614_v61 }
 0x180   : > { %v19979_v53 = vpack.c.bf16 %v26413_v50, %v26412_v11  ;;  %v19986_v10 = vpack.c.bf16 %v26415_v35, %v26414_v44  ;;  %v26420_v57 = vand.u32 4294901760, %v19725_v58  ;;  %v26421_v25 = vand.u32 4294901760, %v19738_v29  ;;  %16617 = vmatprep.subr.bf16.mxu0 %v16616_v62 }
 0x181   : > { %v19992_v38 = vpack.c.bf16 %v26417_v63, %v26416_v55  ;;  %v19998_v47 = vpack.c.bf16 %v26419_v23, %v26418_v5  ;;  %v20007_v42 = vand.u32 4294901760, %v19964_v20  ;;  %v20010_v52 = vand.u32 4294901760, %v19967_v45  ;;  %2053 = vmatmul.mubr.f32.vlgmr.msra.gmra.mrb[0].mxu1 %v19890_v19 }
 0x182   : > { %v20004_v46 = vpack.c.bf16 %v26421_v25, %v26420_v57  ;;  %v26424_v15 = vand.u32 4294901760, %v19745_v37  ;;  %v26425_v27 = vand.u32 4294901760, %v19756_v4  ;;  %v26426_v1 = vand.u32 4294901760, %v19763_v22  ;;  %16643 = vmatpush3.bf16.msra.mxu1 %v19624_v49  ;;  %2058 = vmatprep.mubr.f32.mxu1 %v19943_v6 }
 0x183   : > { %26422 = vst [vmem:[#allocation46_spill] sm:$0xff] %v20007_v42  ;;  %26423 = vst [vmem:[#allocation47_spill] sm:$0xff] %v20010_v52  ;;  %v26427_v11 = vand.u32 4294901760, %v19776_v60  ;;  %v26428_v61 = vand.u32 4294901760, %v19783_v12  ;;  %v26429_v44 = vand.u32 4294901760, %v19794_v59  ;;  %v26430_v55 = vand.u32 4294901760, %v19801_v0  ;;  %16645 = vmatprep.subr.bf16.mxu1 %v19631_v54  ;;  %16619 = vmatpush3.bf16.msra.mxu0 %v16618_v31 }
 0x184   : > { %v20016_v40 = vpack.c.bf16 %v26425_v27, %v26424_v15  ;;  %v26431_v63 = vand.u32 4294901760, %v19814_v28  ;;  %v26432_v23 = vand.u32 4294901760, %v19821_v18  ;;  %v26433_v57 = vand.u32 4294901760, %v19832_v14  ;;  %16621 = vmatprep.subr.bf16.mxu0 %v16620_v7  ;;  %v26439_v31 = vld [vmem:[#allocation38_spill] sm:$0xff]  ;;  %v26440_v7 = vld [vmem:[#allocation32_spill] sm:$0xff] }
 0x185   : > { %v20022_v50 = vpack.c.bf16 %v26427_v11, %v26426_v1  ;;  %v20029_v35 = vpack.c.bf16 %v26429_v44, %v26428_v61  ;;  %v1813_v62 = vsub.f32 %v19964_v20, %v20007_v42  ;;  %v1819_v15 = vsub.f32 %v19967_v45, %v20010_v52  ;;  %2060 = vmatmul.mubr.f32.gmra.mrb[2].mxu1 %v19945_v21 }
 0x186   : > { %v20035_v5 = vpack.c.bf16 %v26431_v63, %v26430_v55  ;;  %v20041_v25 = vpack.c.bf16 %v26433_v57, %v26432_v23  ;;  %v16622_v27 = vpack.c.bf16 %v19738_v29, %v19725_v58  ;;  %v16624_v61 = vpack.c.bf16 %v19756_v4, %v19745_v37  ;;  %16647 = vmatpush3.bf16.msra.mxu1 %v19649_v9  ;;  %v26441_v63 = vld [vmem:[#allocation35_spill] sm:$0xff]  ;;  %v26443_v23 = vld [vmem:[#allocation40_spill] sm:$0xff] }
 0x187   : > { %v20052_v1 = vand.u32 4294901760, %v1813_v62  ;;  %v20054_v11 = vand.u32 4294901760, %v1819_v15  ;;  %16649 = vmatprep.subr.bf16.mxu1 %v19666_v24  ;;  %v16626_v58 = vpack.c.bf16 %v19776_v60, %v19763_v22  ;;  %v16628_v29 = vpack.c.bf16 %v19794_v59, %v19783_v12  ;;  %2311 = vmatprep.mubr.f32.mxu1 %v19888_v8  ;;  %v26436_v59 = vld [vmem:[#allocation29_spill] sm:$0xff]  ;;  %v628_v57 = vld [vmem:[#allocation2 + $0x10] sm:$0xff] }
 0x188   : > { %16623 = vmatpush3.bf16.msra.mxu0 %v16622_v27  ;;  %v16630_v37 = vpack.c.bf16 %v19814_v28, %v19801_v0  ;;  %v16632_v4 = vpack.c.bf16 %v19832_v14, %v19821_v18  ;;  %v16634_v22 = vpack.c.bf16 %v19851_v34, %v19839_v41  ;;  %v16636_v60 = vpack.c.bf16 %v19869_v16, %v19856_v13  ;;  %v26437_v0 = vld [vmem:[#allocation30_spill] sm:$0xff]  ;;  %v26438_v28 = vld [vmem:[#allocation31_spill] sm:$0xff]  ;;  %v715_v62 = vld [vmem:[%s19576_s5 + $0x88] sm:$0xff] }
 0x189   : > { %26434 = vst [vmem:[#allocation48_spill] sm:$0xff] %v20052_v1  ;;  %26435 = vst [vmem:[#allocation49_spill] sm:$0xff] %v20054_v11  ;;  %1815 = vmatprep.mubr.f32.mxu0 %v20052_v1  ;;  %16625 = vmatprep.subr.bf16.mxu0 %v16624_v61  ;;  %v16638_v12 = vpack.c.bf16 %v19894_v48, %v19879_v3  ;;  %v664_v18 = vld [vmem:[%s19566_s7 + $0x100] sm:$0x1]  ;;  %v697_v14 = vld [vmem:[%s19573_s21 + $0x100] sm:$0x1] }
 0x18a   : > { %1821 = vmatmul.mubr.f32.gmra.mrb[2].mxu0 %v20054_v11  ;;  %16651 = vmatpush3.bf16.msra.mxu1 %v19685_v51  ;;  %v928_v44 = vmul.f32 %v664_v18, %v664_v18  ;;  %v961_v55 = vmul.f32 %v697_v14, %v697_v14  ;;  %v747_v15 = vld [vmem:[%s19583_s26 + $0x80] sm:$0xff]  ;;  %v698_v27 = vld [vmem:[%s19576_s5] sm:$0xff]  ;;  %v699_v61 = vld [vmem:[%s19576_s5 + $0x8] sm:$0xff] }
 0x18b   : > { %2195 = vmatprep.mubr.f32.mxu0 %v19872_v30  ;;  %16653 = vmatprep.subr.bf16.mxu1 %v19705_v26  ;;  %v700_v18 = vld [vmem:[%s19576_s5 + $0x10] sm:$0xff] }
 0x18c   : > { %16627 = vmatpush3.bf16.msra.mxu0 %v16626_v58  ;;  %v731_v58 = vld [vmem:[%s19583_s26] sm:$0xff] }
 0x18d   : > { %16629 = vmatprep.subr.bf16.mxu0 %v16628_v29  ;;  %v716_v29 = vld [vmem:[%s19576_s5 + $0x90] sm:$0xff] }
 0x18e   : > { %16655 = vmatpush3.bf16.msra.mxu1 %v19723_v56 }
 0x18f   : > { %16657 = vmatprep.subr.bf16.mxu1 %v19743_v36 }
 0x190   : > { %16631 = vmatpush3.bf16.msra.mxu0 %v16630_v37  ;;  %v717_v37 = vld [vmem:[%s19576_s5 + $0x98] sm:$0xff] }
 0x191   : > { %16633 = vmatprep.subr.bf16.mxu0 %v16632_v4 }
 0x192   : > { %16659 = vmatpush3.bf16.msra.mxu1 %v19761_v17 }
 0x193   : > { %16661 = vmatprep.subr.bf16.mxu1 %v19781_v32 }
 0x194   : > { %16635 = vmatpush3.bf16.msra.mxu0 %v16634_v22  ;;  %v1012_v22 = vmul.f32 %v715_v62, %v715_v62 }
 0x195   : > { %16637 = vmatprep.subr.bf16.mxu0 %v16636_v60  ;;  %v1044_v60 = vmul.f32 %v747_v15, %v747_v15 }
 0x196   : > { %16663 = vmatpush3.bf16.msra.mxu1 %v26436_v59 }
 0x197   : > { %16665 = vmatprep.subr.bf16.mxu1 %v26437_v0 }
 0x198   : > { %16639 = vmatpush3.bf16.msra.mxu0 %v16638_v12  ;;  %v749_v12 = vld [vmem:[%s19583_s26 + $0x90] sm:$0xff] }
 0x199   : > { %16673 = vmatprep.subr.bf16.mxu0 %v19955_v33  ;;  %v26442_v33 = vld [vmem:[#allocation33_spill] sm:$0xff] }
 0x19a   : > { %16667 = vmatpush3.bf16.msra.mxu1 %v26438_v28 }
 0x19b   : > { %2198 = vmatmul.mubr.f32.vlgmr.msra.gmra.mrb[4].mxu0 %v26439_v31  ;;  %16669 = vmatprep.subr.bf16.mxu1 %v26440_v7  ;;  %v758_v31 = vld [vmem:[%s19583_s26 + $0xd8] sm:$0xff] }
 0x19c   : > { %16675 = vmatpush3.bf16.msra.mxu0 %v19961_v39  ;;  %2204 = vmatprep.mubr.f32.mxu0 %v19964_v20  ;;  %v994_v39 = vadd.f32 %v961_v55, %v928_v44  ;;  %v995_v55 = vmul.f32 %v698_v27, %v698_v27  ;;  %v997_v27 = vmul.f32 %v700_v18, %v700_v18  ;;  %v751_v18 = vld [vmem:[%s19583_s26 + $0xa0] sm:$0xff]  ;;  %v725_v20 = vld [vmem:[%s19576_s5 + $0xd8] sm:$0xff] }
 0x19d   : > { %16677 = vmatprep.subr.bf16.mxu0 %v19973_v2  ;;  %v631_v2 = vld [vmem:[#allocation2 + $0x28] sm:$0x7f] }
 0x19e   : > { %16671 = vmatpush3.bf16.msra.mxu1 %v26441_v63 }
 0x19f   : > { %2207 = vmatmul.mubr.f32.gmra.mrb[6].mxu0 %v19967_v45  ;;  %16705 = vmatprep.subr.bf16.mxu1 %v19619_v43  ;;  %v1690_v43 = vsel %vm1688_vm0, %v628_v57, 0  ;;  %v733_v57 = vld [vmem:[%s19583_s26 + $0x10] sm:$0xff] }
 0x1a0   : > { %16679 = vmatpush3.bf16.msra.mxu0 %v19979_v53  ;;  %2492 = vmatprep.mubr.f32.mxu0 %v26442_v33  ;;  %v1693_v53 = vsel %vm1688_vm0, %v631_v2, 0  ;;  %v734_v2 = vld [vmem:[%s19583_s26 + $0x18] sm:$0xff] }
 0x1a1   : > { %2315 = vmatmul.mubr.f32.vlgmr.msra.gmra.mrb[4].mxu1 %v26443_v23  ;;  %16681 = vmatprep.subr.bf16.mxu0 %v19986_v10  ;;  %v20114_v10 = vand.u32 4294901760, %v1690_v43  ;;  %v707_v23 = vld [vmem:[%s19576_s5 + $0x48] sm:$0xff] }
 0x1a2   : > { %16707 = vmatpush3.bf16.msra.mxu1 %v19624_v49  ;;  %2322 = vmatprep.mubr.f32.mxu1 %v20007_v42  ;;  %v1697_v49 = vsel %vm1695_vm1, %v994_v39, 0  ;;  %v701_v39 = vld [vmem:[%s19576_s5 + $0x18] sm:$0xff]  ;;  %v706_v42 = vld [vmem:[%s19576_s5 + $0x40] sm:$0xff] }
 0x1a3   : > { %16709 = vmatprep.subr.bf16.mxu1 %v19631_v54  ;;  %v714_v54 = vld [vmem:[%s19576_s5 + $0x80] sm:$0xff]  ;;  %26444 = vst [vmem:[#allocation29_spill] sm:$0xff] %v20114_v10  ;;  %v20137_v14 = vsub.f32 %v1690_v43, %v20114_v10  ;;  %v1014_v43 = vmul.f32 %v717_v37, %v717_v37 }
 0x1a4   : > { %16683 = vmatpush3.bf16.msra.mxu0 %v19992_v38  ;;  %v20116_v38 = vand.u32 4294901760, %v1693_v53  ;;  %v1011_v4 = vmul.f32 %v714_v54, %v714_v54  ;;  %v1028_v54 = vmul.f32 %v731_v58, %v731_v58  ;;  %v26449_v58 = vand.u32 4294901760, %v19851_v34 }
 0x1a5   : > { %2326 = vmatmul.mubr.f32.gmra.mrb[6].mxu1 %v20010_v52  ;;  %16685 = vmatprep.subr.bf16.mxu0 %v19998_v47  ;;  %v748_v47 = vld [vmem:[%s19583_s26 + $0x88] sm:$0xff]  ;;  %26446 = vst [vmem:[#allocation31_spill] sm:$0xff] %v20137_v14  ;;  %v998_v52 = vmul.f32 %v701_v39, %v701_v39 }
 0x1a6   : > { %16711 = vmatpush3.bf16.msra.mxu1 %v19649_v9  ;;  %2603 = vmatprep.mubr.f32.mxu1 %v26442_v33  ;;  %26445 = vst [vmem:[#allocation30_spill] sm:$0xff] %v20116_v38  ;;  %v20122_v9 = vand.u32 4294901760, %v1697_v49  ;;  %v1045_v44 = vmul.f32 %v748_v47, %v748_v47 }
 0x1a7   : > { %16713 = vmatprep.subr.bf16.mxu1 %v19666_v24  ;;  %v732_v24 = vld [vmem:[%s19583_s26 + $0x8] sm:$0xff] }
 0x1a8   : > { %16687 = vmatpush3.bf16.msra.mxu0 %v20004_v46  ;;  %v750_v46 = vld [vmem:[%s19583_s26 + $0x98] sm:$0xff]  ;;  %v1029_v62 = vmul.f32 %v732_v24, %v732_v24  ;;  %v20147_v15 = vsub.f32 %v1697_v49, %v20122_v9  ;;  %v26448_v49 = vand.u32 4294901760, %v19839_v41  ;;  %v26450_v24 = vand.u32 4294901760, %v19856_v13 }
 0x1a9   : > { %16689 = vmatprep.subr.bf16.mxu0 %v20016_v40  ;;  %v20140_v40 = vsub.f32 %v1693_v53, %v20116_v38  ;;  %v1046_v53 = vmul.f32 %v749_v12, %v749_v12  ;;  %v1047_v47 = vmul.f32 %v750_v46, %v750_v46  ;;  %v20160_v12 = vadd.f32 %v1044_v60, %v1011_v4  ;;  %v718_v46 = vld [vmem:[%s19576_s5 + $0xa0] sm:$0xff]  ;;  %v752_v4 = vld [vmem:[%s19583_s26 + $0xa8] sm:$0xff] }
 0x1aa   : > { %16715 = vmatpush3.bf16.msra.mxu1 %v19685_v51  ;;  %v996_v51 = vmul.f32 %v699_v61, %v699_v61  ;;  %v1031_v61 = vmul.f32 %v734_v2, %v734_v2  ;;  %v20170_v41 = vadd.f32 %v1028_v54, %v995_v55  ;;  %v20175_v13 = vand.u32 4294901760, %v20147_v15 }
 0x1ab   : > { %16717 = vmatprep.subr.bf16.mxu1 %v19705_v26  ;;  %26447 = vst [vmem:[#allocation32_spill] sm:$0xff] %v20140_v40  ;;  %v1013_v26 = vmul.f32 %v716_v29, %v716_v29  ;;  %v26451_v29 = vand.u32 4294901760, %v19869_v16  ;;  %v719_v16 = vld [vmem:[%s19576_s5 + $0xa8] sm:$0xff]  ;;  %v20189_v39 = vadd.f32 %v1047_v47, %v1014_v43  ;;  %v25886_v54 = vand.u32 4294901760, %v20160_v12 }
 0x1ac   : > { %16691 = vmatpush3.bf16.msra.mxu0 %v20022_v50  ;;  %v1030_v50 = vmul.f32 %v733_v57, %v733_v57  ;;  %v20172_v34 = vadd.f32 %v1029_v62, %v996_v51  ;;  %v20194_v2 = vadd.f32 %v1031_v61, %v998_v52  ;;  %v703_v51 = vld [vmem:[%s19576_s5 + $0x28] sm:$0xff]  ;;  %v1049_v43 = vmul.f32 %v752_v4, %v752_v4  ;;  %v736_v52 = vld [vmem:[%s19583_s26 + $0x28] sm:$0xff] }
 0x1ad   : > { %16693 = vmatprep.subr.bf16.mxu0 %v20029_v35  ;;  %v16698_v35 = vpack.c.bf16 %v26449_v58, %v26448_v49  ;;  %v16700_v37 = vpack.c.bf16 %v26451_v29, %v26450_v24  ;;  %v20187_v55 = vadd.f32 %v1046_v53, %v1013_v26  ;;  %v1016_v26 = vmul.f32 %v719_v16, %v719_v16  ;;  %v721_v61 = vld [vmem:[%s19576_s5 + $0xb8] sm:$0xff]  ;;  %v753_v49 = vld [vmem:[%s19583_s26 + $0xb0] sm:$0xff]  ;;  %v738_v4 = vld [vmem:[%s19583_s26 + $0x38] sm:$0xff] }
 0x1ae   : > { %16719 = vmatpush3.bf16.msra.mxu1 %v19723_v56  ;;  %v20162_v56 = vadd.f32 %v1045_v44, %v1012_v22  ;;  %v26453_v22 = vand.u32 4294901760, %v19879_v3  ;;  %v20185_v44 = vand.u32 4294901760, %v20140_v40  ;;  %v20192_v57 = vadd.f32 %v1030_v50, %v997_v27  ;;  %v720_v50 = vld [vmem:[%s19576_s5 + $0xb0] sm:$0xff]  ;;  %v737_v16 = vld [vmem:[%s19583_s26 + $0x30] sm:$0xff] }
 0x1af   : > { %16721 = vmatprep.subr.bf16.mxu1 %v19743_v36  ;;  %v20168_v36 = vand.u32 4294901760, %v20137_v14  ;;  %v1048_v3 = vmul.f32 %v751_v18, %v751_v18  ;;  %v704_v18 = vld [vmem:[%s19576_s5 + $0x30] sm:$0xff]  ;;  %v20223_v58 = vadd.f32 %v1049_v43, %v1016_v26  ;;  %v1018_v24 = vmul.f32 %v721_v61, %v721_v61  ;;  %v722_v43 = vld [vmem:[%s19576_s5 + $0xc0] sm:$0xff] }
 0x1b0   : > { %16695 = vmatpush3.bf16.msra.mxu0 %v20035_v5  ;;  %v26454_v5 = vand.u32 4294901760, %v19894_v48  ;;  %26455 = vst [vmem:[#allocation50_spill] sm:$0xff] %v20185_v44  ;;  %v702_v48 = vld [vmem:[%s19576_s5 + $0x20] sm:$0xff]  ;;  %v25885_v62 = vand.u32 4294901760, %v20162_v56  ;;  %v1050_v27 = vmul.f32 %v753_v49, %v753_v49  ;;  %v26461_v61 = vand.u32 4294901760, %v20187_v55 }
 0x1b1   : > { %26452 = vst [vmem:[#allocation35_spill] sm:$0xff] %v20168_v36  ;;  %16697 = vmatprep.subr.bf16.mxu0 %v20041_v25  ;;  %v1015_v25 = vmul.f32 %v718_v46, %v718_v46  ;;  %v2686_v53 = vsub.f32 %v20137_v14, %v20168_v36  ;;  %v999_v29 = vmul.f32 %v702_v48, %v702_v48  ;;  %v754_v46 = vld [vmem:[%s19583_s26 + $0xb8] sm:$0xff]  ;;  %v26462_v49 = vand.u32 4294901760, %v20189_v39 }
 0x1b2   : > { %v16702_v60 = vpack.c.bf16 %v26454_v5, %v26453_v22  ;;  %16723 = vmatpush3.bf16.msra.mxu1 %v19761_v17  ;;  %v735_v17 = vld [vmem:[%s19583_s26 + $0x20] sm:$0xff]  ;;  %v1033_v48 = vmul.f32 %v736_v52, %v736_v52  ;;  %v1051_v47 = vmul.f32 %v754_v46, %v754_v46  ;;  %v1001_v22 = vmul.f32 %v704_v18, %v704_v18 }
 0x1b3   : > { %16725 = vmatprep.subr.bf16.mxu1 %v19781_v32  ;;  %v2707_v32 = vsub.f32 %v20147_v15, %v20175_v13  ;;  %v20220_v5 = vadd.f32 %v1048_v3, %v1015_v25  ;;  %v1034_v25 = vmul.f32 %v737_v16, %v737_v16  ;;  %v2696_v3 = vsub.f32 %v20140_v40, %v20185_v44 }
 0x1b4   : > { %16699 = vmatpush3.bf16.msra.mxu0 %v16698_v35  ;;  %v1000_v35 = vmul.f32 %v703_v51, %v703_v51  ;;  %v1017_v51 = vmul.f32 %v720_v50, %v720_v50  ;;  %v26458_v52 = vand.u32 4294901760, %v20170_v41  ;;  %v20253_v46 = vpack.c.bf16 %v26462_v49, %v26461_v61 }
 0x1b5   : > { %16701 = vmatprep.subr.bf16.mxu0 %v16700_v37  ;;  %v1032_v37 = vmul.f32 %v735_v17, %v735_v17  ;;  %v20238_v26 = vand.u32 4294901760, %v2707_v32  ;;  %v723_v17 = vld [vmem:[%s19576_s5 + $0xc8] sm:$0xff]  ;;  %v26464_v32 = vand.u32 4294901760, %v20192_v57  ;;  %v26465_v18 = vand.u32 4294901760, %v20194_v2 }
 0x1b6   : > { %16727 = vmatpush3.bf16.msra.mxu1 %v26436_v59  ;;  %v705_v59 = vld [vmem:[%s19576_s5 + $0x38] sm:$0xff]  ;;  %26463 = vst [vmem:[#allocation54_spill] sm:$0xff] %v20253_v46  ;;  %v1035_v49 = vmul.f32 %v738_v4, %v738_v4  ;;  %v1019_v4 = vmul.f32 %v722_v43, %v722_v43  ;;  %v1055_v43 = vmul.f32 %v758_v31, %v758_v31 }
 0x1b7   : > { %16729 = vmatprep.subr.bf16.mxu1 %v26437_v0  ;;  %v20228_v0 = vand.u32 4294901760, %v2686_v53  ;;  %v26459_v53 = vand.u32 4294901760, %v20172_v34  ;;  %v20259_v16 = vpack.c.bf16 %v26465_v18, %v26464_v32  ;;  %v1002_v61 = vmul.f32 %v705_v59, %v705_v59  ;;  %v739_v32 = vld [vmem:[%s19583_s26 + $0x40] sm:$0xff] }
 0x1b8   : > { %16703 = vmatpush3.bf16.msra.mxu0 %v16702_v60  ;;  %v20236_v60 = vpack.c.bf16 %v25885_v62, %v25886_v54  ;;  %v755_v62 = vld [vmem:[%s19583_s26 + $0xc0] sm:$0xff]  ;;  %v756_v54 = vld [vmem:[%s19583_s26 + $0xc8] sm:$0xff]  ;;  %v20277_v18 = vadd.f32 %v1050_v27, %v1017_v51  ;;  %v1020_v59 = vmul.f32 %v723_v17, %v723_v17  ;;  %v1004_v27 = vmul.f32 %v707_v23, %v707_v23 }
 0x1b9   : > { %16304 = vmatprep.subr.mxu0 %v20122_v9  ;;  %26456 = vst [vmem:[#allocation51_spill] sm:$0xff] %v20228_v0  ;;  %v20247_v50 = vpack.c.bf16 %v26459_v53, %v26458_v52  ;;  %26466 = vst [vmem:[#allocation55_spill] sm:$0xff] %v20259_v16  ;;  %v20269_v53 = vadd.f32 %v1033_v48, %v1000_v35  ;;  %v20281_v52 = vadd.f32 %v1034_v25, %v1001_v22  ;;  %v724_v35 = vld [vmem:[%s19576_s5 + $0xd0] sm:$0xff]  ;;  %v757_v48 = vld [vmem:[%s19583_s26 + $0xd0] sm:$0xff] }
 0x1ba   : > { %26457 = vst [vmem:[#allocation52_spill] sm:$0xff] %v20236_v60  ;;  %16731 = vmatpush3.bf16.msra.mxu1 %v26438_v28  ;;  %v20261_v28 = vadd.f32 %v1032_v37, %v999_v29  ;;  %v740_v29 = vld [vmem:[%s19583_s26 + $0x48] sm:$0xff]  ;;  %v1052_v8 = vmul.f32 %v755_v62, %v755_v62  ;;  %v1053_v45 = vmul.f32 %v756_v54, %v756_v54  ;;  %v20290_v22 = vand.u32 4294901760, %v2696_v3  ;;  %v708_v17 = vld [vmem:[%s19576_s5 + $0x50] sm:$0xff] }
 0x1bb   : > { %26460 = vst [vmem:[#allocation53_spill] sm:$0xff] %v20247_v50  ;;  %2494 = vmatmul.mubr.f32.vlgmr.msra.gmra.mrb[8].mxu0 %v19890_v19  ;;  %16733 = vmatprep.subr.bf16.mxu1 %v26440_v7  ;;  %v20279_v7 = vadd.f32 %v1051_v47, %v1018_v24  ;;  %v1003_v37 = vmul.f32 %v706_v42, %v706_v42  ;;  %v26468_v42 = vand.u32 4294901760, %v20220_v5 }
 0x1bc   : > { %2499 = vmatprep.mubr.f32.mxu0 %v19943_v6  ;;  %16305 = vmatpush3.msra.mxu0 %v20122_v9  ;;  %v1036_v47 = vmul.f32 %v739_v32, %v739_v32  ;;  %v1037_v24 = vmul.f32 %v740_v29, %v740_v29  ;;  %26467 = vst [vmem:[#allocation56_spill] sm:$0xff] %v20290_v22  ;;  %v709_v32 = vld [vmem:[%s19576_s5 + $0x58] sm:$0xff]  ;;  %v726_v29 = vld [vmem:[%s19576_s5 + $0xe0] sm:$0xff] }
 0x1bd   : > { %16309 = vmatprep.subr.mxu0 %v20238_v26  ;;  %v20293_v51 = vadd.f32 %v1035_v49, %v1002_v61  ;;  %v1021_v54 = vmul.f32 %v724_v35, %v724_v35  ;;  %v1054_v62 = vmul.f32 %v757_v48, %v757_v48  ;;  %v1022_v3 = vmul.f32 %v725_v20, %v725_v20  ;;  %v741_v48 = vld [vmem:[%s19583_s26 + $0x50] sm:$0xff]  ;;  %v759_v20 = vld [vmem:[%s19583_s26 + $0xe0] sm:$0xff] }
 0x1be   : > { %16735 = vmatpush3.bf16.msra.mxu1 %v26441_v63  ;;  %v26469_v63 = vand.u32 4294901760, %v20223_v58  ;;  %v20309_v35 = vadd.f32 %v1052_v8, %v1019_v4  ;;  %v20316_v31 = vadd.f32 %v1053_v45, %v1020_v59  ;;  %v20320_v49 = vadd.f32 %v1037_v24, %v1004_v27  ;;  %v760_v45 = vld [vmem:[%s19583_s26 + $0xe8] sm:$0xff] }
 0x1bf   : > { %2501 = vmatmul.mubr.f32.gmra.mrb[10].mxu0 %v19945_v21  ;;  %16737 = vmatprep.subr.bf16.mxu1 %v20236_v60  ;;  %v20326_v4 = vadd.f32 %v1054_v62, %v1021_v54  ;;  %v1005_v61 = vmul.f32 %v708_v17, %v708_v17  ;;  %v1006_v25 = vmul.f32 %v709_v32, %v709_v32  ;;  %v26472_v24 = vand.u32 4294901760, %v20269_v53  ;;  %v710_v17 = vld [vmem:[%s19576_s5 + $0x60] sm:$0xff]  ;;  %v746_v60 = vld [vmem:[%s19583_s26 + $0x78] sm:$0xff] }
 0x1c0   : > { %16306 = vmatprep.mubr.f32.mxu0 %v20228_v0  ;;  %v20300_v23 = vpack.c.bf16 %v26469_v63, %v26468_v42  ;;  %v742_v42 = vld [vmem:[%s19583_s26 + $0x58] sm:$0xff]  ;;  %v20318_v63 = vadd.f32 %v1036_v47, %v1003_v37  ;;  %v20333_v37 = vadd.f32 %v1055_v43, %v1022_v3  ;;  %v1038_v59 = vmul.f32 %v741_v48, %v741_v48  ;;  %v26474_v8 = vld [vmem:[#allocation39_spill] sm:$0xff] }
 0x1c1   : > { %2605 = vmatmul.mubr.f32.vlgmr.msra.gmra.mrb[8].mxu1 %v19890_v19  ;;  %v727_v0 = vld [vmem:[%s19576_s5 + $0xe8] sm:$0xff]  ;;  %v1039_v27 = vmul.f32 %v742_v42, %v742_v42  ;;  %v26471_v47 = vand.u32 4294901760, %v20261_v28  ;;  %v1023_v62 = vmul.f32 %v726_v29, %v726_v29  ;;  %v1056_v32 = vmul.f32 %v759_v20, %v759_v20  ;;  %v712_v19 = vld [vmem:[%s19576_s5 + $0x70] sm:$0xff] }
 0x1c2   : > { %26470 = vst [vmem:[#allocation57_spill] sm:$0xff] %v20300_v23  ;;  %16739 = vmatpush3.bf16.msra.mxu1 %v20247_v50  ;;  %2610 = vmatprep.mubr.f32.mxu1 %v19943_v6  ;;  %v1024_v43 = vmul.f32 %v727_v0, %v727_v0  ;;  %v1057_v48 = vmul.f32 %v760_v45, %v760_v45  ;;  %v711_v42 = vld [vmem:[%s19576_s5 + $0x68] sm:$0xff]  ;;  %v26475_v29 = vand.u32 4294901760, %v20277_v18  ;;  %v26478_v0 = vand.u32 4294901760, %v20281_v52  ;;  %v761_v6 = vld [vmem:[%s19583_s26 + $0xf0] sm:$0xff] }
 0x1c3   : > { %16307 = vmatmul.mubr.f32.vlgmr.msra.gmra.mrb[12].mxu0 %v20290_v22  ;;  %16741 = vmatprep.subr.bf16.mxu1 %v20253_v46  ;;  %v20340_v54 = vpack.c.bf16 %v26472_v24, %v26471_v47  ;;  %v743_v47 = vld [vmem:[%s19583_s26 + $0x60] sm:$0xff]  ;;  %v744_v24 = vld [vmem:[%s19583_s26 + $0x68] sm:$0xff]  ;;  %v26479_v20 = vand.u32 4294901760, %v20293_v51  ;;  %v20369_v46 = vadd.f32 %v1038_v59, %v1005_v61  ;;  %v762_v50 = vld [vmem:[%s19583_s26 + $0xf8] sm:$0xff] }
 0x1c4   : > { %16310 = vmatpush3.msra.mxu0 %v20238_v26  ;;  %16311 = vmatprep.mubr.f32.mxu0 %v20114_v10  ;;  %v26476_v26 = vand.u32 4294901760, %v20279_v7  ;;  %v1040_v3 = vmul.f32 %v743_v47, %v743_v47  ;;  %v20385_v59 = vadd.f32 %v1057_v48, %v1024_v43  ;;  %v1059_v47 = vmul.f32 %v762_v50, %v762_v50 }
 0x1c5   : > { %2612 = vmatmul.mubr.f32.gmra.mrb[10].mxu1 %v19945_v21  ;;  %26473 = vst [vmem:[#allocation58_spill] sm:$0xff] %v20340_v54  ;;  %16314 = vmatprep.subr.mxu0 %v20147_v15  ;;  %v20362_v45 = vpack.c.bf16 %v26479_v20, %v26478_v0  ;;  %v728_v21 = vld [vmem:[%s19576_s5 + $0xf0] sm:$0xff]  ;;  %v1007_v0 = vmul.f32 %v710_v17, %v710_v17  ;;  %v26485_v50 = vand.u32 4294901760, %v20333_v37 }
 0x1c6   : > { %16743 = vmatpush3.bf16.msra.mxu1 %v20259_v16  ;;  %3339 = vmatprep.mubr.f32.mxu1 %v26474_v8  ;;  %v20356_v22 = vpack.c.bf16 %v26476_v26, %v26475_v29  ;;  %v20371_v26 = vadd.f32 %v1039_v27, %v1006_v25  ;;  %v729_v29 = vld [vmem:[%s19576_s5 + $0xf8] sm:$0xff]  ;;  %v1008_v20 = vmul.f32 %v711_v42, %v711_v42  ;;  %v26480_v8 = vand.u32 4294901760, %v20309_v35 }
 0x1c7   : > { %16745 = vmatprep.subr.bf16.mxu1 %v20300_v23  ;;  %v1041_v16 = vmul.f32 %v744_v24, %v744_v24  ;;  %v26481_v23 = vand.u32 4294901760, %v20316_v31  ;;  %v20383_v25 = vadd.f32 %v1056_v32, %v1023_v62  ;;  %v1025_v27 = vmul.f32 %v728_v21, %v728_v21  ;;  %v713_v24 = vld [vmem:[%s19576_s5 + $0x78] sm:$0xff] }
 0x1c8   : > { %26477 = vst [vmem:[#allocation59_spill] sm:$0xff] %v20356_v22  ;;  %v1026_v17 = vmul.f32 %v729_v29, %v729_v29  ;;  %v1058_v42 = vmul.f32 %v761_v6, %v761_v6  ;;  %v26484_v6 = vand.u32 4294901760, %v20326_v4  ;;  %v20410_v32 = vadd.f32 %v1040_v3, %v1007_v0 }
 0x1c9   : > { %v20381_v61 = vpack.c.bf16 %v26481_v23, %v26480_v8  ;;  %v26482_v23 = vand.u32 4294901760, %v20318_v63  ;;  %v26483_v8 = vand.u32 4294901760, %v20320_v49  ;;  %v20412_v48 = vadd.f32 %v1041_v16, %v1008_v20 }
 0x1ca   : > { %16747 = vmatpush3.bf16.msra.mxu1 %v20340_v54  ;;  %v745_v54 = vld [vmem:[%s19583_s26 + $0x70] sm:$0xff]  ;;  %v20407_v43 = vpack.c.bf16 %v26485_v50, %v26484_v6  ;;  %v1009_v29 = vmul.f32 %v712_v19, %v712_v19  ;;  %v1043_v62 = vmul.f32 %v746_v60, %v746_v60  ;;  %v20418_v6 = vadd.f32 %v1058_v42, %v1025_v27 }
 0x1cb   : > { %16312 = vmatmul.mubr.f32.vlgmr.msra.gmra.mrb[12].mxu0 %v20116_v38  ;;  %16749 = vmatprep.subr.bf16.mxu1 %v20356_v22  ;;  %v20399_v21 = vpack.c.bf16 %v26483_v8, %v26482_v23  ;;  %v1010_v23 = vmul.f32 %v713_v24, %v713_v24  ;;  %v1042_v8 = vmul.f32 %v745_v54, %v745_v54  ;;  %v25921_v22 = vand.u32 4294901760, %v20385_v59 }
 0x1cc   : > { %16315 = vmatpush3.msra.mxu0 %v20147_v15  ;;  %16316 = vmatprep.mubr.f32.mxu0 %v20137_v14  ;;  %v25922_v15 = vand.u32 4294901760, %v20371_v26  ;;  %v3323_v14 = vand.u32 4294901760, %v20383_v25  ;;  %v20420_v50 = vadd.f32 %v1059_v47, %v1026_v17  ;;  %v26486_v3 = vand.u32 4294901760, %v20160_v12 }
 0x1cd   : > { %16319 = vmatprep.subr.mxu0 %v20122_v9  ;;  %v26487_v19 = vand.u32 4294901760, %v20162_v56  ;;  %v26488_v60 = vand.u32 4294901760, %v20369_v46  ;;  %v25924_v20 = vand.u32 4294901760, %v20410_v32  ;;  %v25923_v27 = vand.u32 4294901760, %v20412_v48 }
 0x1ce   : > { %16751 = vmatpush3.bf16.msra.mxu1 %v20362_v45  ;;  %v20425_v16 = vsub.f32 %v20160_v12, %v26486_v3  ;;  %v20441_v17 = vadd.f32 %v1042_v8, %v1009_v29  ;;  %v20443_v12 = vadd.f32 %v1043_v62, %v1010_v23  ;;  %v26489_v42 = vand.u32 4294901760, %v20170_v41 }
 0x1cf   : > { %16753 = vmatprep.subr.bf16.mxu1 %v20381_v61  ;;  %v20430_v54 = vsub.f32 %v20162_v56, %v26487_v19  ;;  %v20436_v0 = vpack.c.bf16 %v25922_v15, %v26488_v60  ;;  %v20454_v47 = vpack.c.bf16 %v25921_v22, %v3323_v14  ;;  %v3329_v24 = vand.u32 4294901760, %v20418_v6 }
 0x1d0   : > { %v20448_v56 = vsub.f32 %v20170_v41, %v26489_v42  ;;  %v25925_v29 = vand.u32 4294901760, %v20420_v50  ;;  %v26491_v62 = vand.u32 4294901760, %v20172_v34  ;;  %v26492_v41 = vand.u32 4294901760, %v20187_v55 }
 0x1d1   : > { %26490 = vst [vmem:[#allocation60_spill] sm:$0xff] %v20454_v47  ;;  %v26493_v3 = vand.u32 4294901760, %v20189_v39  ;;  %v26494_v60 = vand.u32 4294901760, %v20192_v57  ;;  %v26500_v15 = vand.u32 4294901760, %v20269_v53 }
 0x1d2   : > { %16755 = vmatpush3.bf16.msra.mxu1 %v20399_v21  ;;  %v20461_v23 = vsub.f32 %v20172_v34, %v26491_v62  ;;  %v20466_v8 = vsub.f32 %v20187_v55, %v26492_v41  ;;  %v26495_v34 = vand.u32 4294901760, %v20194_v2  ;;  %v25926_v55 = vand.u32 4294901760, %v20425_v16 }
 0x1d3   : > { %16317 = vmatmul.mubr.f32.vlgmr.msra.gmra.mrb[12].mxu0 %v20140_v40  ;;  %16757 = vmatprep.subr.bf16.mxu1 %v20407_v43  ;;  %v20471_v19 = vsub.f32 %v20189_v39, %v26493_v3  ;;  %v20478_v42 = vsub.f32 %v20192_v57, %v26494_v60  ;;  %v26496_v41 = vand.u32 4294901760, %v20220_v5  ;;  %v20498_v57 = vpack.c.bf16 %v25923_v27, %v25924_v20 }
 0x1d4   : > { %16320 = vmatpush3.msra.mxu0 %v20122_v9  ;;  %16321 = vmatprep.mubr.f32.mxu0 %v20168_v36  ;;  %v20483_v62 = vsub.f32 %v20194_v2, %v26495_v34  ;;  %v25927_v2 = vand.u32 4294901760, %v20441_v17  ;;  %v26498_v34 = vand.u32 4294901760, %v20223_v58  ;;  %v20515_v39 = vsub.f32 %v20269_v53, %v26500_v15 }
 0x1d5   : > { %16324 = vmatprep.subr.mxu0 %v20175_v13  ;;  %v20491_v3 = vsub.f32 %v20220_v5, %v26496_v41  ;;  %26497 = vst [vmem:[#allocation61_spill] sm:$0xff] %v20498_v57  ;;  %v26499_v5 = vand.u32 4294901760, %v20261_v28  ;;  %v20520_v27 = vpack.c.bf16 %v25925_v29, %v3329_v24  ;;  %v26502_v20 = vand.u32 4294901760, %v20277_v18 }
 0x1d6   : > { %16759 = vmatpush3.bf16.msra.mxu1 %v20436_v0  ;;  %v20505_v22 = vsub.f32 %v20223_v58, %v26498_v34  ;;  %v26503_v34 = vand.u32 4294901760, %v20279_v7  ;;  %v26505_v15 = vand.u32 4294901760, %v20293_v51  ;;  %v26506_v60 = vand.u32 4294901760, %v20309_v35 }
 0x1d7   : > { %v20510_v41 = vsub.f32 %v20261_v28, %v26499_v5  ;;  %16761 = vmatprep.subr.bf16.mxu1 %v20454_v47  ;;  %26501 = vst [vmem:[#allocation62_spill] sm:$0xff] %v20520_v27  ;;  %v20525_v58 = vsub.f32 %v20277_v18, %v26502_v20  ;;  %v26504_v5 = vand.u32 4294901760, %v20281_v52  ;;  %v26507_v20 = vand.u32 4294901760, %v20430_v54 }
 0x1d8   : > { %v20530_v28 = vsub.f32 %v20279_v7, %v26503_v34  ;;  %v20540_v29 = vsub.f32 %v20293_v51, %v26505_v15  ;;  %v20545_v18 = vsub.f32 %v20309_v35, %v26506_v60  ;;  %v3481_v7 = vsub.f32 %v20425_v16, %v25926_v55 }
 0x1d9   : > { %v20535_v53 = vsub.f32 %v20281_v52, %v26504_v5  ;;  %v3488_v34 = vsub.f32 %v20430_v54, %v26507_v20  ;;  %v26508_v5 = vand.u32 4294901760, %v20316_v31  ;;  %v26509_v15 = vand.u32 4294901760, %v20318_v63 }
 0x1da   : > { %16763 = vmatpush3.bf16.msra.mxu1 %v20498_v57  ;;  %v26510_v60 = vand.u32 4294901760, %v20443_v12  ;;  %v26512_v52 = vand.u32 4294901760, %v20320_v49  ;;  %v26521_v36 = vand.u32 4294901760, %v20412_v48  ;;  %v26522_v40 = vand.u32 4294901760, %v20466_v8 }
 0x1db   : > { %v20557_v51 = vsub.f32 %v20316_v31, %v26508_v5  ;;  %v20562_v35 = vsub.f32 %v20318_v63, %v26509_v15  ;;  %v26513_v5 = vand.u32 4294901760, %v20326_v4  ;;  %16322 = vmatmul.mubr.f32.vlgmr.msra.gmra.mrb[12].mxu0 %v20185_v44  ;;  %16765 = vmatprep.subr.bf16.mxu1 %v20520_v27  ;;  %v16800_v15 = vpack.c.bf16 %v20430_v54, %v20425_v16 }
 0x1dc   : > { %v20569_v55 = vpack.c.bf16 %v26510_v60, %v25927_v2  ;;  %v20575_v31 = vsub.f32 %v20320_v49, %v26512_v52  ;;  %v26514_v60 = vand.u32 4294901760, %v20333_v37  ;;  %v26515_v49 = vand.u32 4294901760, %v20369_v46  ;;  %16325 = vmatpush3.msra.mxu0 %v20175_v13  ;;  %16326 = vmatprep.mubr.f32.mxu0 %v20114_v10 }
 0x1dd   : > { %v20580_v63 = vsub.f32 %v20326_v4, %v26513_v5  ;;  %v26516_v4 = vand.u32 4294901760, %v20371_v26  ;;  %v20605_v44 = vsub.f32 %v20383_v25, %v3323_v14  ;;  %16329 = vmatprep.subr.mxu0 %v20122_v9  ;;  %v16802_v13 = vpack.c.bf16 %v20461_v23, %v20448_v56 }
 0x1de   : > { %26511 = vst [vmem:[#allocation63_spill] sm:$0xff] %v20569_v55  ;;  %v20589_v2 = vsub.f32 %v20333_v37, %v26514_v60  ;;  %v20594_v52 = vsub.f32 %v20369_v46, %v26515_v49  ;;  %v3482_v37 = vand.u32 4294901760, %v3481_v7  ;;  %v3489_v60 = vand.u32 4294901760, %v3488_v34  ;;  %16767 = vmatpush3.bf16.msra.mxu1 %v20569_v55 }
 0x1df   : > { %v20599_v5 = vsub.f32 %v20371_v26, %v26516_v4  ;;  %v26517_v49 = vand.u32 4294901760, %v20385_v59  ;;  %v26518_v4 = vand.u32 4294901760, %v20448_v56  ;;  %v26519_v25 = vand.u32 4294901760, %v20461_v23  ;;  %16801 = vmatprep.subr.bf16.mxu1 %v16800_v15 }
 0x1e0   : > { %v26520_v34 = vand.u32 4294901760, %v20410_v32  ;;  %v16768_v20 = vpack.c.bf16 %v3489_v60, %v3482_v37  ;;  %v26524_v55 = vand.u32 4294901760, %v20471_v19  ;;  %v26527_v60 = vand.u32 4294901760, %v20483_v62 }
 0x1e1   : > { %v20612_v26 = vsub.f32 %v20385_v59, %v26517_v49  ;;  %v3369_v14 = vsub.f32 %v20448_v56, %v26518_v4  ;;  %v3376_v7 = vsub.f32 %v20461_v23, %v26519_v25  ;;  %v16804_v59 = vpack.c.bf16 %v20471_v19, %v20466_v8 }
 0x1e2   : > { %v20626_v46 = vsub.f32 %v20410_v32, %v26520_v34  ;;  %v20635_v4 = vsub.f32 %v20412_v48, %v26521_v36  ;;  %v20638_v25 = vsub.f32 %v20418_v6, %v3329_v24  ;;  %v3495_v32 = vsub.f32 %v20466_v8, %v26522_v40  ;;  %v26523_v34 = vld [vmem:[#allocation41_spill] sm:$0xff] }
 0x1e3   : > { %3345 = vmatmul.mubr.f32.vlgmr.msra.gmra.mrb[12].mxu1 %v26523_v34  ;;  %v16806_v49 = vpack.c.bf16 %v20483_v62, %v20478_v42  ;;  %v3502_v36 = vsub.f32 %v20471_v19, %v26524_v55  ;;  %v26525_v6 = vand.u32 4294901760, %v20420_v50  ;;  %v3370_v40 = vand.u32 4294901760, %v3369_v14  ;;  %16327 = vmatmul.mubr.f32.vlgmr.msra.gmra.mrb[12].mxu0 %v20116_v38 }
 0x1e4   : > { %16803 = vmatpush3.bf16.msra.mxu1 %v16802_v13  ;;  %v3377_v15 = vand.u32 4294901760, %v3376_v7  ;;  %v16808_v34 = vpack.c.bf16 %v20505_v22, %v20491_v3  ;;  %3354 = vmatprep.mubr.f32.mxu1 %v20052_v1  ;;  %v26526_v55 = vand.u32 4294901760, %v20478_v42  ;;  %v26528_v7 = vand.u32 4294901760, %v20441_v17 }
 0x1e5   : > { %v20654_v24 = vsub.f32 %v20420_v50, %v26525_v6  ;;  %16805 = vmatprep.subr.bf16.mxu1 %v16804_v59  ;;  %v3390_v50 = vsub.f32 %v20483_v62, %v26527_v60  ;;  %16330 = vmatpush3.msra.mxu0 %v20122_v9  ;;  %v16810_v59 = vpack.c.bf16 %v20515_v39, %v20510_v41  ;;  %v26529_v48 = vand.u32 4294901760, %v20491_v3 }
 0x1e6   : > { %v3383_v37 = vsub.f32 %v20478_v42, %v26526_v55  ;;  %v20671_v6 = vsub.f32 %v20441_v17, %v26528_v7  ;;  %16331 = vmatprep.mubr.f32.mxu0 %v20114_v10  ;;  %v3496_v55 = vand.u32 4294901760, %v3495_v32  ;;  %16769 = vmatprep.subr.bf16.mxu0 %v16768_v20  ;;  %v3503_v13 = vand.u32 4294901760, %v3502_v36 }
 0x1e7   : > { %v3509_v60 = vsub.f32 %v20491_v3, %v26529_v48  ;;  %v26530_v14 = vand.u32 4294901760, %v20505_v22  ;;  %3360 = vmatmul.mubr.f32.gmra.mrb[14].mxu1 %v20054_v11  ;;  %v16770_v7 = vpack.c.bf16 %v3377_v15, %v3370_v40  ;;  %v16812_v32 = vpack.c.bf16 %v20530_v28, %v20525_v58 }
 0x1e8   : > { %16807 = vmatpush3.bf16.msra.mxu1 %v16806_v49  ;;  %3734 = vmatprep.mubr.f32.mxu1 %v19872_v30  ;;  %v3384_v36 = vand.u32 4294901760, %v3383_v37  ;;  %v3391_v48 = vand.u32 4294901760, %v3390_v50  ;;  %v26532_v17 = vand.u32 4294901760, %v20515_v39  ;;  %v16814_v15 = vpack.c.bf16 %v20540_v29, %v20535_v53 }
 0x1e9   : > { %v3516_v1 = vsub.f32 %v20505_v22, %v26530_v14  ;;  %16809 = vmatprep.subr.bf16.mxu1 %v16808_v34  ;;  %v26531_v14 = vand.u32 4294901760, %v20510_v41  ;;  %v3510_v40 = vand.u32 4294901760, %v3509_v60  ;;  %v16772_v30 = vpack.c.bf16 %v3503_v13, %v3496_v55 }
 0x1ea   : > { %v3404_v49 = vsub.f32 %v20515_v39, %v26532_v17  ;;  %v26533_v37 = vand.u32 4294901760, %v20525_v58  ;;  %v16816_v17 = vpack.c.bf16 %v20557_v51, %v20545_v18  ;;  %v26535_v60 = vand.u32 4294901760, %v20535_v53 }
 0x1eb   : > { %v3397_v9 = vsub.f32 %v20510_v41, %v26531_v14  ;;  %v3517_v34 = vand.u32 4294901760, %v3516_v1  ;;  %v26534_v14 = vand.u32 4294901760, %v20530_v28  ;;  %v26536_v20 = vand.u32 4294901760, %v20540_v29  ;;  %16332 = vmatmul.mubr.f32.vlgmr.msra.gmra.mrb[12].mxu0 %v20116_v38 }
 0x1ec   : > { %v3523_v50 = vsub.f32 %v20525_v58, %v26533_v37  ;;  %16811 = vmatpush3.bf16.msra.mxu1 %v16810_v59  ;;  %v3411_v10 = vsub.f32 %v20535_v53, %v26535_v60  ;;  %v16774_v55 = vpack.c.bf16 %v3391_v48, %v3384_v36  ;;  %v25950_v59 = vand.u32 4294901760, %v20575_v31  ;;  %16771 = vmatpush3.bf16.msra.mxu0 %v16770_v7 }
 0x1ed   : > { %v3530_v11 = vsub.f32 %v20530_v28, %v26534_v14  ;;  %v3418_v1 = vsub.f32 %v20540_v29, %v26536_v20  ;;  %16813 = vmatprep.subr.bf16.mxu1 %v16812_v32  ;;  %v3398_v37 = vand.u32 4294901760, %v3397_v9  ;;  %v3405_v14 = vand.u32 4294901760, %v3404_v49  ;;  %3590 = vmatprep.mubr.f32.mxu0 %v26442_v33 }
 0x1ee   : > { %v26537_v27 = vand.u32 4294901760, %v20545_v18  ;;  %v26538_v60 = vand.u32 4294901760, %v20557_v51  ;;  %16773 = vmatprep.subr.bf16.mxu0 %v16772_v30  ;;  %v16776_v9 = vpack.c.bf16 %v3517_v34, %v3510_v40  ;;  %v16818_v32 = vpack.c.bf16 %v20575_v31, %v20562_v35 }
 0x1ef   : > { %v3524_v7 = vand.u32 4294901760, %v3523_v50  ;;  %v3531_v36 = vand.u32 4294901760, %v3530_v11  ;;  %v3412_v48 = vand.u32 4294901760, %v3411_v10  ;;  %v16820_v49 = vpack.c.bf16 %v20589_v2, %v20580_v63 }
 0x1f0   : > { %v3537_v57 = vsub.f32 %v20545_v18, %v26537_v27  ;;  %v3544_v47 = vsub.f32 %v20557_v51, %v26538_v60  ;;  %16815 = vmatpush3.bf16.msra.mxu1 %v16814_v15  ;;  %v3419_v27 = vand.u32 4294901760, %v3418_v1  ;;  %v26539_v60 = vand.u32 4294901760, %v20562_v35  ;;  %16775 = vmatpush3.bf16.msra.mxu0 %v16774_v55 }
 0x1f1   : > { %v16778_v13 = vpack.c.bf16 %v3405_v14, %v3398_v37  ;;  %16817 = vmatprep.subr.bf16.mxu1 %v16816_v17  ;;  %v3432_v30 = vsub.f32 %v20575_v31, %v25950_v59  ;;  %v25953_v40 = vand.u32 4294901760, %v20594_v52  ;;  %v26540_v34 = vand.u32 4294901760, %v20580_v63  ;;  %16777 = vmatprep.subr.bf16.mxu0 %v16776_v9 }
 0x1f2   : > { %v3425_v20 = vsub.f32 %v20562_v35, %v26539_v60  ;;  %v3538_v10 = vand.u32 4294901760, %v3537_v57  ;;  %v3545_v15 = vand.u32 4294901760, %v3544_v47  ;;  %v26541_v1 = vand.u32 4294901760, %v20589_v2 }
 0x1f3   : > { %v3551_v50 = vsub.f32 %v20580_v63, %v26540_v34  ;;  %v26542_v17 = vand.u32 4294901760, %v20443_v12  ;;  %v16780_v60 = vpack.c.bf16 %v3531_v36, %v3524_v7  ;;  %v25952_v59 = vand.u32 4294901760, %v20605_v44 }
 0x1f4   : > { %v3558_v37 = vsub.f32 %v20589_v2, %v26541_v1  ;;  %v25951_v57 = vand.u32 4294901760, %v20612_v26  ;;  %16819 = vmatpush3.bf16.msra.mxu1 %v16818_v32  ;;  %v16782_v47 = vpack.c.bf16 %v3419_v27, %v3412_v48  ;;  %v16822_v55 = vpack.c.bf16 %v20599_v5, %v20594_v52  ;;  %16779 = vmatpush3.bf16.msra.mxu0 %v16778_v13 }
 0x1f5   : > { %v20748_v14 = vsub.f32 %v20443_v12, %v26542_v17  ;;  %v3426_v34 = vand.u32 4294901760, %v3425_v20  ;;  %v16824_v1 = vpack.c.bf16 %v20612_v26, %v20605_v44  ;;  %16821 = vmatprep.subr.bf16.mxu1 %v16820_v49  ;;  %v3433_v11 = vand.u32 4294901760, %v3432_v30  ;;  %16781 = vmatprep.subr.bf16.mxu0 %v16780_v60 }
 0x1f6   : > { %v3439_v12 = vsub.f32 %v20594_v52, %v25953_v40  ;;  %v26543_v9 = vand.u32 4294901760, %v20599_v5  ;;  %v3452_v32 = vand.u32 4294901760, %v20626_v46  ;;  %v16784_v36 = vpack.c.bf16 %v3545_v15, %v3538_v10 }
 0x1f7   : > { %v3552_v48 = vand.u32 4294901760, %v3551_v50  ;;  %v3559_v27 = vand.u32 4294901760, %v3558_v37  ;;  %v3459_v20 = vand.u32 4294901760, %v20635_v4  ;;  %v3565_v49 = vsub.f32 %v20605_v44, %v25952_v59 }
 0x1f8   : > { %v3446_v7 = vsub.f32 %v20599_v5, %v26543_v9  ;;  %v3572_v30 = vsub.f32 %v20612_v26, %v25951_v57  ;;  %v25954_v17 = vand.u32 4294901760, %v20638_v25  ;;  %16823 = vmatpush3.bf16.msra.mxu1 %v16822_v55  ;;  %v16826_v13 = vpack.c.bf16 %v20635_v4, %v20626_v46  ;;  %16783 = vmatpush3.bf16.msra.mxu0 %v16782_v47 }
 0x1f9   : > { %v16828_v10 = vpack.c.bf16 %v20654_v24, %v20638_v25  ;;  %v16786_v15 = vpack.c.bf16 %v3433_v11, %v3426_v34  ;;  %16825 = vmatprep.subr.bf16.mxu1 %v16824_v1  ;;  %v3440_v50 = vand.u32 4294901760, %v3439_v12  ;;  %v3453_v60 = vsub.f32 %v20626_v46, %v3452_v32  ;;  %16785 = vmatprep.subr.bf16.mxu0 %v16784_v36 }
 0x1fa   : > { %v3447_v37 = vand.u32 4294901760, %v3446_v7  ;;  %v16788_v57 = vpack.c.bf16 %v3559_v27, %v3552_v48  ;;  %v3460_v55 = vsub.f32 %v20635_v4, %v3459_v20  ;;  %v3466_v59 = vand.u32 4294901760, %v20671_v6 }
 0x1fb   : > { %v3473_v40 = vand.u32 4294901760, %v20748_v14  ;;  %v3566_v9 = vand.u32 4294901760, %v3565_v49  ;;  %v3573_v11 = vand.u32 4294901760, %v3572_v30  ;;  %v3579_v34 = vsub.f32 %v20638_v25, %v25954_v17 }
 0x1fc   : > { %v26544_v1 = vand.u32 4294901760, %v20654_v24  ;;  %16827 = vmatpush3.bf16.msra.mxu1 %v16826_v13  ;;  %v16830_v12 = vpack.c.bf16 %v20748_v14, %v20671_v6  ;;  %v16790_v7 = vpack.c.bf16 %v3447_v37, %v3440_v50  ;;  %v26545_v48 = vand.u32 4294901760, %v20425_v16  ;;  %16787 = vmatpush3.bf16.msra.mxu0 %v16786_v15 }
 0x1fd   : > { %16829 = vmatprep.subr.bf16.mxu1 %v16828_v10  ;;  %v26546_v36 = vand.u32 4294901760, %v20430_v54  ;;  %v3454_v49 = vand.u32 4294901760, %v3453_v60  ;;  %v3461_v30 = vand.u32 4294901760, %v3460_v55  ;;  %v3467_v17 = vsub.f32 %v20671_v6, %v3466_v59  ;;  %16789 = vmatprep.subr.bf16.mxu0 %v16788_v57 }
 0x1fe   : > { %v3586_v47 = vsub.f32 %v20654_v24, %v26544_v1  ;;  %v3474_v13 = vsub.f32 %v20748_v14, %v3473_v40  ;;  %v16792_v10 = vpack.c.bf16 %v3573_v11, %v3566_v9  ;;  %v3580_v50 = vand.u32 4294901760, %v3579_v34  ;;  %v26551_v9 = vld [vmem:[#allocation38_spill] sm:$0xff]  ;;  %v730_v34 = vld [vmem:[%s19576_s5 + $0x100] sm:$0x1] }
 0x1ff   : > { %v16864_v27 = vpack.c.bf16 %v26546_v36, %v26545_v48  ;;  %v26547_v54 = vand.u32 4294901760, %v20448_v56  ;;  %v26548_v15 = vand.u32 4294901760, %v20461_v23  ;;  %v26549_v60 = vand.u32 4294901760, %v20466_v8  ;;  %v26554_v8 = vld [vmem:[#allocation44_spill] sm:$0xff]  ;;  %v767_v14 = vld [vmem:[%s19586_s2 + $0x18] sm:$0xff] }
 0x200   : > { %v3587_v16 = vand.u32 4294901760, %v3586_v47  ;;  %16831 = vmatpush3.bf16.msra.mxu1 %v16830_v12  ;;  %v26550_v55 = vand.u32 4294901760, %v20471_v19  ;;  %16791 = vmatpush3.bf16.msra.mxu0 %v16790_v7  ;;  %v16794_v48 = vpack.c.bf16 %v3461_v30, %v3454_v49  ;;  %v3468_v36 = vand.u32 4294901760, %v3467_v17  ;;  %v763_v47 = vld [vmem:[%s19583_s26 + $0x100] sm:$0x1] }
 0x201   : > { %v16866_v37 = vpack.c.bf16 %v26548_v15, %v26547_v54  ;;  %16865 = vmatprep.subr.bf16.mxu1 %v16864_v27  ;;  %v3475_v57 = vand.u32 4294901760, %v3474_v13  ;;  %16793 = vmatprep.subr.bf16.mxu0 %v16792_v10  ;;  %v26552_v56 = vand.u32 4294901760, %v20478_v42  ;;  %v26553_v23 = vand.u32 4294901760, %v20483_v62  ;;  %v26557_v13 = vld [vmem:[#allocation45_spill] sm:$0xff]  ;;  %v26562_v54 = vld [vmem:[#allocation52_spill] sm:$0xff] }
 0x202   : > { %v16868_v1 = vpack.c.bf16 %v26550_v55, %v26549_v60  ;;  %v16796_v11 = vpack.c.bf16 %v3587_v16, %v3580_v50  ;;  %v26555_v19 = vand.u32 4294901760, %v20491_v3  ;;  %v26556_v17 = vand.u32 4294901760, %v20505_v22  ;;  %v26568_v55 = vld [vmem:[#allocation53_spill] sm:$0xff] }
 0x203   : > { %3737 = vmatmul.mubr.f32.vlgmr.msra.gmra.mrb[16].mxu1 %v26551_v9  ;;  %v16870_v12 = vpack.c.bf16 %v26553_v23, %v26552_v56  ;;  %v16798_v27 = vpack.c.bf16 %v3475_v57, %v3468_v36  ;;  %v1027_v49 = vmul.f32 %v730_v34, %v730_v34  ;;  %v1060_v30 = vmul.f32 %v763_v47, %v763_v47  ;;  %v814_v34 = vld [vmem:[%s19593_s22 + $0x88] sm:$0xff] }
 0x204   : > { %16867 = vmatpush3.bf16.msra.mxu1 %v16866_v37  ;;  %3743 = vmatprep.mubr.f32.mxu1 %v26554_v8  ;;  %v16872_v7 = vpack.c.bf16 %v26556_v17, %v26555_v19  ;;  %v26558_v42 = vand.u32 4294901760, %v20510_v41  ;;  %v26559_v62 = vand.u32 4294901760, %v20515_v39  ;;  %v26560_v22 = vand.u32 4294901760, %v20525_v58  ;;  %v26565_v37 = vld [vmem:[#allocation37_spill] sm:$0xff]  ;;  %v26573_v47 = vld [vmem:[#allocation43_spill] sm:$0xff] }
 0x205   : > { %16869 = vmatprep.subr.bf16.mxu1 %v16868_v1  ;;  %16795 = vmatpush3.bf16.msra.mxu0 %v16794_v48  ;;  %v26561_v3 = vand.u32 4294901760, %v20530_v28  ;;  %v1093_v16 = vadd.f32 %v1060_v30, %v1027_v49  ;;  %v26563_v39 = vand.u32 4294901760, %v20535_v53  ;;  %v26564_v41 = vand.u32 4294901760, %v20540_v29  ;;  %v26569_v1 = vld [vmem:[#allocation42_spill] sm:$0xff]  ;;  %v780_v29 = vld [vmem:[%s19586_s2 + $0x80] sm:$0xff] }
 0x206   : > { %16797 = vmatprep.subr.bf16.mxu0 %v16796_v11  ;;  %v16874_v10 = vpack.c.bf16 %v26559_v62, %v26558_v42  ;;  %v26566_v58 = vand.u32 4294901760, %v20545_v18  ;;  %v26567_v28 = vand.u32 4294901760, %v20557_v51  ;;  %v26570_v53 = vld [vmem:[#allocation54_spill] sm:$0xff]  ;;  %v26571_v36 = vand.u32 4294901760, %v20562_v35  ;;  %v781_v11 = vld [vmem:[%s19586_s2 + $0x88] sm:$0xff]  ;;  %v26576_v17 = vld [vmem:[#allocation55_spill] sm:$0xff] }
 0x207   : > { %3746 = vmatmul.mubr.f32.gmra.mrb[18].mxu1 %v26557_v13  ;;  %v16876_v50 = vpack.c.bf16 %v26561_v3, %v26560_v22  ;;  %v16878_v15 = vpack.c.bf16 %v26564_v41, %v26563_v39  ;;  %v3236_v48 = vsel %vm1695_vm1, %v1093_v16, 0  ;;  %v26572_v57 = vand.u32 4294901760, %v20575_v31  ;;  %v813_v51 = vld [vmem:[%s19593_s22 + $0x80] sm:$0xff]  ;;  %v26577_v35 = vld [vmem:[#allocation36_spill] sm:$0xff] }
 0x208   : > { %16871 = vmatpush3.bf16.msra.mxu1 %v16870_v12  ;;  %4031 = vmatprep.mubr.f32.mxu1 %v26442_v33  ;;  %v16880_v60 = vpack.c.bf16 %v26567_v28, %v26566_v58  ;;  %v26574_v56 = vand.u32 4294901760, %v20580_v63  ;;  %v26575_v23 = vand.u32 4294901760, %v20589_v2  ;;  %v20859_v19 = vand.u32 4294901760, %v3236_v48  ;;  %v764_v31 = vld [vmem:[%s19586_s2] sm:$0xff]  ;;  %v765_v63 = vld [vmem:[%s19586_s2 + $0x8] sm:$0xff]  ;;  %v26583_v28 = vld [vmem:[#allocation58_spill] sm:$0xff] }
 0x209   : > { %16873 = vmatprep.subr.bf16.mxu1 %v16872_v7  ;;  %16799 = vmatpush3.bf16.msra.mxu0 %v16798_v27  ;;  %v16882_v18 = vpack.c.bf16 %v26572_v57, %v26571_v36  ;;  %v797_v7 = vld [vmem:[%s19593_s22] sm:$0xff]  ;;  %v1110_v49 = vmul.f32 %v780_v29, %v780_v29  ;;  %v1111_v30 = vmul.f32 %v781_v11, %v781_v11  ;;  %v26579_v2 = vand.u32 4294901760, %v20594_v52  ;;  %v815_v36 = vld [vmem:[%s19593_s22 + $0x90] sm:$0xff] }
 0x20a   : > { %16833 = vmatprep.subr.bf16.mxu0 %v26562_v54  ;;  %v16884_v12 = vpack.c.bf16 %v26575_v23, %v26574_v56  ;;  %v26578_v27 = vld [vmem:[#allocation57_spill] sm:$0xff]  ;;  %v1143_v42 = vmul.f32 %v813_v51, %v813_v51  ;;  %v1144_v62 = vmul.f32 %v814_v34, %v814_v34  ;;  %v26580_v22 = vand.u32 4294901760, %v20599_v5  ;;  %v26584_v5 = vld [vmem:[#allocation59_spill] sm:$0xff] }
 0x20b   : > { %v26582_v16 = vand.u32 4294901760, %v20612_v26  ;;  %v20877_v41 = vsub.f32 %v3236_v48, %v20859_v19  ;;  %v1127_v58 = vmul.f32 %v797_v7, %v797_v7  ;;  %v782_v52 = vld [vmem:[%s19586_s2 + $0x90] sm:$0xff]  ;;  %v816_v26 = vld [vmem:[%s19593_s22 + $0x98] sm:$0xff]  ;;  %v16890_v48 = vpack.c.bf16 %v3459_v20, %v3452_v32 }
 0x20c   : > { %16875 = vmatpush3.bf16.msra.mxu1 %v16874_v10  ;;  %3592 = vmatmul.mubr.f32.vlgmr.msra.gmra.mrb[14].mxu0 %v26565_v37  ;;  %v798_v10 = vld [vmem:[%s19593_s22 + $0x8] sm:$0xff]  ;;  %v16886_v3 = vpack.c.bf16 %v26580_v22, %v26579_v2  ;;  %v20883_v57 = vadd.f32 %v1143_v42, %v1110_v49  ;;  %v26585_v11 = vand.u32 4294901760, %v20638_v25  ;;  %v26586_v51 = vand.u32 4294901760, %v20654_v24  ;;  %v766_v7 = vld [vmem:[%s19586_s2 + $0x10] sm:$0xff]  ;;  %v799_v49 = vld [vmem:[%s19593_s22 + $0x10] sm:$0xff] }
 0x20d   : > { %16877 = vmatprep.subr.bf16.mxu1 %v16876_v50  ;;  %16835 = vmatpush3.bf16.msra.mxu0 %v26568_v55  ;;  %v26581_v50 = vand.u32 4294901760, %v20605_v44  ;;  %v1128_v29 = vmul.f32 %v798_v10, %v798_v10  ;;  %v783_v44 = vld [vmem:[%s19586_s2 + $0x98] sm:$0xff]  ;;  %v20898_v56 = vand.u32 4294901760, %v20877_v41  ;;  %v1146_v32 = vmul.f32 %v816_v26, %v816_v26  ;;  %v800_v10 = vld [vmem:[%s19593_s22 + $0x18] sm:$0xff]  ;;  %v801_v26 = vld [vmem:[%s19593_s22 + $0x20] sm:$0xff] }
 0x20e   : > { %3597 = vmatprep.mubr.f32.mxu0 %v26569_v1  ;;  %16837 = vmatprep.subr.bf16.mxu0 %v26570_v53  ;;  %v16892_v34 = vpack.c.bf16 %v26586_v51, %v26585_v11  ;;  %v1113_v4 = vmul.f32 %v783_v44, %v783_v44  ;;  %v4826_v25 = vand.u32 4294901760, %v20883_v57  ;;  %v16894_v20 = vpack.c.bf16 %v3473_v40, %v3466_v59  ;;  %v769_v44 = vld [vmem:[%s19586_s2 + $0x28] sm:$0xff] }
 0x20f   : > { %v16888_v39 = vpack.c.bf16 %v26582_v16, %v26581_v50  ;;  %v1096_v2 = vmul.f32 %v766_v7, %v766_v7  ;;  %v1129_v22 = vmul.f32 %v799_v49, %v799_v49  ;;  %v785_v50 = vld [vmem:[%s19586_s2 + $0xa8] sm:$0xff]  ;;  %v1131_v7 = vmul.f32 %v801_v26, %v801_v26 }
 0x210   : > { %16879 = vmatpush3.bf16.msra.mxu1 %v16878_v15  ;;  %3599 = vmatmul.mubr.f32.gmra.mrb[16].mxu0 %v26573_v47  ;;  %v1094_v15 = vmul.f32 %v764_v31, %v764_v31  ;;  %v1145_v31 = vmul.f32 %v815_v36, %v815_v36  ;;  %v20918_v6 = vadd.f32 %v1146_v32, %v1113_v4  ;;  %v26589_v11 = vld [vmem:[#allocation60_spill] sm:$0xff] }
 0x211   : > { %16881 = vmatprep.subr.bf16.mxu1 %v16880_v60  ;;  %16839 = vmatpush3.bf16.msra.mxu0 %v26576_v17  ;;  %v1095_v60 = vmul.f32 %v765_v63, %v765_v63  ;;  %v20922_v59 = vsub.f32 %v20883_v57, %v4826_v25  ;;  %v1097_v57 = vmul.f32 %v767_v14, %v767_v14 }
 0x212   : > { %3850 = vmatprep.mubr.f32.mxu0 %v26577_v35  ;;  %16841 = vmatprep.subr.bf16.mxu0 %v26578_v27  ;;  %v20900_v23 = vadd.f32 %v1127_v58, %v1094_v15  ;;  %v817_v58 = vld [vmem:[%s19593_s22 + $0xa0] sm:$0xff]  ;;  %v4835_v36 = vand.u32 4294901760, %v20918_v6  ;;  %v20950_v51 = vadd.f32 %v1129_v22, %v1096_v2 }
 0x213   : > { %v1161_v46 = vadd.f32 %v1128_v29, %v1095_v60  ;;  %26587 = vst [vmem:[#allocation52_spill] sm:$0xff] %v20922_v59  ;;  %v818_v60 = vld [vmem:[%s19593_s22 + $0xa8] sm:$0xff]  ;;  %v768_v29 = vld [vmem:[%s19586_s2 + $0x20] sm:$0xff] }
 0x214   : > { %16883 = vmatpush3.bf16.msra.mxu1 %v16882_v18  ;;  %v20885_v18 = vadd.f32 %v1144_v62, %v1111_v30  ;;  %v4246_v30 = vsub.f32 %v20877_v41, %v20898_v56  ;;  %v4778_v42 = vand.u32 4294901760, %v20900_v23  ;;  %v1148_v4 = vmul.f32 %v818_v60, %v818_v60 }
 0x215   : > { %16885 = vmatprep.subr.bf16.mxu1 %v16884_v12  ;;  %16843 = vmatpush3.bf16.msra.mxu0 %v26583_v28  ;;  %v1112_v12 = vmul.f32 %v782_v52, %v782_v52  ;;  %v4781_v63 = vand.u32 4294901760, %v1161_v46  ;;  %v1098_v32 = vmul.f32 %v768_v29, %v768_v29  ;;  %v20968_v22 = vsub.f32 %v20918_v6, %v4835_v36  ;;  %v820_v29 = vld [vmem:[%s19593_s22 + $0xb8] sm:$0xff] }
 0x216   : > { %16845 = vmatprep.subr.bf16.mxu0 %v26584_v5  ;;  %v4829_v24 = vand.u32 4294901760, %v20885_v18  ;;  %v20932_v16 = vand.u32 4294901760, %v4246_v30  ;;  %v26590_v30 = vld [vmem:[#allocation61_spill] sm:$0xff] }
 0x217   : > { %v20915_v62 = vadd.f32 %v1145_v31, %v1112_v12  ;;  %v20942_v52 = vsub.f32 %v1161_v46, %v4781_v63  ;;  %v1115_v31 = vmul.f32 %v785_v50, %v785_v50  ;;  %v1147_v46 = vmul.f32 %v817_v58, %v817_v58  ;;  %26592 = vst [vmem:[#allocation55_spill] sm:$0xff] %v20968_v22  ;;  %v787_v50 = vld [vmem:[%s19586_s2 + $0xb8] sm:$0xff] }
 0x218   : > { %16887 = vmatpush3.bf16.msra.mxu1 %v16886_v3  ;;  %v20925_v40 = vsub.f32 %v20885_v18, %v4829_v24  ;;  %v784_v3 = vld [vmem:[%s19586_s2 + $0xa0] sm:$0xff]  ;;  %v1130_v18 = vmul.f32 %v800_v10, %v800_v10  ;;  %v20958_v14 = vpack.c.bf16 %v4829_v24, %v4826_v25  ;;  %v20960_v10 = vpack.c.bf16 %v4781_v63, %v4778_v42  ;;  %v26593_v58 = vld [vmem:[#allocation62_spill] sm:$0xff] }
 0x219   : > { %16889 = vmatprep.subr.bf16.mxu1 %v16888_v39  ;;  %16847 = vmatpush3.bf16.msra.mxu0 %v20362_v45  ;;  %v20935_v39 = vsub.f32 %v20900_v23, %v4778_v42  ;;  %v25955_v15 = vand.u32 4294901760, %v20915_v62  ;;  %v5019_v23 = vand.u32 4294901760, %v20922_v59  ;;  %v4784_v25 = vand.u32 4294901760, %v20950_v51  ;;  %v819_v63 = vld [vmem:[%s19593_s22 + $0xb0] sm:$0xff] }
 0x21a   : > { %16849 = vmatprep.subr.bf16.mxu0 %v20381_v61  ;;  %26588 = vst [vmem:[#allocation53_spill] sm:$0xff] %v20925_v40  ;;  %v5026_v12 = vand.u32 4294901760, %v20925_v40  ;;  %26591 = vst [vmem:[#allocation54_spill] sm:$0xff] %v20960_v10  ;;  %v1163_v60 = vadd.f32 %v1130_v18, %v1097_v57  ;;  %v1181_v6 = vadd.f32 %v1148_v4, %v1115_v31  ;;  %v26595_v18 = vld [vmem:[#allocation63_spill] sm:$0xff] }
 0x21b   : > { %v20965_v2 = vsub.f32 %v20915_v62, %v25955_v15  ;;  %v5020_v24 = vsub.f32 %v20922_v59, %v5019_v23  ;;  %v25959_v15 = vand.u32 4294901760, %v20942_v52  ;;  %v1164_v13 = vadd.f32 %v1131_v7, %v1098_v32 }
 0x21c   : > { %16891 = vmatpush3.bf16.msra.mxu1 %v16890_v48  ;;  %v802_v48 = vld [vmem:[%s19593_s22 + $0x28] sm:$0xff]  ;;  %v5027_v42 = vsub.f32 %v20925_v40, %v5026_v12  ;;  %v1117_v57 = vmul.f32 %v787_v50, %v787_v50  ;;  %v1149_v35 = vmul.f32 %v819_v63, %v819_v63  ;;  %v1150_v59 = vmul.f32 %v820_v29, %v820_v29 }
 0x21d   : > { %16893 = vmatprep.subr.bf16.mxu1 %v16892_v34  ;;  %16851 = vmatpush3.bf16.msra.mxu0 %v20399_v21  ;;  %v1114_v34 = vmul.f32 %v784_v3, %v784_v3  ;;  %v1132_v49 = vmul.f32 %v802_v48, %v802_v48  ;;  %v786_v3 = vld [vmem:[%s19586_s2 + $0xb0] sm:$0xff]  ;;  %v25962_v48 = vand.u32 4294901760, %v20935_v39  ;;  %v25960_v40 = vand.u32 4294901760, %v20965_v2 }
 0x21e   : > { %16853 = vmatprep.subr.bf16.mxu0 %v20407_v43  ;;  %v1116_v9 = vmul.f32 %v786_v3, %v786_v3  ;;  %v4787_v31 = vand.u32 4294901760, %v1163_v60  ;;  %v5028_v4 = vand.u32 4294901760, %v5027_v42  ;;  %v25961_v32 = vand.u32 4294901760, %v20968_v22 }
 0x21f   : > { %v1180_v26 = vadd.f32 %v1147_v46, %v1114_v34  ;;  %v26597_v34 = vld [vmem:[#allocation56_spill] sm:$0xff]  ;;  %v5021_v46 = vand.u32 4294901760, %v5020_v24  ;;  %v26599_v7 = vand.u32 4294901760, %v20915_v62  ;;  %v21001_v50 = vsub.f32 %v20950_v51, %v4784_v25 }
 0x220   : > { %16895 = vmatpush3.bf16.msra.mxu1 %v16894_v20  ;;  %v1099_v20 = vmul.f32 %v769_v44, %v769_v44  ;;  %v26594_v44 = vld [vmem:[#allocation51_spill] sm:$0xff]  ;;  %v4915_v62 = vsub.f32 %v20942_v52, %v25959_v15  ;;  %v1182_v42 = vadd.f32 %v1149_v35, %v1116_v9  ;;  %v1183_v63 = vadd.f32 %v1150_v59, %v1117_v57  ;;  %v770_v9 = vld [vmem:[%s19586_s2 + $0x30] sm:$0xff] }
 0x221   : > { %16334 = vmatprep.subr.mxu1 %v20859_v19  ;;  %16855 = vmatpush3.bf16.msra.mxu0 %v20436_v0  ;;  %v4838_v3 = vand.u32 4294901760, %v1180_v26  ;;  %v5034_v51 = vsub.f32 %v20965_v2, %v25960_v40  ;;  %v21012_v29 = vpack.c.bf16 %v4787_v31, %v4784_v25  ;;  %v21016_v15 = vpack.c.bf16 %v5028_v4, %v5021_v46  ;;  %v771_v25 = vld [vmem:[%s19586_s2 + $0x38] sm:$0xff] }
 0x222   : > { %16857 = vmatprep.subr.bf16.mxu0 %v26589_v11  ;;  %v1165_v8 = vadd.f32 %v1132_v49, %v1099_v20  ;;  %v26598_v20 = vld [vmem:[#allocation29_spill] sm:$0xff]  ;;  %v20993_v49 = vpack.c.bf16 %v4835_v36, %v26599_v7  ;;  %v26602_v36 = vld [vmem:[#allocation46_spill] sm:$0xff]  ;;  %v21014_v7 = vsub.f32 %v1163_v60, %v4787_v31  ;;  %v803_v60 = vld [vmem:[%s19593_s22 + $0x30] sm:$0xff] }
 0x223   : > { %4033 = vmatmul.mubr.f32.vlgmr.msra.gmra.mrb[20].mxu1 %v26565_v37  ;;  %v21024_v59 = vsub.f32 %v1180_v26, %v4838_v3  ;;  %v804_v31 = vld [vmem:[%s19593_s22 + $0x38] sm:$0xff]  ;;  %v26603_v46 = vld [vmem:[#allocation47_spill] sm:$0xff]  ;;  %v821_v26 = vld [vmem:[%s19593_s22 + $0xc0] sm:$0xff] }
 0x224   : > { %16335 = vmatpush3.msra.mxu1 %v20859_v19  ;;  %4038 = vmatprep.mubr.f32.mxu1 %v26569_v1  ;;  %26600 = vst [vmem:[#allocation58_spill] sm:$0xff] %v20993_v49  ;;  %v4793_v24 = vand.u32 4294901760, %v1165_v8 }
 0x225   : > { %16339 = vmatprep.subr.mxu1 %v20932_v16  ;;  %16859 = vmatpush3.bf16.msra.mxu0 %v26590_v30 }
 0x226   : > { %16861 = vmatprep.subr.bf16.mxu0 %v26593_v58 }
 0x227   : > { %4040 = vmatmul.mubr.f32.gmra.mrb[22].mxu1 %v26573_v47  ;;  %v20984_v47 = vpack.c.bf16 %v5026_v12, %v5019_v23  ;;  %v4841_v23 = vand.u32 4294901760, %v1181_v6  ;;  %v26601_v12 = vld [vmem:[#allocation40_spill] sm:$0xff] }
 0x228   : > { %16336 = vmatprep.mubr.f32.mxu1 %v26594_v44  ;;  %v789_v44 = vld [vmem:[%s19586_s2 + $0xc8] sm:$0xff] }
 0x229   : > { %16863 = vmatpush3.bf16.msra.mxu0 %v26595_v18  ;;  %26596 = vst [vmem:[#allocation57_spill] sm:$0xff] %v20984_v47  ;;  %v21022_v35 = vpack.c.bf16 %v4841_v23, %v4838_v3  ;;  %v21026_v57 = vsub.f32 %v1181_v6, %v4841_v23  ;;  %v4844_v6 = vand.u32 4294901760, %v1182_v42  ;;  %v4847_v3 = vand.u32 4294901760, %v1183_v63 }
 0x22a   : > { %16897 = vmatprep.subr.bf16.mxu0 %v26562_v54  ;;  %v4908_v54 = vsub.f32 %v20935_v39, %v25962_v48  ;;  %v4916_v48 = vand.u32 4294901760, %v4915_v62  ;;  %v5035_v23 = vand.u32 4294901760, %v5034_v51  ;;  %v772_v62 = vld [vmem:[%s19586_s2 + $0x40] sm:$0xff]  ;;  %v25965_v51 = vand.u32 4294901760, %v21001_v50 }
 0x22b   : > { %16337 = vmatmul.mubr.f32.vlgmr.msra.gmra.mrb[24].mxu1 %v26597_v34  ;;  %v788_v34 = vld [vmem:[%s19586_s2 + $0xc0] sm:$0xff]  ;;  %v1151_v47 = vmul.f32 %v821_v26, %v821_v26  ;;  %v1102_v26 = vmul.f32 %v772_v62, %v772_v62 }
 0x22c   : > { %16340 = vmatpush3.msra.mxu1 %v20932_v16  ;;  %16341 = vmatprep.mubr.f32.mxu1 %v26598_v20  ;;  %v4790_v16 = vand.u32 4294901760, %v1164_v13 }
 0x22d   : > { %3854 = vmatmul.mubr.f32.vlgmr.msra.gmra.mrb[18].mxu0 %v26601_v12  ;;  %16344 = vmatprep.subr.mxu1 %v20877_v41  ;;  %v1118_v12 = vmul.f32 %v788_v34, %v788_v34  ;;  %v773_v34 = vld [vmem:[%s19586_s2 + $0x48] sm:$0xff] }
 0x22e   : > { %16899 = vmatpush3.bf16.msra.mxu0 %v26568_v55  ;;  %3861 = vmatprep.mubr.f32.mxu0 %v26602_v36  ;;  %v5041_v55 = vsub.f32 %v20968_v22, %v25961_v32  ;;  %v21032_v4 = vpack.c.bf16 %v4793_v24, %v4790_v16  ;;  %v21034_v40 = vsub.f32 %v1164_v13, %v4790_v16  ;;  %v805_v36 = vld [vmem:[%s19593_s22 + $0x40] sm:$0xff]  ;;  %v26609_v22 = vand.u32 4294901760, %v21014_v7 }
 0x22f   : > { %16901 = vmatprep.subr.bf16.mxu0 %v26570_v53  ;;  %v4909_v53 = vand.u32 4294901760, %v4908_v54  ;;  %v21036_v32 = vsub.f32 %v1165_v8, %v4793_v24  ;;  %v1100_v54 = vmul.f32 %v770_v9, %v770_v9  ;;  %v1101_v13 = vmul.f32 %v771_v25, %v771_v25 }
 0x230   : > { %26604 = vst [vmem:[#allocation59_spill] sm:$0xff] %v21034_v40  ;;  %v5042_v8 = vand.u32 4294901760, %v5041_v55  ;;  %v1133_v16 = vmul.f32 %v803_v60, %v803_v60  ;;  %v1134_v24 = vmul.f32 %v804_v31, %v804_v31  ;;  %v21058_v31 = vpack.c.bf16 %v4847_v3, %v4844_v6 }
 0x231   : > { %3865 = vmatmul.mubr.f32.gmra.mrb[20].mxu0 %v26603_v46  ;;  %26605 = vst [vmem:[#allocation60_spill] sm:$0xff] %v21036_v32  ;;  %v822_v46 = vld [vmem:[%s19593_s22 + $0xc8] sm:$0xff]  ;;  %v1135_v9 = vmul.f32 %v805_v36, %v805_v36  ;;  %v4929_v36 = vsub.f32 %v21014_v7, %v26609_v22  ;;  %v1184_v62 = vadd.f32 %v1151_v47, %v1118_v12  ;;  %v26612_v12 = vld [vmem:[#allocation32_spill] sm:$0xff] }
 0x232   : > { %16903 = vmatpush3.bf16.msra.mxu0 %v26576_v17  ;;  %4142 = vmatprep.mubr.f32.mxu0 %v26442_v33  ;;  %v26606_v17 = vld [vmem:[#allocation31_spill] sm:$0xff]  ;;  %v1152_v55 = vmul.f32 %v822_v46, %v822_v46  ;;  %v21064_v46 = vsub.f32 %v1183_v63, %v4847_v3  ;;  %v21066_v25 = vpack.c.bf16 %v5042_v8, %v5035_v23  ;;  %v26610_v3 = vand.u32 4294901760, %v21024_v59 }
 0x233   : > { %16905 = vmatprep.subr.bf16.mxu0 %v26578_v27  ;;  %16342 = vmatmul.mubr.f32.vlgmr.msra.gmra.mrb[24].mxu1 %v20116_v38  ;;  %v1119_v27 = vmul.f32 %v789_v44, %v789_v44  ;;  %v21062_v44 = vsub.f32 %v1182_v42, %v4844_v6  ;;  %v1166_v60 = vadd.f32 %v1133_v16, %v1100_v54  ;;  %v823_v42 = vld [vmem:[%s19593_s22 + $0xd0] sm:$0xff]  ;;  %v824_v6 = vld [vmem:[%s19593_s22 + $0xd8] sm:$0xff]  ;;  %v26611_v54 = vand.u32 4294901760, %v21026_v57 }
 0x234   : > { %16345 = vmatpush3.msra.mxu1 %v20877_v41  ;;  %16346 = vmatprep.mubr.f32.mxu1 %v26606_v17  ;;  %v21056_v41 = vpack.c.bf16 %v4916_v48, %v4909_v53  ;;  %26608 = vst [vmem:[#allocation62_spill] sm:$0xff] %v21064_v46  ;;  %v790_v48 = vld [vmem:[%s19586_s2 + $0xd0] sm:$0xff]  ;;  %v1167_v53 = vadd.f32 %v1134_v24, %v1101_v13 }
 0x235   : > { %16349 = vmatprep.subr.mxu1 %v20859_v19  ;;  %26607 = vst [vmem:[#allocation61_spill] sm:$0xff] %v21062_v44  ;;  %v4922_v17 = vsub.f32 %v21001_v50, %v25965_v51  ;;  %v1185_v63 = vadd.f32 %v1152_v55, %v1119_v27  ;;  %v5048_v23 = vsub.f32 %v21024_v59, %v26610_v3 }
 0x236   : > { %16907 = vmatpush3.bf16.msra.mxu0 %v26583_v28  ;;  %v806_v28 = vld [vmem:[%s19593_s22 + $0x48] sm:$0xff]  ;;  %v5055_v8 = vsub.f32 %v21026_v57, %v26611_v54  ;;  %v1103_v13 = vmul.f32 %v773_v34, %v773_v34  ;;  %v21086_v24 = vadd.f32 %v1135_v9, %v1102_v26  ;;  %v1120_v22 = vmul.f32 %v790_v48, %v790_v48 }
 0x237   : > { %16909 = vmatprep.subr.bf16.mxu0 %v26584_v5  ;;  %v791_v5 = vld [vmem:[%s19586_s2 + $0xd8] sm:$0xff]  ;;  %v1136_v16 = vmul.f32 %v806_v28, %v806_v28  ;;  %v1153_v3 = vmul.f32 %v823_v42, %v823_v42  ;;  %v1154_v51 = vmul.f32 %v824_v6, %v824_v6  ;;  %v4799_v28 = vand.u32 4294901760, %v1167_v53 }
 0x238   : > { %v1121_v55 = vmul.f32 %v791_v5, %v791_v5  ;;  %v26613_v34 = vld [vmem:[#allocation35_spill] sm:$0xff]  ;;  %v4923_v9 = vand.u32 4294901760, %v4922_v17  ;;  %v4930_v48 = vand.u32 4294901760, %v4929_v36  ;;  %v4853_v54 = vand.u32 4294901760, %v1185_v63 }
 0x239   : > { %v5049_v5 = vand.u32 4294901760, %v5048_v23  ;;  %v5056_v42 = vand.u32 4294901760, %v5055_v8  ;;  %v1169_v6 = vadd.f32 %v1136_v16, %v1103_v13  ;;  %v4802_v27 = vand.u32 4294901760, %v21086_v24 }
 0x23a   : > { %16911 = vmatpush3.bf16.msra.mxu0 %v20362_v45  ;;  %v4796_v45 = vand.u32 4294901760, %v1166_v60  ;;  %v26614_v17 = vand.u32 4294901760, %v21034_v40  ;;  %v26615_v26 = vand.u32 4294901760, %v21036_v32  ;;  %v21110_v13 = vsub.f32 %v1167_v53, %v4799_v28  ;;  %v807_v53 = vld [vmem:[%s19593_s22 + $0x50] sm:$0xff] }
 0x23b   : > { %16913 = vmatprep.subr.bf16.mxu0 %v20381_v61  ;;  %16347 = vmatmul.mubr.f32.vlgmr.msra.gmra.mrb[24].mxu1 %v26612_v12  ;;  %v4850_v61 = vand.u32 4294901760, %v1184_v62 }
 0x23c   : > { %16350 = vmatpush3.msra.mxu1 %v20859_v19  ;;  %16351 = vmatprep.mubr.f32.mxu1 %v26613_v34  ;;  %v4936_v36 = vsub.f32 %v21034_v40, %v26614_v17  ;;  %v4943_v47 = vsub.f32 %v21036_v32, %v26615_v26  ;;  %v1186_v34 = vadd.f32 %v1153_v3, %v1120_v22 }
 0x23d   : > { %16354 = vmatprep.subr.mxu1 %v20898_v56  ;;  %v21106_v23 = vpack.c.bf16 %v4799_v28, %v4796_v45  ;;  %v21108_v8 = vsub.f32 %v1166_v60, %v4796_v45  ;;  %26618 = vst [vmem:[#allocation65_spill] sm:$0xff] %v21110_v13  ;;  %v21115_v17 = vpack.c.bf16 %v4930_v48, %v4923_v9  ;;  %v774_v60 = vld [vmem:[%s19586_s2 + $0x50] sm:$0xff]  ;;  %v4805_v28 = vand.u32 4294901760, %v1169_v6  ;;  %v792_v48 = vld [vmem:[%s19586_s2 + $0xe0] sm:$0xff] }
 0x23e   : > { %16915 = vmatpush3.bf16.msra.mxu0 %v20399_v21  ;;  %v1187_v21 = vadd.f32 %v1154_v51, %v1121_v55  ;;  %v21117_v12 = vpack.c.bf16 %v4853_v54, %v4850_v61  ;;  %v21119_v26 = vsub.f32 %v1184_v62, %v4850_v61  ;;  %v26622_v51 = vand.u32 4294901760, %v21064_v46  ;;  %v775_v55 = vld [vmem:[%s19586_s2 + $0x58] sm:$0xff]  ;;  %v808_v62 = vld [vmem:[%s19593_s22 + $0x58] sm:$0xff] }
 0x23f   : > { %16917 = vmatprep.subr.bf16.mxu0 %v20407_v43  ;;  %26616 = vst [vmem:[#allocation63_spill] sm:$0xff] %v21106_v23  ;;  %26617 = vst [vmem:[#allocation64_spill] sm:$0xff] %v21108_v8  ;;  %v26619_v43 = vand.u32 4294901760, %v21062_v44  ;;  %v21128_v3 = vsub.f32 %v1185_v63, %v4853_v54  ;;  %v21130_v45 = vpack.c.bf16 %v5056_v42, %v5049_v5  ;;  %v793_v61 = vld [vmem:[%s19586_s2 + $0xe8] sm:$0xff]  ;;  %v826_v63 = vld [vmem:[%s19593_s22 + $0xe8] sm:$0xff] }
 0x240   : > { %26620 = vst [vmem:[#allocation66_spill] sm:$0xff] %v21117_v12  ;;  %26621 = vst [vmem:[#allocation67_spill] sm:$0xff] %v21119_v26  ;;  %v5069_v22 = vsub.f32 %v21064_v46, %v26622_v51  ;;  %v21133_v9 = vsub.f32 %v21086_v24, %v4802_v27  ;;  %v4937_v51 = vand.u32 4294901760, %v4936_v36  ;;  %v4944_v46 = vand.u32 4294901760, %v4943_v47  ;;  %v776_v47 = vld [vmem:[%s19586_s2 + $0x60] sm:$0xff] }
 0x241   : > { %v5062_v16 = vsub.f32 %v21062_v44, %v26619_v43  ;;  %26623 = vst [vmem:[#allocation68_spill] sm:$0xff] %v21128_v3  ;;  %v26624_v43 = vld [vmem:[#allocation50_spill] sm:$0xff]  ;;  %v4856_v44 = vand.u32 4294901760, %v1186_v34  ;;  %v4859_v32 = vand.u32 4294901760, %v1187_v21  ;;  %v1104_v24 = vmul.f32 %v774_v60, %v774_v60 }
 0x242   : > { %16919 = vmatpush3.bf16.msra.mxu0 %v20436_v0  ;;  %v825_v0 = vld [vmem:[%s19593_s22 + $0xe0] sm:$0xff]  ;;  %v1105_v5 = vmul.f32 %v775_v55, %v775_v55  ;;  %v1137_v42 = vmul.f32 %v807_v53, %v807_v53  ;;  %v1138_v40 = vmul.f32 %v808_v62, %v808_v62  ;;  %v1156_v60 = vmul.f32 %v826_v63, %v826_v63 }
 0x243   : > { %16921 = vmatprep.subr.bf16.mxu0 %v26589_v11  ;;  %16352 = vmatmul.mubr.f32.vlgmr.msra.gmra.mrb[24].mxu1 %v26624_v43  ;;  %v5063_v54 = vand.u32 4294901760, %v5062_v16  ;;  %v5070_v11 = vand.u32 4294901760, %v5069_v22  ;;  %v1123_v43 = vmul.f32 %v793_v61, %v793_v61  ;;  %v1155_v16 = vmul.f32 %v825_v0, %v825_v0  ;;  %v809_v61 = vld [vmem:[%s19593_s22 + $0x60] sm:$0xff] }
 0x244   : > { %16355 = vmatpush3.msra.mxu1 %v20898_v56  ;;  %16356 = vmatprep.mubr.f32.mxu1 %v26598_v20  ;;  %v1122_v56 = vmul.f32 %v792_v48, %v792_v48  ;;  %v21149_v55 = vpack.c.bf16 %v4805_v28, %v4802_v27  ;;  %v21151_v22 = vsub.f32 %v1169_v6, %v4805_v28  ;;  %v25974_v48 = vand.u32 4294901760, %v21119_v26  ;;  %v777_v27 = vld [vmem:[%s19586_s2 + $0x68] sm:$0xff]  ;;  %v810_v6 = vld [vmem:[%s19593_s22 + $0x68] sm:$0xff] }
 0x245   : > { %16359 = vmatprep.subr.mxu1 %v20859_v19  ;;  %v21153_v53 = vpack.c.bf16 %v4944_v46, %v4937_v51  ;;  %v21155_v62 = vpack.c.bf16 %v4859_v32, %v4856_v44  ;;  %v21158_v36 = vsub.f32 %v1186_v34, %v4856_v44  ;;  %v21167_v28 = vpack.c.bf16 %v5070_v11, %v5063_v54  ;;  %v794_v34 = vld [vmem:[%s19586_s2 + $0xf0] sm:$0xff] }
 0x246   : > { %16923 = vmatpush3.bf16.msra.mxu0 %v26590_v30  ;;  %26625 = vst [vmem:[#allocation69_spill] sm:$0xff] %v21149_v55  ;;  %v21160_v30 = vsub.f32 %v1187_v21, %v4859_v32  ;;  %v21169_v46 = vadd.f32 %v1137_v42, %v1104_v24  ;;  %v21171_v51 = vadd.f32 %v1138_v40, %v1105_v5  ;;  %v26626_v44 = vand.u32 4294901760, %v21108_v8  ;;  %v795_v40 = vld [vmem:[%s19586_s2 + $0xf8] sm:$0xff]  ;;  %v827_v5 = vld [vmem:[%s19593_s22 + $0xf0] sm:$0xff]  ;;  %v828_v42 = vld [vmem:[%s19593_s22 + $0xf8] sm:$0xff] }
 0x247   : > { %16925 = vmatprep.subr.bf16.mxu0 %v26593_v58  ;;  %v25975_v58 = vand.u32 4294901760, %v21128_v3  ;;  %v26627_v21 = vand.u32 4294901760, %v21110_v13  ;;  %v21183_v63 = vadd.f32 %v1155_v16, %v1122_v56  ;;  %v21185_v54 = vadd.f32 %v1156_v60, %v1123_v43  ;;  %v778_v16 = vld [vmem:[%s19586_s2 + $0x70] sm:$0xff] }
 0x248   : > { %v21176_v32 = vsub.f32 %v21108_v8, %v26626_v44  ;;  %v1106_v24 = vmul.f32 %v776_v47, %v776_v47  ;;  %v1139_v11 = vmul.f32 %v809_v61, %v809_v61  ;;  %v1140_v44 = vmul.f32 %v810_v6, %v810_v6  ;;  %v811_v6 = vld [vmem:[%s19593_s22 + $0x70] sm:$0xff] }
 0x249   : > { %v4957_v0 = vsub.f32 %v21110_v13, %v26627_v21  ;;  %v5076_v43 = vsub.f32 %v21119_v26, %v25974_v48  ;;  %v5083_v47 = vsub.f32 %v21128_v3, %v25975_v58  ;;  %v1124_v56 = vmul.f32 %v794_v34, %v794_v34  ;;  %v812_v21 = vld [vmem:[%s19593_s22 + $0x78] sm:$0xff] }
 0x24a   : > { %16927 = vmatpush3.bf16.msra.mxu0 %v26595_v18  ;;  %v1107_v18 = vmul.f32 %v777_v27, %v777_v27  ;;  %v1125_v60 = vmul.f32 %v795_v40, %v795_v40  ;;  %v1157_v27 = vmul.f32 %v827_v5, %v827_v5  ;;  %v1158_v61 = vmul.f32 %v828_v42, %v828_v42 }
 0x24b   : > { %16929 = vmatprep.subr.bf16.mxu0 %v20958_v14  ;;  %16357 = vmatmul.mubr.f32.vlgmr.msra.gmra.mrb[24].mxu1 %v20116_v38  ;;  %v4951_v34 = vand.u32 4294901760, %v21176_v32  ;;  %v25993_v40 = vand.u32 4294901760, %v21185_v54  ;;  %v21214_v5 = vadd.f32 %v1139_v11, %v1106_v24  ;;  %v1108_v26 = vmul.f32 %v778_v16, %v778_v16  ;;  %v26629_v16 = vld [vmem:[#allocation39_spill] sm:$0xff] }
 0x24c   : > { %16360 = vmatpush3.msra.mxu1 %v20859_v19  ;;  %16361 = vmatprep.mubr.f32.mxu1 %v26598_v20  ;;  %v779_v19 = vld [vmem:[%s19586_s2 + $0x78] sm:$0xff]  ;;  %v4958_v20 = vand.u32 4294901760, %v4957_v0  ;;  %v21216_v42 = vadd.f32 %v1140_v44, %v1107_v18  ;;  %v1141_v8 = vmul.f32 %v811_v6, %v811_v6  ;;  %v1142_v48 = vmul.f32 %v812_v21, %v812_v21 }
 0x24d   : > { %4144 = vmatmul.mubr.f32.vlgmr.msra.gmra.mrb[22].mxu0 %v26565_v37  ;;  %16961 = vmatprep.subr.bf16.mxu1 %v21016_v15  ;;  %v25997_v15 = vand.u32 4294901760, %v21183_v63  ;;  %v14368_v3 = vpop.f32.mrb[0].mxu0  ;;  %v1109_v13 = vmul.f32 %v779_v19, %v779_v19  ;;  %v5077_v32 = vand.u32 4294901760, %v5076_v43  ;;  %v5084_v0 = vand.u32 4294901760, %v5083_v47 }
 0x24e   : > { %16931 = vmatpush3.bf16.msra.mxu0 %v20960_v10  ;;  %4149 = vmatprep.mubr.f32.mxu0 %v26569_v1  ;;  %v26628_v1 = vld [vmem:[#allocation43_spill] sm:$0xff]  ;;  %v14369_v58 = vpop.f32.mrb[1].mxu0  ;;  %v21219_v10 = vadd.f32 %v1157_v27, %v1124_v56  ;;  %v25991_v18 = vand.u32 4294901760, %v21133_v9  ;;  %v25990_v11 = vand.u32 4294901760, %v21151_v22  ;;  %v25992_v44 = vand.u32 4294901760, %v21158_v36 }
 0x24f   : > { %16933 = vmatprep.subr.bf16.mxu0 %v20993_v49  ;;  %v21221_v49 = vadd.f32 %v1158_v61, %v1125_v60  ;;  %v14370_v24 = vadd.f32 %v14369_v58, %v14368_v3  ;;  %v26630_v43 = vand.u32 4294901760, %v21169_v46  ;;  %v26631_v56 = vand.u32 4294901760, %v21171_v51 }
 0x250   : > { %v25994_v58 = vand.u32 4294901760, %v21214_v5  ;;  %v25995_v60 = vand.u32 4294901760, %v21160_v30  ;;  %v21243_v27 = vpack.c.bf16 %v4958_v20, %v4951_v34  ;;  %v25996_v61 = vand.u32 4294901760, %v21216_v42 }
 0x251   : > { %4151 = vmatmul.mubr.f32.gmra.mrb[24].mxu0 %v26628_v1  ;;  %v21233_v47 = vsub.f32 %v21169_v46, %v26630_v43  ;;  %v21238_v3 = vsub.f32 %v21171_v51, %v26631_v56  ;;  %v21246_v19 = vadd.f32 %v1141_v8, %v1108_v26  ;;  %v21248_v6 = vadd.f32 %v1142_v48, %v1109_v13 }
 0x252   : > { %16935 = vmatpush3.bf16.msra.mxu0 %v21012_v29  ;;  %4878 = vmatprep.mubr.f32.mxu0 %v26629_v16  ;;  %v21255_v21 = vsub.f32 %v21183_v63, %v25997_v15  ;;  %v21260_v20 = vsub.f32 %v21185_v54, %v25993_v40  ;;  %v25999_v8 = vand.u32 4294901760, %v21221_v49  ;;  %v16976_v26 = vpack.c.bf16 %v5084_v0, %v5077_v32 }
 0x253   : > { %16937 = vmatprep.subr.bf16.mxu0 %v21022_v35  ;;  %16362 = vmatmul.mubr.f32.vlgmr.msra.gmra.mrb[24].mxu1 %v20116_v38  ;;  %v4971_v48 = vsub.f32 %v21151_v22, %v25990_v11  ;;  %v5090_v34 = vsub.f32 %v21158_v36, %v25992_v44  ;;  %v21278_v56 = vsub.f32 %v21214_v5, %v25994_v58  ;;  %v26000_v0 = vand.u32 4294901760, %v21233_v47 }
 0x254   : > { %16963 = vmatpush3.bf16.msra.mxu1 %v21056_v41  ;;  %5129 = vmatprep.mubr.f32.mxu1 %v26442_v33  ;;  %26632 = vst [vmem:[#allocation70_spill] sm:$0xff] %v21260_v20  ;;  %v25998_v41 = vand.u32 4294901760, %v21219_v10  ;;  %v14406_v13 = vpop.f32.mrb[0].mxu1  ;;  %v5097_v32 = vsub.f32 %v21160_v30, %v25995_v60  ;;  %v26003_v11 = vand.u32 4294901760, %v21238_v3  ;;  %v21289_v44 = vsub.f32 %v21216_v42, %v25996_v61 }
 0x255   : > { %16965 = vmatprep.subr.bf16.mxu1 %v21066_v25  ;;  %v4964_v25 = vsub.f32 %v21133_v9, %v25991_v18  ;;  %v14407_v43 = vpop.f32.mrb[1].mxu1  ;;  %v5091_v58 = vand.u32 4294901760, %v5090_v34  ;;  %v26634_v34 = vand.u32 4294901760, %v21248_v6 }
 0x256   : > { %16939 = vmatpush3.bf16.msra.mxu0 %v21032_v4  ;;  %v14408_v18 = vadd.f32 %v14407_v43, %v14406_v13  ;;  %v21297_v60 = vsub.f32 %v21219_v10, %v25998_v41  ;;  %v5098_v41 = vand.u32 4294901760, %v5097_v32  ;;  %v4985_v13 = vsub.f32 %v21238_v3, %v26003_v11 }
 0x257   : > { %16941 = vmatprep.subr.bf16.mxu0 %v21058_v31  ;;  %v4965_v15 = vand.u32 4294901760, %v4964_v25  ;;  %v26633_v25 = vand.u32 4294901760, %v21246_v19  ;;  %v21326_v32 = vsub.f32 %v21248_v6, %v26634_v34  ;;  %v26635_v11 = vand.u32 4294901760, %v21255_v21 }
 0x258   : > { %16967 = vmatpush3.bf16.msra.mxu1 %v21115_v17  ;;  %v21302_v17 = vsub.f32 %v21221_v49, %v25999_v8  ;;  %v21306_v61 = vadd.f32 %v14408_v18, %v14370_v24  ;;  %v14409_v40 = vpop.f32.mrb[2].mxu1  ;;  %v4978_v8 = vsub.f32 %v21233_v47, %v26000_v0  ;;  %v26636_v24 = vand.u32 4294901760, %v21260_v20 }
 0x259   : > { %16969 = vmatprep.subr.bf16.mxu1 %v21130_v45  ;;  %v4972_v45 = vand.u32 4294901760, %v4971_v48  ;;  %v14410_v18 = vpop.f32.mrb[3].mxu1  ;;  %v21321_v48 = vsub.f32 %v21246_v19, %v26633_v25  ;;  %v26637_v0 = vand.u32 4294901760, %v21169_v46  ;;  %v16980_v33 = vpack.c.bf16 %v5098_v41, %v5091_v58 }
 0x25a   : > { %16943 = vmatpush3.bf16.msra.mxu0 %v21106_v23  ;;  %v14411_v38 = vadd.f32 %v14410_v18, %v14409_v40  ;;  %v5111_v25 = vsub.f32 %v21260_v20, %v26636_v24  ;;  %v26638_v40 = vand.u32 4294901760, %v21171_v51  ;;  %v26639_v18 = vand.u32 4294901760, %v21183_v63 }
 0x25b   : > { %16945 = vmatprep.subr.bf16.mxu0 %v21117_v12  ;;  %v16978_v24 = vpack.c.bf16 %v4972_v45, %v4965_v15  ;;  %v4979_v34 = vand.u32 4294901760, %v4978_v8  ;;  %v4986_v20 = vand.u32 4294901760, %v4985_v13  ;;  %v26642_v51 = vand.u32 4294901760, %v21289_v44 }
 0x25c   : > { %16971 = vmatpush3.bf16.msra.mxu1 %v21153_v53  ;;  %v5104_v53 = vsub.f32 %v21255_v21, %v26635_v11  ;;  %v26640_v11 = vand.u32 4294901760, %v21185_v54  ;;  %v26014_v15 = vand.u32 4294901760, %v21321_v48  ;;  %v5112_v41 = vand.u32 4294901760, %v5111_v25 }
 0x25d   : > { %v14371_v43 = vpop.f32.mrb[2].mxu0  ;;  %16973 = vmatprep.subr.bf16.mxu1 %v21167_v28  ;;  %v21343_v28 = vpack.c.bf16 %v26638_v40, %v26637_v0  ;;  %v4999_v63 = vsub.f32 %v21289_v44, %v26642_v51  ;;  %v26643_v8 = vand.u32 4294901760, %v21297_v60 }
 0x25e   : > { %v14372_v16 = vpop.f32.mrb[3].mxu0  ;;  %16947 = vmatpush3.bf16.msra.mxu0 %v21149_v55  ;;  %v21349_v12 = vpack.c.bf16 %v26640_v11, %v26639_v18  ;;  %v26641_v55 = vand.u32 4294901760, %v21278_v56  ;;  %v5105_v58 = vand.u32 4294901760, %v5104_v53  ;;  %v16982_v53 = vpack.c.bf16 %v4986_v20, %v4979_v34 }
 0x25f   : > { %v14373_v23 = vadd.f32 %v14372_v16, %v14371_v43  ;;  %16949 = vmatprep.subr.bf16.mxu0 %v21155_v62  ;;  %v26013_v16 = vand.u32 4294901760, %v21326_v32  ;;  %v5118_v0 = vsub.f32 %v21297_v60, %v26643_v8  ;;  %v26649_v43 = vand.u32 4294901760, %v21221_v49 }
 0x260   : > { %v4992_v46 = vsub.f32 %v21278_v56, %v26641_v55  ;;  %16975 = vmatpush3.bf16.msra.mxu1 %v21243_v27  ;;  %v26644_v55 = vand.u32 4294901760, %v21302_v17  ;;  %v5000_v40 = vand.u32 4294901760, %v4999_v63  ;;  %v16984_v18 = vpack.c.bf16 %v5112_v41, %v5105_v58 }
 0x261   : > { %v21359_v54 = vadd.f32 %v14411_v38, %v14373_v23  ;;  %16977 = vmatprep.subr.bf16.mxu1 %v16976_v26  ;;  %v26645_v38 = vand.u32 4294901760, %v21214_v5  ;;  %v26646_v23 = vand.u32 4294901760, %v21216_v42  ;;  %v26648_v26 = vand.u32 4294901760, %v21219_v10 }
 0x262   : > { %v5125_v27 = vsub.f32 %v21302_v17, %v26644_v55  ;;  %16951 = vmatpush3.bf16.msra.mxu0 %v21343_v28  ;;  %v4993_v25 = vand.u32 4294901760, %v4992_v46  ;;  %v5006_v5 = vsub.f32 %v21321_v48, %v26014_v15  ;;  %v5013_v42 = vsub.f32 %v21326_v32, %v26013_v16  ;;  %v26655_v46 = vld [vmem:[#allocation53_spill] sm:$0xff]  ;;  %v26672_v16 = vld [vmem:[#allocation36_spill] sm:$0xff] }
 0x263   : > { %v21374_v13 = vpack.c.bf16 %v26646_v23, %v26645_v38  ;;  %16953 = vmatprep.subr.bf16.mxu0 %v21349_v12  ;;  %v21381_v45 = vpack.c.bf16 %v26649_v43, %v26648_v26  ;;  %v5119_v11 = vand.u32 4294901760, %v5118_v0  ;;  %v26651_v49 = vand.u32 4294901760, %v21246_v19  ;;  %v26657_v55 = vld [vmem:[#allocation41_spill] sm:$0xff]  ;;  %v26658_v38 = vld [vmem:[#allocation48_spill] sm:$0xff] }
 0x264   : > { %16979 = vmatpush3.bf16.msra.mxu1 %v16978_v24  ;;  %v5126_v10 = vand.u32 4294901760, %v5125_v27  ;;  %v26652_v20 = vand.u32 4294901760, %v21248_v6  ;;  %v26654_v24 = vld [vmem:[#allocation52_spill] sm:$0xff]  ;;  %v16986_v63 = vpack.c.bf16 %v5000_v40, %v4993_v25  ;;  %v5007_v8 = vand.u32 4294901760, %v5006_v5  ;;  %v26656_v6 = vld [vmem:[#allocation55_spill] sm:$0xff] }
 0x265   : > { %26647 = vst [vmem:[#allocation71_spill] sm:$0xff] %v21374_v13  ;;  %26650 = vst [vmem:[#allocation72_spill] sm:$0xff] %v21381_v45  ;;  %16981 = vmatprep.subr.bf16.mxu1 %v16980_v33  ;;  %v16992_v51 = vpack.c.bf16 %v26655_v46, %v26654_v24  ;;  %v5014_v33 = vand.u32 4294901760, %v5013_v42  ;;  %v16994_v19 = vpack.c.bf16 %v20942_v52, %v20935_v39  ;;  %v26660_v40 = vld [vmem:[#allocation59_spill] sm:$0xff]  ;;  %v26661_v5 = vld [vmem:[#allocation60_spill] sm:$0xff] }
 0x266   : > { %16955 = vmatpush3.bf16.msra.mxu0 %v21374_v13  ;;  %v21394_v34 = vpack.c.bf16 %v26652_v20, %v26651_v49  ;;  %v16988_v58 = vpack.c.bf16 %v5126_v10, %v5119_v11  ;;  %v16996_v41 = vpack.c.bf16 %v26656_v6, %v20965_v2  ;;  %v16998_v27 = vpack.c.bf16 %v21014_v7, %v21001_v50  ;;  %v26663_v11 = vld [vmem:[#allocation61_spill] sm:$0xff]  ;;  %v26664_v10 = vld [vmem:[#allocation62_spill] sm:$0xff] }
 0x267   : > { %16957 = vmatprep.subr.bf16.mxu0 %v21381_v45  ;;  %v16990_v0 = vpack.c.bf16 %v5014_v33, %v5007_v8  ;;  %v17000_v23 = vpack.c.bf16 %v21026_v57, %v21024_v59  ;;  %v17002_v42 = vpack.c.bf16 %v26661_v5, %v26660_v40  ;;  %v17004_v49 = vpack.c.bf16 %v26664_v10, %v26663_v11  ;;  %v26665_v46 = vld [vmem:[#allocation54_spill] sm:$0xff] }
 0x268   : > { %26653 = vst [vmem:[#allocation73_spill] sm:$0xff] %v21394_v34  ;;  %16983 = vmatpush3.bf16.msra.mxu1 %v16982_v53  ;;  %v26659_v53 = vld [vmem:[#allocation49_spill] sm:$0xff]  ;;  %v26667_v8 = vld [vmem:[#allocation58_spill] sm:$0xff]  ;;  %v17012_v15 = vpack.c.bf16 %v21160_v30, %v21158_v36 }
 0x269   : > { %16985 = vmatprep.subr.bf16.mxu1 %v16984_v18  ;;  %v26662_v18 = vld [vmem:[#allocation34_spill] sm:$0xff] }
 0x26a   : > { %16959 = vmatpush3.bf16.msra.mxu0 %v21394_v34 }
 0x26b   : > { %16993 = vmatprep.subr.bf16.mxu0 %v16992_v51  ;;  %v26666_v51 = vld [vmem:[#allocation42_spill] sm:$0xff] }
 0x26c   : > { %16987 = vmatpush3.bf16.msra.mxu1 %v16986_v63 }
 0x26d   : > { %4884 = vmatmul.mubr.f32.vlgmr.msra.gmra.mrb[26].mxu0 %v26657_v55  ;;  %16989 = vmatprep.subr.bf16.mxu1 %v16988_v58  ;;  %v846_v55 = vld [vmem:[%s19596_s18 + $0x80] sm:$0xff] }
 0x26e   : > { %16995 = vmatpush3.bf16.msra.mxu0 %v16994_v19  ;;  %4893 = vmatprep.mubr.f32.mxu0 %v26658_v38  ;;  %v14444_v26 = vpop.f32.mrb[4].mxu0  ;;  %v26668_v19 = vld [vmem:[#allocation64_spill] sm:$0xff]  ;;  %v26681_v38 = vand.u32 4294901760, %v26656_v6 }
 0x26f   : > { %16997 = vmatprep.subr.bf16.mxu0 %v16996_v41  ;;  %v14445_v43 = vpop.f32.mrb[5].mxu0  ;;  %v26669_v41 = vld [vmem:[#allocation65_spill] sm:$0xff]  ;;  %v26683_v6 = vld [vmem:[#allocation44_spill] sm:$0xff] }
 0x270   : > { %16991 = vmatpush3.bf16.msra.mxu1 %v16990_v0  ;;  %v14446_v25 = vadd.f32 %v14445_v43, %v14444_v26  ;;  %v17006_v0 = vpack.c.bf16 %v26669_v41, %v26668_v19  ;;  %v26671_v26 = vld [vmem:[#allocation68_spill] sm:$0xff] }
 0x271   : > { %17025 = vmatprep.subr.bf16.mxu1 %v20958_v14  ;;  %4899 = vmatmul.mubr.f32.gmra.mrb[28].mxu0 %v26659_v53  ;;  %v26680_v53 = vand.u32 4294901760, %v20965_v2 }
 0x272   : > { %16999 = vmatpush3.bf16.msra.mxu0 %v16998_v27  ;;  %5273 = vmatprep.mubr.f32.mxu0 %v26662_v18  ;;  %v2200_v20 = vadd.f32 %v14446_v25, %v21306_v61  ;;  %v14447_v24 = vpop.f32.mrb[6].mxu0 }
 0x273   : > { %5131 = vmatmul.mubr.f32.vlgmr.msra.gmra.mrb[26].mxu1 %v26565_v37  ;;  %17001 = vmatprep.subr.bf16.mxu0 %v17000_v23  ;;  %v14448_v63 = vpop.f32.mrb[7].mxu0  ;;  %v26670_v23 = vld [vmem:[#allocation67_spill] sm:$0xff] }
 0x274   : > { %17027 = vmatpush3.bf16.msra.mxu1 %v26665_v46  ;;  %5136 = vmatprep.mubr.f32.mxu1 %v26666_v51  ;;  %v14449_v33 = vadd.f32 %v14448_v63, %v14447_v24  ;;  %v14482_v58 = vpop.f32.mrb[4].mxu1  ;;  %v17008_v43 = vpack.c.bf16 %v26671_v26, %v26670_v23  ;;  %v849_v37 = vld [vmem:[%s19596_s18 + $0x98] sm:$0xff] }
 0x275   : > { %17029 = vmatprep.subr.bf16.mxu1 %v26667_v8  ;;  %v14483_v27 = vpop.f32.mrb[5].mxu1 }
 0x276   : > { %17003 = vmatpush3.bf16.msra.mxu0 %v17002_v42  ;;  %v2209_v61 = vadd.f32 %v14449_v33, %v21359_v54  ;;  %v14484_v25 = vadd.f32 %v14483_v27, %v14482_v58  ;;  %v26673_v58 = vld [vmem:[#allocation70_spill] sm:$0xff]  ;;  %v26674_v27 = vld [vmem:[#allocation63_spill] sm:$0xff] }
 0x277   : > { %17005 = vmatprep.subr.bf16.mxu0 %v17004_v49  ;;  %5138 = vmatmul.mubr.f32.gmra.mrb[28].mxu1 %v26628_v1  ;;  %v17010_v49 = vpack.c.bf16 %v21151_v22, %v21133_v9  ;;  %v847_v1 = vld [vmem:[%s19596_s18 + $0x88] sm:$0xff] }
 0x278   : > { %17031 = vmatpush3.bf16.msra.mxu1 %v21012_v29  ;;  %5389 = vmatprep.mubr.f32.mxu1 %v26672_v16  ;;  %v21431_v42 = vadd.f32 %v14484_v25, %v2200_v20  ;;  %v14485_v24 = vpop.f32.mrb[6].mxu1  ;;  %v17014_v20 = vpack.c.bf16 %v21238_v3, %v21233_v47  ;;  %v17018_v25 = vpack.c.bf16 %v21289_v44, %v21278_v56  ;;  %v26678_v16 = vand.u32 4294901760, %v20942_v52  ;;  %v880_v52 = vld [vmem:[%s21472_s13 + $0x88] sm:$0xff] }
 0x279   : > { %17033 = vmatprep.subr.bf16.mxu1 %v21022_v35  ;;  %v14486_v63 = vpop.f32.mrb[7].mxu1  ;;  %v1210_v51 = vmul.f32 %v847_v1, %v847_v1  ;;  %v26690_v1 = vand.u32 4294901760, %v26661_v5  ;;  %v26694_v5 = vld [vmem:[#allocation40_spill] sm:$0xff] }
 0x27a   : > { %17007 = vmatpush3.bf16.msra.mxu0 %v17006_v0  ;;  %v14487_v54 = vadd.f32 %v14486_v63, %v14485_v24  ;;  %v17016_v0 = vpack.c.bf16 %v26673_v58, %v21255_v21  ;;  %v26676_v24 = vld [vmem:[#allocation69_spill] sm:$0xff] }
 0x27b   : > { %17009 = vmatprep.subr.bf16.mxu0 %v17008_v43  ;;  %v26675_v43 = vld [vmem:[#allocation66_spill] sm:$0xff] }
 0x27c   : > { %17035 = vmatpush3.bf16.msra.mxu1 %v21032_v4  ;;  %v21439_v33 = vadd.f32 %v14487_v54, %v2209_v61  ;;  %v17020_v61 = vpack.c.bf16 %v21302_v17, %v21297_v60  ;;  %v829_v63 = vld [vmem:[%s19593_s22 + $0x100] sm:$0x1] }
 0x27d   : > { %17037 = vmatprep.subr.bf16.mxu1 %v21058_v31 }
 0x27e   : > { %17011 = vmatpush3.bf16.msra.mxu0 %v17010_v49  ;;  %v796_v49 = vld [vmem:[%s19586_s2 + $0x100] sm:$0x1] }
 0x27f   : > { %17013 = vmatprep.subr.bf16.mxu0 %v17012_v15  ;;  %v17022_v15 = vpack.c.bf16 %v21326_v32, %v21321_v48  ;;  %v1126_v54 = vmul.f32 %v796_v49, %v796_v49  ;;  %v26686_v49 = vand.u32 4294901760, %v21024_v59 }
 0x280   : > { %17039 = vmatpush3.bf16.msra.mxu1 %v26674_v27 }
 0x281   : > { %17041 = vmatprep.subr.bf16.mxu1 %v26675_v43 }
 0x282   : > { %17015 = vmatpush3.bf16.msra.mxu0 %v17014_v20  ;;  %v1159_v20 = vmul.f32 %v829_v63, %v829_v63  ;;  %v26687_v63 = vand.u32 4294901760, %v21026_v57  ;;  %v26689_v57 = vand.u32 4294901760, %v26660_v40  ;;  %v881_v40 = vld [vmem:[%s21472_s13 + $0x90] sm:$0xff] }
 0x283   : > { %17017 = vmatprep.subr.bf16.mxu0 %v17016_v0  ;;  %v26677_v0 = vand.u32 4294901760, %v20935_v39  ;;  %v879_v39 = vld [vmem:[%s21472_s13 + $0x80] sm:$0xff] }
 0x284   : > { %17043 = vmatpush3.bf16.msra.mxu1 %v26676_v24  ;;  %v1192_v2 = vadd.f32 %v1159_v20, %v1126_v54  ;;  %v1243_v54 = vmul.f32 %v880_v52, %v880_v52  ;;  %v863_v20 = vld [vmem:[%s21472_s13] sm:$0xff] }
 0x285   : > { %17045 = vmatprep.subr.bf16.mxu1 %v21155_v62  ;;  %v17058_v18 = vpack.c.bf16 %v26678_v16, %v26677_v0  ;;  %v26682_v16 = vld [vmem:[#allocation38_spill] sm:$0xff]  ;;  %v17064_v0 = vpack.c.bf16 %v26687_v63, %v26686_v49 }
 0x286   : > { %17019 = vmatpush3.bf16.msra.mxu0 %v17018_v25  ;;  %v26679_v25 = vld [vmem:[#allocation57_spill] sm:$0xff] }
 0x287   : > { %17021 = vmatprep.subr.bf16.mxu0 %v17020_v61  ;;  %v17060_v61 = vpack.c.bf16 %v26681_v38, %v26680_v53  ;;  %v26684_v38 = vand.u32 4294901760, %v21001_v50  ;;  %v26685_v53 = vand.u32 4294901760, %v21014_v7  ;;  %v864_v50 = vld [vmem:[%s21472_s13 + $0x8] sm:$0xff]  ;;  %v26688_v7 = vld [vmem:[#allocation45_spill] sm:$0xff] }
 0x288   : > { %17047 = vmatpush3.bf16.msra.mxu1 %v21343_v28  ;;  %v848_v49 = vld [vmem:[%s19596_s18 + $0x90] sm:$0xff] }
 0x289   : > { %17049 = vmatprep.subr.bf16.mxu1 %v21349_v12 }
 0x28a   : > { %17023 = vmatpush3.bf16.msra.mxu0 %v17022_v15  ;;  %v17062_v15 = vpack.c.bf16 %v26685_v53, %v26684_v38  ;;  %v4775_v38 = vsel %vm1695_vm1, %v1192_v2, 0 }
 0x28b   : > { %17057 = vmatprep.subr.bf16.mxu0 %v26679_v25  ;;  %v830_v25 = vld [vmem:[%s19596_s18] sm:$0xff] }
 0x28c   : > { %17051 = vmatpush3.bf16.msra.mxu1 %v21374_v13  ;;  %v1193_v53 = vmul.f32 %v830_v25, %v830_v25  ;;  %v882_v13 = vld [vmem:[%s21472_s13 + $0x98] sm:$0xff] }
 0x28d   : > { %5276 = vmatmul.mubr.f32.vlgmr.msra.gmra.mrb[30].mxu0 %v26682_v16  ;;  %17053 = vmatprep.subr.bf16.mxu1 %v21381_v45  ;;  %v1209_v16 = vmul.f32 %v846_v55, %v846_v55  ;;  %v1242_v45 = vmul.f32 %v879_v39, %v879_v39  ;;  %v17066_v55 = vpack.c.bf16 %v26690_v1, %v26689_v57  ;;  %v26692_v39 = vand.u32 4294901760, %v26664_v10 }
 0x28e   : > { %17059 = vmatpush3.bf16.msra.mxu0 %v17058_v18  ;;  %5282 = vmatprep.mubr.f32.mxu0 %v26683_v6  ;;  %v831_v18 = vld [vmem:[%s19596_s18 + $0x8] sm:$0xff]  ;;  %v14520_v6 = vpop.f32.mrb[8].mxu0  ;;  %v21509_v57 = vadd.f32 %v1243_v54, %v1210_v51  ;;  %v1227_v10 = vmul.f32 %v864_v50, %v864_v50  ;;  %v21522_v51 = vand.u32 4294901760, %v4775_v38  ;;  %v1212_v54 = vmul.f32 %v849_v37, %v849_v37 }
 0x28f   : > { %17061 = vmatprep.subr.bf16.mxu0 %v17060_v61  ;;  %v14521_v59 = vpop.f32.mrb[9].mxu0  ;;  %v26691_v61 = vand.u32 4294901760, %v26663_v11  ;;  %v1275_v11 = vadd.f32 %v1242_v45, %v1209_v16  ;;  %v1245_v50 = vmul.f32 %v882_v13, %v882_v13  ;;  %v26705_v13 = vand.u32 4294901760, %v21233_v47 }
 0x290   : > { %17055 = vmatpush3.bf16.msra.mxu1 %v21394_v34  ;;  %v14522_v63 = vadd.f32 %v14521_v59, %v14520_v6  ;;  %v1194_v34 = vmul.f32 %v831_v18, %v831_v18  ;;  %v26695_v6 = vld [vmem:[#allocation46_spill] sm:$0xff]  ;;  %v26697_v18 = vand.u32 4294901760, %v26669_v41  ;;  %v26698_v59 = vand.u32 4294901760, %v26670_v23 }
 0x291   : > { %5285 = vmatmul.mubr.f32.gmra.mrb[32].mxu0 %v26688_v7  ;;  %17089 = vmatprep.subr.bf16.mxu1 %v20958_v14  ;;  %v17068_v52 = vpack.c.bf16 %v26692_v39, %v26691_v61  ;;  %v26693_v7 = vld [vmem:[#allocation33_spill] sm:$0xff]  ;;  %v1226_v14 = vmul.f32 %v863_v20, %v863_v20  ;;  %v26700_v41 = vand.u32 4294901760, %v21133_v9  ;;  %v26701_v61 = vand.u32 4294901760, %v21151_v22 }
 0x292   : > { %17063 = vmatpush3.bf16.msra.mxu0 %v17062_v15  ;;  %5570 = vmatprep.mubr.f32.mxu0 %v26693_v7  ;;  %v2496_v2 = vadd.f32 %v14522_v63, %v21431_v42  ;;  %v14523_v25 = vpop.f32.mrb[10].mxu0  ;;  %v26696_v15 = vand.u32 4294901760, %v26668_v19  ;;  %v1211_v42 = vmul.f32 %v848_v49, %v848_v49  ;;  %v26703_v39 = vand.u32 4294901760, %v21160_v30 }
 0x293   : > { %5393 = vmatmul.mubr.f32.vlgmr.msra.gmra.mrb[30].mxu1 %v26694_v5  ;;  %17065 = vmatprep.subr.bf16.mxu0 %v17064_v0  ;;  %v26699_v0 = vand.u32 4294901760, %v26671_v26  ;;  %v14524_v16 = vpop.f32.mrb[11].mxu0  ;;  %v17074_v23 = vpack.c.bf16 %v26701_v61, %v26700_v41  ;;  %v26702_v26 = vand.u32 4294901760, %v21158_v36  ;;  %v6365_v22 = vand.u32 4294901760, %v1275_v11  ;;  %v892_v5 = vld [vmem:[%s21472_s13 + $0xe8] sm:$0xff] }
 0x294   : > { %17091 = vmatpush3.bf16.msra.mxu1 %v26665_v46  ;;  %5400 = vmatprep.mubr.f32.mxu1 %v26695_v6  ;;  %v17070_v20 = vpack.c.bf16 %v26697_v18, %v26696_v15  ;;  %v1244_v46 = vmul.f32 %v881_v40, %v881_v40  ;;  %v14525_v1 = vadd.f32 %v14524_v16, %v14523_v25  ;;  %v14558_v19 = vpop.f32.mrb[8].mxu1  ;;  %v6368_v36 = vand.u32 4294901760, %v21509_v57  ;;  %v865_v18 = vld [vmem:[%s21472_s13 + $0x10] sm:$0xff] }
 0x295   : > { %v17072_v45 = vpack.c.bf16 %v26699_v0, %v26698_v59  ;;  %17093 = vmatprep.subr.bf16.mxu1 %v26667_v8  ;;  %v17076_v63 = vpack.c.bf16 %v26703_v39, %v26702_v26  ;;  %v21533_v15 = vadd.f32 %v1226_v14, %v1193_v53  ;;  %v26704_v8 = vld [vmem:[#allocation47_spill] sm:$0xff]  ;;  %v14559_v37 = vpop.f32.mrb[9].mxu1  ;;  %v1260_v49 = vadd.f32 %v1227_v10, %v1194_v34  ;;  %v867_v39 = vld [vmem:[%s21472_s13 + $0x20] sm:$0xff] }
 0x296   : > { %17067 = vmatpush3.bf16.msra.mxu0 %v17066_v55  ;;  %v26706_v55 = vand.u32 4294901760, %v21238_v3  ;;  %v2503_v30 = vadd.f32 %v14525_v1, %v21439_v33  ;;  %v14560_v53 = vadd.f32 %v14559_v37, %v14558_v19  ;;  %v21547_v47 = vsub.f32 %v4775_v38, %v21522_v51  ;;  %v832_v3 = vld [vmem:[%s19596_s18 + $0x10] sm:$0xff]  ;;  %v833_v38 = vld [vmem:[%s19596_s18 + $0x18] sm:$0xff]  ;;  %v834_v26 = vld [vmem:[%s19596_s18 + $0x20] sm:$0xff] }
 0x297   : > { %5404 = vmatmul.mubr.f32.gmra.mrb[32].mxu1 %v26704_v8  ;;  %17069 = vmatprep.subr.bf16.mxu0 %v17068_v52  ;;  %v26707_v52 = vand.u32 4294901760, %v21255_v21  ;;  %v26708_v14 = vand.u32 4294901760, %v26673_v58  ;;  %v26709_v33 = vand.u32 4294901760, %v21278_v56  ;;  %v1277_v10 = vadd.f32 %v1244_v46, %v1211_v42  ;;  %v866_v42 = vld [vmem:[%s21472_s13 + $0x18] sm:$0xff]  ;;  %v883_v1 = vld [vmem:[%s21472_s13 + $0xa0] sm:$0xff]  ;;  %v884_v19 = vld [vmem:[%s21472_s13 + $0xa8] sm:$0xff] }
 0x298   : > { %v21540_v9 = vpack.c.bf16 %v26706_v55, %v26705_v13  ;;  %17095 = vmatpush3.bf16.msra.mxu1 %v21012_v29  ;;  %5681 = vmatprep.mubr.f32.mxu1 %v26693_v7  ;;  %v26710_v29 = vand.u32 4294901760, %v21289_v44  ;;  %v21563_v25 = vadd.f32 %v1245_v50, %v1212_v54  ;;  %v26711_v21 = vand.u32 4294901760, %v21297_v60  ;;  %v850_v54 = vld [vmem:[%s19596_s18 + $0xa0] sm:$0xff] }
 0x299   : > { %17097 = vmatprep.subr.bf16.mxu1 %v21022_v35  ;;  %v21555_v34 = vpack.c.bf16 %v26708_v14, %v26707_v52  ;;  %v14561_v35 = vpop.f32.mrb[10].mxu1  ;;  %v26712_v58 = vand.u32 4294901760, %v21302_v17  ;;  %v26713_v44 = vand.u32 4294901760, %v21321_v48  ;;  %v26714_v56 = vand.u32 4294901760, %v21326_v32  ;;  %v851_v32 = vld [vmem:[%s19596_s18 + $0xa8] sm:$0xff] }
 0x29a   : > { %v21561_v40 = vpack.c.bf16 %v26710_v29, %v26709_v33  ;;  %17071 = vmatpush3.bf16.msra.mxu0 %v17070_v20  ;;  %v6317_v16 = vand.u32 4294901760, %v21533_v15  ;;  %v21582_v20 = vadd.f32 %v14560_v53, %v2496_v2  ;;  %v14562_v60 = vpop.f32.mrb[11].mxu1  ;;  %v21584_v46 = vpack.c.bf16 %v6368_v36, %v6365_v22  ;;  %v868_v53 = vld [vmem:[%s21472_s13 + $0x28] sm:$0xff] }
 0x29b   : > { %v21571_v59 = vpack.c.bf16 %v26712_v58, %v26711_v21  ;;  %v21577_v0 = vpack.c.bf16 %v26714_v56, %v26713_v44  ;;  %17073 = vmatprep.subr.bf16.mxu0 %v17072_v45  ;;  %v21586_v17 = vsub.f32 %v1275_v11, %v6365_v22  ;;  %v6320_v50 = vand.u32 4294901760, %v1260_v49  ;;  %v835_v22 = vld [vmem:[%s19596_s18 + $0x28] sm:$0xff]  ;;  %v853_v21 = vld [vmem:[%s19596_s18 + $0xb8] sm:$0xff]  ;;  %v885_v58 = vld [vmem:[%s21472_s13 + $0xb0] sm:$0xff] }
 0x29c   : > { %26715 = vst [vmem:[#allocation52_spill] sm:$0xff] %v21584_v46  ;;  %v1195_v48 = vmul.f32 %v832_v3, %v832_v3  ;;  %v14563_v41 = vadd.f32 %v14562_v60, %v14561_v35  ;;  %17099 = vmatpush3.bf16.msra.mxu1 %v21032_v4  ;;  %v21593_v2 = vand.u32 4294901760, %v21547_v47  ;;  %v1196_v61 = vmul.f32 %v833_v38, %v833_v38  ;;  %v852_v35 = vld [vmem:[%s19596_s18 + $0xb0] sm:$0xff] }
 0x29d   : > { %v1228_v45 = vmul.f32 %v865_v18, %v865_v18  ;;  %17101 = vmatprep.subr.bf16.mxu1 %v21058_v31  ;;  %v6371_v11 = vand.u32 4294901760, %v1277_v10  ;;  %v6374_v37 = vand.u32 4294901760, %v21563_v25  ;;  %v1229_v13 = vmul.f32 %v866_v42, %v866_v42 }
 0x29e   : > { %v1213_v55 = vmul.f32 %v850_v54, %v850_v54  ;;  %17075 = vmatpush3.bf16.msra.mxu0 %v17074_v23  ;;  %v1214_v3 = vmul.f32 %v851_v32, %v851_v32  ;;  %v1246_v4 = vmul.f32 %v883_v1, %v883_v1  ;;  %v1247_v52 = vmul.f32 %v884_v19, %v884_v19  ;;  %v837_v32 = vld [vmem:[%s19596_s18 + $0x38] sm:$0xff]  ;;  %v869_v1 = vld [vmem:[%s21472_s13 + $0x30] sm:$0xff]  ;;  %v870_v19 = vld [vmem:[%s21472_s13 + $0x38] sm:$0xff] }
 0x29f   : > { %v21601_v14 = vadd.f32 %v14563_v41, %v2503_v30  ;;  %17077 = vmatprep.subr.bf16.mxu0 %v17076_v63  ;;  %v21604_v33 = vsub.f32 %v21509_v57, %v6368_v36  ;;  %v21607_v31 = vsub.f32 %v21533_v15, %v6317_v16  ;;  %v1197_v29 = vmul.f32 %v834_v26, %v834_v26 }
 0x2a0   : > { %v1230_v38 = vmul.f32 %v867_v39, %v867_v39  ;;  %17103 = vmatpush3.bf16.msra.mxu1 %v26674_v27  ;;  %v21610_v23 = vpack.c.bf16 %v6320_v50, %v6317_v16  ;;  %v1198_v18 = vmul.f32 %v835_v22, %v835_v22  ;;  %v1231_v30 = vmul.f32 %v868_v53, %v868_v53  ;;  %v886_v27 = vld [vmem:[%s21472_s13 + $0xb8] sm:$0xff]  ;;  %v836_v16 = vld [vmem:[%s19596_s18 + $0x30] sm:$0xff] }
 0x2a1   : > { %17105 = vmatprep.subr.bf16.mxu1 %v26675_v43  ;;  %v21614_v63 = vsub.f32 %v1260_v49, %v6320_v50  ;;  %v5785_v57 = vsub.f32 %v21547_v47, %v21593_v2  ;;  %v1261_v36 = vadd.f32 %v1228_v45, %v1195_v48  ;;  %v1262_v15 = vadd.f32 %v1229_v13, %v1196_v61  ;;  %v855_v53 = vld [vmem:[%s19596_s18 + $0xc8] sm:$0xff] }
 0x2a2   : > { %26716 = vst [vmem:[#allocation53_spill] sm:$0xff] %v21610_v23  ;;  %17079 = vmatpush3.bf16.msra.mxu0 %v21540_v9  ;;  %v21622_v44 = vpack.c.bf16 %v6374_v37, %v6371_v11  ;;  %v21624_v56 = vsub.f32 %v1277_v10, %v6371_v11  ;;  %v1279_v43 = vadd.f32 %v1246_v4, %v1213_v55  ;;  %v19095_v54 = vmov 1966171168   ;;  %v854_v11 = vld [vmem:[%s19596_s18 + $0xc0] sm:$0xff]  ;;  %v888_v4 = vld [vmem:[%s21472_s13 + $0xc8] sm:$0xff] }
 0x2a3   : > { %v1280_v49 = vadd.f32 %v1247_v52, %v1214_v3  ;;  %17081 = vmatprep.subr.bf16.mxu0 %v21555_v34  ;;  %v21628_v42 = vadd.f32 %v1230_v38, %v1197_v29  ;;  %v3110_v60 = vunpack.c.l.s4 %v19095_v54  ;;  %v3112_v50 = vlaneseq  ;;  %v887_v3 = vld [vmem:[%s21472_s13 + $0xc0] sm:$0xff] }
 0x2a4   : > { %26717 = vst [vmem:[#allocation55_spill] sm:$0xff] %v21622_v44  ;;  %v1215_v48 = vmul.f32 %v852_v35, %v852_v35  ;;  %17107 = vmatpush3.bf16.msra.mxu1 %v26676_v24  ;;  %v21634_v9 = vadd.f32 %v1231_v30, %v1198_v18  ;;  %v1216_v10 = vmul.f32 %v853_v21, %v853_v21  ;;  %v21637_v61 = vand.u32 4294901760, %v5785_v57 }
 0x2a5   : > { %v1248_v41 = vmul.f32 %v885_v58, %v885_v58  ;;  %v1249_v34 = vmul.f32 %v886_v27, %v886_v27  ;;  %17109 = vmatprep.subr.bf16.mxu1 %v21155_v62  ;;  %v21640_v45 = vsub.f32 %v21563_v25, %v6374_v37  ;;  %v6323_v26 = vand.u32 4294901760, %v1261_v36 }
 0x2a6   : > { %v6326_v39 = vand.u32 4294901760, %v1262_v15  ;;  %17083 = vmatpush3.bf16.msra.mxu0 %v21561_v40  ;;  %v1199_v24 = vmul.f32 %v836_v16, %v836_v16  ;;  %v1200_v13 = vmul.f32 %v837_v32, %v837_v32  ;;  %v1232_v55 = vmul.f32 %v869_v1, %v869_v1 }
 0x2a7   : > { %v1233_v22 = vmul.f32 %v870_v19, %v870_v19  ;;  %17085 = vmatprep.subr.bf16.mxu0 %v21571_v59  ;;  %v6377_v62 = vand.u32 4294901760, %v1279_v43  ;;  %v6380_v52 = vand.u32 4294901760, %v1280_v49  ;;  %v6329_v29 = vand.u32 4294901760, %v21628_v42 }
 0x2a8   : > { %v3111_v25 = vunpack.c.0.s8 %v3110_v60  ;;  %17111 = vmatpush3.bf16.msra.mxu1 %v21343_v28  ;;  %v6332_v37 = vand.u32 4294901760, %v21634_v9  ;;  %v3113_v38 = vshrl.u32 %v3112_v50, 7  ;;  %v1281_v40 = vadd.f32 %v1248_v41, %v1215_v48  ;;  %v839_v50 = vld [vmem:[%s19596_s18 + $0x48] sm:$0xff]  ;;  %v26720_v48 = vld [vmem:[#allocation71_spill] sm:$0xff]  ;;  %v856_v41 = vld [vmem:[%s19596_s18 + $0xd0] sm:$0xff] }
 0x2a9   : > { %v1282_v18 = vadd.f32 %v1249_v34, %v1216_v10  ;;  %17113 = vmatprep.subr.bf16.mxu1 %v21349_v12  ;;  %v1217_v30 = vmul.f32 %v854_v11, %v854_v11  ;;  %v1218_v35 = vmul.f32 %v855_v53, %v855_v53  ;;  %v1250_v59 = vmul.f32 %v887_v3, %v887_v3  ;;  %v872_v10 = vld [vmem:[%s21472_s13 + $0x48] sm:$0xff]  ;;  %v26722_v34 = vld [vmem:[#allocation37_spill] sm:$0xff] }
 0x2aa   : > { %v1251_v57 = vmul.f32 %v888_v4, %v888_v4  ;;  %17087 = vmatpush3.bf16.msra.mxu0 %v21577_v0  ;;  %v21653_v21 = vpack.c.bf16 %v6326_v39, %v6323_v26  ;;  %v21655_v58 = vsub.f32 %v1261_v36, %v6323_v26  ;;  %v1265_v28 = vadd.f32 %v1232_v55, %v1199_v24  ;;  %v838_v0 = vld [vmem:[%s19596_s18 + $0x40] sm:$0xff]  ;;  %v871_v36 = vld [vmem:[%s21472_s13 + $0x40] sm:$0xff]  ;;  %v857_v24 = vld [vmem:[%s19596_s18 + $0xd8] sm:$0xff] }
 0x2ab   : > { %v1266_v27 = vadd.f32 %v1233_v22, %v1200_v13  ;;  %16364 = vmatprep.subr.mxu0 %v21522_v51  ;;  %v21658_v12 = vsub.f32 %v1262_v15, %v6326_v39  ;;  %v21660_v16 = vpack.c.bf16 %v6380_v52, %v6377_v62  ;;  %v21662_v54 = vsub.f32 %v1279_v43, %v6377_v62  ;;  %v889_v43 = vld [vmem:[%s21472_s13 + $0xd0] sm:$0xff]  ;;  %v26725_v13 = vld [vmem:[#allocation42_spill] sm:$0xff] }
 0x2ac   : > { %26718 = vst [vmem:[#allocation59_spill] sm:$0xff] %v21653_v21  ;;  %v21664_v60 = vsub.f32 %v1280_v49, %v6380_v52  ;;  %17115 = vmatpush3.bf16.msra.mxu1 %v26720_v48  ;;  %v21671_v32 = vsub.f32 %v21628_v42, %v6329_v29  ;;  %v21673_v1 = vsub.s32 %v3111_v25, %v3113_v38  ;;  %v6383_v15 = vand.u32 4294901760, %v1281_v40  ;;  %v26723_v49 = vld [vmem:[#allocation72_spill] sm:$0xff]  ;;  %v26726_v25 = vld [vmem:[#allocation73_spill] sm:$0xff] }
 0x2ad   : > { %26719 = vst [vmem:[#allocation60_spill] sm:$0xff] %v21660_v16  ;;  %v6386_v19 = vand.u32 4294901760, %v1282_v18  ;;  %5572 = vmatmul.mubr.f32.vlgmr.msra.gmra.mrb[34].mxu0 %v26722_v34  ;;  %17117 = vmatprep.subr.bf16.mxu1 %v26723_v49  ;;  %v21680_v26 = vpack.c.bf16 %v6332_v37, %v6329_v29  ;;  %v21682_v39 = vadd.f32 %v1250_v59, %v1217_v30  ;;  %v890_v42 = vld [vmem:[%s21472_s13 + $0xd8] sm:$0xff]  ;;  %v6335_v55 = vand.u32 4294901760, %v1265_v28 }
 0x2ae   : > { %26721 = vst [vmem:[#allocation61_spill] sm:$0xff] %v21673_v1  ;;  %v21684_v11 = vadd.f32 %v1251_v57, %v1218_v35  ;;  %5577 = vmatprep.mubr.f32.mxu0 %v26725_v13  ;;  %16365 = vmatpush3.msra.mxu0 %v21522_v51  ;;  %v6338_v22 = vand.u32 4294901760, %v1266_v27  ;;  %v1201_v53 = vmul.f32 %v838_v0, %v838_v0  ;;  %v840_v57 = vld [vmem:[%s19596_s18 + $0x50] sm:$0xff]  ;;  %v841_v0 = vld [vmem:[%s19596_s18 + $0x58] sm:$0xff] }
 0x2af   : > { %26724 = vst [vmem:[#allocation62_spill] sm:$0xff] %v21680_v26  ;;  %v1234_v3 = vmul.f32 %v871_v36, %v871_v36  ;;  %16369 = vmatprep.subr.mxu0 %v21637_v61  ;;  %v1202_v4 = vmul.f32 %v839_v50, %v839_v50  ;;  %v1235_v62 = vmul.f32 %v872_v10, %v872_v10  ;;  %v26728_v36 = vld [vmem:[#allocation43_spill] sm:$0xff] }
 0x2b0   : > { %v1219_v52 = vmul.f32 %v856_v41, %v856_v41  ;;  %v1252_v29 = vmul.f32 %v889_v43, %v889_v43  ;;  %17119 = vmatpush3.bf16.msra.mxu1 %v26726_v25  ;;  %v21693_v38 = vsub.f32 %v21634_v9, %v6332_v37  ;;  %v21695_v30 = vpack.c.bf16 %v6386_v19, %v6383_v15  ;;  %v873_v10 = vld [vmem:[%s21472_s13 + $0x50] sm:$0xff]  ;;  %v874_v41 = vld [vmem:[%s21472_s13 + $0x58] sm:$0xff] }
 0x2b1   : > { %v1220_v35 = vmul.f32 %v857_v24, %v857_v24  ;;  %v1253_v59 = vmul.f32 %v890_v42, %v890_v42  ;;  %5579 = vmatmul.mubr.f32.gmra.mrb[36].mxu0 %v26728_v36  ;;  %17121 = vmatprep.subr.bf16.mxu1 %v21584_v46  ;;  %v21701_v50 = vsub.f32 %v1281_v40, %v6383_v15  ;;  %v6389_v9 = vand.u32 4294901760, %v21682_v39  ;;  %v26731_v43 = vld [vmem:[#allocation51_spill] sm:$0xff]  ;;  %v859_v15 = vld [vmem:[%s19596_s18 + $0xe8] sm:$0xff] }
 0x2b2   : > { %26727 = vst [vmem:[#allocation54_spill] sm:$0xff] %v21695_v30  ;;  %v21703_v48 = vsub.f32 %v1282_v18, %v6386_v19  ;;  %16366 = vmatprep.mubr.f32.mxu0 %v26731_v43  ;;  %v21710_v49 = vpack.c.bf16 %v6338_v22, %v6335_v55  ;;  %v21712_v24 = vsub.f32 %v1265_v28, %v6335_v55  ;;  %v858_v18 = vld [vmem:[%s19596_s18 + $0xe0] sm:$0xff]  ;;  %v891_v19 = vld [vmem:[%s21472_s13 + $0xe0] sm:$0xff]  ;;  %v876_v43 = vld [vmem:[%s21472_s13 + $0x68] sm:$0xff] }
 0x2b3   : > { %26729 = vst [vmem:[#allocation58_spill] sm:$0xff] %v21701_v50  ;;  %v21714_v42 = vsub.f32 %v1266_v27, %v6338_v22  ;;  %v21716_v40 = vadd.f32 %v1234_v3, %v1201_v53  ;;  %5683 = vmatmul.mubr.f32.vlgmr.msra.gmra.mrb[34].mxu1 %v26722_v34  ;;  %v21722_v25 = vadd.f32 %v1235_v62, %v1202_v4  ;;  %v842_v28 = vld [vmem:[%s19596_s18 + $0x60] sm:$0xff]  ;;  %v875_v55 = vld [vmem:[%s21472_s13 + $0x60] sm:$0xff]  ;;  %v843_v3 = vld [vmem:[%s19596_s18 + $0x68] sm:$0xff] }
 0x2b4   : > { %26730 = vst [vmem:[#allocation64_spill] sm:$0xff] %v21703_v48  ;;  %26732 = vst [vmem:[#allocation65_spill] sm:$0xff] %v21710_v49  ;;  %v21724_v37 = vadd.f32 %v1252_v29, %v1219_v52  ;;  %v1203_v8 = vmul.f32 %v840_v57, %v840_v57  ;;  %v1204_v6 = vmul.f32 %v841_v0, %v841_v0  ;;  %17123 = vmatpush3.bf16.msra.mxu1 %v21610_v23  ;;  %v26735_v34 = vld [vmem:[#allocation56_spill] sm:$0xff]  ;;  %v26736_v57 = vld [vmem:[#allocation29_spill] sm:$0xff] }
 0x2b5   : > { %26733 = vst [vmem:[#allocation67_spill] sm:$0xff] %v21712_v24  ;;  %26734 = vst [vmem:[#allocation68_spill] sm:$0xff] %v21714_v42  ;;  %5688 = vmatprep.mubr.f32.mxu1 %v26725_v13  ;;  %v21731_v27 = vadd.f32 %v1253_v59, %v1220_v35  ;;  %v1236_v22 = vmul.f32 %v873_v10, %v873_v10  ;;  %v1237_v53 = vmul.f32 %v874_v41, %v874_v41  ;;  %v894_v13 = vld [vmem:[%s21472_s13 + $0xf8] sm:$0xff] }
 0x2b6   : > { %16367 = vmatmul.mubr.f32.vlgmr.msra.gmra.mrb[38].mxu0 %v26735_v34  ;;  %17125 = vmatprep.subr.bf16.mxu1 %v21622_v44  ;;  %v1221_v4 = vmul.f32 %v858_v18, %v858_v18  ;;  %v1222_v62 = vmul.f32 %v859_v15, %v859_v15  ;;  %v1254_v52 = vmul.f32 %v891_v19, %v891_v19  ;;  %v14614_v29 = vpop.f32.mrb[12].mxu1  ;;  %v26737_v41 = vand.u32 4294901760, %v21684_v11  ;;  %v860_v34 = vld [vmem:[%s19596_s18 + $0xf0] sm:$0xff]  ;;  %v861_v44 = vld [vmem:[%s19596_s18 + $0xf8] sm:$0xff] }
 0x2b7   : > { %16370 = vmatpush3.msra.mxu0 %v21637_v61  ;;  %16371 = vmatprep.mubr.f32.mxu0 %v26736_v57  ;;  %v1255_v35 = vmul.f32 %v892_v5, %v892_v5  ;;  %v1205_v59 = vmul.f32 %v842_v28, %v842_v28  ;;  %v1238_v0 = vmul.f32 %v875_v55, %v875_v55  ;;  %v14615_v10 = vpop.f32.mrb[13].mxu1  ;;  %v6341_v15 = vand.u32 4294901760, %v21716_v40  ;;  %v893_v5 = vld [vmem:[%s21472_s13 + $0xf0] sm:$0xff] }
 0x2b8   : > { %5690 = vmatmul.mubr.f32.gmra.mrb[36].mxu1 %v26728_v36  ;;  %16374 = vmatprep.subr.mxu0 %v21547_v47  ;;  %v21743_v18 = vpack.c.bf16 %v26737_v41, %v6389_v9  ;;  %v1206_v61 = vmul.f32 %v843_v3, %v843_v3  ;;  %v1239_v19 = vmul.f32 %v876_v43, %v876_v43  ;;  %v6344_v36 = vand.u32 4294901760, %v21722_v25  ;;  %v844_v3 = vld [vmem:[%s19596_s18 + $0x70] sm:$0xff]  ;;  %v26741_v43 = vld [vmem:[#allocation39_spill] sm:$0xff] }
 0x2b9   : > { %v21748_v28 = vadd.f32 %v14615_v10, %v14614_v29  ;;  %17127 = vmatpush3.bf16.msra.mxu1 %v21653_v21  ;;  %v21752_v55 = vsub.f32 %v21682_v39, %v6389_v9  ;;  %v6395_v41 = vand.u32 4294901760, %v21724_v37  ;;  %6417 = vmatprep.mubr.f32.mxu1 %v26741_v43  ;;  %v6398_v29 = vand.u32 4294901760, %v21731_v27  ;;  %v845_v21 = vld [vmem:[%s19596_s18 + $0x78] sm:$0xff]  ;;  %v877_v39 = vld [vmem:[%s21472_s13 + $0x70] sm:$0xff]  ;;  %v878_v9 = vld [vmem:[%s21472_s13 + $0x78] sm:$0xff] }
 0x2ba   : > { %26738 = vst [vmem:[#allocation70_spill] sm:$0xff] %v21743_v18  ;;  %17129 = vmatprep.subr.bf16.mxu1 %v21660_v16  ;;  %v1269_v10 = vadd.f32 %v1236_v22, %v1203_v8  ;;  %v1270_v23 = vadd.f32 %v1237_v53, %v1204_v6  ;;  %v21762_v46 = vadd.f32 %v1254_v52, %v1221_v4  ;;  %v14617_v24 = vpop.f32.mrb[14].mxu1 }
 0x2bb   : > { %26739 = vst [vmem:[#allocation63_spill] sm:$0xff] %v21748_v28  ;;  %26740 = vst [vmem:[#allocation66_spill] sm:$0xff] %v21752_v55  ;;  %v21767_v28 = vadd.f32 %v1255_v35, %v1222_v62  ;;  %v21769_v7 = vadd.f32 %v1238_v0, %v1205_v59  ;;  %v1223_v55 = vmul.f32 %v860_v34, %v860_v34  ;;  %v14618_v8 = vpop.f32.mrb[15].mxu1  ;;  %v26742_v62 = vld [vmem:[#allocation30_spill] sm:$0xff]  ;;  %v26743_v34 = vand.u32 4294901760, %v21684_v11 }
 0x2bc   : > { %v1256_v42 = vmul.f32 %v893_v5, %v893_v5  ;;  %v21771_v48 = vadd.f32 %v1239_v19, %v1206_v61  ;;  %v1224_v43 = vmul.f32 %v861_v44, %v861_v44  ;;  %v1257_v16 = vmul.f32 %v894_v13, %v894_v13 }
 0x2bd   : > { %v1207_v50 = vmul.f32 %v844_v3, %v844_v3  ;;  %17131 = vmatpush3.bf16.msra.mxu1 %v21680_v26  ;;  %v1208_v6 = vmul.f32 %v845_v21, %v845_v21  ;;  %v1240_v22 = vmul.f32 %v877_v39, %v877_v39  ;;  %v1241_v53 = vmul.f32 %v878_v9, %v878_v9  ;;  %v26744_v21 = vld [vmem:[#allocation31_spill] sm:$0xff] }
 0x2be   : > { %v21774_v4 = vadd.f32 %v14618_v8, %v14617_v24  ;;  %16372 = vmatmul.mubr.f32.vlgmr.msra.gmra.mrb[38].mxu0 %v26742_v62  ;;  %17133 = vmatprep.subr.bf16.mxu1 %v21695_v30  ;;  %v21781_v52 = vsub.f32 %v21684_v11, %v26743_v34  ;;  %v21784_v44 = vsub.f32 %v21716_v40, %v6341_v15  ;;  %v6347_v13 = vand.u32 4294901760, %v1269_v10  ;;  %v16333_v5 = vpop.f32.mrb[12].mxu0 }
 0x2bf   : > { %v6350_v35 = vand.u32 4294901760, %v1270_v23  ;;  %16375 = vmatpush3.msra.mxu0 %v21547_v47  ;;  %16376 = vmatprep.mubr.f32.mxu0 %v26744_v21  ;;  %v21789_v24 = vpack.c.bf16 %v6344_v36, %v6341_v15  ;;  %v6401_v59 = vand.u32 4294901760, %v21762_v46  ;;  %v6404_v0 = vand.u32 4294901760, %v21767_v28  ;;  %v26771_v21 = vld [vmem:[#allocation64_spill] sm:$0xff] }
 0x2c0   : > { %v21793_v61 = vadd.f32 %v1256_v42, %v1223_v55  ;;  %v21796_v11 = vsub.f32 %v21722_v25, %v6344_v36  ;;  %16379 = vmatprep.subr.mxu0 %v21522_v51  ;;  %v26040_v40 = vand.u32 4294901760, %v21769_v7  ;;  %v26039_v19 = vand.u32 4294901760, %v21771_v48  ;;  %v3096_v55 = vpop.f32.mrb[13].mxu0 }
 0x2c1   : > { %26745 = vst [vmem:[#allocation69_spill] sm:$0xff] %v21789_v24  ;;  %v21801_v47 = vadd.f32 %v1257_v16, %v1224_v43  ;;  %17135 = vmatpush3.bf16.msra.mxu1 %v21710_v49  ;;  %v21804_v15 = vpack.c.bf16 %v6398_v29, %v6395_v41  ;;  %v21807_v3 = vsub.f32 %v21724_v37, %v6395_v41  ;;  %v26070_v30 = vand.u32 4294901760, %v21784_v44 }
 0x2c2   : > { %v21809_v42 = vadd.f32 %v1240_v22, %v1207_v50  ;;  %v21811_v36 = vadd.f32 %v1241_v53, %v1208_v6  ;;  %v18080_v25 = vadd.f32 %v16333_v5, %v21601_v14  ;;  %17137 = vmatprep.subr.bf16.mxu1 %v21743_v18  ;;  %v21816_v16 = vsub.f32 %v21731_v27, %v6398_v29 }
 0x2c3   : > { %26746 = vst [vmem:[#allocation57_spill] sm:$0xff] %v21804_v15  ;;  %v21818_v43 = vpack.c.bf16 %v6350_v35, %v6347_v13  ;;  %v21820_v39 = vsub.f32 %v1269_v10, %v6347_v13  ;;  %v18081_v9 = vadd.f32 %v3096_v55, %v21582_v20  ;;  %v21823_v37 = vsub.f32 %v1270_v23, %v6350_v35  ;;  %v26751_v13 = vld [vmem:[#allocation32_spill] sm:$0xff] }
 0x2c4   : > { %v21829_v14 = vpack.c.bf16 %v6404_v0, %v6401_v59  ;;  %v6407_v50 = vand.u32 4294901760, %v21793_v61  ;;  %v3157_v41 = vcombine.high %v18080_v25, %v18080_v25  ;;  %v3164_v27 = vrot.slane %v18080_v25, %v21673_v1 }
 0x2c5   : > { %26747 = vst [vmem:[#allocation71_spill] sm:$0xff] %v21818_v43  ;;  %26748 = vst [vmem:[#allocation72_spill] sm:$0xff] %v21823_v37  ;;  %v21837_v29 = vpack.c.bf16 %v26039_v19, %v26040_v40  ;;  %v6410_v20 = vand.u32 4294901760, %v21801_v47  ;;  %v3108_v23 = vcombine.high %v18081_v9, %v18081_v9  ;;  %v3115_v10 = vrot.slane %v18081_v9, %v21673_v1  ;;  %v26752_v9 = vld [vmem:[#allocation35_spill] sm:$0xff] }
 0x2c6   : > { %26749 = vst [vmem:[#allocation73_spill] sm:$0xff] %v21829_v14  ;;  %17139 = vmatpush3.bf16.msra.mxu1 %v21789_v24  ;;  %v3171_v22 = vrot.slane %v3157_v41, %v21673_v1  ;;  %v3172_v53 = vcombine.high %v3164_v27, %v3164_v27  ;;  %v3180_v34 = vrot.slane %v3164_v27, %v21673_v1  ;;  %14273 = vst.sshfl [vmem:[%s21848_s20 + $0x40] sm:$0x1 pattern:$0x73625140] %v3164_v27 }
 0x2c7   : > { %26750 = vst [vmem:[#allocation74_spill] sm:$0xff] %v21837_v29  ;;  %16377 = vmatmul.mubr.f32.vlgmr.msra.gmra.mrb[38].mxu0 %v26751_v13  ;;  %17141 = vmatprep.subr.bf16.mxu1 %v21804_v15  ;;  %v3122_v5 = vrot.slane %v3108_v23, %v21673_v1  ;;  %v3123_v25 = vcombine.high %v3115_v10, %v3115_v10  ;;  %14269 = vst.sshfl [vmem:[%s21848_s20] sm:$0x1 pattern:$0x73625140] %v3115_v10 }
 0x2c8   : > { %v3131_v55 = vrot.slane %v3115_v10, %v21673_v1  ;;  %16380 = vmatpush3.msra.mxu0 %v21522_v51  ;;  %16381 = vmatprep.mubr.f32.mxu0 %v26752_v9  ;;  %v3173_v27 = vcombine.high %v3171_v22, %v3171_v22  ;;  %v3187_v19 = vrot.slane %v3171_v22, %v21673_v1 }
 0x2c9   : > { %v3194_v40 = vrot.slane %v3172_v53, %v21673_v1  ;;  %v3202_v23 = vcombine.high %v3180_v34, %v3180_v34  ;;  %14274 = vst.sshfl [vmem:[%s21848_s20 + $0x48] sm:$0x1 pattern:$0x73625140] %v3172_v53  ;;  %16384 = vmatprep.subr.mxu0 %v21593_v2  ;;  %v3124_v10 = vcombine.high %v3122_v5, %v3122_v5  ;;  %v26042_v53 = vand.u32 4294901760, %v21607_v31 }
 0x2ca   : > { %14275 = vst.sshfl [vmem:[%s21848_s20 + $0x60] sm:$0x1 pattern:$0x73625140] %v3171_v22  ;;  %v3138_v6 = vrot.slane %v3122_v5, %v21673_v1  ;;  %v3145_v8 = vrot.slane %v3123_v25, %v21673_v1  ;;  %v3153_v41 = vcombine.high %v3131_v55, %v3131_v55  ;;  %17143 = vmatpush3.bf16.msra.mxu1 %v21818_v43 }
 0x2cb   : > { %14270 = vst.sshfl [vmem:[%s21848_s20 + $0x8] sm:$0x1 pattern:$0x73625140] %v3123_v25  ;;  %v3203_v35 = vcombine.high %v3187_v19, %v3187_v19  ;;  %v3204_v34 = vcombine.high %v3194_v40, %v3194_v40  ;;  %3230 = vst [vmem:[%s21848_s20 + $0x50] sm:$0x1] %v3202_v23  ;;  %17145 = vmatprep.subr.bf16.mxu1 %v21829_v14  ;;  %v21877_v22 = vpack.c.bf16 %v6410_v20, %v6407_v50 }
 0x2cc   : > { %14271 = vst.sshfl [vmem:[%s21848_s20 + $0x20] sm:$0x1 pattern:$0x73625140] %v3122_v5  ;;  %v3152_v5 = vrot.slane %v3124_v10, %v21673_v1  ;;  %v3154_v25 = vcombine.high %v3138_v6, %v3138_v6  ;;  %v3155_v55 = vcombine.high %v3145_v8, %v3145_v8  ;;  %3222 = vst [vmem:[%s21848_s20 + $0x10] sm:$0x1] %v3153_v41 }
 0x2cd   : > { %14276 = vst.sshfl [vmem:[%s21848_s20 + $0x68] sm:$0x1 pattern:$0x73625140] %v3173_v27  ;;  %26753 = vst [vmem:[#allocation75_spill] sm:$0xff] %v21877_v22  ;;  %v26041_v40 = vand.u32 4294901760, %v21614_v63  ;;  %v21889_v19 = vsub.f32 %v21762_v46, %v6401_v59  ;;  %v21894_v27 = vsub.f32 %v21767_v28, %v6404_v0 }
 0x2ce   : > { %14272 = vst.sshfl [vmem:[%s21848_s20 + $0x28] sm:$0x1 pattern:$0x73625140] %v3124_v10  ;;  %3231 = vst [vmem:[%s21848_s20 + $0x58] sm:$0x1] %v3204_v34  ;;  %17147 = vmatpush3.bf16.msra.mxu1 %v21837_v29 }
 0x2cf   : > { %3234 = vst [vmem:[%s21848_s20 + $0x70] sm:$0x1] %v3203_v35  ;;  %v26754_v6 = vand.u32 4294901760, %v21586_v17  ;;  %v26755_v41 = vand.u32 4294901760, %v21604_v33  ;;  %v3156_v35 = vcombine.high %v3152_v5, %v3152_v5  ;;  %3223 = vst [vmem:[%s21848_s20 + $0x18] sm:$0x1] %v3155_v55  ;;  %17149 = vmatprep.subr.bf16.mxu1 %v21877_v22 }
 0x2d0   : > { %3226 = vst [vmem:[%s21848_s20 + $0x30] sm:$0x1] %v3154_v25  ;;  %v26756_v46 = vand.u32 4294901760, %v21809_v42  ;;  %v26757_v59 = vand.u32 4294901760, %v21811_v36  ;;  %v26043_v28 = vand.u32 4294901760, %v21624_v56  ;;  %v26044_v0 = vand.u32 4294901760, %v21640_v45 }
 0x2d1   : > { %v6559_v8 = vsub.f32 %v21586_v17, %v26754_v6  ;;  %v6566_v23 = vsub.f32 %v21604_v33, %v26755_v41  ;;  %v26759_v34 = vld [vmem:[#allocation50_spill] sm:$0xff]  ;;  %v26760_v6 = vand.u32 4294901760, %v21769_v7  ;;  %v26761_v25 = vand.u32 4294901760, %v21771_v48  ;;  %3227 = vst [vmem:[%s21848_s20 + $0x38] sm:$0x1] %v3156_v35  ;;  %v26765_v1 = vld [vmem:[#allocation41_spill] sm:$0xff] }
 0x2d2   : > { %v21909_v10 = vpack.c.bf16 %v26757_v59, %v26756_v46  ;;  %16382 = vmatmul.mubr.f32.vlgmr.msra.gmra.mrb[38].mxu0 %v26759_v34  ;;  %v17184_v41 = vpack.c.bf16 %v21604_v33, %v21586_v17  ;;  %v21932_v46 = vsub.f32 %v21793_v61, %v6407_v50 }
 0x2d3   : > { %v21917_v5 = vsub.f32 %v21769_v7, %v26760_v6  ;;  %v21922_v55 = vsub.f32 %v21771_v48, %v26761_v25  ;;  %16385 = vmatpush3.msra.mxu0 %v21593_v2  ;;  %16386 = vmatprep.mubr.f32.mxu0 %v26736_v57  ;;  %v6447_v7 = vsub.f32 %v21607_v31, %v26042_v53  ;;  %v6560_v35 = vand.u32 4294901760, %v6559_v8 }
 0x2d4   : > { %26758 = vst [vmem:[#allocation76_spill] sm:$0xff] %v21909_v10  ;;  %v6454_v48 = vsub.f32 %v21614_v63, %v26041_v40  ;;  %v17186_v2 = vpack.c.bf16 %v21614_v63, %v21607_v31  ;;  %16389 = vmatprep.subr.mxu0 %v21522_v51  ;;  %v6567_v61 = vand.u32 4294901760, %v6566_v23  ;;  %17151 = vmatpush3.bf16.msra.mxu1 %v21909_v10  ;;  %v26762_v23 = vand.u32 4294901760, %v21809_v42  ;;  %v26772_v10 = vld [vmem:[#allocation67_spill] sm:$0xff] }
 0x2d5   : > { %v17188_v6 = vpack.c.bf16 %v21640_v45, %v21624_v56  ;;  %v17190_v25 = vpack.c.bf16 %v21658_v12, %v21655_v58  ;;  %v6573_v40 = vsub.f32 %v21624_v56, %v26043_v28  ;;  %v6580_v53 = vsub.f32 %v21640_v45, %v26044_v0  ;;  %17185 = vmatprep.subr.bf16.mxu1 %v17184_v41 }
 0x2d6   : > { %v21960_v8 = vsub.f32 %v21801_v47, %v6410_v20  ;;  %v21965_v50 = vsub.f32 %v21809_v42, %v26762_v23  ;;  %v26763_v28 = vmov %v26757_v59  ;;  %v6448_v0 = vand.u32 4294901760, %v6447_v7  ;;  %v26770_v59 = vld [vmem:[#allocation58_spill] sm:$0xff] }
 0x2d7   : > { %v21972_v9 = vsub.f32 %v21811_v36, %v26763_v28  ;;  %v6455_v13 = vand.u32 4294901760, %v6454_v48  ;;  %v26764_v47 = vand.u32 4294901760, %v21655_v58  ;;  %6423 = vmatmul.mubr.f32.vlgmr.msra.gmra.mrb[38].mxu1 %v26765_v1  ;;  %v17152_v42 = vpack.c.bf16 %v6567_v61, %v6560_v35 }
 0x2d8   : > { %v17192_v41 = vpack.c.bf16 %v21664_v60, %v21662_v54  ;;  %v26766_v23 = vand.u32 4294901760, %v21658_v12  ;;  %17187 = vmatpush3.bf16.msra.mxu1 %v17186_v2  ;;  %v17194_v36 = vpack.c.bf16 %v21693_v38, %v21671_v32  ;;  %v6574_v28 = vand.u32 4294901760, %v6573_v40 }
 0x2d9   : > { %v6461_v20 = vsub.f32 %v21655_v58, %v26764_v47  ;;  %v6581_v7 = vand.u32 4294901760, %v6580_v53  ;;  %v26767_v47 = vld [vmem:[#allocation48_spill] sm:$0xff]  ;;  %17189 = vmatprep.subr.bf16.mxu1 %v17188_v6  ;;  %v26768_v35 = vand.u32 4294901760, %v21662_v54  ;;  %v14690_v53 = vpop.f32.mrb[16].mxu1  ;;  %v17154_v48 = vpack.c.bf16 %v6455_v13, %v6448_v0 }
 0x2da   : > { %v6468_v34 = vsub.f32 %v21658_v12, %v26766_v23  ;;  %6432 = vmatprep.mubr.f32.mxu1 %v26767_v47  ;;  %16387 = vmatmul.mubr.f32.vlgmr.msra.gmra.mrb[38].mxu0 %v26742_v62  ;;  %v26769_v23 = vand.u32 4294901760, %v21664_v60  ;;  %v17196_v6 = vpack.c.bf16 %v26771_v21, %v26770_v59  ;;  %v14691_v29 = vpop.f32.mrb[17].mxu1  ;;  %v26774_v1 = vand.u32 4294901760, %v21671_v32 }
 0x2db   : > { %v6587_v61 = vsub.f32 %v21662_v54, %v26768_v35  ;;  %16390 = vmatpush3.msra.mxu0 %v21522_v51  ;;  %16391 = vmatprep.mubr.f32.mxu0 %v26736_v57  ;;  %v6462_v47 = vand.u32 4294901760, %v6461_v20  ;;  %v26773_v35 = vld [vmem:[#allocation68_spill] sm:$0xff]  ;;  %v26775_v57 = vld [vmem:[#allocation49_spill] sm:$0xff]  ;;  %v22009_v13 = vadd.f32 %v14691_v29, %v14690_v53  ;;  %v17156_v0 = vpack.c.bf16 %v6581_v7, %v6574_v28  ;;  %v26780_v53 = vld [vmem:[#allocation66_spill] sm:$0xff]  ;;  %v14693_v28 = vpop.f32.mrb[18].mxu1 }
 0x2dc   : > { %v6594_v2 = vsub.f32 %v21664_v60, %v26769_v23  ;;  %v17198_v22 = vpack.c.bf16 %v26773_v35, %v26772_v10  ;;  %17153 = vmatprep.subr.bf16.mxu0 %v17152_v42  ;;  %v6469_v23 = vand.u32 4294901760, %v6468_v34  ;;  %v6475_v40 = vsub.f32 %v21671_v32, %v26774_v1  ;;  %6438 = vmatmul.mubr.f32.gmra.mrb[40].mxu1 %v26775_v57  ;;  %v26777_v42 = vld [vmem:[#allocation34_spill] sm:$0xff] }
 0x2dd   : > { %17191 = vmatpush3.bf16.msra.mxu1 %v17190_v25  ;;  %v26776_v20 = vand.u32 4294901760, %v21693_v38  ;;  %6812 = vmatprep.mubr.f32.mxu1 %v26777_v42  ;;  %v6588_v34 = vand.u32 4294901760, %v6587_v61  ;;  %v26778_v1 = vand.u32 4294901760, %v26770_v59  ;;  %v26779_v51 = vand.u32 4294901760, %v26771_v21  ;;  %v14694_v42 = vpop.f32.mrb[19].mxu1 }
 0x2de   : > { %17193 = vmatprep.subr.bf16.mxu1 %v17192_v41  ;;  %v6595_v15 = vand.u32 4294901760, %v6594_v2  ;;  %v17200_v25 = vpack.c.bf16 %v21781_v52, %v26780_v53  ;;  %v17202_v7 = vpack.c.bf16 %v21796_v11, %v21784_v44  ;;  %v26068_v41 = vand.u32 4294901760, %v21781_v52 }
 0x2df   : > { %v6482_v43 = vsub.f32 %v21693_v38, %v26776_v20  ;;  %v6601_v14 = vsub.f32 %v26770_v59, %v26778_v1  ;;  %v6608_v29 = vsub.f32 %v26771_v21, %v26779_v51  ;;  %v17158_v61 = vpack.c.bf16 %v6469_v23, %v6462_v47 }
 0x2e0   : > { %v6476_v2 = vand.u32 4294901760, %v6475_v40  ;;  %v26781_v1 = vand.u32 4294901760, %v26772_v10  ;;  %v26782_v51 = vand.u32 4294901760, %v26773_v35  ;;  %v22033_v49 = vadd.f32 %v14694_v42, %v14693_v28 }
 0x2e1   : > { %17195 = vmatpush3.bf16.msra.mxu1 %v17194_v36  ;;  %v6483_v18 = vand.u32 4294901760, %v6482_v43  ;;  %v26071_v20 = vand.u32 4294901760, %v21796_v11  ;;  %v17160_v47 = vpack.c.bf16 %v6595_v15, %v6588_v34  ;;  %v6602_v40 = vand.u32 4294901760, %v6601_v14  ;;  %v14652_v34 = vpop.f32.mrb[14].mxu0 }
 0x2e2   : > { %v6489_v57 = vsub.f32 %v26772_v10, %v26781_v1  ;;  %v6496_v24 = vsub.f32 %v26773_v35, %v26782_v51  ;;  %16392 = vmatmul.mubr.f32.vlgmr.msra.gmra.mrb[38].mxu0 %v26742_v62  ;;  %17197 = vmatprep.subr.bf16.mxu1 %v17196_v6  ;;  %v6609_v23 = vand.u32 4294901760, %v6608_v29  ;;  %v17204_v1 = vpack.c.bf16 %v21816_v16, %v21807_v3  ;;  %v26784_v51 = vld [vmem:[#allocation33_spill] sm:$0xff] }
 0x2e3   : > { %17155 = vmatpush3.bf16.msra.mxu0 %v17154_v48  ;;  %v17206_v36 = vpack.c.bf16 %v21823_v37, %v21820_v39  ;;  %v26783_v43 = vand.u32 4294901760, %v26780_v53  ;;  %v6622_v28 = vsub.f32 %v21781_v52, %v26068_v41  ;;  %6668 = vmatprep.mubr.f32.mxu0 %v26784_v51  ;;  %v17162_v29 = vpack.c.bf16 %v6483_v18, %v6476_v2  ;;  %v26787_v18 = vld [vmem:[#allocation63_spill] sm:$0xff] }
 0x2e4   : > { %17157 = vmatprep.subr.bf16.mxu0 %v17156_v0  ;;  %v6490_v15 = vand.u32 4294901760, %v6489_v57  ;;  %v6497_v14 = vand.u32 4294901760, %v6496_v24  ;;  %v6510_v41 = vsub.f32 %v21796_v11, %v26071_v20  ;;  %v14653_v0 = vpop.f32.mrb[15].mxu0  ;;  %v17164_v57 = vpack.c.bf16 %v6609_v23, %v6602_v40 }
 0x2e5   : > { %v6615_v42 = vsub.f32 %v26780_v53, %v26783_v43  ;;  %17199 = vmatpush3.bf16.msra.mxu1 %v17198_v22  ;;  %v6503_v43 = vsub.f32 %v21784_v44, %v26070_v30  ;;  %v17208_v24 = vpack.c.bf16 %v21894_v27, %v21889_v19  ;;  %v14654_v22 = vadd.f32 %v14653_v0, %v14652_v34 }
 0x2e6   : > { %17201 = vmatprep.subr.bf16.mxu1 %v17200_v25  ;;  %v6623_v30 = vand.u32 4294901760, %v6622_v28  ;;  %v17166_v20 = vpack.c.bf16 %v6497_v14, %v6490_v15  ;;  %v17210_v62 = vpack.c.bf16 %v21922_v55, %v21917_v5  ;;  %v26785_v25 = vand.u32 4294901760, %v21807_v3 }
 0x2e7   : > { %17159 = vmatpush3.bf16.msra.mxu0 %v17158_v61  ;;  %v6616_v2 = vand.u32 4294901760, %v6615_v42  ;;  %v26786_v23 = vand.u32 4294901760, %v21816_v16  ;;  %v3594_v34 = vadd.f32 %v14654_v22, %v26787_v18  ;;  %v14655_v61 = vpop.f32.mrb[16].mxu0  ;;  %v6504_v42 = vand.u32 4294901760, %v6503_v43 }
 0x2e8   : > { %17161 = vmatprep.subr.bf16.mxu0 %v17160_v47  ;;  %v6629_v40 = vsub.f32 %v21807_v3, %v26785_v25  ;;  %v6511_v28 = vand.u32 4294901760, %v6510_v41  ;;  %v26788_v47 = vand.u32 4294901760, %v21820_v39  ;;  %v14656_v14 = vpop.f32.mrb[17].mxu0  ;;  %v26789_v0 = vand.u32 4294901760, %v21823_v37 }
 0x2e9   : > { %v6636_v48 = vsub.f32 %v21816_v16, %v26786_v23  ;;  %17203 = vmatpush3.bf16.msra.mxu1 %v17202_v7  ;;  %v26790_v6 = vand.u32 4294901760, %v21889_v19  ;;  %v6537_v7 = vand.u32 4294901760, %v21922_v55  ;;  %v14657_v43 = vadd.f32 %v14656_v14, %v14655_v61  ;;  %v895_v14 = vld [vmem:[%s21472_s13 + $0x100] sm:$0x1] }
 0x2ea   : > { %v6517_v15 = vsub.f32 %v21820_v39, %v26788_v47  ;;  %17205 = vmatprep.subr.bf16.mxu1 %v17204_v1  ;;  %v6524_v25 = vsub.f32 %v21823_v37, %v26789_v0  ;;  %v17168_v41 = vpack.c.bf16 %v6623_v30, %v6616_v2  ;;  %v26791_v22 = vand.u32 4294901760, %v21894_v27 }
 0x2eb   : > { %v6643_v23 = vsub.f32 %v21889_v19, %v26790_v6  ;;  %17163 = vmatpush3.bf16.msra.mxu0 %v17162_v29  ;;  %v22087_v1 = vadd.f32 %v22009_v13, %v3594_v34  ;;  %v6630_v0 = vand.u32 4294901760, %v6629_v40  ;;  %v6637_v26 = vand.u32 4294901760, %v6636_v48 }
 0x2ec   : > { %v6650_v47 = vsub.f32 %v21894_v27, %v26791_v22  ;;  %17165 = vmatprep.subr.bf16.mxu0 %v17164_v57  ;;  %v6656_v37 = vand.u32 4294901760, %v21932_v46  ;;  %v6663_v6 = vand.u32 4294901760, %v21960_v8  ;;  %v3601_v18 = vadd.f32 %v14657_v43, %v21774_v4 }
 0x2ed   : > { %17207 = vmatpush3.bf16.msra.mxu1 %v17206_v36  ;;  %v17170_v61 = vpack.c.bf16 %v6511_v28, %v6504_v42  ;;  %v6518_v29 = vand.u32 4294901760, %v6517_v15  ;;  %v17212_v30 = vpack.c.bf16 %v21960_v8, %v21932_v46  ;;  %v6525_v2 = vand.u32 4294901760, %v6524_v25 }
 0x2ee   : > { %17209 = vmatprep.subr.bf16.mxu1 %v17208_v24  ;;  %v6644_v13 = vand.u32 4294901760, %v6643_v23  ;;  %v26792_v57 = vand.u32 4294901760, %v21917_v5  ;;  %v6538_v40 = vsub.f32 %v21922_v55, %v6537_v7  ;;  %v22101_v4 = vadd.f32 %v22033_v49, %v3601_v18  ;;  %v26837_v55 = vld [vmem:[#allocation65_spill] sm:$0xff] }
 0x2ef   : > { %17167 = vmatpush3.bf16.msra.mxu0 %v17166_v20  ;;  %v6651_v36 = vand.u32 4294901760, %v6650_v47  ;;  %v26077_v34 = vand.u32 4294901760, %v21965_v50  ;;  %v26076_v24 = vand.u32 4294901760, %v21972_v9  ;;  %v17172_v42 = vpack.c.bf16 %v6637_v26, %v6630_v0  ;;  %v862_v20 = vld [vmem:[%s19596_s18 + $0x100] sm:$0x1] }
 0x2f0   : > { %v6531_v48 = vsub.f32 %v21917_v5, %v26792_v57  ;;  %17169 = vmatprep.subr.bf16.mxu0 %v17168_v41  ;;  %v6657_v28 = vsub.f32 %v21932_v46, %v6656_v37  ;;  %v6664_v15 = vsub.f32 %v21960_v8, %v6663_v6  ;;  %v17214_v49 = vpack.c.bf16 %v21972_v9, %v21965_v50 }
 0x2f1   : > { %17211 = vmatpush3.bf16.msra.mxu1 %v17210_v62  ;;  %v17174_v25 = vpack.c.bf16 %v6525_v2, %v6518_v29  ;;  %v26793_v18 = vand.u32 4294901760, %v21586_v17  ;;  %v26794_v26 = vand.u32 4294901760, %v21604_v33  ;;  %v17176_v41 = vpack.c.bf16 %v6651_v36, %v6644_v13 }
 0x2f2   : > { %17213 = vmatprep.subr.bf16.mxu1 %v17212_v30  ;;  %v6532_v23 = vand.u32 4294901760, %v6531_v48  ;;  %v6539_v22 = vand.u32 4294901760, %v6538_v40  ;;  %v6545_v62 = vsub.f32 %v21965_v50, %v26077_v34  ;;  %v6552_v47 = vsub.f32 %v21972_v9, %v26076_v24 }
 0x2f3   : > { %v17248_v43 = vpack.c.bf16 %v26794_v26, %v26793_v18  ;;  %17171 = vmatpush3.bf16.msra.mxu0 %v17170_v61  ;;  %v6658_v0 = vand.u32 4294901760, %v6657_v28  ;;  %v6665_v29 = vand.u32 4294901760, %v6664_v15  ;;  %v1225_v30 = vmul.f32 %v862_v20, %v862_v20  ;;  %v26799_v28 = vld [vmem:[#allocation38_spill] sm:$0xff]  ;;  %v26805_v26 = vld [vmem:[#allocation45_spill] sm:$0xff] }
 0x2f4   : > { %17173 = vmatprep.subr.bf16.mxu0 %v17172_v42  ;;  %v1258_v2 = vmul.f32 %v895_v14, %v895_v14  ;;  %v26795_v17 = vand.u32 4294901760, %v21607_v31  ;;  %v26796_v33 = vand.u32 4294901760, %v21614_v63  ;;  %v26797_v13 = vand.u32 4294901760, %v21624_v56  ;;  %v26802_v14 = vld [vmem:[#allocation44_spill] sm:$0xff] }
 0x2f5   : > { %17215 = vmatpush3.bf16.msra.mxu1 %v17214_v49  ;;  %v26798_v57 = vand.u32 4294901760, %v21640_v45  ;;  %v17178_v40 = vpack.c.bf16 %v6539_v22, %v6532_v23  ;;  %v6546_v36 = vand.u32 4294901760, %v6545_v62  ;;  %v6553_v42 = vand.u32 4294901760, %v6552_v47 }
 0x2f6   : > { %v17250_v61 = vpack.c.bf16 %v26796_v33, %v26795_v17  ;;  %17249 = vmatprep.subr.bf16.mxu1 %v17248_v43  ;;  %v17180_v15 = vpack.c.bf16 %v6665_v29, %v6658_v0  ;;  %v1291_v49 = vadd.f32 %v1258_v2, %v1225_v30  ;;  %v26800_v31 = vand.u32 4294901760, %v21655_v58  ;;  %v14766_v23 = vpop.f32.mrb[20].mxu1  ;;  %v18287_v0 = vld [vmem:[%s19566_s7 + $0x80] sm:$0xff]  ;;  %v18289_v2 = vld [vmem:[%s19573_s21 + $0x80] sm:$0xff] }
 0x2f7   : > { %v17252_v48 = vpack.c.bf16 %v26798_v57, %v26797_v13  ;;  %17175 = vmatpush3.bf16.msra.mxu0 %v17174_v25  ;;  %v26801_v63 = vand.u32 4294901760, %v21658_v12  ;;  %v26803_v56 = vand.u32 4294901760, %v21662_v54  ;;  %v26804_v45 = vand.u32 4294901760, %v21664_v60  ;;  %v14767_v58 = vpop.f32.mrb[21].mxu1  ;;  %v18288_v29 = vld [vmem:[%s19576_s5 + $0x80] sm:$0xff] }
 0x2f8   : > { %17177 = vmatprep.subr.bf16.mxu0 %v17176_v41  ;;  %6815 = vmatmul.mubr.f32.vlgmr.msra.gmra.mrb[42].mxu1 %v26799_v28  ;;  %v17182_v18 = vpack.c.bf16 %v6553_v42, %v6546_v36  ;;  %v6314_v12 = vsel %vm1695_vm1, %v1291_v49, 0  ;;  %v22145_v43 = vadd.f32 %v14767_v58, %v14766_v23  ;;  %v26806_v54 = vand.u32 4294901760, %v21671_v32  ;;  %v18290_v32 = vld [vmem:[%s19583_s26 + $0x80] sm:$0xff]  ;;  %v18292_v36 = vld [vmem:[%s19576_s5 + $0x88] sm:$0xff]  ;;  %v18294_v49 = vld [vmem:[%s19583_s26 + $0x88] sm:$0xff] }
 0x2f9   : > { %17251 = vmatpush3.bf16.msra.mxu1 %v17250_v61  ;;  %v17254_v20 = vpack.c.bf16 %v26801_v63, %v26800_v31  ;;  %6821 = vmatprep.mubr.f32.mxu1 %v26802_v14  ;;  %v17256_v25 = vpack.c.bf16 %v26804_v45, %v26803_v56  ;;  %v26807_v60 = vand.u32 4294901760, %v21693_v38  ;;  %v26808_v22 = vand.u32 4294901760, %v26770_v59  ;;  %v26810_v61 = vld [vmem:[#allocation52_spill] sm:$0xff]  ;;  %v26813_v63 = vld [vmem:[#allocation37_spill] sm:$0xff] }
 0x2fa   : > { %17253 = vmatprep.subr.bf16.mxu1 %v17252_v48  ;;  %v26809_v62 = vand.u32 4294901760, %v26771_v21  ;;  %v1308_v30 = vmul.f32 %v18288_v29, %v18287_v0  ;;  %v1341_v17 = vmul.f32 %v18290_v32, %v18289_v2  ;;  %v14769_v38 = vpop.f32.mrb[22].mxu1  ;;  %v22160_v33 = vand.u32 4294901760, %v6314_v12  ;;  %v26816_v45 = vld [vmem:[#allocation53_spill] sm:$0xff]  ;;  %v18295_v58 = vld [vmem:[%s19566_s7] sm:$0xff]  ;;  %v18301_v0 = vld [vmem:[%s19573_s21 + $0x8] sm:$0xff] }
 0x2fb   : > { %17179 = vmatpush3.bf16.msra.mxu0 %v17178_v40  ;;  %v17258_v41 = vpack.c.bf16 %v26807_v60, %v26806_v54  ;;  %v14770_v59 = vpop.f32.mrb[23].mxu1  ;;  %v26811_v21 = vand.u32 4294901760, %v26772_v10  ;;  %v26812_v57 = vand.u32 4294901760, %v26773_v35  ;;  %v18291_v40 = vld [vmem:[%s19566_s7 + $0x88] sm:$0xff]  ;;  %v26814_v10 = vand.u32 4294901760, %v26780_v53  ;;  %v18296_v54 = vld [vmem:[%s19576_s5] sm:$0xff] }
 0x2fc   : > { %17181 = vmatprep.subr.bf16.mxu0 %v17180_v15  ;;  %6824 = vmatmul.mubr.f32.gmra.mrb[44].mxu1 %v26805_v26  ;;  %v17260_v47 = vpack.c.bf16 %v26809_v62, %v26808_v22  ;;  %v22163_v13 = vadd.f32 %v14770_v59, %v14769_v38  ;;  %v1309_v42 = vmul.f32 %v18292_v36, %v18291_v40  ;;  %v18293_v15 = vld [vmem:[%s19573_s21 + $0x88] sm:$0xff]  ;;  %v26815_v35 = vand.u32 4294901760, %v21781_v52  ;;  %v18297_v53 = vld [vmem:[%s19566_s7 + $0x8] sm:$0xff]  ;;  %v18299_v22 = vld [vmem:[%s19573_s21] sm:$0xff] }
 0x2fd   : > { %17255 = vmatpush3.bf16.msra.mxu1 %v17254_v20  ;;  %7109 = vmatprep.mubr.f32.mxu1 %v26784_v51  ;;  %v17262_v48 = vpack.c.bf16 %v26812_v57, %v26811_v21  ;;  %v1342_v31 = vmul.f32 %v18294_v49, %v18293_v15  ;;  %v22178_v56 = vadd.f32 %v1341_v17, %v1308_v30  ;;  %v18300_v62 = vld [vmem:[%s19583_s26] sm:$0xff]  ;;  %v18302_v29 = vld [vmem:[%s19583_s26 + $0x8] sm:$0xff]  ;;  %v26819_v32 = vand.u32 4294901760, %v21784_v44  ;;  %v18349_v26 = vld [vmem:[%s19573_s21 + $0x38] sm:$0xff] }
 0x2fe   : > { %17257 = vmatprep.subr.bf16.mxu1 %v17256_v25  ;;  %v17264_v20 = vpack.c.bf16 %v26815_v35, %v26814_v10  ;;  %v26817_v25 = vld [vmem:[#allocation42_spill] sm:$0xff]  ;;  %v22183_v23 = vsub.f32 %v6314_v12, %v22160_v33  ;;  %v1292_v60 = vmul.f32 %v18296_v54, %v18295_v58  ;;  %v1326_v30 = vmul.f32 %v18302_v29, %v18301_v0  ;;  %v26821_v59 = vld [vmem:[#allocation43_spill] sm:$0xff]  ;;  %v18350_v14 = vld [vmem:[%s19583_s26 + $0x38] sm:$0xff] }
 0x2ff   : > { %17183 = vmatpush3.bf16.msra.mxu0 %v17182_v18  ;;  %v26818_v18 = vld [vmem:[#allocation55_spill] sm:$0xff]  ;;  %v26820_v12 = vand.u32 4294901760, %v21796_v11  ;;  %v22198_v38 = vadd.f32 %v1342_v31, %v1309_v42  ;;  %v26822_v57 = vand.u32 4294901760, %v21807_v3  ;;  %v26823_v40 = vand.u32 4294901760, %v21816_v16  ;;  %v26826_v42 = vld [vmem:[#allocation72_spill] sm:$0xff] }
 0x300   : > { %17217 = vmatprep.subr.bf16.mxu0 %v26810_v61  ;;  %v14728_v2 = vpop.f32.mrb[18].mxu0  ;;  %v26824_v44 = vld [vmem:[#allocation59_spill] sm:$0xff]  ;;  %v26825_v11 = vand.u32 4294901760, %v21820_v39  ;;  %v26827_v49 = vand.u32 4294901760, %v26826_v42  ;;  %v26828_v10 = vand.u32 4294901760, %v21889_v19  ;;  %v26829_v35 = vand.u32 4294901760, %v21894_v27 }
 0x301   : > { %17259 = vmatpush3.bf16.msra.mxu1 %v17258_v41  ;;  %v18298_v41 = vld [vmem:[%s19576_s5 + $0x8] sm:$0xff]  ;;  %v17266_v17 = vpack.c.bf16 %v26820_v12, %v26819_v32  ;;  %v14729_v21 = vpop.f32.mrb[19].mxu0  ;;  %v17268_v36 = vpack.c.bf16 %v26823_v40, %v26822_v57  ;;  %v22218_v58 = vand.u32 4294901760, %v22183_v23  ;;  %v18305_v0 = vld [vmem:[%s19566_s7 + $0x98] sm:$0xff]  ;;  %v18308_v29 = vld [vmem:[%s19583_s26 + $0x90] sm:$0xff] }
 0x302   : > { %6670 = vmatmul.mubr.f32.vlgmr.msra.gmra.mrb[40].mxu0 %v26813_v63  ;;  %17261 = vmatprep.subr.bf16.mxu1 %v17260_v47  ;;  %v1293_v52 = vmul.f32 %v18298_v41, %v18297_v53  ;;  %v1325_v47 = vmul.f32 %v18300_v62, %v18299_v22  ;;  %v14730_v15 = vadd.f32 %v14729_v21, %v14728_v2  ;;  %v26831_v16 = vld [vmem:[#allocation60_spill] sm:$0xff]  ;;  %v18303_v53 = vld [vmem:[%s19566_s7 + $0x90] sm:$0xff]  ;;  %v7907_v62 = vand.u32 4294901760, %v22198_v38 }
 0x303   : > { %17219 = vmatpush3.bf16.msra.mxu0 %v26816_v45  ;;  %6675 = vmatprep.mubr.f32.mxu0 %v26817_v25  ;;  %v17270_v31 = vpack.c.bf16 %v26827_v49, %v26825_v11  ;;  %v17272_v3 = vpack.c.bf16 %v26829_v35, %v26828_v10  ;;  %v18304_v41 = vld [vmem:[%s19576_s5 + $0x90] sm:$0xff]  ;;  %v18309_v32 = vld [vmem:[%s19573_s21 + $0x98] sm:$0xff]  ;;  %v18314_v11 = vld [vmem:[%s19576_s5 + $0x18] sm:$0xff] }
 0x304   : > { %17221 = vmatprep.subr.bf16.mxu0 %v26818_v18  ;;  %v22220_v54 = vadd.f32 %v1325_v47, %v1292_v60  ;;  %v22222_v39 = vadd.f32 %v1326_v30, %v1293_v52  ;;  %v1310_v19 = vmul.f32 %v18304_v41, %v18303_v53  ;;  %v3856_v27 = vadd.f32 %v14730_v15, %v22087_v1  ;;  %v14731_v22 = vpop.f32.mrb[20].mxu0  ;;  %v18306_v60 = vld [vmem:[%s19576_s5 + $0x98] sm:$0xff]  ;;  %v18307_v52 = vld [vmem:[%s19573_s21 + $0x90] sm:$0xff]  ;;  %v18310_v12 = vld [vmem:[%s19583_s26 + $0x98] sm:$0xff] }
 0x305   : > { %17263 = vmatpush3.bf16.msra.mxu1 %v17262_v48  ;;  %v26075_v48 = vand.u32 4294901760, %v22178_v56  ;;  %v1311_v47 = vmul.f32 %v18306_v60, %v18305_v0  ;;  %v1343_v30 = vmul.f32 %v18308_v29, %v18307_v52  ;;  %v14732_v2 = vpop.f32.mrb[21].mxu0  ;;  %v18311_v21 = vld [vmem:[%s19566_s7 + $0x10] sm:$0xff]  ;;  %v18313_v15 = vld [vmem:[%s19566_s7 + $0x18] sm:$0xff]  ;;  %v18315_v35 = vld [vmem:[%s19573_s21 + $0x10] sm:$0xff] }
 0x306   : > { %6677 = vmatmul.mubr.f32.gmra.mrb[42].mxu0 %v26821_v59  ;;  %17265 = vmatprep.subr.bf16.mxu1 %v17264_v20  ;;  %v26830_v20 = vld [vmem:[#allocation36_spill] sm:$0xff]  ;;  %v18312_v57 = vld [vmem:[%s19576_s5 + $0x10] sm:$0xff]  ;;  %v14733_v42 = vadd.f32 %v14732_v2, %v14731_v22  ;;  %v22245_v10 = vadd.f32 %v22145_v43, %v3856_v27  ;;  %v18325_v27 = vld [vmem:[%s19573_s21 + $0xa8] sm:$0xff] }
 0x307   : > { %17223 = vmatpush3.bf16.msra.mxu0 %v26824_v44  ;;  %6928 = vmatprep.mubr.f32.mxu0 %v26830_v20  ;;  %v22235_v1 = vsub.f32 %v22178_v56, %v26075_v48  ;;  %v1294_v40 = vmul.f32 %v18312_v57, %v18311_v21  ;;  %v26833_v49 = vld [vmem:[#allocation62_spill] sm:$0xff]  ;;  %v18316_v53 = vld [vmem:[%s19583_s26 + $0x10] sm:$0xff]  ;;  %v18317_v0 = vld [vmem:[%s19573_s21 + $0x18] sm:$0xff] }
 0x308   : > { %17225 = vmatprep.subr.bf16.mxu0 %v26831_v16  ;;  %v1327_v41 = vmul.f32 %v18316_v53, %v18315_v35  ;;  %v18318_v60 = vld [vmem:[%s19583_s26 + $0x18] sm:$0xff]  ;;  %v26834_v29 = vld [vmem:[#allocation54_spill] sm:$0xff]  ;;  %v3867_v34 = vadd.f32 %v14733_v42, %v22101_v4  ;;  %v26835_v35 = vand.u32 4294901760, %v21917_v5  ;;  %v7856_v4 = vand.u32 4294901760, %v22220_v54 }
 0x309   : > { %17267 = vmatpush3.bf16.msra.mxu1 %v17266_v17  ;;  %26832 = vst [vmem:[#allocation58_spill] sm:$0xff] %v22235_v1  ;;  %v1344_v17 = vmul.f32 %v18310_v12, %v18309_v32  ;;  %v1328_v52 = vmul.f32 %v18318_v60, %v18317_v0  ;;  %v18319_v32 = vld [vmem:[%s19566_s7 + $0xa0] sm:$0xff]  ;;  %v18321_v2 = vld [vmem:[%s19566_s7 + $0xa8] sm:$0xff]  ;;  %v18326_v48 = vld [vmem:[%s19583_s26 + $0xa8] sm:$0xff]  ;;  %v17276_v0 = vpack.c.bf16 %v6663_v6, %v6656_v37  ;;  %v7859_v37 = vand.u32 4294901760, %v22222_v39 }
 0x30a   : > { %17269 = vmatprep.subr.bf16.mxu1 %v17268_v36  ;;  %v1295_v36 = vmul.f32 %v18314_v11, %v18313_v15  ;;  %v18320_v12 = vld [vmem:[%s19576_s5 + $0xa0] sm:$0xff]  ;;  %v18322_v21 = vld [vmem:[%s19576_s5 + $0xa8] sm:$0xff]  ;;  %v18323_v15 = vld [vmem:[%s19573_s21 + $0xa0] sm:$0xff]  ;;  %v1346_v24 = vmul.f32 %v18326_v48, %v18325_v27  ;;  %v17274_v53 = vpack.c.bf16 %v6537_v7, %v26835_v35  ;;  %v7324_v60 = vsub.f32 %v22183_v23, %v22218_v58 }
 0x30b   : > { %17227 = vmatpush3.bf16.msra.mxu0 %v26833_v49  ;;  %v1312_v22 = vmul.f32 %v18320_v12, %v18319_v32  ;;  %v1313_v57 = vmul.f32 %v18322_v21, %v18321_v2  ;;  %v18324_v11 = vld [vmem:[%s19583_s26 + $0xa0] sm:$0xff]  ;;  %v22274_v48 = vsub.f32 %v22198_v38, %v7907_v62  ;;  %v1376_v5 = vadd.f32 %v1343_v30, %v1310_v19  ;;  %v18328_v21 = vld [vmem:[%s19576_s5 + $0x20] sm:$0xff] }
 0x30c   : > { %17229 = vmatprep.subr.bf16.mxu0 %v26834_v29  ;;  %v1345_v43 = vmul.f32 %v18324_v11, %v18323_v15  ;;  %v22279_v46 = vadd.f32 %v22163_v13, %v3867_v34  ;;  %v1360_v8 = vadd.f32 %v1327_v41, %v1294_v40  ;;  %v1361_v7 = vadd.f32 %v1328_v52, %v1295_v36  ;;  %v26838_v6 = vld [vmem:[#allocation70_spill] sm:$0xff]  ;;  %v18329_v15 = vld [vmem:[%s19566_s7 + $0x28] sm:$0xff] }
 0x30d   : > { %17271 = vmatpush3.bf16.msra.mxu1 %v17270_v31  ;;  %26836 = vst [vmem:[#allocation64_spill] sm:$0xff] %v22274_v48  ;;  %v1377_v31 = vadd.f32 %v1344_v17, %v1311_v47  ;;  %v22283_v42 = vadd.f32 %v1346_v24, %v1313_v57  ;;  %v26079_v32 = vand.u32 4294901760, %v22235_v1  ;;  %v26839_v19 = vand.u32 4294901760, %v21965_v50  ;;  %v26842_v50 = vld [vmem:[#allocation69_spill] sm:$0xff] }
 0x30e   : > { %17273 = vmatprep.subr.bf16.mxu1 %v17272_v3  ;;  %v1378_v3 = vadd.f32 %v1345_v43, %v1312_v22  ;;  %v26840_v47 = vand.u32 4294901760, %v21972_v9  ;;  %v22290_v17 = vand.u32 4294901760, %v7324_v60  ;;  %v26841_v34 = vand.u32 4294901760, %v22178_v56  ;;  %v18330_v11 = vld [vmem:[%s19576_s5 + $0x28] sm:$0xff]  ;;  %v18331_v27 = vld [vmem:[%s19573_s21 + $0x20] sm:$0xff] }
 0x30f   : > { %17231 = vmatpush3.bf16.msra.mxu0 %v26837_v55  ;;  %v7910_v24 = vand.u32 4294901760, %v1376_v5  ;;  %v7913_v40 = vand.u32 4294901760, %v1377_v31  ;;  %v26078_v36 = vand.u32 4294901760, %v22274_v48  ;;  %v22300_v9 = vpack.c.bf16 %v7859_v37, %v7856_v4  ;;  %v18332_v35 = vld [vmem:[%s19583_s26 + $0x20] sm:$0xff] }
 0x310   : > { %17233 = vmatprep.subr.bf16.mxu0 %v26838_v6  ;;  %v17278_v30 = vpack.c.bf16 %v26840_v47, %v26839_v19  ;;  %v22296_v13 = vpack.c.bf16 %v7907_v62, %v26841_v34  ;;  %v22303_v41 = vsub.f32 %v22220_v54, %v7856_v4  ;;  %v7862_v56 = vand.u32 4294901760, %v1360_v8  ;;  %v26844_v62 = vld [vmem:[#allocation57_spill] sm:$0xff]  ;;  %v18327_v54 = vld [vmem:[%s19566_s7 + $0x20] sm:$0xff] }
 0x311   : > { %17275 = vmatpush3.bf16.msra.mxu1 %v17274_v53  ;;  %v7865_v38 = vand.u32 4294901760, %v1361_v7  ;;  %v22307_v52 = vsub.f32 %v22222_v39, %v7859_v37  ;;  %v7916_v12 = vand.u32 4294901760, %v1378_v3  ;;  %v26080_v22 = vand.u32 4294901760, %v22283_v42  ;;  %v18333_v39 = vld [vmem:[%s19573_s21 + $0x28] sm:$0xff] }
 0x312   : > { %17277 = vmatprep.subr.bf16.mxu1 %v17276_v0  ;;  %26843 = vst [vmem:[#allocation67_spill] sm:$0xff] %v22303_v41  ;;  %v22313_v2 = vsub.f32 %v22235_v1, %v26079_v32  ;;  %v1296_v57 = vmul.f32 %v18328_v21, %v18327_v54  ;;  %v1297_v43 = vmul.f32 %v18330_v11, %v18329_v15  ;;  %v18334_v0 = vld [vmem:[%s19583_s26 + $0x28] sm:$0xff]  ;;  %v26081_v15 = vand.u32 4294901760, %v22303_v41  ;;  %v18346_v32 = vld [vmem:[%s19583_s26 + $0x30] sm:$0xff] }
 0x313   : > { %17235 = vmatpush3.bf16.msra.mxu0 %v26842_v50  ;;  %26845 = vst [vmem:[#allocation68_spill] sm:$0xff] %v22307_v52  ;;  %v1329_v53 = vmul.f32 %v18332_v35, %v18331_v27  ;;  %v1330_v60 = vmul.f32 %v18334_v0, %v18333_v39  ;;  %v22324_v4 = vpack.c.bf16 %v7913_v40, %v7910_v24  ;;  %v18339_v39 = vld [vmem:[%s19566_s7 + $0xb8] sm:$0xff]  ;;  %v18351_v1 = vld [vmem:[%s19566_s7 + $0xc0] sm:$0xff] }
 0x314   : > { %17237 = vmatprep.subr.bf16.mxu0 %v26844_v62  ;;  %v22326_v37 = vsub.f32 %v1376_v5, %v7910_v24  ;;  %v22328_v19 = vsub.f32 %v1377_v31, %v7913_v40  ;;  %v8105_v47 = vsub.f32 %v22274_v48, %v26078_v36  ;;  %v22334_v34 = vpack.c.bf16 %v7865_v38, %v7862_v56  ;;  %v26851_v5 = vld [vmem:[#allocation73_spill] sm:$0xff]  ;;  %v18340_v0 = vld [vmem:[%s19576_s5 + $0xb8] sm:$0xff]  ;;  %v18345_v36 = vld [vmem:[%s19573_s21 + $0x30] sm:$0xff] }
 0x315   : > { %17279 = vmatpush3.bf16.msra.mxu1 %v17278_v30  ;;  %v26848_v30 = vld [vmem:[#allocation71_spill] sm:$0xff]  ;;  %v22336_v54 = vsub.f32 %v1360_v8, %v7862_v56  ;;  %v22338_v21 = vsub.f32 %v1361_v7, %v7865_v38  ;;  %v22345_v31 = vpack.c.bf16 %v26080_v22, %v7916_v12  ;;  %v22347_v24 = vsub.f32 %v1378_v3, %v7916_v12  ;;  %v18335_v40 = vld [vmem:[%s19566_s7 + $0xb0] sm:$0xff] }
 0x316   : > { %16394 = vmatprep.subr.mxu1 %v22160_v33  ;;  %26846 = vst [vmem:[#allocation66_spill] sm:$0xff] %v22326_v37  ;;  %26847 = vst [vmem:[#allocation63_spill] sm:$0xff] %v22328_v19  ;;  %v8099_v8 = vand.u32 4294901760, %v22313_v2  ;;  %v18336_v7 = vld [vmem:[%s19576_s5 + $0xb0] sm:$0xff]  ;;  %v22354_v38 = vadd.f32 %v1329_v53, %v1296_v57  ;;  %v22356_v11 = vadd.f32 %v1330_v60, %v1297_v43  ;;  %v18337_v3 = vld [vmem:[%s19573_s21 + $0xb0] sm:$0xff]  ;;  %v8106_v35 = vand.u32 4294901760, %v8105_v47 }
 0x317   : > { %17239 = vmatpush3.bf16.msra.mxu0 %v26848_v30  ;;  %26849 = vst [vmem:[#allocation52_spill] sm:$0xff] %v22336_v54  ;;  %26850 = vst [vmem:[#allocation53_spill] sm:$0xff] %v22338_v21  ;;  %v1314_v56 = vmul.f32 %v18336_v7, %v18335_v40  ;;  %v18338_v12 = vld [vmem:[%s19583_s26 + $0xb0] sm:$0xff]  ;;  %v1315_v40 = vmul.f32 %v18340_v0, %v18339_v39  ;;  %v18341_v57 = vld [vmem:[%s19573_s21 + $0xb8] sm:$0xff]  ;;  %v1331_v27 = vmul.f32 %v18346_v32, %v18345_v36 }
 0x318   : > { %17241 = vmatprep.subr.bf16.mxu0 %v26851_v5  ;;  %7111 = vmatmul.mubr.f32.vlgmr.msra.gmra.mrb[46].mxu1 %v26813_v63  ;;  %26852 = vst [vmem:[#allocation55_spill] sm:$0xff] %v22347_v24  ;;  %v1347_v2 = vmul.f32 %v18338_v12, %v18337_v3  ;;  %v18342_v43 = vld [vmem:[%s19583_s26 + $0xb8] sm:$0xff]  ;;  %v26853_v7 = vld [vmem:[#allocation74_spill] sm:$0xff]  ;;  %v22371_v3 = vsub.f32 %v22303_v41, %v26081_v15  ;;  %v26856_v32 = vand.u32 4294901760, %v22283_v42  ;;  %v7871_v28 = vand.u32 4294901760, %v22356_v11 }
 0x319   : > { %16395 = vmatpush3.msra.mxu1 %v22160_v33  ;;  %7116 = vmatprep.mubr.f32.mxu1 %v26817_v25  ;;  %v1348_v53 = vmul.f32 %v18342_v43, %v18341_v57  ;;  %v18343_v12 = vld [vmem:[%s19566_s7 + $0x30] sm:$0xff]  ;;  %v26854_v57 = vld [vmem:[#allocation75_spill] sm:$0xff]  ;;  %v1332_v15 = vmul.f32 %v18350_v14, %v18349_v26  ;;  %v26860_v41 = vld [vmem:[#allocation76_spill] sm:$0xff] }
 0x31a   : > { %16399 = vmatprep.subr.mxu1 %v22290_v17  ;;  %v18344_v39 = vld [vmem:[%s19576_s5 + $0x30] sm:$0xff]  ;;  %v18347_v43 = vld [vmem:[%s19566_s7 + $0x38] sm:$0xff]  ;;  %v22390_v36 = vsub.f32 %v22283_v42, %v26856_v32  ;;  %v1380_v26 = vadd.f32 %v1347_v2, %v1314_v56  ;;  %v26861_v42 = vand.u32 4294901760, %v22328_v19 }
 0x31b   : > { %17243 = vmatpush3.bf16.msra.mxu0 %v26853_v7  ;;  %v1298_v0 = vmul.f32 %v18344_v39, %v18343_v12  ;;  %v18348_v60 = vld [vmem:[%s19576_s5 + $0x38] sm:$0xff]  ;;  %v26858_v39 = vand.u32 4294901760, %v22307_v52  ;;  %v1381_v47 = vadd.f32 %v1348_v53, %v1315_v40  ;;  %v18353_v56 = vld [vmem:[%s19573_s21 + $0xc0] sm:$0xff]  ;;  %v26862_v40 = vld [vmem:[#allocation56_spill] sm:$0xff]  ;;  %v7987_v53 = vand.u32 4294901760, %v22371_v3 }
 0x31c   : > { %17245 = vmatprep.subr.bf16.mxu0 %v26854_v57  ;;  %7118 = vmatmul.mubr.f32.gmra.mrb[48].mxu1 %v26821_v59  ;;  %v1299_v22 = vmul.f32 %v18348_v60, %v18347_v43  ;;  %v26855_v12 = vld [vmem:[#allocation51_spill] sm:$0xff]  ;;  %26857 = vst [vmem:[#allocation59_spill] sm:$0xff] %v22390_v36  ;;  %v7868_v60 = vand.u32 4294901760, %v22354_v38  ;;  %v22396_v43 = vpack.c.bf16 %v8106_v35, %v8099_v8  ;;  %v18354_v2 = vld [vmem:[%s19583_s26 + $0xc0] sm:$0xff] }
 0x31d   : > { %16396 = vmatprep.mubr.f32.mxu1 %v26855_v12  ;;  %v7993_v14 = vsub.f32 %v22307_v52, %v26858_v39  ;;  %v26859_v12 = vand.u32 4294901760, %v22326_v37  ;;  %v8119_v32 = vsub.f32 %v22328_v19, %v26861_v42  ;;  %v1364_v48 = vadd.f32 %v1331_v27, %v1298_v0  ;;  %v18352_v39 = vld [vmem:[%s19576_s5 + $0xc0] sm:$0xff]  ;;  %v18356_v19 = vld [vmem:[%s19576_s5 + $0xc8] sm:$0xff]  ;;  %v18358_v3 = vld [vmem:[%s19583_s26 + $0xc8] sm:$0xff] }
 0x31e   : > { %v1316_v8 = vmul.f32 %v18352_v39, %v18351_v1  ;;  %v1349_v35 = vmul.f32 %v18354_v2, %v18353_v56  ;;  %v26863_v42 = vand.u32 4294901760, %v22336_v54  ;;  %v26864_v0 = vand.u32 4294901760, %v22338_v21  ;;  %v26865_v39 = vld [vmem:[#allocation29_spill] sm:$0xff] }
 0x31f   : > { %v8112_v20 = vsub.f32 %v22326_v37, %v26859_v12  ;;  %17247 = vmatpush3.bf16.msra.mxu0 %v26860_v41  ;;  %v1365_v12 = vadd.f32 %v1332_v15, %v1299_v22  ;;  %v7994_v56 = vand.u32 4294901760, %v7993_v14  ;;  %v7922_v2 = vand.u32 4294901760, %v1380_v26  ;;  %v18357_v37 = vld [vmem:[%s19573_s21 + $0xc8] sm:$0xff]  ;;  %v26866_v15 = vld [vmem:[#allocation40_spill] sm:$0xff] }
 0x320   : > { %17281 = vmatprep.subr.bf16.mxu0 %v26810_v61  ;;  %16397 = vmatmul.mubr.f32.vlgmr.msra.gmra.mrb[50].mxu1 %v26862_v40  ;;  %v8000_v27 = vsub.f32 %v22336_v54, %v26863_v42  ;;  %v8007_v1 = vsub.f32 %v22338_v21, %v26864_v0  ;;  %v18355_v61 = vld [vmem:[%s19566_s7 + $0xc8] sm:$0xff]  ;;  %v1350_v22 = vmul.f32 %v18358_v3, %v18357_v37  ;;  %v7925_v54 = vand.u32 4294901760, %v1381_v47  ;;  %v26868_v14 = vld [vmem:[#allocation46_spill] sm:$0xff]  ;;  %v14804_v0 = vpop.f32.mrb[22].mxu0 }
 0x321   : > { %16400 = vmatpush3.msra.mxu1 %v22290_v17  ;;  %16401 = vmatprep.mubr.f32.mxu1 %v26865_v39  ;;  %v1317_v40 = vmul.f32 %v18356_v19, %v18355_v61  ;;  %v22427_v42 = vpack.c.bf16 %v7871_v28, %v7868_v60  ;;  %v8113_v21 = vand.u32 4294901760, %v8112_v20  ;;  %v8120_v19 = vand.u32 4294901760, %v8119_v32  ;;  %v26869_v32 = vld [vmem:[#allocation47_spill] sm:$0xff] }
 0x322   : > { %6932 = vmatmul.mubr.f32.vlgmr.msra.gmra.mrb[44].mxu0 %v26866_v15  ;;  %16404 = vmatprep.subr.mxu1 %v22183_v23  ;;  %v7874_v61 = vand.u32 4294901760, %v1364_v48  ;;  %v22433_v52 = vadd.f32 %v1349_v35, %v1316_v8  ;;  %v22437_v37 = vsub.f32 %v22354_v38, %v7868_v60  ;;  %v7877_v3 = vand.u32 4294901760, %v1365_v12  ;;  %v14805_v8 = vpop.f32.mrb[23].mxu0 }
 0x323   : > { %26867 = vst [vmem:[#allocation72_spill] sm:$0xff] %v22427_v42  ;;  %17283 = vmatpush3.bf16.msra.mxu0 %v26816_v45  ;;  %6939 = vmatprep.mubr.f32.mxu0 %v26868_v14  ;;  %v8001_v15 = vand.u32 4294901760, %v8000_v27  ;;  %v8008_v42 = vand.u32 4294901760, %v8007_v1  ;;  %v22440_v17 = vsub.f32 %v22356_v11, %v7871_v28  ;;  %v22442_v45 = vpack.c.bf16 %v7994_v56, %v7987_v53 }
 0x324   : > { %17285 = vmatprep.subr.bf16.mxu0 %v26818_v18  ;;  %v22444_v14 = vsub.f32 %v1380_v26, %v7922_v2  ;;  %v1383_v20 = vadd.f32 %v1350_v22, %v1317_v40  ;;  %v22447_v35 = vpack.c.bf16 %v7925_v54, %v7922_v2  ;;  %v22449_v18 = vsub.f32 %v1381_v47, %v7925_v54  ;;  %v26873_v40 = vld [vmem:[#allocation30_spill] sm:$0xff]  ;;  %v14807_v56 = vpop.f32.mrb[24].mxu0  ;;  %v18359_v2 = vld [vmem:[%s19566_s7 + $0x40] sm:$0xff] }
 0x325   : > { %v26871_v38 = vand.u32 4294901760, %v22347_v24  ;;  %v26872_v27 = vand.u32 4294901760, %v22390_v36  ;;  %v14806_v11 = vadd.f32 %v14805_v8, %v14804_v0  ;;  %v22459_v26 = vpack.c.bf16 %v8120_v19, %v8113_v21  ;;  %v26875_v21 = vld [vmem:[#allocation31_spill] sm:$0xff]  ;;  %v18361_v19 = vld [vmem:[%s19566_s7 + $0x48] sm:$0xff] }
 0x326   : > { %6943 = vmatmul.mubr.f32.gmra.mrb[46].mxu0 %v26869_v32  ;;  %26870 = vst [vmem:[#allocation60_spill] sm:$0xff] %v22447_v35  ;;  %v22461_v54 = vsub.f32 %v1364_v48, %v7874_v61  ;;  %v7928_v47 = vand.u32 4294901760, %v22433_v52  ;;  %v22466_v53 = vpack.c.bf16 %v7877_v3, %v7874_v61  ;;  %v22468_v1 = vsub.f32 %v1365_v12, %v7877_v3  ;;  %v18360_v22 = vld [vmem:[%s19576_s5 + $0x40] sm:$0xff]  ;;  %v18362_v12 = vld [vmem:[%s19576_s5 + $0x48] sm:$0xff] }
 0x327   : > { %v8126_v60 = vsub.f32 %v22347_v24, %v26871_v38  ;;  %v8133_v28 = vsub.f32 %v22390_v36, %v26872_v27  ;;  %17287 = vmatpush3.bf16.msra.mxu0 %v26824_v44  ;;  %7220 = vmatprep.mubr.f32.mxu0 %v26784_v51  ;;  %v22470_v44 = vpack.c.bf16 %v8008_v42, %v8001_v15  ;;  %v14808_v15 = vpop.f32.mrb[25].mxu0  ;;  %v22486_v38 = vld [vmem:[%s19573_s21 + $0x48] sm:$0xff] }
 0x328   : > { %17289 = vmatprep.subr.bf16.mxu0 %v26831_v16  ;;  %16402 = vmatmul.mubr.f32.vlgmr.msra.gmra.mrb[50].mxu1 %v26873_v40  ;;  %26874 = vst [vmem:[#allocation62_spill] sm:$0xff] %v22466_v53  ;;  %v4146_v48 = vadd.f32 %v14806_v11, %v22245_v10  ;;  %v7931_v16 = vand.u32 4294901760, %v1383_v20  ;;  %v1300_v0 = vmul.f32 %v18360_v22, %v18359_v2  ;;  %v18364_v10 = vld [vmem:[%s19583_s26 + $0x40] sm:$0xff]  ;;  %26877 = vst [vmem:[#allocation65_spill] sm:$0xff] %v22486_v38  ;;  %v18366_v27 = vld [vmem:[%s19583_s26 + $0x48] sm:$0xff] }
 0x329   : > { %16405 = vmatpush3.msra.mxu1 %v22183_v23  ;;  %16406 = vmatprep.mubr.f32.mxu1 %v26875_v21  ;;  %v1301_v61 = vmul.f32 %v18362_v12, %v18361_v19  ;;  %v8127_v42 = vand.u32 4294901760, %v8126_v60  ;;  %v8134_v3 = vand.u32 4294901760, %v8133_v28  ;;  %v22481_v23 = vld [vmem:[%s19573_s21 + $0x40] sm:$0xff]  ;;  %v1334_v11 = vmul.f32 %v18366_v27, %v22486_v38  ;;  %v16363_v60 = vpop.f32.mrb[24].mxu1  ;;  %v22508_v38 = vld [vmem:[%s19573_s21 + $0xd0] sm:$0xff]  ;;  %v18373_v22 = vld [vmem:[%s19573_s21 + $0xd8] sm:$0xff] }
 0x32a   : > { %16409 = vmatprep.subr.mxu1 %v22160_v33  ;;  %26876 = vst [vmem:[#allocation54_spill] sm:$0xff] %v22481_v23  ;;  %v1333_v8 = vmul.f32 %v18364_v10, %v22481_v23  ;;  %v14809_v2 = vadd.f32 %v14808_v15, %v14807_v56  ;;  %v22492_v28 = vsub.f32 %v22433_v52, %v7928_v47  ;;  %v4635_v12 = vpop.f32.mrb[25].mxu1  ;;  %v22498_v10 = vld [vmem:[%s19566_s7 + $0xd0] sm:$0xff]  ;;  %v18369_v56 = vld [vmem:[%s19566_s7 + $0xd8] sm:$0xff]  ;;  %26880 = vst [vmem:[#allocation57_spill] sm:$0xff] %v22508_v38 }
 0x32b   : > { %17291 = vmatpush3.bf16.msra.mxu0 %v26833_v49  ;;  %26878 = vst [vmem:[#allocation70_spill] sm:$0xff] %v22498_v10  ;;  %v22501_v27 = vld [vmem:[%s19576_s5 + $0xd0] sm:$0xff]  ;;  %v18370_v15 = vld [vmem:[%s19576_s5 + $0xd8] sm:$0xff]  ;;  %v22511_v52 = vld [vmem:[%s19583_s26 + $0xd0] sm:$0xff]  ;;  %v18083_v36 = vadd.f32 %v4635_v12, %v4146_v48  ;;  %v22518_v24 = vpack.c.bf16 %v7931_v16, %v7928_v47  ;;  %v22520_v53 = vsub.f32 %v1383_v20, %v7931_v16  ;;  %v26884_v47 = vand.u32 4294901760, %v22437_v37 }
 0x32c   : > { %17293 = vmatprep.subr.bf16.mxu0 %v26834_v29  ;;  %26879 = vst [vmem:[#allocation69_spill] sm:$0xff] %v22501_v27  ;;  %v1318_v49 = vmul.f32 %v22501_v27, %v22498_v10  ;;  %v1319_v21 = vmul.f32 %v18370_v15, %v18369_v56  ;;  %26881 = vst [vmem:[#allocation71_spill] sm:$0xff] %v22511_v52  ;;  %v1351_v19 = vmul.f32 %v22511_v52, %v22508_v38  ;;  %v18374_v29 = vld [vmem:[%s19583_s26 + $0xd8] sm:$0xff] }
 0x32d   : > { %v1352_v23 = vmul.f32 %v18374_v29, %v18373_v22  ;;  %v4153_v32 = vadd.f32 %v14809_v2, %v22279_v46  ;;  %26882 = vst [vmem:[#allocation73_spill] sm:$0xff] %v22518_v24  ;;  %v22522_v10 = vpack.c.bf16 %v8134_v3, %v8127_v42  ;;  %v22524_v56 = vadd.f32 %v1333_v8, %v1300_v0  ;;  %v26883_v29 = vld [vmem:[#allocation61_spill] sm:$0xff]  ;;  %v26885_v48 = vld [vmem:[#allocation32_spill] sm:$0xff] }
 0x32e   : > { %v22526_v15 = vadd.f32 %v1334_v11, %v1301_v61  ;;  %v26110_v27 = vand.u32 4294901760, %v22444_v14  ;;  %v4647_v22 = vcombine.high %v18083_v36, %v18083_v36  ;;  %v4654_v46 = vrot.slane %v18083_v36, %v26883_v29  ;;  %v26887_v11 = vld [vmem:[#allocation35_spill] sm:$0xff]  ;;  %v22564_v2 = vld [vmem:[%s19576_s5 + $0x50] sm:$0xff] }
 0x32f   : > { %v18082_v52 = vadd.f32 %v16363_v60, %v4153_v32  ;;  %17295 = vmatpush3.bf16.msra.mxu0 %v26837_v55  ;;  %v22534_v20 = vsub.f32 %v22437_v37, %v26884_v47  ;;  %v26886_v16 = vand.u32 4294901760, %v22440_v17  ;;  %v22543_v55 = vadd.f32 %v1351_v19, %v1318_v49  ;;  %26889 = vst [vmem:[#allocation75_spill] sm:$0xff] %v22564_v2 }
 0x330   : > { %17297 = vmatprep.subr.bf16.mxu0 %v26838_v6  ;;  %16407 = vmatmul.mubr.f32.vlgmr.msra.gmra.mrb[50].mxu1 %v26885_v48  ;;  %v22545_v0 = vadd.f32 %v1352_v23, %v1319_v21  ;;  %v26109_v36 = vand.u32 4294901760, %v22449_v18  ;;  %v4661_v6 = vrot.slane %v4647_v22, %v26883_v29  ;;  %v4662_v3 = vcombine.high %v4654_v46, %v4654_v46  ;;  %v22561_v23 = vld [vmem:[%s19566_s7 + $0x50] sm:$0xff] }
 0x331   : > { %v22541_v32 = vsub.f32 %v22440_v17, %v26886_v16  ;;  %v4696_v61 = vcombine.high %v18082_v52, %v18082_v52  ;;  %v4703_v42 = vrot.slane %v18082_v52, %v26883_v29  ;;  %14277 = vst.sshfl [vmem:[%s21848_s20 + $0x1] sm:$0x1 pattern:$0x73625140] %v4654_v46  ;;  %16410 = vmatpush3.msra.mxu1 %v22160_v33  ;;  %26888 = vst [vmem:[#allocation74_spill] sm:$0xff] %v22561_v23 }
 0x332   : > { %v4670_v8 = vrot.slane %v4654_v46, %v26883_v29  ;;  %16411 = vmatprep.mubr.f32.mxu1 %v26887_v11  ;;  %16414 = vmatprep.subr.mxu1 %v22218_v58  ;;  %v22558_v21 = vsub.f32 %v22444_v14, %v26110_v27  ;;  %v1302_v60 = vmul.f32 %v22564_v2, %v22561_v23  ;;  %v22593_v27 = vld [vmem:[%s19583_s26 + $0x50] sm:$0xff] }
 0x333   : > { %v4710_v19 = vrot.slane %v4696_v61, %v26883_v29  ;;  %v4711_v12 = vcombine.high %v4703_v42, %v4703_v42  ;;  %v4719_v49 = vrot.slane %v4703_v42, %v26883_v29  ;;  %14281 = vst.sshfl [vmem:[%s21848_s20 + $0x41] sm:$0x1 pattern:$0x73625140] %v4703_v42  ;;  %v4663_v52 = vcombine.high %v4661_v6, %v4661_v6 }
 0x334   : > { %14278 = vst.sshfl [vmem:[%s21848_s20 + $0x9] sm:$0x1 pattern:$0x73625140] %v4662_v3  ;;  %17299 = vmatpush3.bf16.msra.mxu0 %v26842_v50  ;;  %v4677_v22 = vrot.slane %v4661_v6, %v26883_v29  ;;  %v4684_v46 = vrot.slane %v4662_v3, %v26883_v29  ;;  %v4692_v47 = vcombine.high %v4670_v8, %v4670_v8  ;;  %26891 = vst [vmem:[#allocation77_spill] sm:$0xff] %v22593_v27 }
 0x335   : > { %14279 = vst.sshfl [vmem:[%s21848_s20 + $0x21] sm:$0x1 pattern:$0x73625140] %v4661_v6  ;;  %17301 = vmatprep.subr.bf16.mxu0 %v26844_v62  ;;  %v22580_v16 = vsub.f32 %v22449_v18, %v26109_v36  ;;  %v4712_v61 = vcombine.high %v4710_v19, %v4710_v19  ;;  %v4726_v42 = vrot.slane %v4710_v19, %v26883_v29  ;;  %v22590_v36 = vld [vmem:[%s19573_s21 + $0x50] sm:$0xff] }
 0x336   : > { %v4733_v50 = vrot.slane %v4711_v12, %v26883_v29  ;;  %v4741_v6 = vcombine.high %v4719_v49, %v4719_v49  ;;  %14282 = vst.sshfl [vmem:[%s21848_s20 + $0x49] sm:$0x1 pattern:$0x73625140] %v4711_v12  ;;  %v4691_v3 = vrot.slane %v4663_v52, %v26883_v29  ;;  %v4693_v62 = vcombine.high %v4677_v22, %v4677_v22  ;;  %v26892_v22 = vld [vmem:[#allocation50_spill] sm:$0xff]  ;;  %v22651_v29 = vld [vmem:[%s19576_s5 + $0xe8] sm:$0xff] }
 0x337   : > { %14283 = vst.sshfl [vmem:[%s21848_s20 + $0x61] sm:$0x1 pattern:$0x73625140] %v4710_v19  ;;  %v4694_v8 = vcombine.high %v4684_v46, %v4684_v46  ;;  %4761 = vst [vmem:[%s21848_s20 + $0x11] sm:$0x1] %v4692_v47  ;;  %v1335_v11 = vmul.f32 %v22593_v27, %v22590_v36  ;;  %v4742_v48 = vcombine.high %v4726_v42, %v4726_v42 }
 0x338   : > { %14280 = vst.sshfl [vmem:[%s21848_s20 + $0x29] sm:$0x1 pattern:$0x73625140] %v4663_v52  ;;  %26890 = vst [vmem:[#allocation76_spill] sm:$0xff] %v22590_v36  ;;  %v4743_v12 = vcombine.high %v4733_v50, %v4733_v50  ;;  %17303 = vmatpush3.bf16.msra.mxu0 %v26848_v30  ;;  %v7880_v19 = vand.u32 4294901760, %v22524_v56  ;;  %v4695_v52 = vcombine.high %v4691_v3, %v4691_v3  ;;  %16412 = vmatmul.mubr.f32.vlgmr.msra.gmra.mrb[50].mxu1 %v26892_v22 }
 0x339   : > { %4769 = vst [vmem:[%s21848_s20 + $0x51] sm:$0x1] %v4741_v6  ;;  %14284 = vst.sshfl [vmem:[%s21848_s20 + $0x69] sm:$0x1 pattern:$0x73625140] %v4712_v61  ;;  %17305 = vmatprep.subr.bf16.mxu0 %v26851_v5  ;;  %16415 = vmatpush3.msra.mxu1 %v22218_v58  ;;  %v22634_v6 = vadd.f32 %v1335_v11, %v1302_v60 }
 0x33a   : > { %v7883_v49 = vand.u32 4294901760, %v22526_v15  ;;  %4762 = vst [vmem:[%s21848_s20 + $0x19] sm:$0x1] %v4694_v8  ;;  %4765 = vst [vmem:[%s21848_s20 + $0x31] sm:$0x1] %v4693_v62  ;;  %v8015_v46 = vand.u32 4294901760, %v22534_v20  ;;  %16416 = vmatprep.mubr.f32.mxu1 %v26865_v39  ;;  %16419 = vmatprep.subr.mxu1 %v22160_v33 }
 0x33b   : > { %v8022_v30 = vand.u32 4294901760, %v22541_v32  ;;  %v7934_v47 = vand.u32 4294901760, %v22543_v55  ;;  %4770 = vst [vmem:[%s21848_s20 + $0x59] sm:$0x1] %v4743_v12  ;;  %4773 = vst [vmem:[%s21848_s20 + $0x71] sm:$0x1] %v4742_v48 }
 0x33c   : > { %v7937_v61 = vand.u32 4294901760, %v22545_v0  ;;  %v8141_v5 = vand.u32 4294901760, %v22558_v21  ;;  %v22616_v42 = vld [vmem:[%s19566_s7 + $0x58] sm:$0xff]  ;;  %v22624_v48 = vld [vmem:[%s19573_s21 + $0x58] sm:$0xff]  ;;  %4766 = vst [vmem:[%s21848_s20 + $0x39] sm:$0x1] %v4695_v52  ;;  %17307 = vmatpush3.bf16.msra.mxu0 %v26853_v7 }
 0x33d   : > { %26893 = vst [vmem:[#allocation78_spill] sm:$0xff] %v22616_v42  ;;  %v22619_v20 = vld [vmem:[%s19576_s5 + $0x58] sm:$0xff]  ;;  %26895 = vst [vmem:[#allocation80_spill] sm:$0xff] %v22624_v48  ;;  %v22627_v58 = vld [vmem:[%s19583_s26 + $0x58] sm:$0xff]  ;;  %v8148_v21 = vand.u32 4294901760, %v22580_v16  ;;  %17309 = vmatprep.subr.bf16.mxu0 %v26854_v57 }
 0x33e   : > { %26894 = vst [vmem:[#allocation79_spill] sm:$0xff] %v22619_v20  ;;  %v1303_v32 = vmul.f32 %v22619_v20, %v22616_v42  ;;  %26896 = vst [vmem:[#allocation81_spill] sm:$0xff] %v22627_v58  ;;  %v1336_v50 = vmul.f32 %v22627_v58, %v22624_v48  ;;  %v22640_v8 = vld [vmem:[%s19566_s7 + $0xe0] sm:$0xff]  ;;  %v22648_v22 = vld [vmem:[%s19566_s7 + $0xe8] sm:$0xff]  ;;  %v26120_v58 = vand.u32 4294901760, %v22492_v28  ;;  %v22689_v57 = vsub.f32 %v22545_v0, %v7937_v61 }
 0x33f   : > { %26897 = vst [vmem:[#allocation82_spill] sm:$0xff] %v22640_v8  ;;  %v22643_v12 = vld [vmem:[%s19576_s5 + $0xe0] sm:$0xff]  ;;  %26899 = vst [vmem:[#allocation84_spill] sm:$0xff] %v22648_v22  ;;  %v1321_v11 = vmul.f32 %v22651_v29, %v22648_v22  ;;  %v22656_v60 = vld [vmem:[%s19573_s21 + $0xe0] sm:$0xff]  ;;  %v22675_v22 = vsub.f32 %v22524_v56, %v7880_v19  ;;  %v22691_v56 = vpack.c.bf16 %v8148_v21, %v8141_v5 }
 0x340   : > { %26898 = vst [vmem:[#allocation83_spill] sm:$0xff] %v22643_v12  ;;  %v1320_v52 = vmul.f32 %v22643_v12, %v22640_v8  ;;  %26900 = vst [vmem:[#allocation85_spill] sm:$0xff] %v22651_v29  ;;  %v22659_v16 = vld [vmem:[%s19583_s26 + $0xe0] sm:$0xff]  ;;  %v22664_v62 = vld [vmem:[%s19573_s21 + $0xe8] sm:$0xff]  ;;  %v22672_v12 = vpack.c.bf16 %v7883_v49, %v7880_v19  ;;  %v22678_v29 = vsub.f32 %v22526_v15, %v7883_v49  ;;  %v26906_v49 = vand.u32 4294901760, %v22461_v54  ;;  %v14860_v27 = vpop.f32.mrb[26].mxu0 }
 0x341   : > { %26901 = vst [vmem:[#allocation86_spill] sm:$0xff] %v22656_v60  ;;  %26902 = vst [vmem:[#allocation87_spill] sm:$0xff] %v22659_v16  ;;  %v1353_v7 = vmul.f32 %v22659_v16, %v22656_v60  ;;  %v22667_v3 = vld [vmem:[%s19583_s26 + $0xe8] sm:$0xff]  ;;  %v22681_v16 = vpack.c.bf16 %v8022_v30, %v8015_v46  ;;  %v22683_v60 = vpack.c.bf16 %v7937_v61, %v7934_v47  ;;  %17311 = vmatpush3.bf16.msra.mxu0 %v26860_v41  ;;  %v22720_v5 = vld [vmem:[%s19566_s7 + $0x60] sm:$0xff] }
 0x342   : > { %26903 = vst [vmem:[#allocation88_spill] sm:$0xff] %v22664_v62  ;;  %26904 = vst [vmem:[#allocation89_spill] sm:$0xff] %v22667_v3  ;;  %v1354_v8 = vmul.f32 %v22667_v3, %v22664_v62  ;;  %v22686_v3 = vsub.f32 %v22543_v55, %v7934_v47  ;;  %v22693_v15 = vadd.f32 %v1336_v50, %v1303_v32  ;;  %v26907_v55 = vand.u32 4294901760, %v22468_v1  ;;  %v22723_v32 = vld [vmem:[%s19576_s5 + $0x60] sm:$0xff]  ;;  %v22728_v21 = vld [vmem:[%s19566_s7 + $0x68] sm:$0xff] }
 0x343   : > { %26905 = vst [vmem:[#allocation90_spill] sm:$0xff] %v22672_v12  ;;  %v22699_v46 = vsub.f32 %v22461_v54, %v26906_v49  ;;  %v22707_v30 = vadd.f32 %v1353_v7, %v1320_v52  ;;  %17313 = vmatprep.subr.bf16.mxu0 %v22296_v13  ;;  %16417 = vmatmul.mubr.f32.vlgmr.msra.gmra.mrb[50].mxu1 %v26873_v40  ;;  %26908 = vst [vmem:[#allocation91_spill] sm:$0xff] %v22720_v5  ;;  %v22741_v7 = vld [vmem:[%s19583_s26 + $0x60] sm:$0xff]  ;;  %v22815_v42 = vld [vmem:[%s19583_s26 + $0x70] sm:$0xff] }
 0x344   : > { %v22705_v0 = vsub.f32 %v22468_v1, %v26907_v55  ;;  %v22709_v47 = vadd.f32 %v1354_v8, %v1321_v11  ;;  %v22717_v41 = vsub.f32 %v22492_v28, %v26120_v58  ;;  %26909 = vst [vmem:[#allocation92_spill] sm:$0xff] %v22723_v32  ;;  %v1304_v50 = vmul.f32 %v22723_v32, %v22720_v5  ;;  %v22731_v8 = vld [vmem:[%s19576_s5 + $0x68] sm:$0xff]  ;;  %v22738_v11 = vld [vmem:[%s19573_s21 + $0x60] sm:$0xff]  ;;  %v22746_v55 = vld [vmem:[%s19573_s21 + $0x68] sm:$0xff] }
 0x345   : > { %26910 = vst [vmem:[#allocation93_spill] sm:$0xff] %v22728_v21  ;;  %26911 = vst [vmem:[#allocation94_spill] sm:$0xff] %v22731_v8  ;;  %v1305_v52 = vmul.f32 %v22731_v8, %v22728_v21  ;;  %16420 = vmatpush3.msra.mxu1 %v22160_v33  ;;  %16421 = vmatprep.mubr.f32.mxu1 %v26865_v39  ;;  %v1337_v49 = vmul.f32 %v22741_v7, %v22738_v11  ;;  %v22749_v58 = vld [vmem:[%s19583_s26 + $0x68] sm:$0xff]  ;;  %v22754_v61 = vld [vmem:[%s19566_s7 + $0xf0] sm:$0xff] }
 0x346   : > { %26912 = vst [vmem:[#allocation95_spill] sm:$0xff] %v22738_v11  ;;  %26913 = vst [vmem:[#allocation96_spill] sm:$0xff] %v22741_v7  ;;  %v1338_v33 = vmul.f32 %v22749_v58, %v22746_v55  ;;  %v22757_v19 = vld [vmem:[%s19576_s5 + $0xf0] sm:$0xff]  ;;  %7222 = vmatmul.mubr.f32.vlgmr.msra.gmra.mrb[48].mxu0 %v26813_v63  ;;  %17345 = vmatprep.subr.bf16.mxu1 %v22396_v43  ;;  %v22765_v5 = vld [vmem:[%s19566_s7 + $0xf8] sm:$0xff]  ;;  %v26925_v11 = vand.u32 4294901760, %v22520_v53 }
 0x347   : > { %26914 = vst [vmem:[#allocation97_spill] sm:$0xff] %v22746_v55  ;;  %26915 = vst [vmem:[#allocation98_spill] sm:$0xff] %v22749_v58  ;;  %v1322_v21 = vmul.f32 %v22757_v19, %v22754_v61  ;;  %v22768_v8 = vld [vmem:[%s19576_s5 + $0xf8] sm:$0xff]  ;;  %v22773_v55 = vld [vmem:[%s19573_s21 + $0xf0] sm:$0xff]  ;;  %17315 = vmatpush3.bf16.msra.mxu0 %v22300_v9  ;;  %7227 = vmatprep.mubr.f32.mxu0 %v26817_v25  ;;  %v22819_v23 = vadd.f32 %v1337_v49, %v1304_v50  ;;  %v14861_v50 = vpop.f32.mrb[27].mxu0  ;;  %v26154_v49 = vand.u32 4294901760, %v22675_v22 }
 0x348   : > { %26916 = vst [vmem:[#allocation99_spill] sm:$0xff] %v22754_v61  ;;  %26917 = vst [vmem:[#allocation100_spill] sm:$0xff] %v22757_v19  ;;  %v1323_v58 = vmul.f32 %v22768_v8, %v22765_v5  ;;  %v22776_v39 = vld [vmem:[%s19583_s26 + $0xf0] sm:$0xff]  ;;  %v22781_v43 = vld [vmem:[%s19573_s21 + $0xf8] sm:$0xff]  ;;  %v8161_v32 = vsub.f32 %v22520_v53, %v26925_v11  ;;  %17317 = vmatprep.subr.bf16.mxu0 %v22324_v4 }
 0x349   : > { %26918 = vst [vmem:[#allocation101_spill] sm:$0xff] %v22765_v5  ;;  %26919 = vst [vmem:[#allocation102_spill] sm:$0xff] %v22768_v8  ;;  %v1355_v61 = vmul.f32 %v22776_v39, %v22773_v55  ;;  %v22784_v7 = vld [vmem:[%s19583_s26 + $0xf8] sm:$0xff]  ;;  %v26924_v5 = vand.u32 4294901760, %v22634_v6  ;;  %v22807_v62 = vld [vmem:[%s19576_s5 + $0x70] sm:$0xff] }
 0x34a   : > { %26920 = vst [vmem:[#allocation103_spill] sm:$0xff] %v22773_v55  ;;  %26921 = vst [vmem:[#allocation104_spill] sm:$0xff] %v22776_v39  ;;  %v1356_v19 = vmul.f32 %v22784_v7, %v22781_v43  ;;  %v8029_v39 = vand.u32 4294901760, %v22699_v46  ;;  %v8036_v55 = vand.u32 4294901760, %v22705_v0  ;;  %v22812_v0 = vld [vmem:[%s19573_s21 + $0x70] sm:$0xff]  ;;  %v22827_v48 = vld [vmem:[%s19576_s5 + $0x78] sm:$0xff]  ;;  %7229 = vmatmul.mubr.f32.gmra.mrb[50].mxu0 %v26821_v59 }
 0x34b   : > { %26922 = vst [vmem:[#allocation105_spill] sm:$0xff] %v22781_v43  ;;  %26923 = vst [vmem:[#allocation106_spill] sm:$0xff] %v22784_v7  ;;  %v22793_v8 = vsub.f32 %v22634_v6, %v26924_v5  ;;  %v22804_v5 = vld [vmem:[%s19566_s7 + $0x70] sm:$0xff]  ;;  %v1339_v11 = vmul.f32 %v22815_v42, %v22812_v0  ;;  %v22821_v7 = vadd.f32 %v1338_v33, %v1305_v52  ;;  %v22824_v43 = vld [vmem:[%s19566_s7 + $0x78] sm:$0xff]  ;;  %v8155_v52 = vand.u32 4294901760, %v22717_v41 }
 0x34c   : > { %26926 = vst [vmem:[#allocation107_spill] sm:$0xff] %v22804_v5  ;;  %26927 = vst [vmem:[#allocation108_spill] sm:$0xff] %v22807_v62  ;;  %v1306_v46 = vmul.f32 %v22807_v62, %v22804_v5  ;;  %v1307_v20 = vmul.f32 %v22827_v48, %v22824_v43  ;;  %v22832_v5 = vld [vmem:[%s19573_s21 + $0x78] sm:$0xff]  ;;  %v22842_v33 = vadd.f32 %v1355_v61, %v1322_v21  ;;  %17319 = vmatpush3.bf16.msra.mxu0 %v22334_v34 }
 0x34d   : > { %26928 = vst [vmem:[#allocation109_spill] sm:$0xff] %v22812_v0  ;;  %26929 = vst [vmem:[#allocation110_spill] sm:$0xff] %v22815_v42  ;;  %v22835_v62 = vld [vmem:[%s19583_s26 + $0x78] sm:$0xff]  ;;  %v22844_v42 = vadd.f32 %v1356_v19, %v1323_v58  ;;  %17321 = vmatprep.subr.bf16.mxu0 %v22345_v31  ;;  %16422 = vmatmul.mubr.f32.vlgmr.msra.gmra.mrb[50].mxu1 %v26873_v40  ;;  %v26935_v41 = vand.u32 4294901760, %v22693_v15  ;;  %v22857_v58 = vpack.c.bf16 %v8036_v55, %v8029_v39 }
 0x34e   : > { %26930 = vst [vmem:[#allocation111_spill] sm:$0xff] %v22824_v43  ;;  %26931 = vst [vmem:[#allocation112_spill] sm:$0xff] %v22827_v48  ;;  %v1340_v36 = vmul.f32 %v22835_v62, %v22832_v5  ;;  %v14862_v43 = vadd.f32 %v14861_v50, %v14860_v27  ;;  %v8162_v48 = vand.u32 4294901760, %v8161_v32  ;;  %v22860_v19 = vadd.f32 %v1339_v11, %v1306_v46 }
 0x34f   : > { %26932 = vst [vmem:[#allocation113_spill] sm:$0xff] %v22832_v5  ;;  %26933 = vst [vmem:[#allocation114_spill] sm:$0xff] %v22835_v62  ;;  %v26934_v62 = vld [vmem:[#allocation39_spill] sm:$0xff]  ;;  %v22855_v61 = vsub.f32 %v22693_v15, %v26935_v41  ;;  %17347 = vmatpush3.bf16.msra.mxu1 %v22442_v45  ;;  %v26936_v32 = vand.u32 4294901760, %v22707_v30  ;;  %v14863_v41 = vpop.f32.mrb[28].mxu0  ;;  %8207 = vmatprep.mubr.f32.mxu1 %v26784_v51  ;;  %v26938_v39 = vand.u32 4294901760, %v22709_v47 }
 0x350   : > { %7956 = vmatprep.mubr.f32.mxu0 %v26934_v62  ;;  %v22870_v0 = vadd.f32 %v1340_v36, %v1307_v20  ;;  %17349 = vmatprep.subr.bf16.mxu1 %v22459_v26  ;;  %v8042_v55 = vsub.f32 %v22675_v22, %v26154_v49  ;;  %v14864_v36 = vpop.f32.mrb[29].mxu0  ;;  %v26939_v20 = vld [vmem:[#allocation72_spill] sm:$0xff]  ;;  %v17360_v2 = vpack.c.bf16 %v8162_v48, %v8155_v52  ;;  %v26940_v26 = vand.u32 4294901760, %v22678_v29  ;;  %v26947_v5 = vld [vmem:[#allocation62_spill] sm:$0xff] }
 0x351   : > { %v22866_v21 = vsub.f32 %v22707_v30, %v26936_v32  ;;  %v22877_v45 = vsub.f32 %v22709_v47, %v26938_v39  ;;  %17323 = vmatpush3.bf16.msra.mxu0 %v26939_v20  ;;  %v14898_v32 = vpop.f32.mrb[26].mxu1  ;;  %v26941_v39 = vand.u32 4294901760, %v22686_v3  ;;  %v14865_v40 = vadd.f32 %v14864_v36, %v14863_v41 }
 0x352   : > { %v8049_v50 = vsub.f32 %v22678_v29, %v26940_v26  ;;  %17325 = vmatprep.subr.bf16.mxu0 %v22447_v35  ;;  %v14899_v49 = vpop.f32.mrb[27].mxu1  ;;  %v26942_v46 = vand.u32 4294901760, %v22689_v57  ;;  %v26943_v26 = vand.u32 4294901760, %v22819_v23  ;;  %v26944_v36 = vand.u32 4294901760, %v22821_v7 }
 0x353   : > { %26937 = vst [vmem:[#allocation115_spill] sm:$0xff] %v22866_v21  ;;  %v8168_v27 = vsub.f32 %v22686_v3, %v26941_v39  ;;  %v14900_v62 = vadd.f32 %v14899_v49, %v14898_v32  ;;  %17351 = vmatpush3.bf16.msra.mxu1 %v22470_v44  ;;  %v26945_v48 = vand.u32 4294901760, %v22842_v33  ;;  %v26946_v44 = vand.u32 4294901760, %v22844_v42  ;;  %v14901_v35 = vpop.f32.mrb[28].mxu1 }
 0x354   : > { %v8175_v11 = vsub.f32 %v22689_v57, %v26942_v46  ;;  %v22902_v41 = vsub.f32 %v22819_v23, %v26943_v26  ;;  %v22907_v39 = vsub.f32 %v22821_v7, %v26944_v36  ;;  %v7901_v46 = vand.u32 4294901760, %v22870_v0  ;;  %17353 = vmatprep.subr.bf16.mxu1 %v22522_v10 }
 0x355   : > { %v22914_v49 = vsub.f32 %v22842_v33, %v26945_v48  ;;  %v22919_v32 = vsub.f32 %v22844_v42, %v26946_v44  ;;  %v22923_v36 = vadd.f32 %v14900_v62, %v14862_v43  ;;  %17327 = vmatpush3.bf16.msra.mxu0 %v26947_v5  ;;  %v8043_v38 = vand.u32 4294901760, %v8042_v55  ;;  %v14902_v55 = vpop.f32.mrb[29].mxu1 }
 0x356   : > { %v8050_v10 = vand.u32 4294901760, %v8049_v50  ;;  %v8169_v51 = vand.u32 4294901760, %v8168_v27  ;;  %17329 = vmatprep.subr.bf16.mxu0 %v22518_v24  ;;  %v8176_v48 = vand.u32 4294901760, %v8175_v11  ;;  %v26948_v20 = vand.u32 4294901760, %v22860_v19 }
 0x357   : > { %v26949_v26 = vand.u32 4294901760, %v22793_v8  ;;  %v26950_v62 = vand.u32 4294901760, %v22855_v61  ;;  %17355 = vmatpush3.bf16.msra.mxu1 %v22681_v16  ;;  %v22940_v27 = vsub.f32 %v22870_v0, %v7901_v46  ;;  %v26951_v24 = vand.u32 4294901760, %v22866_v21 }
 0x358   : > { %v22930_v44 = vsub.f32 %v22860_v19, %v26948_v20  ;;  %v14903_v20 = vadd.f32 %v14902_v55, %v14901_v35  ;;  %17357 = vmatprep.subr.bf16.mxu1 %v22691_v56  ;;  %v26952_v5 = vand.u32 4294901760, %v22877_v45  ;;  %v26953_v50 = vand.u32 4294901760, %v22634_v6 }
 0x359   : > { %v8056_v52 = vsub.f32 %v22793_v8, %v26949_v26  ;;  %v8063_v43 = vsub.f32 %v22855_v61, %v26950_v62  ;;  %v8182_v26 = vsub.f32 %v22866_v21, %v26951_v24  ;;  %17331 = vmatpush3.bf16.msra.mxu0 %v22672_v12  ;;  %v26954_v35 = vand.u32 4294901760, %v22693_v15 }
 0x35a   : > { %v8189_v62 = vsub.f32 %v22877_v45, %v26952_v5  ;;  %v26955_v56 = vand.u32 4294901760, %v22707_v30  ;;  %v26956_v24 = vand.u32 4294901760, %v22709_v47  ;;  %v22966_v21 = vadd.f32 %v14903_v20, %v14865_v40  ;;  %17333 = vmatprep.subr.bf16.mxu0 %v22683_v60 }
 0x35b   : > { %v22958_v55 = vpack.c.bf16 %v26954_v35, %v26953_v50  ;;  %v17362_v5 = vpack.c.bf16 %v8050_v10, %v8043_v38  ;;  %v17364_v0 = vpack.c.bf16 %v8176_v48, %v8169_v51  ;;  %v8057_v16 = vand.u32 4294901760, %v8056_v52  ;;  %17359 = vmatpush3.bf16.msra.mxu1 %v22857_v58 }
 0x35c   : > { %v22964_v11 = vpack.c.bf16 %v26956_v24, %v26955_v56  ;;  %v8064_v12 = vand.u32 4294901760, %v8063_v43  ;;  %v26957_v6 = vand.u32 4294901760, %v22902_v41  ;;  %v26958_v30 = vand.u32 4294901760, %v22907_v39  ;;  %17361 = vmatprep.subr.bf16.mxu1 %v17360_v2 }
 0x35d   : > { %v26167_v50 = vand.u32 4294901760, %v22930_v44  ;;  %v26166_v40 = vand.u32 4294901760, %v22940_v27  ;;  %v8183_v20 = vand.u32 4294901760, %v8182_v26  ;;  %v8190_v38 = vand.u32 4294901760, %v8189_v62  ;;  %17335 = vmatpush3.bf16.msra.mxu0 %v22958_v55 }
 0x35e   : > { %v8070_v15 = vsub.f32 %v22902_v41, %v26957_v6  ;;  %v8077_v47 = vsub.f32 %v22907_v39, %v26958_v30  ;;  %v26959_v51 = vand.u32 4294901760, %v22914_v49  ;;  %v26960_v58 = vand.u32 4294901760, %v22919_v32  ;;  %17337 = vmatprep.subr.bf16.mxu0 %v22964_v11 }
 0x35f   : > { %v26961_v48 = vand.u32 4294901760, %v22819_v23  ;;  %v26962_v43 = vand.u32 4294901760, %v22821_v7  ;;  %v26963_v2 = vand.u32 4294901760, %v22842_v33  ;;  %v26964_v26 = vand.u32 4294901760, %v22844_v42  ;;  %17363 = vmatpush3.bf16.msra.mxu1 %v17362_v5  ;;  %v26968_v5 = vld [vmem:[#allocation64_spill] sm:$0xff] }
 0x360   : > { %v8196_v52 = vsub.f32 %v22914_v49, %v26959_v51  ;;  %v8203_v10 = vsub.f32 %v22919_v32, %v26960_v58  ;;  %v17366_v56 = vpack.c.bf16 %v8064_v12, %v8057_v16  ;;  %v8071_v24 = vand.u32 4294901760, %v8070_v15  ;;  %17365 = vmatprep.subr.bf16.mxu1 %v17364_v0  ;;  %v26967_v16 = vld [vmem:[#allocation58_spill] sm:$0xff] }
 0x361   : > { %v22989_v35 = vpack.c.bf16 %v26962_v43, %v26961_v48  ;;  %v22996_v62 = vpack.c.bf16 %v26964_v26, %v26963_v2  ;;  %v8078_v6 = vand.u32 4294901760, %v8077_v47  ;;  %v8084_v23 = vsub.f32 %v22930_v44, %v26167_v50  ;;  %v26973_v2 = vld [vmem:[#allocation41_spill] sm:$0xff]  ;;  %v26974_v26 = vld [vmem:[#allocation52_spill] sm:$0xff] }
 0x362   : > { %v8091_v7 = vsub.f32 %v22940_v27, %v26166_v40  ;;  %v17368_v30 = vpack.c.bf16 %v8190_v38, %v8183_v20  ;;  %v8197_v51 = vand.u32 4294901760, %v8196_v52  ;;  %v8204_v33 = vand.u32 4294901760, %v8203_v10  ;;  %v26969_v20 = vld [vmem:[#allocation67_spill] sm:$0xff]  ;;  %v26970_v38 = vld [vmem:[#allocation68_spill] sm:$0xff] }
 0x363   : > { %17339 = vmatpush3.bf16.msra.mxu0 %v22989_v35  ;;  %v26965_v42 = vand.u32 4294901760, %v22860_v19  ;;  %v17376_v15 = vpack.c.bf16 %v26968_v5, %v26967_v16  ;;  %17367 = vmatpush3.bf16.msra.mxu1 %v17366_v56  ;;  %v17370_v47 = vpack.c.bf16 %v8078_v6, %v8071_v24  ;;  %v8085_v58 = vand.u32 4294901760, %v8084_v23  ;;  %v26971_v19 = vld [vmem:[#allocation66_spill] sm:$0xff]  ;;  %v26975_v56 = vld [vmem:[#allocation53_spill] sm:$0xff]  ;;  %v26976_v6 = vld [vmem:[#allocation48_spill] sm:$0xff] }
 0x364   : > { %17341 = vmatprep.subr.bf16.mxu0 %v22996_v62  ;;  %v8092_v48 = vand.u32 4294901760, %v8091_v7  ;;  %17369 = vmatprep.subr.bf16.mxu1 %v17368_v30  ;;  %v17372_v0 = vpack.c.bf16 %v8204_v33, %v8197_v51  ;;  %v17378_v52 = vpack.c.bf16 %v26970_v38, %v26969_v20  ;;  %v17382_v24 = vpack.c.bf16 %v26975_v56, %v26974_v26  ;;  %v26977_v23 = vld [vmem:[#allocation55_spill] sm:$0xff]  ;;  %v14936_v51 = vpop.f32.mrb[30].mxu0  ;;  %v26981_v40 = vld [vmem:[#allocation36_spill] sm:$0xff] }
 0x365   : > { %v23007_v12 = vpack.c.bf16 %v7901_v46, %v26965_v42  ;;  %v26972_v46 = vld [vmem:[#allocation63_spill] sm:$0xff]  ;;  %v14937_v33 = vpop.f32.mrb[31].mxu0  ;;  %v26979_v42 = vld [vmem:[#allocation49_spill] sm:$0xff]  ;;  %v17396_v50 = vpack.c.bf16 %v22689_v57, %v22686_v3 }
 0x366   : > { %v17380_v10 = vpack.c.bf16 %v26972_v46, %v26971_v19  ;;  %v17374_v43 = vpack.c.bf16 %v8092_v48, %v8085_v58  ;;  %v26978_v7 = vld [vmem:[#allocation59_spill] sm:$0xff]  ;;  %v26980_v58 = vld [vmem:[#allocation34_spill] sm:$0xff]  ;;  %v17388_v48 = vpack.c.bf16 %v22449_v18, %v22444_v14 }
 0x367   : > { %26966 = vst [vmem:[#allocation116_spill] sm:$0xff] %v23007_v12  ;;  %17343 = vmatpush3.bf16.msra.mxu0 %v23007_v12  ;;  %17371 = vmatpush3.bf16.msra.mxu1 %v17370_v47  ;;  %v17384_v30 = vpack.c.bf16 %v26978_v7, %v26977_v23  ;;  %v17386_v47 = vpack.c.bf16 %v22440_v17, %v22437_v37 }
 0x368   : > { %17377 = vmatprep.subr.bf16.mxu0 %v17376_v15  ;;  %17373 = vmatprep.subr.bf16.mxu1 %v17372_v0  ;;  %v14938_v15 = vadd.f32 %v14937_v33, %v14936_v51  ;;  %v17390_v51 = vpack.c.bf16 %v22468_v1, %v22461_v54  ;;  %v17392_v33 = vpack.c.bf16 %v22520_v53, %v22492_v28 }
 0x36a   : > { %7962 = vmatmul.mubr.f32.vlgmr.msra.gmra.mrb[52].mxu0 %v26973_v2  ;;  %v5278_v0 = vadd.f32 %v14938_v15, %v22923_v36  ;;  %v18418_v2 = vld [vmem:[%s19583_s26 + $0x100] sm:$0x1] }
 0x36b   : > { %17379 = vmatpush3.bf16.msra.mxu0 %v17378_v52  ;;  %7971 = vmatprep.mubr.f32.mxu0 %v26976_v6  ;;  %v14939_v52 = vpop.f32.mrb[32].mxu0  ;;  %v18417_v6 = vld [vmem:[%s19573_s21 + $0x100] sm:$0x1] }
 0x36c   : > { %17381 = vmatprep.subr.bf16.mxu0 %v17380_v10  ;;  %17375 = vmatpush3.bf16.msra.mxu1 %v17374_v43  ;;  %v14940_v10 = vpop.f32.mrb[33].mxu0 }
 0x36d   : > { %17409 = vmatprep.subr.bf16.mxu1 %v22296_v13  ;;  %v14941_v43 = vadd.f32 %v14940_v10, %v14939_v52 }
 0x36e   : > { %7977 = vmatmul.mubr.f32.gmra.mrb[54].mxu0 %v26979_v42 }
 0x36f   : > { %17383 = vmatpush3.bf16.msra.mxu0 %v17382_v24  ;;  %8351 = vmatprep.mubr.f32.mxu0 %v26980_v58  ;;  %v14974_v24 = vpop.f32.mrb[30].mxu1  ;;  %v5287_v36 = vadd.f32 %v14941_v43, %v22966_v21  ;;  %v26982_v43 = vld [vmem:[#allocation72_spill] sm:$0xff] }
 0x370   : > { %8209 = vmatmul.mubr.f32.vlgmr.msra.gmra.mrb[52].mxu1 %v26813_v63  ;;  %17385 = vmatprep.subr.bf16.mxu0 %v17384_v30  ;;  %v14975_v30 = vpop.f32.mrb[31].mxu1  ;;  %v18416_v58 = vld [vmem:[%s19576_s5 + $0x100] sm:$0x1] }
 0x371   : > { %17411 = vmatpush3.bf16.msra.mxu1 %v22300_v9  ;;  %8214 = vmatprep.mubr.f32.mxu1 %v26817_v25  ;;  %v14976_v15 = vadd.f32 %v14975_v30, %v14974_v24  ;;  %v14977_v52 = vpop.f32.mrb[32].mxu1  ;;  %v26983_v24 = vld [vmem:[#allocation60_spill] sm:$0xff] }
 0x372   : > { %17413 = vmatprep.subr.bf16.mxu1 %v22324_v4  ;;  %v14978_v10 = vpop.f32.mrb[33].mxu1 }
 0x373   : > { %17387 = vmatpush3.bf16.msra.mxu0 %v17386_v47  ;;  %v23044_v47 = vadd.f32 %v14976_v15, %v5278_v0  ;;  %v14979_v21 = vadd.f32 %v14978_v10, %v14977_v52  ;;  %v17398_v0 = vpack.c.bf16 %v22855_v61, %v22793_v8  ;;  %v26985_v15 = vld [vmem:[#allocation62_spill] sm:$0xff]  ;;  %v17404_v52 = vpack.c.bf16 %v22919_v32, %v22914_v49 }
 0x374   : > { %17389 = vmatprep.subr.bf16.mxu0 %v17388_v48  ;;  %8216 = vmatmul.mubr.f32.gmra.mrb[54].mxu1 %v26821_v59  ;;  %v17394_v48 = vpack.c.bf16 %v22678_v29, %v22675_v22  ;;  %v26988_v10 = vand.u32 4294901760, %v26967_v16  ;;  %v1357_v59 = vmul.f32 %v18418_v2, %v18417_v6  ;;  %v26992_v16 = vand.u32 4294901760, %v26971_v19  ;;  %v26994_v6 = vld [vmem:[#allocation38_spill] sm:$0xff] }
 0x375   : > { %17415 = vmatpush3.bf16.msra.mxu1 %v22334_v34  ;;  %8467 = vmatprep.mubr.f32.mxu1 %v26981_v40  ;;  %v23052_v30 = vadd.f32 %v14979_v21, %v5287_v36  ;;  %v26986_v40 = vld [vmem:[#allocation73_spill] sm:$0xff]  ;;  %v17402_v36 = vpack.c.bf16 %v22907_v39, %v22902_v41  ;;  %v26989_v21 = vand.u32 4294901760, %v26968_v5  ;;  %v26993_v5 = vand.u32 4294901760, %v26972_v46 }
 0x376   : > { %17417 = vmatprep.subr.bf16.mxu1 %v22345_v31  ;;  %v26997_v19 = vand.u32 4294901760, %v26975_v56  ;;  %v18419_v56 = vld [vmem:[%s19573_s21 + $0x80] sm:$0xff] }
 0x377   : > { %17391 = vmatpush3.bf16.msra.mxu0 %v17390_v51  ;;  %v26984_v51 = vld [vmem:[#allocation115_spill] sm:$0xff] }
 0x378   : > { %17393 = vmatprep.subr.bf16.mxu0 %v17392_v33  ;;  %v17400_v33 = vpack.c.bf16 %v22877_v45, %v26984_v51 }
 0x379   : > { %17419 = vmatpush3.bf16.msra.mxu1 %v26982_v43 }
 0x37a   : > { %17421 = vmatprep.subr.bf16.mxu1 %v26983_v24 }
 0x37b   : > { %17395 = vmatpush3.bf16.msra.mxu0 %v17394_v48  ;;  %v26987_v48 = vld [vmem:[#allocation90_spill] sm:$0xff] }
 0x37c   : > { %17397 = vmatprep.subr.bf16.mxu0 %v17396_v50  ;;  %v17406_v50 = vpack.c.bf16 %v22940_v27, %v22930_v44 }
 0x37d   : > { %17423 = vmatpush3.bf16.msra.mxu1 %v26985_v15 }
 0x37e   : > { %17425 = vmatprep.subr.bf16.mxu1 %v26986_v40 }
 0x37f   : > { %17399 = vmatpush3.bf16.msra.mxu0 %v17398_v0  ;;  %v17440_v0 = vpack.c.bf16 %v26989_v21, %v26988_v10  ;;  %v17444_v10 = vpack.c.bf16 %v26993_v5, %v26992_v16  ;;  %v27001_v21 = vand.u32 4294901760, %v22440_v17  ;;  %v18424_v17 = vld [vmem:[%s19583_s26 + $0x80] sm:$0xff] }
 0x380   : > { %17401 = vmatprep.subr.bf16.mxu0 %v17400_v33  ;;  %v18415_v33 = vld [vmem:[%s19566_s7 + $0x100] sm:$0x1]  ;;  %v27002_v5 = vld [vmem:[#allocation45_spill] sm:$0xff] }
 0x381   : > { %17427 = vmatpush3.bf16.msra.mxu1 %v26987_v48  ;;  %v1324_v42 = vmul.f32 %v18416_v58, %v18415_v33  ;;  %v26998_v58 = vand.u32 4294901760, %v26977_v23  ;;  %v18420_v33 = vld [vmem:[%s19576_s5 + $0x80] sm:$0xff] }
 0x382   : > { %17429 = vmatprep.subr.bf16.mxu1 %v22683_v60  ;;  %v1407_v23 = vmul.f32 %v18420_v33, %v18419_v56  ;;  %v18430_v56 = vld [vmem:[%s19576_s5 + $0x8] sm:$0xff] }
 0x383   : > { %17403 = vmatpush3.bf16.msra.mxu0 %v17402_v36  ;;  %v26990_v36 = vand.u32 4294901760, %v26969_v20  ;;  %v1390_v2 = vadd.f32 %v1357_v59, %v1324_v42  ;;  %v26995_v20 = vld [vmem:[#allocation44_spill] sm:$0xff]  ;;  %v26999_v59 = vand.u32 4294901760, %v26978_v7  ;;  %v18421_v7 = vld [vmem:[%s19573_s21 + $0x88] sm:$0xff] }
 0x384   : > { %17405 = vmatprep.subr.bf16.mxu0 %v17404_v52  ;;  %v26991_v52 = vand.u32 4294901760, %v26970_v38  ;;  %v26996_v38 = vand.u32 4294901760, %v26974_v26 }
 0x385   : > { %17431 = vmatpush3.bf16.msra.mxu1 %v22958_v55  ;;  %v17448_v42 = vpack.c.bf16 %v26999_v59, %v26998_v58  ;;  %v7853_v26 = vsel %vm1695_vm1, %v1390_v2, 0  ;;  %v18425_v2 = vld [vmem:[%s19566_s7 + $0x88] sm:$0xff]  ;;  %v18427_v58 = vld [vmem:[%s19573_s21] sm:$0xff]  ;;  %v18428_v59 = vld [vmem:[%s19576_s5] sm:$0xff] }
 0x386   : > { %17433 = vmatprep.subr.bf16.mxu1 %v22964_v11  ;;  %v17442_v25 = vpack.c.bf16 %v26991_v52, %v26990_v36  ;;  %v17446_v46 = vpack.c.bf16 %v26997_v19, %v26996_v38  ;;  %v18422_v36 = vld [vmem:[%s19576_s5 + $0x88] sm:$0xff]  ;;  %v18423_v52 = vld [vmem:[%s19566_s7 + $0x80] sm:$0xff]  ;;  %v18426_v38 = vld [vmem:[%s19583_s26 + $0x88] sm:$0xff] }
 0x387   : > { %17407 = vmatpush3.bf16.msra.mxu0 %v17406_v50  ;;  %v27000_v50 = vand.u32 4294901760, %v22437_v37  ;;  %v1408_v37 = vmul.f32 %v18422_v36, %v18421_v7  ;;  %v1440_v16 = vmul.f32 %v18424_v17, %v18423_v52  ;;  %v1441_v19 = vmul.f32 %v18426_v38, %v18425_v2  ;;  %v27003_v36 = vld [vmem:[#allocation33_spill] sm:$0xff]  ;;  %v18431_v52 = vld [vmem:[%s19566_s7] sm:$0xff] }
 0x388   : > { %17441 = vmatprep.subr.bf16.mxu0 %v17440_v0  ;;  %v18432_v17 = vld [vmem:[%s19583_s26] sm:$0xff]  ;;  %v27005_v2 = vand.u32 4294901760, %v22444_v14  ;;  %v27006_v38 = vand.u32 4294901760, %v22449_v18  ;;  %v27010_v18 = vand.u32 4294901760, %v22492_v28 }
 0x389   : > { %17435 = vmatpush3.bf16.msra.mxu1 %v22989_v35  ;;  %v17450_v0 = vpack.c.bf16 %v27001_v21, %v27000_v50  ;;  %v1391_v50 = vmul.f32 %v18428_v59, %v18427_v58  ;;  %v18429_v21 = vld [vmem:[%s19573_s21 + $0x8] sm:$0xff]  ;;  %v23128_v59 = vand.u32 4294901760, %v7853_v26 }
 0x38a   : > { %8354 = vmatmul.mubr.f32.vlgmr.msra.gmra.mrb[56].mxu0 %v26994_v6  ;;  %17437 = vmatprep.subr.bf16.mxu1 %v22996_v62  ;;  %v1392_v33 = vmul.f32 %v18430_v56, %v18429_v21  ;;  %v17452_v58 = vpack.c.bf16 %v27006_v38, %v27005_v2  ;;  %v27011_v56 = vand.u32 4294901760, %v22520_v53  ;;  %v27014_v2 = vld [vmem:[#allocation47_spill] sm:$0xff]  ;;  %v18439_v38 = vld [vmem:[%s19566_s7 + $0x90] sm:$0xff] }
 0x38b   : > { %17443 = vmatpush3.bf16.msra.mxu0 %v17442_v25  ;;  %8360 = vmatprep.mubr.f32.mxu0 %v26995_v20  ;;  %v15012_v25 = vpop.f32.mrb[34].mxu0  ;;  %v18433_v20 = vld [vmem:[%s19566_s7 + $0x8] sm:$0xff] }
 0x38c   : > { %17445 = vmatprep.subr.bf16.mxu0 %v17444_v10  ;;  %v15013_v10 = vpop.f32.mrb[35].mxu0 }
 0x38d   : > { %17439 = vmatpush3.bf16.msra.mxu1 %v23007_v12  ;;  %v15014_v7 = vadd.f32 %v15013_v10, %v15012_v25  ;;  %v27004_v12 = vld [vmem:[#allocation40_spill] sm:$0xff]  ;;  %v15015_v25 = vpop.f32.mrb[36].mxu0  ;;  %v27007_v10 = vld [vmem:[#allocation46_spill] sm:$0xff] }
 0x38e   : > { %8363 = vmatmul.mubr.f32.gmra.mrb[58].mxu0 %v27002_v5  ;;  %17473 = vmatprep.subr.bf16.mxu1 %v22296_v13  ;;  %v1424_v5 = vmul.f32 %v18432_v17, %v18431_v52  ;;  %v18434_v13 = vld [vmem:[%s19583_s26 + $0x8] sm:$0xff]  ;;  %v15016_v14 = vpop.f32.mrb[37].mxu0  ;;  %v27013_v52 = vand.u32 4294901760, %v22678_v29 }
 0x38f   : > { %17447 = vmatpush3.bf16.msra.mxu0 %v17446_v46  ;;  %8648 = vmatprep.mubr.f32.mxu0 %v27003_v36  ;;  %v1425_v6 = vmul.f32 %v18434_v13, %v18433_v20  ;;  %v5574_v46 = vadd.f32 %v15014_v7, %v23044_v47  ;;  %v27008_v20 = vand.u32 4294901760, %v22461_v54  ;;  %v17456_v47 = vpack.c.bf16 %v27011_v56, %v27010_v18  ;;  %v18436_v13 = vld [vmem:[%s19576_s5 + $0x90] sm:$0xff] }
 0x390   : > { %8471 = vmatmul.mubr.f32.vlgmr.msra.gmra.mrb[56].mxu1 %v27004_v12  ;;  %17449 = vmatprep.subr.bf16.mxu0 %v17448_v42  ;;  %v27009_v42 = vand.u32 4294901760, %v22468_v1  ;;  %v27012_v7 = vand.u32 4294901760, %v22675_v22  ;;  %v23148_v54 = vsub.f32 %v1407_v23, %v1440_v16  ;;  %v23150_v1 = vsub.f32 %v1408_v37, %v1441_v19  ;;  %v18435_v22 = vld [vmem:[%s19573_s21 + $0x90] sm:$0xff]  ;;  %v18437_v16 = vld [vmem:[%s19573_s21 + $0x98] sm:$0xff]  ;;  %v18438_v19 = vld [vmem:[%s19576_s5 + $0x98] sm:$0xff] }
 0x391   : > { %17475 = vmatpush3.bf16.msra.mxu1 %v22300_v9  ;;  %8478 = vmatprep.mubr.f32.mxu1 %v27007_v10  ;;  %v15017_v17 = vadd.f32 %v15016_v14, %v15015_v25  ;;  %v23152_v28 = vsub.f32 %v1391_v50, %v1424_v5  ;;  %v23154_v53 = vsub.f32 %v1392_v33, %v1425_v6  ;;  %v18440_v5 = vld [vmem:[%s19583_s26 + $0x90] sm:$0xff]  ;;  %v18441_v25 = vld [vmem:[%s19566_s7 + $0x98] sm:$0xff]  ;;  %v27017_v18 = vand.u32 4294901760, %v22793_v8 }
 0x392   : > { %v17454_v21 = vpack.c.bf16 %v27009_v42, %v27008_v20  ;;  %17477 = vmatprep.subr.bf16.mxu1 %v22324_v4  ;;  %v23146_v9 = vpack.c.bf16 %v27013_v52, %v27012_v7  ;;  %v15050_v4 = vpop.f32.mrb[34].mxu1  ;;  %v1409_v29 = vmul.f32 %v18436_v13, %v18435_v22  ;;  %v23160_v37 = vsub.f32 %v7853_v26, %v23128_v59  ;;  %v18442_v20 = vld [vmem:[%s19583_s26 + $0x98] sm:$0xff]  ;;  %v27063_v12 = vld [vmem:[#allocation95_spill] sm:$0xff] }
 0x393   : > { %17451 = vmatpush3.bf16.msra.mxu0 %v17450_v0  ;;  %v15051_v23 = vpop.f32.mrb[35].mxu1  ;;  %v1410_v0 = vmul.f32 %v18438_v19, %v18437_v16  ;;  %v1442_v50 = vmul.f32 %v18440_v5, %v18439_v38  ;;  %v5581_v6 = vadd.f32 %v15017_v17, %v23052_v30  ;;  %v27015_v26 = vand.u32 4294901760, %v22686_v3  ;;  %v18444_v16 = vld [vmem:[%s19576_s5 + $0x10] sm:$0xff]  ;;  %v18445_v38 = vld [vmem:[%s19573_s21 + $0x18] sm:$0xff]  ;;  %v18446_v5 = vld [vmem:[%s19576_s5 + $0x18] sm:$0xff] }
 0x394   : > { %8482 = vmatmul.mubr.f32.gmra.mrb[58].mxu1 %v27014_v2  ;;  %17453 = vmatprep.subr.bf16.mxu0 %v17452_v58  ;;  %v15052_v33 = vadd.f32 %v15051_v23, %v15050_v4  ;;  %v1443_v58 = vmul.f32 %v18442_v20, %v18441_v25  ;;  %v27016_v42 = vand.u32 4294901760, %v22689_v57  ;;  %v27018_v56 = vand.u32 4294901760, %v22855_v61  ;;  %v15053_v57 = vpop.f32.mrb[36].mxu1  ;;  %v18443_v23 = vld [vmem:[%s19573_s21 + $0x10] sm:$0xff]  ;;  %v18447_v25 = vld [vmem:[%s19566_s7 + $0x10] sm:$0xff] }
 0x395   : > { %17479 = vmatpush3.bf16.msra.mxu1 %v22334_v34  ;;  %8759 = vmatprep.mubr.f32.mxu1 %v27003_v36  ;;  %v27019_v34 = vand.u32 4294901760, %v26984_v51  ;;  %v27020_v7 = vand.u32 4294901760, %v22877_v45  ;;  %v27021_v17 = vand.u32 4294901760, %v22902_v41  ;;  %v27023_v8 = vand.u32 4294901760, %v22914_v49  ;;  %v27062_v10 = vld [vmem:[#allocation92_spill] sm:$0xff] }
 0x396   : > { %17481 = vmatprep.subr.bf16.mxu1 %v22345_v31  ;;  %v17460_v14 = vpack.c.bf16 %v27016_v42, %v27015_v26  ;;  %v23180_v30 = vpack.c.bf16 %v27018_v56, %v27017_v18  ;;  %v27022_v31 = vand.u32 4294901760, %v22907_v39  ;;  %v27024_v61 = vand.u32 4294901760, %v22919_v32  ;;  %v18452_v26 = vld [vmem:[%s19576_s5 + $0xa0] sm:$0xff]  ;;  %v18453_v18 = vld [vmem:[%s19573_s21 + $0xa8] sm:$0xff] }
 0x397   : > { %v23186_v52 = vpack.c.bf16 %v27020_v7, %v27019_v34  ;;  %17455 = vmatpush3.bf16.msra.mxu0 %v17454_v21  ;;  %v27025_v45 = vand.u32 4294901760, %v22930_v44  ;;  %v27026_v51 = vand.u32 4294901760, %v22940_v27  ;;  %v9443_v41 = vand.u32 4294901760, %v23148_v54  ;;  %v15054_v21 = vpop.f32.mrb[37].mxu1  ;;  %v18455_v34 = vld [vmem:[%s19566_s7 + $0xa0] sm:$0xff]  ;;  %v18456_v7 = vld [vmem:[%s19583_s26 + $0xa0] sm:$0xff] }
 0x398   : > { %v23192_v3 = vpack.c.bf16 %v27022_v31, %v27021_v17  ;;  %v23198_v4 = vpack.c.bf16 %v27024_v61, %v27023_v8  ;;  %v23207_v39 = vadd.f32 %v15052_v33, %v5574_v46  ;;  %17457 = vmatprep.subr.bf16.mxu0 %v17456_v47  ;;  %v9446_v49 = vand.u32 4294901760, %v23150_v1  ;;  %v18457_v31 = vld [vmem:[%s19566_s7 + $0xa8] sm:$0xff] }
 0x399   : > { %v23204_v22 = vpack.c.bf16 %v27026_v51, %v27025_v45  ;;  %v9395_v32 = vand.u32 4294901760, %v23152_v28  ;;  %v9398_v44 = vand.u32 4294901760, %v23154_v53  ;;  %v23213_v27 = vand.u32 4294901760, %v23160_v37  ;;  %17483 = vmatpush3.bf16.msra.mxu1 %v26982_v43  ;;  %v18448_v43 = vld [vmem:[%s19583_s26 + $0x10] sm:$0xff] }
 0x39a   : > { %v15055_v13 = vadd.f32 %v15054_v21, %v15053_v57  ;;  %v23216_v46 = vsub.f32 %v1409_v29, %v1442_v50  ;;  %v23218_v47 = vsub.f32 %v1410_v0, %v1443_v58  ;;  %v1393_v19 = vmul.f32 %v18444_v16, %v18443_v23  ;;  %17485 = vmatprep.subr.bf16.mxu1 %v26983_v24  ;;  %v18449_v50 = vld [vmem:[%s19566_s7 + $0x18] sm:$0xff]  ;;  %v18450_v0 = vld [vmem:[%s19583_s26 + $0x18] sm:$0xff]  ;;  %v18451_v58 = vld [vmem:[%s19573_s21 + $0xa0] sm:$0xff] }
 0x39b   : > { %v1394_v33 = vmul.f32 %v18446_v5, %v18445_v38  ;;  %v1426_v29 = vmul.f32 %v18448_v43, %v18447_v25  ;;  %v1427_v20 = vmul.f32 %v18450_v0, %v18449_v50  ;;  %v1411_v42 = vmul.f32 %v18452_v26, %v18451_v58  ;;  %17459 = vmatpush3.bf16.msra.mxu0 %v23146_v9  ;;  %v18454_v24 = vld [vmem:[%s19576_s5 + $0xa8] sm:$0xff]  ;;  %v18458_v57 = vld [vmem:[%s19583_s26 + $0xa8] sm:$0xff]  ;;  %v18464_v5 = vld [vmem:[%s19583_s26 + $0x20] sm:$0xff] }
 0x39c   : > { %v1412_v56 = vmul.f32 %v18454_v24, %v18453_v18  ;;  %v1444_v17 = vmul.f32 %v18456_v7, %v18455_v34  ;;  %v1445_v8 = vmul.f32 %v18458_v57, %v18457_v31  ;;  %v23238_v61 = vadd.f32 %v15055_v13, %v5581_v6  ;;  %17461 = vmatprep.subr.bf16.mxu0 %v17460_v14  ;;  %v18461_v13 = vld [vmem:[%s19573_s21 + $0x28] sm:$0xff]  ;;  %v18462_v23 = vld [vmem:[%s19576_s5 + $0x28] sm:$0xff]  ;;  %v18467_v50 = vld [vmem:[%s19573_s21 + $0xb0] sm:$0xff] }
 0x39d   : > { %v23240_v45 = vpack.c.bf16 %v9446_v49, %v9443_v41  ;;  %v23243_v9 = vsub.f32 %v23148_v54, %v9443_v41  ;;  %v23246_v51 = vsub.f32 %v23150_v1, %v9446_v49  ;;  %v23250_v21 = vpack.c.bf16 %v9398_v44, %v9395_v32  ;;  %17487 = vmatpush3.bf16.msra.mxu1 %v26985_v15  ;;  %v18459_v15 = vld [vmem:[%s19573_s21 + $0x20] sm:$0xff]  ;;  %v18465_v25 = vld [vmem:[%s19566_s7 + $0x28] sm:$0xff]  ;;  %v18466_v43 = vld [vmem:[%s19583_s26 + $0x28] sm:$0xff] }
 0x39e   : > { %v23254_v6 = vsub.f32 %v23152_v28, %v9395_v32  ;;  %v8863_v14 = vsub.f32 %v23160_v37, %v23213_v27  ;;  %v9449_v54 = vand.u32 4294901760, %v23216_v46  ;;  %v9452_v41 = vand.u32 4294901760, %v23218_v47  ;;  %17489 = vmatprep.subr.bf16.mxu1 %v26986_v40  ;;  %v18460_v28 = vld [vmem:[%s19576_s5 + $0x20] sm:$0xff]  ;;  %v18470_v58 = vld [vmem:[%s19576_s5 + $0xb8] sm:$0xff]  ;;  %v18474_v34 = vld [vmem:[%s19583_s26 + $0xb8] sm:$0xff] }
 0x39f   : > { %27027 = vst [vmem:[#allocation58_spill] sm:$0xff] %v23240_v45  ;;  %27028 = vst [vmem:[#allocation64_spill] sm:$0xff] %v23250_v21  ;;  %v23261_v1 = vsub.f32 %v1393_v19, %v1426_v29  ;;  %v23263_v49 = vsub.f32 %v1394_v33, %v1427_v20  ;;  %v1395_v32 = vmul.f32 %v18460_v28, %v18459_v15  ;;  %17463 = vmatpush3.bf16.msra.mxu0 %v23180_v30  ;;  %v18463_v19 = vld [vmem:[%s19566_s7 + $0x20] sm:$0xff]  ;;  %v18468_v30 = vld [vmem:[%s19576_s5 + $0xb0] sm:$0xff] }
 0x3a0   : > { %v1396_v16 = vmul.f32 %v18462_v23, %v18461_v13  ;;  %v23270_v38 = vsub.f32 %v1411_v42, %v1444_v17  ;;  %v23272_v40 = vsub.f32 %v1412_v56, %v1445_v8  ;;  %v1428_v33 = vmul.f32 %v18464_v5, %v18463_v19  ;;  %17465 = vmatprep.subr.bf16.mxu0 %v23186_v52  ;;  %v18469_v20 = vld [vmem:[%s19573_s21 + $0xb8] sm:$0xff]  ;;  %v18471_v42 = vld [vmem:[%s19566_s7 + $0xb0] sm:$0xff]  ;;  %v18472_v18 = vld [vmem:[%s19583_s26 + $0xb0] sm:$0xff] }
 0x3a1   : > { %v1429_v29 = vmul.f32 %v18466_v43, %v18465_v25  ;;  %v1413_v0 = vmul.f32 %v18468_v30, %v18467_v50  ;;  %v1414_v26 = vmul.f32 %v18470_v58, %v18469_v20  ;;  %v1446_v24 = vmul.f32 %v18472_v18, %v18471_v42  ;;  %v18473_v56 = vld [vmem:[%s19566_s7 + $0xb8] sm:$0xff]  ;;  %17491 = vmatpush3.bf16.msra.mxu1 %v26987_v48  ;;  %v18475_v52 = vld [vmem:[%s19573_s21 + $0x30] sm:$0xff]  ;;  %v18476_v17 = vld [vmem:[%s19576_s5 + $0x30] sm:$0xff] }
 0x3a2   : > { %v1447_v7 = vmul.f32 %v18474_v34, %v18473_v56  ;;  %v1397_v31 = vmul.f32 %v18476_v17, %v18475_v52  ;;  %v18477_v57 = vld [vmem:[%s19573_s21 + $0x38] sm:$0xff]  ;;  %v18478_v8 = vld [vmem:[%s19576_s5 + $0x38] sm:$0xff]  ;;  %v18479_v28 = vld [vmem:[%s19566_s7 + $0x30] sm:$0xff]  ;;  %17493 = vmatprep.subr.bf16.mxu1 %v22683_v60  ;;  %v23300_v43 = vsub.f32 %v23154_v53, %v9398_v44  ;;  %v23302_v48 = vand.u32 4294901760, %v8863_v14 }
 0x3a3   : > { %v1398_v15 = vmul.f32 %v18478_v8, %v18477_v57  ;;  %v18480_v13 = vld [vmem:[%s19583_s26 + $0x30] sm:$0xff]  ;;  %v18481_v19 = vld [vmem:[%s19566_s7 + $0x38] sm:$0xff]  ;;  %v18482_v5 = vld [vmem:[%s19583_s26 + $0x38] sm:$0xff]  ;;  %v23304_v50 = vpack.c.bf16 %v9452_v41, %v9449_v54  ;;  %v9401_v30 = vand.u32 4294901760, %v23261_v1  ;;  %17467 = vmatpush3.bf16.msra.mxu0 %v23192_v3  ;;  %v9404_v20 = vand.u32 4294901760, %v23263_v49 }
 0x3a4   : > { %v1430_v23 = vmul.f32 %v18480_v13, %v18479_v28  ;;  %v1431_v25 = vmul.f32 %v18482_v5, %v18481_v19  ;;  %v9455_v58 = vand.u32 4294901760, %v23270_v38  ;;  %v9458_v60 = vand.u32 4294901760, %v23272_v40  ;;  %17469 = vmatprep.subr.bf16.mxu0 %v23198_v4  ;;  %v18487_v18 = vld [vmem:[%s19566_s7 + $0xc0] sm:$0xff]  ;;  %v18489_v56 = vld [vmem:[%s19566_s7 + $0xc8] sm:$0xff]  ;;  %v27032_v28 = vld [vmem:[#allocation54_spill] sm:$0xff] }
 0x3a5   : > { %27029 = vst [vmem:[#allocation67_spill] sm:$0xff] %v23304_v50  ;;  %v1461_v42 = vsub.f32 %v1395_v32, %v1428_v33  ;;  %v23313_v53 = vsub.f32 %v23216_v46, %v9449_v54  ;;  %v23316_v44 = vsub.f32 %v23218_v47, %v9452_v41  ;;  %v1462_v3 = vsub.f32 %v1396_v16, %v1429_v29  ;;  %v18483_v47 = vld [vmem:[%s19573_s21 + $0xc0] sm:$0xff]  ;;  %v18484_v54 = vld [vmem:[%s19576_s5 + $0xc0] sm:$0xff]  ;;  %v18485_v16 = vld [vmem:[%s19573_s21 + $0xc8] sm:$0xff] }
 0x3a6   : > { %v23318_v14 = vsub.f32 %v1413_v0, %v1446_v24  ;;  %17495 = vmatpush3.bf16.msra.mxu1 %v22958_v55  ;;  %v23322_v32 = vsub.f32 %v23261_v1, %v9401_v30  ;;  %v1480_v33 = vsub.f32 %v1414_v26, %v1447_v7  ;;  %v23324_v4 = vsub.f32 %v1397_v31, %v1430_v23  ;;  %v18486_v29 = vld [vmem:[%s19576_s5 + $0xc8] sm:$0xff]  ;;  %v18488_v24 = vld [vmem:[%s19583_s26 + $0xc0] sm:$0xff]  ;;  %v18490_v1 = vld [vmem:[%s19583_s26 + $0xc8] sm:$0xff] }
 0x3a7   : > { %v23326_v46 = vsub.f32 %v1398_v15, %v1431_v25  ;;  %17497 = vmatprep.subr.bf16.mxu1 %v22964_v11  ;;  %v1415_v41 = vmul.f32 %v18484_v54, %v18483_v47  ;;  %v1416_v0 = vmul.f32 %v18486_v29, %v18485_v16  ;;  %v1448_v55 = vmul.f32 %v18488_v24, %v18487_v18  ;;  %v18491_v15 = vld [vmem:[%s19576_s5 + $0x40] sm:$0xff]  ;;  %v27033_v23 = vld [vmem:[#allocation65_spill] sm:$0xff]  ;;  %v18496_v47 = vld [vmem:[%s19583_s26 + $0x48] sm:$0xff] }
 0x3a8   : > { %v1449_v34 = vmul.f32 %v18490_v1, %v18489_v56  ;;  %17471 = vmatpush3.bf16.msra.mxu0 %v23204_v22  ;;  %v23338_v26 = vpack.c.bf16 %v9404_v20, %v9401_v30  ;;  %v23341_v11 = vsub.f32 %v23263_v49, %v9404_v20  ;;  %v23343_v7 = vpack.c.bf16 %v9458_v60, %v9455_v58  ;;  %v18493_v25 = vld [vmem:[%s19566_s7 + $0x40] sm:$0xff]  ;;  %v18494_v30 = vld [vmem:[%s19583_s26 + $0x40] sm:$0xff]  ;;  %v18497_v56 = vld [vmem:[%s19573_s21 + $0xd8] sm:$0xff] }
 0x3a9   : > { %v9407_v52 = vand.u32 4294901760, %v1461_v42  ;;  %16424 = vmatprep.subr.mxu0 %v23128_v59  ;;  %v23347_v17 = vsub.f32 %v23270_v38, %v9455_v58  ;;  %v23350_v31 = vsub.f32 %v23272_v40, %v9458_v60  ;;  %v9410_v57 = vand.u32 4294901760, %v1462_v3  ;;  %v18492_v38 = vld [vmem:[%s19576_s5 + $0x48] sm:$0xff]  ;;  %v27034_v58 = vld [vmem:[#allocation42_spill] sm:$0xff]  ;;  %v27038_v18 = vld [vmem:[#allocation71_spill] sm:$0xff] }
 0x3aa   : > { %27030 = vst [vmem:[#allocation68_spill] sm:$0xff] %v23338_v26  ;;  %27031 = vst [vmem:[#allocation66_spill] sm:$0xff] %v23343_v7  ;;  %v9461_v22 = vand.u32 4294901760, %v23318_v14  ;;  %17499 = vmatpush3.bf16.msra.mxu1 %v22989_v35  ;;  %v9464_v49 = vand.u32 4294901760, %v1480_v33  ;;  %v9413_v8 = vand.u32 4294901760, %v23324_v4  ;;  %v1399_v13 = vmul.f32 %v18491_v15, %v27032_v28  ;;  %v18495_v60 = vld [vmem:[%s19566_s7 + $0x48] sm:$0xff] }
 0x3ab   : > { %v1400_v19 = vmul.f32 %v18492_v38, %v27033_v23  ;;  %8650 = vmatmul.mubr.f32.vlgmr.msra.gmra.mrb[60].mxu0 %v26813_v63  ;;  %17501 = vmatprep.subr.bf16.mxu1 %v22996_v62  ;;  %v9416_v40 = vand.u32 4294901760, %v23326_v46  ;;  %v23362_v5 = vsub.f32 %v1415_v41, %v1448_v55  ;;  %v23364_v35 = vsub.f32 %v1416_v0, %v1449_v34  ;;  %v27035_v54 = vld [vmem:[#allocation69_spill] sm:$0xff]  ;;  %v27037_v41 = vld [vmem:[#allocation70_spill] sm:$0xff]  ;;  %v27040_v23 = vld [vmem:[#allocation116_spill] sm:$0xff] }
 0x3ac   : > { %v1432_v20 = vmul.f32 %v18494_v30, %v18493_v25  ;;  %8655 = vmatprep.mubr.f32.mxu0 %v27034_v58  ;;  %16425 = vmatpush3.msra.mxu0 %v23128_v59  ;;  %v1433_v62 = vmul.f32 %v18496_v47, %v18495_v60  ;;  %v27036_v16 = vld [vmem:[#allocation57_spill] sm:$0xff]  ;;  %v1450_v24 = vmul.f32 %v27038_v18, %v27037_v41  ;;  %v18498_v1 = vld [vmem:[%s19576_s5 + $0xd8] sm:$0xff]  ;;  %v27081_v36 = vld [vmem:[#allocation104_spill] sm:$0xff] }
 0x3ad   : > { %v1417_v29 = vmul.f32 %v27036_v16, %v27035_v54  ;;  %16429 = vmatprep.subr.mxu0 %v23302_v48  ;;  %v23377_v0 = vpack.c.bf16 %v9410_v57, %v9407_v52  ;;  %v23379_v55 = vsub.f32 %v1461_v42, %v9407_v52  ;;  %v1418_v34 = vmul.f32 %v18498_v1, %v18497_v56  ;;  %v18499_v15 = vld [vmem:[%s19566_s7 + $0xd8] sm:$0xff]  ;;  %v18500_v28 = vld [vmem:[%s19583_s26 + $0xd8] sm:$0xff] }
 0x3ae   : > { %v1451_v38 = vmul.f32 %v18500_v28, %v18499_v15  ;;  %17503 = vmatpush3.bf16.msra.mxu1 %v27040_v23  ;;  %v23386_v25 = vsub.f32 %v1462_v3, %v9410_v57  ;;  %v23388_v30 = vpack.c.bf16 %v9464_v49, %v9461_v22  ;;  %v23391_v60 = vsub.f32 %v23318_v14, %v9461_v22  ;;  %v27042_v54 = vld [vmem:[#allocation43_spill] sm:$0xff]  ;;  %v27049_v1 = vld [vmem:[#allocation74_spill] sm:$0xff]  ;;  %v27050_v15 = vld [vmem:[#allocation77_spill] sm:$0xff] }
 0x3af   : > { %27039 = vst [vmem:[#allocation63_spill] sm:$0xff] %v23377_v0  ;;  %v23393_v47 = vsub.f32 %v1480_v33, %v9464_v49  ;;  %8657 = vmatmul.mubr.f32.gmra.mrb[62].mxu0 %v27042_v54  ;;  %17505 = vmatprep.subr.bf16.mxu1 %v23240_v45  ;;  %v23397_v42 = vpack.c.bf16 %v9416_v40, %v9413_v8  ;;  %v9467_v3 = vand.u32 4294901760, %v23362_v5  ;;  %v27044_v57 = vld [vmem:[#allocation51_spill] sm:$0xff]  ;;  %v9470_v14 = vand.u32 4294901760, %v23364_v35  ;;  %v27079_v45 = vld [vmem:[#allocation105_spill] sm:$0xff] }
 0x3b0   : > { %27041 = vst [vmem:[#allocation52_spill] sm:$0xff] %v23388_v30  ;;  %v23400_v52 = vsub.f32 %v23324_v4, %v9413_v8  ;;  %v23403_v16 = vsub.f32 %v23326_v46, %v9416_v40  ;;  %16426 = vmatprep.mubr.f32.mxu0 %v27044_v57  ;;  %v1465_v33 = vsub.f32 %v1399_v13, %v1432_v20  ;;  %v27045_v18 = vld [vmem:[#allocation75_spill] sm:$0xff]  ;;  %v27046_v4 = vld [vmem:[#allocation76_spill] sm:$0xff]  ;;  %v27051_v13 = vld [vmem:[#allocation78_spill] sm:$0xff] }
 0x3b1   : > { %27043 = vst [vmem:[#allocation53_spill] sm:$0xff] %v23397_v42  ;;  %v1466_v22 = vsub.f32 %v1400_v19, %v1433_v62  ;;  %v23408_v49 = vsub.f32 %v1417_v29, %v1450_v24  ;;  %8761 = vmatmul.mubr.f32.vlgmr.msra.gmra.mrb[60].mxu1 %v26813_v63  ;;  %v23411_v41 = vsub.f32 %v1418_v34, %v1451_v38  ;;  %v27047_v56 = vld [vmem:[#allocation79_spill] sm:$0xff]  ;;  %v27048_v46 = vld [vmem:[#allocation80_spill] sm:$0xff]  ;;  %v27052_v19 = vld [vmem:[#allocation81_spill] sm:$0xff] }
 0x3b2   : > { %v1401_v8 = vmul.f32 %v27046_v4, %v27045_v18  ;;  %v1402_v40 = vmul.f32 %v27048_v46, %v27047_v56  ;;  %v1434_v28 = vmul.f32 %v27050_v15, %v27049_v1  ;;  %17507 = vmatpush3.bf16.msra.mxu1 %v23250_v21  ;;  %8766 = vmatprep.mubr.f32.mxu1 %v27034_v58  ;;  %v27053_v62 = vld [vmem:[#allocation83_spill] sm:$0xff]  ;;  %v27054_v29 = vld [vmem:[#allocation86_spill] sm:$0xff]  ;;  %v27055_v34 = vld [vmem:[#allocation85_spill] sm:$0xff] }
 0x3b3   : > { %v1435_v20 = vmul.f32 %v27052_v19, %v27051_v13  ;;  %v1419_v24 = vmul.f32 %v27054_v29, %v27053_v62  ;;  %v27056_v38 = vld [vmem:[#allocation88_spill] sm:$0xff]  ;;  %17509 = vmatprep.subr.bf16.mxu1 %v23304_v50  ;;  %v27058_v4 = vld [vmem:[#allocation82_spill] sm:$0xff]  ;;  %v27059_v56 = vld [vmem:[#allocation87_spill] sm:$0xff]  ;;  %v1403_v57 = vmul.f32 %v27063_v12, %v27062_v10  ;;  %v15106_v13 = vpop.f32.mrb[38].mxu1  ;;  %v9419_v62 = vand.u32 4294901760, %v1465_v33 }
 0x3b4   : > { %v1420_v23 = vmul.f32 %v27056_v38, %v27055_v34  ;;  %v27057_v18 = vld [vmem:[#allocation56_spill] sm:$0xff]  ;;  %v1452_v46 = vmul.f32 %v27059_v56, %v27058_v4  ;;  %v27061_v15 = vld [vmem:[#allocation89_spill] sm:$0xff]  ;;  %v27065_v29 = vld [vmem:[#allocation94_spill] sm:$0xff]  ;;  %v23445_v12 = vpack.c.bf16 %v9470_v14, %v9467_v3  ;;  %v23448_v10 = vsub.f32 %v23362_v5, %v9467_v3 }
 0x3b5   : > { %16427 = vmatmul.mubr.f32.vlgmr.msra.gmra.mrb[64].mxu0 %v27057_v18  ;;  %v27060_v1 = vld [vmem:[#allocation84_spill] sm:$0xff]  ;;  %v27064_v19 = vld [vmem:[#allocation29_spill] sm:$0xff]  ;;  %v27067_v18 = vld [vmem:[#allocation91_spill] sm:$0xff]  ;;  %8768 = vmatmul.mubr.f32.gmra.mrb[62].mxu1 %v27042_v54  ;;  %v1467_v5 = vsub.f32 %v1401_v8, %v1434_v28  ;;  %v1468_v3 = vsub.f32 %v1402_v40, %v1435_v20 }
 0x3b6   : > { %v1453_v2 = vmul.f32 %v27061_v15, %v27060_v1  ;;  %16430 = vmatpush3.msra.mxu0 %v23302_v48  ;;  %16431 = vmatprep.mubr.f32.mxu0 %v27064_v19  ;;  %v27066_v34 = vld [vmem:[#allocation97_spill] sm:$0xff]  ;;  %v27068_v50 = vld [vmem:[#allocation96_spill] sm:$0xff]  ;;  %v27070_v4 = vld [vmem:[#allocation98_spill] sm:$0xff]  ;;  %v15107_v1 = vpop.f32.mrb[39].mxu1  ;;  %27071 = vst [vmem:[#allocation55_spill] sm:$0xff] %v23445_v12  ;;  %v23451_v48 = vsub.f32 %v23364_v35, %v9470_v14 }
 0x3b7   : > { %v1404_v38 = vmul.f32 %v27066_v34, %v27065_v29  ;;  %v1436_v58 = vmul.f32 %v27068_v50, %v27067_v18  ;;  %v27069_v21 = vld [vmem:[#allocation93_spill] sm:$0xff]  ;;  %16434 = vmatprep.subr.mxu0 %v23160_v37  ;;  %v23453_v15 = vadd.f32 %v15107_v1, %v15106_v13  ;;  %17511 = vmatpush3.bf16.msra.mxu1 %v23338_v26  ;;  %v9422_v50 = vand.u32 4294901760, %v1466_v22  ;;  %v27075_v29 = vld [vmem:[#allocation39_spill] sm:$0xff]  ;;  %v27076_v1 = vld [vmem:[#allocation100_spill] sm:$0xff]  ;;  %v15109_v54 = vpop.f32.mrb[40].mxu1 }
 0x3b8   : > { %v1437_v56 = vmul.f32 %v27070_v4, %v27069_v21  ;;  %27072 = vst [vmem:[#allocation59_spill] sm:$0xff] %v23451_v48  ;;  %v23456_v18 = vsub.f32 %v1465_v33, %v9419_v62  ;;  %v9473_v21 = vand.u32 4294901760, %v23408_v49  ;;  %9495 = vmatprep.mubr.f32.mxu1 %v27075_v29  ;;  %17513 = vmatprep.subr.bf16.mxu1 %v23343_v7  ;;  %v9476_v34 = vand.u32 4294901760, %v23411_v41  ;;  %v27077_v26 = vld [vmem:[#allocation103_spill] sm:$0xff]  ;;  %v27078_v63 = vld [vmem:[#allocation102_spill] sm:$0xff]  ;;  %v27084_v40 = vld [vmem:[#allocation108_spill] sm:$0xff] }
 0x3b9   : > { %27073 = vst [vmem:[#allocation72_spill] sm:$0xff] %v23453_v15  ;;  %v1485_v4 = vsub.f32 %v1419_v24, %v1452_v46  ;;  %v1486_v35 = vsub.f32 %v1420_v23, %v1453_v2  ;;  %v23462_v14 = vsub.f32 %v1403_v57, %v1436_v58  ;;  %v1421_v33 = vmul.f32 %v27077_v26, %v27076_v1  ;;  %v27080_v29 = vld [vmem:[#allocation99_spill] sm:$0xff]  ;;  %v27083_v48 = vld [vmem:[#allocation106_spill] sm:$0xff]  ;;  %v27085_v28 = vld [vmem:[#allocation109_spill] sm:$0xff]  ;;  %v15110_v58 = vpop.f32.mrb[41].mxu1 }
 0x3ba   : > { %27074 = vst [vmem:[#allocation60_spill] sm:$0xff] %v23456_v18  ;;  %v23464_v13 = vsub.f32 %v1404_v38, %v1437_v56  ;;  %v1422_v15 = vmul.f32 %v27079_v45, %v27078_v63  ;;  %v1454_v7 = vmul.f32 %v27081_v36, %v27080_v29  ;;  %v27082_v18 = vld [vmem:[#allocation101_spill] sm:$0xff]  ;;  %v1405_v2 = vmul.f32 %v27085_v28, %v27084_v40  ;;  %v27086_v57 = vld [vmem:[#allocation112_spill] sm:$0xff]  ;;  %v27088_v26 = vld [vmem:[#allocation107_spill] sm:$0xff] }
 0x3bb   : > { %v1455_v8 = vmul.f32 %v27083_v48, %v27082_v18  ;;  %17515 = vmatpush3.bf16.msra.mxu1 %v23377_v0  ;;  %v27087_v20 = vld [vmem:[#allocation113_spill] sm:$0xff]  ;;  %v27089_v23 = vld [vmem:[#allocation110_spill] sm:$0xff]  ;;  %v27090_v38 = vld [vmem:[#allocation111_spill] sm:$0xff]  ;;  %v23483_v56 = vadd.f32 %v15110_v58, %v15109_v54  ;;  %v23487_v48 = vpack.c.bf16 %v9422_v50, %v9419_v62  ;;  %v23489_v18 = vsub.f32 %v1466_v22, %v9422_v50 }
 0x3bc   : > { %v1406_v24 = vmul.f32 %v27087_v20, %v27086_v57  ;;  %v1438_v46 = vmul.f32 %v27089_v23, %v27088_v26  ;;  %v27091_v63 = vld [vmem:[#allocation114_spill] sm:$0xff]  ;;  %17517 = vmatprep.subr.bf16.mxu1 %v23388_v30  ;;  %v9425_v29 = vand.u32 4294901760, %v1467_v5  ;;  %v9428_v1 = vand.u32 4294901760, %v1468_v3  ;;  %v27094_v40 = vld [vmem:[#allocation31_spill] sm:$0xff] }
 0x3bd   : > { %v1439_v45 = vmul.f32 %v27091_v63, %v27090_v38  ;;  %v27092_v36 = vld [vmem:[#allocation30_spill] sm:$0xff]  ;;  %27093 = vst [vmem:[#allocation115_spill] sm:$0xff] %v23487_v48  ;;  %v9479_v28 = vand.u32 4294901760, %v1485_v4  ;;  %v9482_v57 = vand.u32 4294901760, %v1486_v35  ;;  %v9431_v20 = vand.u32 4294901760, %v23462_v14 }
 0x3be   : > { %16432 = vmatmul.mubr.f32.vlgmr.msra.gmra.mrb[64].mxu0 %v27092_v36  ;;  %v23496_v58 = vpack.c.bf16 %v9476_v34, %v9473_v21  ;;  %v23499_v62 = vsub.f32 %v23408_v49, %v9473_v21  ;;  %v23501_v22 = vsub.f32 %v1421_v33, %v1454_v7  ;;  %v23503_v50 = vsub.f32 %v1422_v15, %v1455_v8 }
 0x3bf   : > { %16435 = vmatpush3.msra.mxu0 %v23160_v37  ;;  %16436 = vmatprep.mubr.f32.mxu0 %v27094_v40  ;;  %v16393_v37 = vpop.f32.mrb[38].mxu0  ;;  %v23507_v26 = vsub.f32 %v23411_v41, %v9476_v34  ;;  %v23509_v23 = vsub.f32 %v1467_v5, %v9425_v29  ;;  %v23511_v38 = vsub.f32 %v1405_v2, %v1438_v46  ;;  %v27101_v2 = vld [vmem:[#allocation61_spill] sm:$0xff] }
 0x3c0   : > { %16439 = vmatprep.subr.mxu0 %v23128_v59  ;;  %27095 = vst [vmem:[#allocation62_spill] sm:$0xff] %v23496_v58  ;;  %17519 = vmatpush3.bf16.msra.mxu1 %v23397_v42  ;;  %v23513_v63 = vsub.f32 %v1406_v24, %v1439_v45  ;;  %v18084_v54 = vadd.f32 %v16393_v37, %v23238_v61  ;;  %v6174_v49 = vpop.f32.mrb[39].mxu0  ;;  %v27099_v61 = vand.u32 4294901760, %v23464_v13 }
 0x3c1   : > { %17521 = vmatprep.subr.bf16.mxu1 %v23445_v12  ;;  %v23517_v7 = vpack.c.bf16 %v9428_v1, %v9425_v29  ;;  %v23519_v15 = vsub.f32 %v1468_v3, %v9428_v1  ;;  %v23521_v21 = vsub.f32 %v1485_v4, %v9479_v28  ;;  %v18085_v41 = vadd.f32 %v6174_v49, %v23207_v39 }
 0x3c2   : > { %v23524_v34 = vpack.c.bf16 %v9482_v57, %v9479_v28  ;;  %v23526_v5 = vsub.f32 %v1486_v35, %v9482_v57  ;;  %v23532_v33 = vpack.c.bf16 %v27099_v61, %v9431_v20  ;;  %v6235_v8 = vcombine.high %v18084_v54, %v18084_v54  ;;  %v27102_v57 = vld [vmem:[#allocation32_spill] sm:$0xff]  ;;  %v27103_v61 = vld [vmem:[#allocation35_spill] sm:$0xff] }
 0x3c3   : > { %27096 = vst [vmem:[#allocation73_spill] sm:$0xff] %v23517_v7  ;;  %27097 = vst [vmem:[#allocation90_spill] sm:$0xff] %v23519_v15  ;;  %v6242_v24 = vrot.slane %v18084_v54, %v27101_v2  ;;  %v6186_v39 = vcombine.high %v18085_v41, %v18085_v41  ;;  %v6193_v46 = vrot.slane %v18085_v41, %v27101_v2  ;;  %v27147_v30 = vand.u32 4294901760, %v23521_v21 }
 0x3c4   : > { %27098 = vst [vmem:[#allocation54_spill] sm:$0xff] %v23524_v34  ;;  %27100 = vst [vmem:[#allocation65_spill] sm:$0xff] %v23532_v33  ;;  %17523 = vmatpush3.bf16.msra.mxu1 %v23487_v48  ;;  %v6249_v29 = vrot.slane %v6235_v8, %v27101_v2  ;;  %v17580_v40 = vpack.c.bf16 %v23393_v47, %v23391_v60 }
 0x3c5   : > { %v6250_v1 = vcombine.high %v6242_v24, %v6242_v24  ;;  %v6258_v28 = vrot.slane %v6242_v24, %v27101_v2  ;;  %14289 = vst.sshfl [vmem:[%s21848_s20 + $0x42] sm:$0x1 pattern:$0x73625140] %v6242_v24  ;;  %17525 = vmatprep.subr.bf16.mxu1 %v23496_v58  ;;  %v6200_v37 = vrot.slane %v6186_v39, %v27101_v2 }
 0x3c6   : > { %16437 = vmatmul.mubr.f32.vlgmr.msra.gmra.mrb[64].mxu0 %v27102_v57  ;;  %v6201_v49 = vcombine.high %v6193_v46, %v6193_v46  ;;  %v6209_v41 = vrot.slane %v6193_v46, %v27101_v2  ;;  %14285 = vst.sshfl [vmem:[%s21848_s20 + $0x2] sm:$0x1 pattern:$0x73625140] %v6193_v46  ;;  %v6251_v24 = vcombine.high %v6249_v29, %v6249_v29 }
 0x3c7   : > { %16440 = vmatpush3.msra.mxu0 %v23128_v59  ;;  %16441 = vmatprep.mubr.f32.mxu0 %v27103_v61  ;;  %v6265_v45 = vrot.slane %v6249_v29, %v27101_v2  ;;  %v6272_v54 = vrot.slane %v6250_v1, %v27101_v2  ;;  %v6280_v39 = vcombine.high %v6258_v28, %v6258_v28 }
 0x3c8   : > { %14290 = vst.sshfl [vmem:[%s21848_s20 + $0x4a] sm:$0x1 pattern:$0x73625140] %v6250_v1  ;;  %16444 = vmatprep.subr.mxu0 %v23213_v27  ;;  %v6202_v46 = vcombine.high %v6200_v37, %v6200_v37  ;;  %v6216_v35 = vrot.slane %v6200_v37, %v27101_v2  ;;  %v6223_v4 = vrot.slane %v6201_v49, %v27101_v2  ;;  %v27104_v1 = vand.u32 4294901760, %v23501_v22 }
 0x3c9   : > { %14291 = vst.sshfl [vmem:[%s21848_s20 + $0x62] sm:$0x1 pattern:$0x73625140] %v6249_v29  ;;  %v6231_v8 = vcombine.high %v6209_v41, %v6209_v41  ;;  %17527 = vmatpush3.bf16.msra.mxu1 %v23517_v7  ;;  %v6281_v3 = vcombine.high %v6265_v45, %v6265_v45  ;;  %v6282_v28 = vcombine.high %v6272_v54, %v6272_v54  ;;  %6308 = vst [vmem:[%s21848_s20 + $0x52] sm:$0x1] %v6280_v39 }
 0x3ca   : > { %14286 = vst.sshfl [vmem:[%s21848_s20 + $0xa] sm:$0x1 pattern:$0x73625140] %v6201_v49  ;;  %17529 = vmatprep.subr.bf16.mxu1 %v23524_v34  ;;  %v23569_v29 = vsub.f32 %v23462_v14, %v9431_v20  ;;  %v27105_v49 = vand.u32 4294901760, %v23503_v50  ;;  %v6230_v45 = vrot.slane %v6202_v46, %v27101_v2  ;;  %v6232_v54 = vcombine.high %v6216_v35, %v6216_v35 }
 0x3cb   : > { %14287 = vst.sshfl [vmem:[%s21848_s20 + $0x22] sm:$0x1 pattern:$0x73625140] %v6200_v37  ;;  %v6233_v41 = vcombine.high %v6223_v4, %v6223_v4  ;;  %6300 = vst [vmem:[%s21848_s20 + $0x12] sm:$0x1] %v6231_v8 }
 0x3cc   : > { %14292 = vst.sshfl [vmem:[%s21848_s20 + $0x6a] sm:$0x1 pattern:$0x73625140] %v6251_v24  ;;  %v23575_v37 = vpack.c.bf16 %v27105_v49, %v27104_v1  ;;  %v26187_v24 = vand.u32 4294901760, %v23254_v6  ;;  %v27107_v14 = vand.u32 4294901760, %v23464_v13 }
 0x3cd   : > { %14288 = vst.sshfl [vmem:[%s21848_s20 + $0x2a] sm:$0x1 pattern:$0x73625140] %v6202_v46  ;;  %6309 = vst [vmem:[%s21848_s20 + $0x5a] sm:$0x1] %v6282_v28  ;;  %v6234_v46 = vcombine.high %v6230_v45, %v6230_v45  ;;  %17531 = vmatpush3.bf16.msra.mxu1 %v23532_v33  ;;  %v17570_v45 = vpack.c.bf16 %v23300_v43, %v23254_v6 }
 0x3ce   : > { %27106 = vst [vmem:[#allocation69_spill] sm:$0xff] %v23575_v37  ;;  %6312 = vst [vmem:[%s21848_s20 + $0x72] sm:$0x1] %v6281_v3  ;;  %v23586_v20 = vsub.f32 %v23464_v13, %v27107_v14  ;;  %v27108_v39 = vand.u32 4294901760, %v23511_v38  ;;  %v27109_v1 = vand.u32 4294901760, %v23513_v63  ;;  %v27111_v4 = vand.u32 4294901760, %v23243_v9  ;;  %17533 = vmatprep.subr.bf16.mxu1 %v23575_v37 }
 0x3cf   : > { %v27112_v8 = vand.u32 4294901760, %v23246_v51  ;;  %6301 = vst [vmem:[%s21848_s20 + $0x1a] sm:$0x1] %v6233_v41  ;;  %6304 = vst [vmem:[%s21848_s20 + $0x32] sm:$0x1] %v6232_v54  ;;  %v17572_v54 = vpack.c.bf16 %v23316_v44, %v23313_v53  ;;  %v27114_v41 = vand.u32 4294901760, %v23501_v22  ;;  %v9525_v14 = vsub.f32 %v23254_v6, %v26187_v24 }
 0x3d0   : > { %v23592_v49 = vpack.c.bf16 %v27109_v1, %v27108_v39  ;;  %v9637_v35 = vsub.f32 %v23243_v9, %v27111_v4  ;;  %v27113_v39 = vld [vmem:[#allocation50_spill] sm:$0xff]  ;;  %v17568_v1 = vpack.c.bf16 %v23246_v51, %v23243_v9  ;;  %6305 = vst [vmem:[%s21848_s20 + $0x3a] sm:$0x1] %v6234_v46  ;;  %v27117_v24 = vand.u32 4294901760, %v23313_v53 }
 0x3d1   : > { %v9644_v3 = vsub.f32 %v23246_v51, %v27112_v8  ;;  %16442 = vmatmul.mubr.f32.vlgmr.msra.gmra.mrb[64].mxu0 %v27113_v39  ;;  %v23619_v4 = vsub.f32 %v23501_v22, %v27114_v41  ;;  %v17574_v8 = vpack.c.bf16 %v23341_v11, %v23322_v32  ;;  %v27115_v22 = vand.u32 4294901760, %v23503_v50 }
 0x3d2   : > { %27110 = vst [vmem:[#allocation57_spill] sm:$0xff] %v23592_v49  ;;  %16445 = vmatpush3.msra.mxu0 %v23213_v27  ;;  %16446 = vmatprep.mubr.f32.mxu0 %v27064_v19  ;;  %v9638_v28 = vand.u32 4294901760, %v9637_v35  ;;  %v27116_v39 = vand.u32 4294901760, %v23300_v43  ;;  %v9651_v35 = vsub.f32 %v23313_v53, %v27117_v24  ;;  %v27119_v13 = vand.u32 4294901760, %v23511_v38 }
 0x3d3   : > { %16449 = vmatprep.subr.mxu0 %v23128_v59  ;;  %v9645_v46 = vand.u32 4294901760, %v9644_v3  ;;  %v23633_v41 = vsub.f32 %v23503_v50, %v27115_v22  ;;  %17535 = vmatpush3.bf16.msra.mxu1 %v23592_v49  ;;  %v27118_v3 = vand.u32 4294901760, %v23316_v44  ;;  %v27120_v50 = vand.u32 4294901760, %v23513_v63 }
 0x3d4   : > { %v9532_v61 = vsub.f32 %v23300_v43, %v27116_v39  ;;  %v23648_v57 = vsub.f32 %v23511_v38, %v27119_v13  ;;  %17569 = vmatprep.subr.bf16.mxu1 %v17568_v1  ;;  %v17576_v24 = vpack.c.bf16 %v23350_v31, %v23347_v17  ;;  %v27121_v13 = vld [vmem:[#allocation41_spill] sm:$0xff]  ;;  %v27122_v1 = vand.u32 4294901760, %v23322_v32  ;;  %v27124_v38 = vld [vmem:[#allocation48_spill] sm:$0xff] }
 0x3d5   : > { %v9658_v27 = vsub.f32 %v23316_v44, %v27118_v3  ;;  %v23653_v22 = vsub.f32 %v23513_v63, %v27120_v50  ;;  %v17578_v3 = vpack.c.bf16 %v23386_v25, %v23379_v55  ;;  %v17536_v49 = vpack.c.bf16 %v9645_v46, %v9638_v28 }
 0x3d6   : > { %9501 = vmatmul.mubr.f32.vlgmr.msra.gmra.mrb[64].mxu1 %v27121_v13  ;;  %v9526_v63 = vand.u32 4294901760, %v9525_v14  ;;  %v9539_v50 = vsub.f32 %v23322_v32, %v27122_v1  ;;  %v27123_v2 = vand.u32 4294901760, %v23341_v11  ;;  %v9533_v37 = vand.u32 4294901760, %v9532_v61 }
 0x3d7   : > { %17571 = vmatpush3.bf16.msra.mxu1 %v17570_v45  ;;  %v9652_v33 = vand.u32 4294901760, %v9651_v35  ;;  %v9659_v34 = vand.u32 4294901760, %v9658_v27  ;;  %9510 = vmatprep.mubr.f32.mxu1 %v27124_v38  ;;  %v27125_v28 = vand.u32 4294901760, %v23347_v17  ;;  %v27126_v46 = vand.u32 4294901760, %v23350_v31  ;;  %v15182_v27 = vpop.f32.mrb[42].mxu1 }
 0x3d8   : > { %v9546_v39 = vsub.f32 %v23341_v11, %v27123_v2  ;;  %17573 = vmatprep.subr.bf16.mxu1 %v17572_v54  ;;  %v17582_v54 = vpack.c.bf16 %v23403_v16, %v23400_v52  ;;  %v27127_v35 = vand.u32 4294901760, %v23379_v55  ;;  %v15183_v38 = vpop.f32.mrb[43].mxu1  ;;  %v9540_v61 = vand.u32 4294901760, %v9539_v50 }
 0x3d9   : > { %16447 = vmatmul.mubr.f32.vlgmr.msra.gmra.mrb[64].mxu0 %v27092_v36  ;;  %v9665_v14 = vsub.f32 %v23347_v17, %v27125_v28  ;;  %v9672_v2 = vsub.f32 %v23350_v31, %v27126_v46  ;;  %v27128_v28 = vand.u32 4294901760, %v23386_v25  ;;  %v23695_v7 = vadd.f32 %v15183_v38, %v15182_v27  ;;  %v15185_v38 = vpop.f32.mrb[44].mxu1 }
 0x3da   : > { %16450 = vmatpush3.msra.mxu0 %v23128_v59  ;;  %16451 = vmatprep.mubr.f32.mxu0 %v27064_v19  ;;  %v9553_v1 = vsub.f32 %v23379_v55, %v27127_v35  ;;  %v9547_v45 = vand.u32 4294901760, %v9546_v39  ;;  %v27129_v19 = vld [vmem:[#allocation49_spill] sm:$0xff]  ;;  %v17538_v58 = vpack.c.bf16 %v9533_v37, %v9526_v63  ;;  %v17540_v48 = vpack.c.bf16 %v9659_v34, %v9652_v33  ;;  %v27130_v35 = vld [vmem:[#allocation34_spill] sm:$0xff]  ;;  %v27133_v37 = vld [vmem:[#allocation59_spill] sm:$0xff]  ;;  %v15186_v63 = vpop.f32.mrb[45].mxu1 }
 0x3db   : > { %v9560_v46 = vsub.f32 %v23386_v25, %v27128_v28  ;;  %17537 = vmatprep.subr.bf16.mxu0 %v17536_v49  ;;  %9516 = vmatmul.mubr.f32.gmra.mrb[66].mxu1 %v27129_v19  ;;  %v9666_v12 = vand.u32 4294901760, %v9665_v14  ;;  %v9673_v28 = vand.u32 4294901760, %v9672_v2  ;;  %v27131_v49 = vand.u32 4294901760, %v23391_v60 }
 0x3dc   : > { %17575 = vmatpush3.bf16.msra.mxu1 %v17574_v8  ;;  %9890 = vmatprep.mubr.f32.mxu1 %v27130_v35  ;;  %v27132_v50 = vand.u32 4294901760, %v23393_v47  ;;  %v9554_v13 = vand.u32 4294901760, %v9553_v1  ;;  %v17542_v33 = vpack.c.bf16 %v9547_v45, %v9540_v61  ;;  %v27134_v14 = vand.u32 4294901760, %v23400_v52  ;;  %v27136_v1 = vld [vmem:[#allocation60_spill] sm:$0xff]  ;;  %v27139_v45 = vld [vmem:[#allocation33_spill] sm:$0xff] }
 0x3dd   : > { %17577 = vmatprep.subr.bf16.mxu1 %v17576_v24  ;;  %v9679_v39 = vsub.f32 %v23391_v60, %v27131_v49  ;;  %v9561_v19 = vand.u32 4294901760, %v9560_v46  ;;  %v17584_v24 = vpack.c.bf16 %v27133_v37, %v23448_v10  ;;  %v27135_v27 = vand.u32 4294901760, %v23403_v16 }
 0x3de   : > { %v9686_v59 = vsub.f32 %v23393_v47, %v27132_v50  ;;  %v9567_v2 = vsub.f32 %v23400_v52, %v27134_v14  ;;  %v17586_v46 = vpack.c.bf16 %v23489_v18, %v27136_v1  ;;  %v23716_v50 = vadd.f32 %v15186_v63, %v15185_v38 }
 0x3df   : > { %v9574_v49 = vsub.f32 %v23403_v16, %v27135_v27  ;;  %v17544_v34 = vpack.c.bf16 %v9673_v28, %v9666_v12  ;;  %v9680_v8 = vand.u32 4294901760, %v9679_v39  ;;  %v17588_v35 = vpack.c.bf16 %v23507_v26, %v23499_v62  ;;  %v15144_v39 = vpop.f32.mrb[40].mxu0 }
 0x3e0   : > { %17579 = vmatpush3.bf16.msra.mxu1 %v17578_v3  ;;  %v9687_v14 = vand.u32 4294901760, %v9686_v59  ;;  %v17546_v3 = vpack.c.bf16 %v9561_v19, %v9554_v13  ;;  %v27137_v27 = vand.u32 4294901760, %v23448_v10  ;;  %v27138_v63 = vand.u32 4294901760, %v27133_v37  ;;  %v27144_v59 = vld [vmem:[#allocation72_spill] sm:$0xff] }
 0x3e1   : > { %16452 = vmatmul.mubr.f32.vlgmr.msra.gmra.mrb[64].mxu0 %v27092_v36  ;;  %17581 = vmatprep.subr.bf16.mxu1 %v17580_v40  ;;  %v9568_v40 = vand.u32 4294901760, %v9567_v2  ;;  %v9575_v12 = vand.u32 4294901760, %v9574_v49  ;;  %v17590_v19 = vpack.c.bf16 %v23519_v15, %v23509_v23  ;;  %v15145_v2 = vpop.f32.mrb[41].mxu0  ;;  %v17592_v28 = vpack.c.bf16 %v23526_v5, %v23521_v21 }
 0x3e2   : > { %17539 = vmatpush3.bf16.msra.mxu0 %v17538_v58  ;;  %v9693_v38 = vsub.f32 %v23448_v10, %v27137_v27  ;;  %v9700_v61 = vsub.f32 %v27133_v37, %v27138_v63  ;;  %9746 = vmatprep.mubr.f32.mxu0 %v27139_v45  ;;  %v27140_v58 = vand.u32 4294901760, %v27136_v1  ;;  %v27141_v27 = vand.u32 4294901760, %v23489_v18 }
 0x3e3   : > { %17541 = vmatprep.subr.bf16.mxu0 %v17540_v48  ;;  %v17548_v49 = vpack.c.bf16 %v9687_v14, %v9680_v8  ;;  %v15146_v36 = vadd.f32 %v15145_v2, %v15144_v39  ;;  %v17594_v48 = vpack.c.bf16 %v23586_v20, %v23569_v29  ;;  %v27142_v8 = vand.u32 4294901760, %v23499_v62 }
 0x3e4   : > { %17583 = vmatpush3.bf16.msra.mxu1 %v17582_v54  ;;  %v9581_v13 = vsub.f32 %v27136_v1, %v27140_v58  ;;  %v9588_v63 = vsub.f32 %v23489_v18, %v27141_v27  ;;  %v9694_v42 = vand.u32 4294901760, %v9693_v38  ;;  %v9701_v58 = vand.u32 4294901760, %v9700_v61 }
 0x3e5   : > { %17585 = vmatprep.subr.bf16.mxu1 %v17584_v24  ;;  %v17550_v27 = vpack.c.bf16 %v9575_v12, %v9568_v40  ;;  %v9707_v24 = vsub.f32 %v23499_v62, %v27142_v8  ;;  %v27143_v14 = vand.u32 4294901760, %v23507_v26  ;;  %v6672_v39 = vadd.f32 %v15146_v36, %v27144_v59 }
 0x3e6   : > { %17543 = vmatpush3.bf16.msra.mxu0 %v17542_v33  ;;  %v15147_v33 = vpop.f32.mrb[42].mxu0  ;;  %v9582_v61 = vand.u32 4294901760, %v9581_v13  ;;  %v9589_v38 = vand.u32 4294901760, %v9588_v63  ;;  %v27146_v2 = vand.u32 4294901760, %v23519_v15  ;;  %v17552_v13 = vpack.c.bf16 %v9701_v58, %v9694_v42 }
 0x3e7   : > { %17545 = vmatprep.subr.bf16.mxu0 %v17544_v34  ;;  %v9714_v54 = vsub.f32 %v23507_v26, %v27143_v14  ;;  %v27145_v34 = vand.u32 4294901760, %v23509_v23  ;;  %v15148_v12 = vpop.f32.mrb[43].mxu0  ;;  %v9721_v14 = vsub.f32 %v23521_v21, %v27147_v30  ;;  %v27148_v63 = vand.u32 4294901760, %v23526_v5 }
 0x3e8   : > { %17587 = vmatpush3.bf16.msra.mxu1 %v17586_v46  ;;  %v9602_v8 = vsub.f32 %v23519_v15, %v27146_v2  ;;  %v9615_v46 = vand.u32 4294901760, %v23586_v20  ;;  %v15149_v59 = vadd.f32 %v15148_v12, %v15147_v33  ;;  %v9708_v2 = vand.u32 4294901760, %v9707_v24 }
 0x3e9   : > { %v9595_v40 = vsub.f32 %v23509_v23, %v27145_v34  ;;  %17589 = vmatprep.subr.bf16.mxu1 %v17588_v35  ;;  %v9728_v34 = vsub.f32 %v23526_v5, %v27148_v63  ;;  %v23770_v35 = vadd.f32 %v23695_v7, %v6672_v39  ;;  %v9715_v0 = vand.u32 4294901760, %v9714_v54 }
 0x3ea   : > { %17547 = vmatpush3.bf16.msra.mxu0 %v17546_v3  ;;  %v9734_v15 = vand.u32 4294901760, %v23619_v4  ;;  %v9741_v30 = vand.u32 4294901760, %v23633_v41  ;;  %v6679_v36 = vadd.f32 %v15149_v59, %v23483_v56  ;;  %v17554_v33 = vpack.c.bf16 %v9589_v38, %v9582_v61 }
 0x3eb   : > { %17549 = vmatprep.subr.bf16.mxu0 %v17548_v49  ;;  %v9596_v3 = vand.u32 4294901760, %v9595_v40  ;;  %v17596_v42 = vpack.c.bf16 %v23633_v41, %v23619_v4  ;;  %v9603_v58 = vand.u32 4294901760, %v9602_v8  ;;  %v9722_v12 = vand.u32 4294901760, %v9721_v14 }
 0x3ec   : > { %17591 = vmatpush3.bf16.msra.mxu1 %v17590_v19  ;;  %v27149_v7 = vand.u32 4294901760, %v23569_v29  ;;  %v9616_v54 = vsub.f32 %v23586_v20, %v9615_v46  ;;  %v23784_v24 = vadd.f32 %v23716_v50, %v6679_v36  ;;  %v9729_v56 = vand.u32 4294901760, %v9728_v34  ;;  %v27194_v20 = vld [vmem:[#allocation53_spill] sm:$0xff] }
 0x3ed   : > { %17593 = vmatprep.subr.bf16.mxu1 %v17592_v28  ;;  %v26216_v19 = vand.u32 4294901760, %v23648_v57  ;;  %v26215_v39 = vand.u32 4294901760, %v23653_v22  ;;  %v17556_v28 = vpack.c.bf16 %v9715_v0, %v9708_v2  ;;  %v9735_v61 = vsub.f32 %v23619_v4, %v9734_v15  ;;  %v18501_v2 = vld [vmem:[%s19573_s21 + $0x100] sm:$0x1] }
 0x3ee   : > { %v9609_v49 = vsub.f32 %v23569_v29, %v27149_v7  ;;  %17551 = vmatpush3.bf16.msra.mxu0 %v17550_v27  ;;  %v9742_v38 = vsub.f32 %v23633_v41, %v9741_v30  ;;  %v17598_v50 = vpack.c.bf16 %v23653_v22, %v23648_v57  ;;  %v17558_v27 = vpack.c.bf16 %v9603_v58, %v9596_v3  ;;  %v18502_v3 = vld [vmem:[%s19576_s5 + $0x100] sm:$0x1] }
 0x3ef   : > { %17553 = vmatprep.subr.bf16.mxu0 %v17552_v13  ;;  %v27150_v0 = vand.u32 4294901760, %v23243_v9  ;;  %v27151_v8 = vand.u32 4294901760, %v23246_v51  ;;  %v17560_v36 = vpack.c.bf16 %v9729_v56, %v9722_v12  ;;  %v9617_v59 = vand.u32 4294901760, %v9616_v54  ;;  %v18504_v51 = vld [vmem:[%s19583_s26 + $0x100] sm:$0x1] }
 0x3f0   : > { %17595 = vmatpush3.bf16.msra.mxu1 %v17594_v48  ;;  %v9610_v40 = vand.u32 4294901760, %v9609_v49  ;;  %v9623_v48 = vsub.f32 %v23648_v57, %v26216_v19  ;;  %v9630_v13 = vsub.f32 %v23653_v22, %v26215_v39  ;;  %v9736_v63 = vand.u32 4294901760, %v9735_v61 }
 0x3f1   : > { %17597 = vmatprep.subr.bf16.mxu1 %v17596_v42  ;;  %v17632_v14 = vpack.c.bf16 %v27151_v8, %v27150_v0  ;;  %v9743_v34 = vand.u32 4294901760, %v9742_v38  ;;  %v1423_v9 = vmul.f32 %v18502_v3, %v18501_v2  ;;  %v18503_v42 = vld [vmem:[%s19566_s7 + $0x100] sm:$0x1]  ;;  %v27153_v12 = vand.u32 4294901760, %v23300_v43  ;;  %v27156_v0 = vld [vmem:[#allocation38_spill] sm:$0xff]  ;;  %s19003_s7 = scalar_lea.vmem %s19002_s3, 3840 }
 0x3f2   : > { %17555 = vmatpush3.bf16.msra.mxu0 %v17554_v33  ;;  %v1456_v58 = vmul.f32 %v18504_v51, %v18503_v42  ;;  %v27152_v33 = vand.u32 4294901760, %v23254_v6  ;;  %v27154_v49 = vand.u32 4294901760, %v23313_v53  ;;  %v27155_v54 = vand.u32 4294901760, %v23316_v44  ;;  %v27159_v2 = vld [vmem:[#allocation44_spill] sm:$0xff]  ;;  %p19005_p0 = scmp.lt.s32.totalorder %s19003_s7, %s18997_s24 }
 0x3f3   : > { %17557 = vmatprep.subr.bf16.mxu0 %v17556_v28  ;;  %v17562_v28 = vpack.c.bf16 %v9617_v59, %v9610_v40  ;;  %v9624_v61 = vand.u32 4294901760, %v9623_v48  ;;  %v9631_v38 = vand.u32 4294901760, %v9630_v13  ;;  %v17564_v8 = vpack.c.bf16 %v9743_v34, %v9736_v63  ;;  %v15258_v40 = vpop.f32.mrb[46].mxu1  ;;  %v27162_v59 = vld [vmem:[#allocation45_spill] sm:$0xff]  ;;  %v18506_v42 = vld [vmem:[%s19596_s18 + $0x80] sm:$0xff] }
 0x3f4   : > { %17599 = vmatpush3.bf16.msra.mxu1 %v17598_v50  ;;  %v17634_v7 = vpack.c.bf16 %v27153_v12, %v27152_v33  ;;  %v17636_v56 = vpack.c.bf16 %v27155_v54, %v27154_v49  ;;  %v1489_v50 = vsub.f32 %v1423_v9, %v1456_v58  ;;  %v27157_v6 = vand.u32 4294901760, %v23322_v32  ;;  %v15259_v32 = vpop.f32.mrb[47].mxu1  ;;  %v18505_v9 = vld [vmem:[%s19586_s2 + $0x80] sm:$0xff]  ;;  %v18507_v58 = vld [vmem:[%s19593_s22 + $0x80] sm:$0xff]  ;;  %p19006_p11 = por %p19005_p0, %p19004_p2 }
 0x3f5   : > { %17633 = vmatprep.subr.bf16.mxu1 %v17632_v14  ;;  %v27158_v43 = vand.u32 4294901760, %v23341_v11  ;;  %v27160_v53 = vand.u32 4294901760, %v23347_v17  ;;  %v27161_v44 = vand.u32 4294901760, %v23350_v31  ;;  %v23830_v48 = vadd.f32 %v15259_v32, %v15258_v40  ;;  %v18513_v32 = vld [vmem:[%s19586_s2] sm:$0xff] }
 0x3f6   : > { %17559 = vmatpush3.bf16.msra.mxu0 %v17558_v27  ;;  %v9392_v11 = vsel %vm1695_vm1, %v1489_v50, 0  ;;  %v27163_v17 = vand.u32 4294901760, %v23379_v55  ;;  %v27164_v31 = vand.u32 4294901760, %v23386_v25  ;;  %v27165_v63 = vand.u32 4294901760, %v23391_v60  ;;  %v18508_v55 = vld [vmem:[%s21472_s13 + $0x80] sm:$0xff]  ;;  %v15261_v25 = vpop.f32.mrb[48].mxu1  ;;  %p19007_p13 = pnand %p19006_p11, %p19000_p12 }
 0x3f7   : > { %17561 = vmatprep.subr.bf16.mxu0 %v17560_v36  ;;  %9893 = vmatmul.mubr.f32.vlgmr.msra.gmra.mrb[68].mxu1 %v27156_v0  ;;  %v17638_v14 = vpack.c.bf16 %v27158_v43, %v27157_v6  ;;  %v17640_v27 = vpack.c.bf16 %v27161_v44, %v27160_v53  ;;  %v17566_v36 = vpack.c.bf16 %v9631_v38, %v9624_v61  ;;  %v27166_v34 = vand.u32 4294901760, %v23393_v47  ;;  %v15262_v60 = vpop.f32.mrb[49].mxu1  ;;  %v18510_v61 = vld [vmem:[%s19596_s18 + $0x88] sm:$0xff]  ;;  %v18512_v50 = vld [vmem:[%s21472_s13 + $0x88] sm:$0xff] }
 0x3f8   : > { %17635 = vmatpush3.bf16.msra.mxu1 %v17634_v7  ;;  %9899 = vmatprep.mubr.f32.mxu1 %v27159_v2  ;;  %v17642_v13 = vpack.c.bf16 %v27164_v31, %v27163_v17  ;;  %v1506_v51 = vmul.f32 %v18506_v42, %v18505_v9  ;;  %v1539_v33 = vmul.f32 %v18508_v55, %v18507_v58  ;;  %v23845_v12 = vand.u32 4294901760, %v9392_v11  ;;  %v27167_v7 = vld [vmem:[#allocation58_spill] sm:$0xff]  ;;  %v27170_v43 = vld [vmem:[#allocation37_spill] sm:$0xff]  ;;  %v27173_v44 = vld [vmem:[#allocation64_spill] sm:$0xff]  ;;  %v15220_v58 = vpop.f32.mrb[44].mxu0 }
 0x3f9   : > { %17637 = vmatprep.subr.bf16.mxu1 %v17636_v56  ;;  %v17644_v3 = vpack.c.bf16 %v27166_v34, %v27165_v63  ;;  %v23848_v49 = vadd.f32 %v15262_v60, %v15261_v25  ;;  %v27168_v47 = vand.u32 4294901760, %v23400_v52  ;;  %v27169_v54 = vand.u32 4294901760, %v23403_v16  ;;  %v18514_v17 = vld [vmem:[%s19596_s18] sm:$0xff]  ;;  %v18517_v63 = vld [vmem:[%s19593_s22] sm:$0xff]  ;;  %v18519_v9 = vld [vmem:[%s19593_s22 + $0x8] sm:$0xff] }
 0x3fa   : > { %17563 = vmatpush3.bf16.msra.mxu0 %v17562_v28  ;;  %v18509_v28 = vld [vmem:[%s19586_s2 + $0x88] sm:$0xff]  ;;  %v27171_v52 = vand.u32 4294901760, %v23448_v10  ;;  %v27172_v16 = vand.u32 4294901760, %v27133_v37  ;;  %v23863_v53 = vadd.f32 %v1539_v33, %v1506_v51  ;;  %v23868_v40 = vsub.f32 %v9392_v11, %v23845_v12  ;;  %v18518_v34 = vld [vmem:[%s21472_s13] sm:$0xff]  ;;  %v18520_v42 = vld [vmem:[%s21472_s13 + $0x8] sm:$0xff] }
 0x3fb   : > { %17565 = vmatprep.subr.bf16.mxu0 %v17564_v8  ;;  %9902 = vmatmul.mubr.f32.gmra.mrb[70].mxu1 %v27162_v59  ;;  %v17646_v56 = vpack.c.bf16 %v27169_v54, %v27168_v47  ;;  %v1507_v38 = vmul.f32 %v18510_v61, %v18509_v28  ;;  %v18511_v8 = vld [vmem:[%s19593_s22 + $0x88] sm:$0xff]  ;;  %v1490_v31 = vmul.f32 %v18514_v17, %v18513_v32  ;;  %v18515_v10 = vld [vmem:[%s19586_s2 + $0x8] sm:$0xff]  ;;  %v27176_v55 = vand.u32 4294901760, %v27136_v1  ;;  %v15221_v47 = vpop.f32.mrb[45].mxu0 }
 0x3fc   : > { %17639 = vmatpush3.bf16.msra.mxu1 %v17638_v14  ;;  %10187 = vmatprep.mubr.f32.mxu1 %v27139_v45  ;;  %v1540_v6 = vmul.f32 %v18512_v50, %v18511_v8  ;;  %v17648_v14 = vpack.c.bf16 %v27172_v16, %v27171_v52  ;;  %v1524_v51 = vmul.f32 %v18520_v42, %v18519_v9  ;;  %v27177_v11 = vand.u32 4294901760, %v23489_v18  ;;  %v27178_v60 = vld [vmem:[#allocation43_spill] sm:$0xff]  ;;  %v27181_v1 = vld [vmem:[#allocation68_spill] sm:$0xff] }
 0x3fd   : > { %17641 = vmatprep.subr.bf16.mxu1 %v17640_v27  ;;  %v27174_v27 = vld [vmem:[#allocation42_spill] sm:$0xff]  ;;  %v27179_v54 = vand.u32 4294901760, %v23499_v62  ;;  %v27180_v28 = vand.u32 4294901760, %v23507_v26  ;;  %v15222_v8 = vadd.f32 %v15221_v47, %v15220_v58  ;;  %v27182_v18 = vand.u32 4294901760, %v23509_v23  ;;  %v18526_v42 = vld [vmem:[%s21472_s13 + $0x90] sm:$0xff]  ;;  %v18567_v59 = vld [vmem:[%s19593_s22 + $0x38] sm:$0xff] }
 0x3fe   : > { %17567 = vmatpush3.bf16.msra.mxu0 %v17566_v36  ;;  %v27175_v36 = vld [vmem:[#allocation67_spill] sm:$0xff]  ;;  %v17650_v33 = vpack.c.bf16 %v27177_v11, %v27176_v55  ;;  %v23883_v25 = vadd.f32 %v1540_v6, %v1507_v38  ;;  %v27183_v38 = vld [vmem:[#allocation90_spill] sm:$0xff]  ;;  %v27185_v52 = vand.u32 4294901760, %v23521_v21  ;;  %v27186_v16 = vand.u32 4294901760, %v23526_v5  ;;  %v18527_v55 = vld [vmem:[%s19593_s22 + $0x98] sm:$0xff] }
 0x3ff   : > { %17601 = vmatprep.subr.bf16.mxu0 %v27167_v7  ;;  %v17652_v61 = vpack.c.bf16 %v27180_v28, %v27179_v54  ;;  %v27184_v50 = vand.u32 4294901760, %v27183_v38  ;;  %v27188_v26 = vld [vmem:[#allocation66_spill] sm:$0xff]  ;;  %v23903_v32 = vand.u32 4294901760, %v23868_v40  ;;  %v6934_v5 = vadd.f32 %v15222_v8, %v23770_v35  ;;  %v18528_v11 = vld [vmem:[%s21472_s13 + $0x98] sm:$0xff] }
 0x400   : > { %17643 = vmatpush3.bf16.msra.mxu1 %v17642_v13  ;;  %v18516_v13 = vld [vmem:[%s19596_s18 + $0x8] sm:$0xff]  ;;  %v17656_v62 = vpack.c.bf16 %v27186_v16, %v27185_v52  ;;  %v18523_v9 = vld [vmem:[%s19586_s2 + $0x98] sm:$0xff]  ;;  %v18529_v47 = vld [vmem:[%s19586_s2 + $0x10] sm:$0xff] }
 0x401   : > { %9748 = vmatmul.mubr.f32.vlgmr.msra.gmra.mrb[66].mxu0 %v27170_v43  ;;  %17645 = vmatprep.subr.bf16.mxu1 %v17644_v3  ;;  %v1491_v37 = vmul.f32 %v18516_v13, %v18515_v10  ;;  %v1523_v3 = vmul.f32 %v18518_v34, %v18517_v63  ;;  %v17654_v6 = vpack.c.bf16 %v27184_v50, %v27182_v18  ;;  %v18521_v10 = vld [vmem:[%s19586_s2 + $0x90] sm:$0xff]  ;;  %v15223_v63 = vpop.f32.mrb[46].mxu0  ;;  %v10985_v34 = vand.u32 4294901760, %v23883_v25  ;;  %v18531_v8 = vld [vmem:[%s19586_s2 + $0x18] sm:$0xff]  ;;  %v18533_v16 = vld [vmem:[%s19593_s22 + $0x10] sm:$0xff] }
 0x402   : > { %17603 = vmatpush3.bf16.msra.mxu0 %v27173_v44  ;;  %9753 = vmatprep.mubr.f32.mxu0 %v27174_v27  ;;  %v18522_v13 = vld [vmem:[%s19596_s18 + $0x90] sm:$0xff]  ;;  %v15224_v58 = vpop.f32.mrb[47].mxu0  ;;  %v18532_v18 = vld [vmem:[%s19596_s18 + $0x18] sm:$0xff]  ;;  %v23930_v52 = vadd.f32 %v23830_v48, %v6934_v5  ;;  %v18568_v2 = vld [vmem:[%s21472_s13 + $0x38] sm:$0xff] }
 0x403   : > { %17605 = vmatprep.subr.bf16.mxu0 %v27175_v36  ;;  %v23905_v17 = vadd.f32 %v1523_v3, %v1490_v31  ;;  %v23907_v23 = vadd.f32 %v1524_v51, %v1491_v37  ;;  %v1508_v21 = vmul.f32 %v18522_v13, %v18521_v10  ;;  %v18524_v31 = vld [vmem:[%s19596_s18 + $0x98] sm:$0xff]  ;;  %v18525_v37 = vld [vmem:[%s19593_s22 + $0x90] sm:$0xff]  ;;  %v18530_v54 = vld [vmem:[%s19596_s18 + $0x10] sm:$0xff]  ;;  %v15225_v38 = vadd.f32 %v15224_v58, %v15223_v63 }
 0x404   : > { %17647 = vmatpush3.bf16.msra.mxu1 %v17646_v56  ;;  %v26214_v56 = vand.u32 4294901760, %v23863_v53  ;;  %v1509_v3 = vmul.f32 %v18524_v31, %v18523_v9  ;;  %v1541_v51 = vmul.f32 %v18526_v42, %v18525_v37  ;;  %v1492_v28 = vmul.f32 %v18530_v54, %v18529_v47  ;;  %v27190_v50 = vld [vmem:[#allocation63_spill] sm:$0xff]  ;;  %v18535_v9 = vld [vmem:[%s19593_s22 + $0x18] sm:$0xff] }
 0x405   : > { %9755 = vmatmul.mubr.f32.gmra.mrb[68].mxu0 %v27178_v60  ;;  %17649 = vmatprep.subr.bf16.mxu1 %v17648_v14  ;;  %v27187_v14 = vld [vmem:[#allocation36_spill] sm:$0xff]  ;;  %v18543_v5 = vld [vmem:[%s19593_s22 + $0xa8] sm:$0xff]  ;;  %v6945_v19 = vadd.f32 %v15225_v38, %v23784_v24  ;;  %v10934_v24 = vand.u32 4294901760, %v23905_v17 }
 0x406   : > { %17607 = vmatpush3.bf16.msra.mxu0 %v27181_v1  ;;  %10006 = vmatprep.mubr.f32.mxu0 %v27187_v14  ;;  %v23920_v35 = vsub.f32 %v23863_v53, %v26214_v56  ;;  %v18534_v10 = vld [vmem:[%s21472_s13 + $0x10] sm:$0xff]  ;;  %v18536_v31 = vld [vmem:[%s21472_s13 + $0x18] sm:$0xff]  ;;  %v18544_v56 = vld [vmem:[%s21472_s13 + $0xa8] sm:$0xff] }
 0x407   : > { %17609 = vmatprep.subr.bf16.mxu0 %v27188_v26  ;;  %v1525_v13 = vmul.f32 %v18534_v10, %v18533_v16  ;;  %v1526_v37 = vmul.f32 %v18536_v31, %v18535_v9  ;;  %v27191_v42 = vld [vmem:[#allocation52_spill] sm:$0xff]  ;;  %v1544_v39 = vmul.f32 %v18544_v56, %v18543_v5  ;;  %v27192_v16 = vand.u32 4294901760, %v23569_v29  ;;  %v18549_v5 = vld [vmem:[%s19593_s22 + $0x20] sm:$0xff] }
 0x408   : > { %17651 = vmatpush3.bf16.msra.mxu1 %v17650_v33  ;;  %27189 = vst [vmem:[#allocation70_spill] sm:$0xff] %v23920_v35  ;;  %v1542_v33 = vmul.f32 %v18528_v11, %v18527_v55  ;;  %v18537_v55 = vld [vmem:[%s19586_s2 + $0xa0] sm:$0xff]  ;;  %v18539_v58 = vld [vmem:[%s19586_s2 + $0xa8] sm:$0xff]  ;;  %v17660_v9 = vpack.c.bf16 %v9741_v30, %v9734_v15  ;;  %v10402_v31 = vsub.f32 %v23868_v40, %v23903_v32  ;;  %v10937_v15 = vand.u32 4294901760, %v23907_v23 }
 0x409   : > { %17653 = vmatprep.subr.bf16.mxu1 %v17652_v61  ;;  %v1493_v61 = vmul.f32 %v18532_v18, %v18531_v8  ;;  %v18538_v11 = vld [vmem:[%s19596_s18 + $0xa0] sm:$0xff]  ;;  %v18540_v47 = vld [vmem:[%s19596_s18 + $0xa8] sm:$0xff]  ;;  %v18541_v8 = vld [vmem:[%s19593_s22 + $0xa0] sm:$0xff]  ;;  %v17658_v10 = vpack.c.bf16 %v9615_v46, %v27192_v16  ;;  %v23959_v56 = vsub.f32 %v23883_v25, %v10985_v34  ;;  %v1574_v29 = vadd.f32 %v1541_v51, %v1508_v21 }
 0x40a   : > { %17611 = vmatpush3.bf16.msra.mxu0 %v27190_v50  ;;  %v1510_v63 = vmul.f32 %v18538_v11, %v18537_v55  ;;  %v1511_v54 = vmul.f32 %v18540_v47, %v18539_v58  ;;  %v18542_v18 = vld [vmem:[%s21472_s13 + $0xa0] sm:$0xff]  ;;  %v23964_v4 = vadd.f32 %v23848_v49, %v6945_v19  ;;  %v1558_v41 = vadd.f32 %v1525_v13, %v1492_v28  ;;  %v27195_v30 = vld [vmem:[#allocation55_spill] sm:$0xff] }
 0x40b   : > { %17613 = vmatprep.subr.bf16.mxu0 %v27191_v42  ;;  %v1543_v48 = vmul.f32 %v18542_v18, %v18541_v8  ;;  %27193 = vst [vmem:[#allocation71_spill] sm:$0xff] %v23959_v56  ;;  %v1559_v46 = vadd.f32 %v1526_v37, %v1493_v61  ;;  %v26218_v55 = vand.u32 4294901760, %v23920_v35  ;;  %v27196_v21 = vand.u32 4294901760, %v23648_v57  ;;  %v27199_v57 = vld [vmem:[#allocation115_spill] sm:$0xff]  ;;  %v18547_v8 = vld [vmem:[%s19586_s2 + $0x28] sm:$0xff]  ;;  %v18550_v16 = vld [vmem:[%s21472_s13 + $0x20] sm:$0xff] }
 0x40c   : > { %17655 = vmatpush3.bf16.msra.mxu1 %v17654_v6  ;;  %v1575_v6 = vadd.f32 %v1542_v33, %v1509_v3  ;;  %v23968_v38 = vadd.f32 %v1544_v39, %v1511_v54  ;;  %v27197_v3 = vand.u32 4294901760, %v23653_v22  ;;  %v23975_v33 = vand.u32 4294901760, %v10402_v31  ;;  %v18546_v47 = vld [vmem:[%s19596_s18 + $0x20] sm:$0xff]  ;;  %v18548_v18 = vld [vmem:[%s19596_s18 + $0x28] sm:$0xff] }
 0x40d   : > { %17657 = vmatprep.subr.bf16.mxu1 %v17656_v62  ;;  %v1576_v62 = vadd.f32 %v1543_v48, %v1510_v63  ;;  %v27198_v19 = vand.u32 4294901760, %v23863_v53  ;;  %v10988_v39 = vand.u32 4294901760, %v1574_v29  ;;  %v26217_v61 = vand.u32 4294901760, %v23959_v56 }
 0x40e   : > { %17615 = vmatpush3.bf16.msra.mxu0 %v27194_v20  ;;  %v17662_v51 = vpack.c.bf16 %v27197_v3, %v27196_v21  ;;  %v10991_v28 = vand.u32 4294901760, %v1575_v6  ;;  %v23985_v22 = vpack.c.bf16 %v10937_v15, %v10934_v24  ;;  %v23988_v13 = vsub.f32 %v23905_v17, %v10934_v24  ;;  %v18545_v17 = vld [vmem:[%s19586_s2 + $0x20] sm:$0xff] }
 0x40f   : > { %17617 = vmatprep.subr.bf16.mxu0 %v27195_v30  ;;  %v23981_v49 = vpack.c.bf16 %v10985_v34, %v27198_v19  ;;  %v10940_v53 = vand.u32 4294901760, %v1558_v41  ;;  %v10943_v25 = vand.u32 4294901760, %v1559_v46  ;;  %v27201_v34 = vld [vmem:[#allocation62_spill] sm:$0xff]  ;;  %v23992_v37 = vsub.f32 %v23907_v23, %v10937_v15 }
 0x410   : > { %17659 = vmatpush3.bf16.msra.mxu1 %v17658_v10  ;;  %27200 = vst [vmem:[#allocation116_spill] sm:$0xff] %v23988_v13  ;;  %v10994_v11 = vand.u32 4294901760, %v1576_v62  ;;  %v26219_v63 = vand.u32 4294901760, %v23968_v38  ;;  %v23998_v58 = vsub.f32 %v23920_v35, %v26218_v55  ;;  %v1494_v54 = vmul.f32 %v18546_v47, %v18545_v17  ;;  %v18551_v23 = vld [vmem:[%s19593_s22 + $0x28] sm:$0xff]  ;;  %v18564_v55 = vld [vmem:[%s21472_s13 + $0x30] sm:$0xff] }
 0x411   : > { %17661 = vmatprep.subr.bf16.mxu1 %v17660_v9  ;;  %27202 = vst [vmem:[#allocation75_spill] sm:$0xff] %v23992_v37  ;;  %v1495_v48 = vmul.f32 %v18548_v18, %v18547_v8  ;;  %v1527_v10 = vmul.f32 %v18550_v16, %v18549_v5  ;;  %v18552_v9 = vld [vmem:[%s21472_s13 + $0x28] sm:$0xff]  ;;  %v24009_v24 = vpack.c.bf16 %v10991_v28, %v10988_v39  ;;  %v26220_v8 = vand.u32 4294901760, %v23988_v13  ;;  %v18569_v35 = vld [vmem:[%s19586_s2 + $0xc0] sm:$0xff] }
 0x412   : > { %17619 = vmatpush3.bf16.msra.mxu0 %v27199_v57  ;;  %v1528_v31 = vmul.f32 %v18552_v9, %v18551_v23  ;;  %v24011_v15 = vsub.f32 %v1574_v29, %v10988_v39  ;;  %v24013_v21 = vsub.f32 %v1575_v6, %v10991_v28  ;;  %v11183_v3 = vsub.f32 %v23959_v56, %v26217_v61  ;;  %v27208_v29 = vld [vmem:[#allocation54_spill] sm:$0xff]  ;;  %v18563_v61 = vld [vmem:[%s19593_s22 + $0x30] sm:$0xff] }
 0x413   : > { %17621 = vmatprep.subr.bf16.mxu0 %v27201_v34  ;;  %v24019_v19 = vpack.c.bf16 %v10943_v25, %v10940_v53  ;;  %v24021_v17 = vsub.f32 %v1558_v41, %v10940_v53  ;;  %v24023_v47 = vsub.f32 %v1559_v46, %v10943_v25  ;;  %v24030_v6 = vpack.c.bf16 %v26219_v63, %v10994_v11  ;;  %v18553_v28 = vld [vmem:[%s19586_s2 + $0xb0] sm:$0xff]  ;;  %v18557_v23 = vld [vmem:[%s19586_s2 + $0xb8] sm:$0xff] }
 0x414   : > { %17663 = vmatpush3.bf16.msra.mxu1 %v17662_v51  ;;  %27203 = vst [vmem:[#allocation76_spill] sm:$0xff] %v24011_v15  ;;  %27204 = vst [vmem:[#allocation79_spill] sm:$0xff] %v24013_v21  ;;  %v27205_v51 = vld [vmem:[#allocation73_spill] sm:$0xff]  ;;  %v24032_v39 = vsub.f32 %v1576_v62, %v10994_v11  ;;  %v11177_v41 = vand.u32 4294901760, %v23998_v58  ;;  %v24039_v25 = vadd.f32 %v1527_v10, %v1494_v54  ;;  %v18555_v62 = vld [vmem:[%s19593_s22 + $0xb0] sm:$0xff]  ;;  %v11184_v16 = vand.u32 4294901760, %v11183_v3 }
 0x415   : > { %16454 = vmatprep.subr.mxu1 %v23845_v12  ;;  %27206 = vst [vmem:[#allocation80_spill] sm:$0xff] %v24021_v17  ;;  %27207 = vst [vmem:[#allocation74_spill] sm:$0xff] %v24023_v47  ;;  %v18554_v46 = vld [vmem:[%s19596_s18 + $0xb0] sm:$0xff]  ;;  %v24041_v18 = vadd.f32 %v1528_v31, %v1495_v48  ;;  %v18556_v11 = vld [vmem:[%s21472_s13 + $0xb0] sm:$0xff]  ;;  %v1529_v5 = vmul.f32 %v18564_v55, %v18563_v61  ;;  %v27213_v55 = vand.u32 4294901760, %v23968_v38 }
 0x416   : > { %17623 = vmatpush3.bf16.msra.mxu0 %v27205_v51  ;;  %27209 = vst [vmem:[#allocation77_spill] sm:$0xff] %v24032_v39  ;;  %v1512_v53 = vmul.f32 %v18554_v46, %v18553_v28  ;;  %v1545_v58 = vmul.f32 %v18556_v11, %v18555_v62  ;;  %v18558_v9 = vld [vmem:[%s19596_s18 + $0xb8] sm:$0xff]  ;;  %v18559_v54 = vld [vmem:[%s19593_s22 + $0xb8] sm:$0xff]  ;;  %v24056_v62 = vsub.f32 %v23988_v13, %v26220_v8  ;;  %v18561_v11 = vld [vmem:[%s19586_s2 + $0x30] sm:$0xff] }
 0x417   : > { %17625 = vmatprep.subr.bf16.mxu0 %v27208_v29  ;;  %10189 = vmatmul.mubr.f32.vlgmr.msra.gmra.mrb[72].mxu1 %v27170_v43  ;;  %v1513_v28 = vmul.f32 %v18558_v9, %v18557_v23  ;;  %v18560_v48 = vld [vmem:[%s21472_s13 + $0xb8] sm:$0xff]  ;;  %v18562_v23 = vld [vmem:[%s19596_s18 + $0x30] sm:$0xff]  ;;  %v18566_v31 = vld [vmem:[%s19596_s18 + $0x38] sm:$0xff]  ;;  %v1530_v8 = vmul.f32 %v18568_v2, %v18567_v59  ;;  %v24075_v61 = vsub.f32 %v23968_v38, %v27213_v55  ;;  %v10949_v0 = vand.u32 4294901760, %v24041_v18 }
 0x418   : > { %16455 = vmatpush3.msra.mxu1 %v23845_v12  ;;  %10194 = vmatprep.mubr.f32.mxu1 %v27174_v27  ;;  %v1546_v10 = vmul.f32 %v18560_v48, %v18559_v54  ;;  %v27210_v46 = vld [vmem:[#allocation65_spill] sm:$0xff]  ;;  %v1496_v9 = vmul.f32 %v18562_v23, %v18561_v11  ;;  %v18565_v48 = vld [vmem:[%s19586_s2 + $0x38] sm:$0xff]  ;;  %v27215_v23 = vand.u32 4294901760, %v23992_v37  ;;  %v1578_v59 = vadd.f32 %v1545_v58, %v1512_v53 }
 0x419   : > { %16459 = vmatprep.subr.mxu1 %v23975_v33  ;;  %v27211_v54 = vld [vmem:[#allocation69_spill] sm:$0xff]  ;;  %v1497_v63 = vmul.f32 %v18566_v31, %v18565_v48  ;;  %v27212_v11 = vld [vmem:[#allocation51_spill] sm:$0xff]  ;;  %27214 = vst [vmem:[#allocation78_spill] sm:$0xff] %v24075_v61  ;;  %v10946_v31 = vand.u32 4294901760, %v24039_v25  ;;  %v24081_v48 = vpack.c.bf16 %v11184_v16, %v11177_v41  ;;  %v27218_v38 = vand.u32 4294901760, %v24013_v21 }
 0x41a   : > { %17627 = vmatpush3.bf16.msra.mxu0 %v27210_v46  ;;  %v11071_v2 = vsub.f32 %v23992_v37, %v27215_v23  ;;  %v1579_v3 = vadd.f32 %v1546_v10, %v1513_v28  ;;  %v27217_v13 = vld [vmem:[#allocation57_spill] sm:$0xff]  ;;  %v1562_v56 = vadd.f32 %v1529_v5, %v1496_v9  ;;  %v18570_v23 = vld [vmem:[%s19596_s18 + $0xc0] sm:$0xff]  ;;  %v11065_v10 = vand.u32 4294901760, %v24056_v62  ;;  %v18576_v62 = vld [vmem:[%s21472_s13 + $0xc8] sm:$0xff] }
 0x41b   : > { %17629 = vmatprep.subr.bf16.mxu0 %v27211_v54  ;;  %10196 = vmatmul.mubr.f32.gmra.mrb[74].mxu1 %v27178_v60  ;;  %v11197_v55 = vsub.f32 %v24013_v21, %v27218_v38  ;;  %v1514_v41 = vmul.f32 %v18570_v23, %v18569_v35  ;;  %v18571_v53 = vld [vmem:[%s19593_s22 + $0xc0] sm:$0xff]  ;;  %v27219_v28 = vld [vmem:[#allocation56_spill] sm:$0xff]  ;;  %v27220_v38 = vand.u32 4294901760, %v24021_v17  ;;  %v27221_v9 = vand.u32 4294901760, %v24023_v47 }
 0x41c   : > { %16456 = vmatprep.mubr.f32.mxu1 %v27212_v11  ;;  %v27216_v11 = vand.u32 4294901760, %v24011_v15  ;;  %v18572_v58 = vld [vmem:[%s21472_s13 + $0xc0] sm:$0xff]  ;;  %v18574_v21 = vld [vmem:[%s19596_s18 + $0xc8] sm:$0xff] }
 0x41d   : > { %v1547_v16 = vmul.f32 %v18572_v58, %v18571_v53  ;;  %v11078_v5 = vsub.f32 %v24021_v17, %v27220_v38  ;;  %v11085_v35 = vsub.f32 %v24023_v47, %v27221_v9  ;;  %v27222_v23 = vld [vmem:[#allocation29_spill] sm:$0xff]  ;;  %v11072_v53 = vand.u32 4294901760, %v11071_v2  ;;  %v27225_v2 = vld [vmem:[#allocation46_spill] sm:$0xff]  ;;  %v15296_v9 = vpop.f32.mrb[48].mxu0 }
 0x41e   : > { %v11190_v14 = vsub.f32 %v24011_v15, %v27216_v11  ;;  %17631 = vmatpush3.bf16.msra.mxu0 %v27217_v13  ;;  %v1563_v11 = vadd.f32 %v1530_v8, %v1497_v63  ;;  %v11000_v58 = vand.u32 4294901760, %v1578_v59  ;;  %v18575_v15 = vld [vmem:[%s19593_s22 + $0xc8] sm:$0xff]  ;;  %v27223_v8 = vld [vmem:[#allocation40_spill] sm:$0xff]  ;;  %v24112_v38 = vpack.c.bf16 %v10949_v0, %v10946_v31 }
 0x41f   : > { %17665 = vmatprep.subr.bf16.mxu0 %v27167_v7  ;;  %16457 = vmatmul.mubr.f32.vlgmr.msra.gmra.mrb[76].mxu1 %v27219_v28  ;;  %v18573_v7 = vld [vmem:[%s19586_s2 + $0xc8] sm:$0xff]  ;;  %v1548_v63 = vmul.f32 %v18576_v62, %v18575_v15  ;;  %v11003_v17 = vand.u32 4294901760, %v1579_v3  ;;  %v24118_v37 = vadd.f32 %v1547_v16, %v1514_v41  ;;  %v24122_v15 = vsub.f32 %v24039_v25, %v10946_v31  ;;  %v15297_v41 = vpop.f32.mrb[49].mxu0 }
 0x420   : > { %16460 = vmatpush3.msra.mxu1 %v23975_v33  ;;  %16461 = vmatprep.mubr.f32.mxu1 %v27222_v23  ;;  %v1515_v28 = vmul.f32 %v18574_v21, %v18573_v7  ;;  %27224 = vst [vmem:[#allocation81_spill] sm:$0xff] %v24112_v38  ;;  %v11191_v47 = vand.u32 4294901760, %v11190_v14  ;;  %v11198_v21 = vand.u32 4294901760, %v11197_v55  ;;  %v10952_v7 = vand.u32 4294901760, %v1562_v56  ;;  %v27226_v55 = vld [vmem:[#allocation47_spill] sm:$0xff] }
 0x421   : > { %10010 = vmatmul.mubr.f32.vlgmr.msra.gmra.mrb[70].mxu0 %v27223_v8  ;;  %16464 = vmatprep.subr.mxu1 %v23868_v40  ;;  %v10955_v62 = vand.u32 4294901760, %v1563_v11  ;;  %v11079_v8 = vand.u32 4294901760, %v11078_v5  ;;  %v11086_v38 = vand.u32 4294901760, %v11085_v35  ;;  %v24125_v33 = vsub.f32 %v24041_v18, %v10949_v0 }
 0x422   : > { %17667 = vmatpush3.bf16.msra.mxu0 %v27173_v44  ;;  %10017 = vmatprep.mubr.f32.mxu0 %v27225_v2  ;;  %v24127_v44 = vpack.c.bf16 %v11072_v53, %v11065_v10  ;;  %v24129_v2 = vsub.f32 %v1578_v59, %v11000_v58  ;;  %v1581_v14 = vadd.f32 %v1548_v63, %v1515_v28  ;;  %v27228_v25 = vand.u32 4294901760, %v24032_v39  ;;  %v27230_v28 = vld [vmem:[#allocation30_spill] sm:$0xff]  ;;  %v15299_v53 = vpop.f32.mrb[50].mxu0  ;;  %v18578_v63 = vld [vmem:[%s19596_s18 + $0x40] sm:$0xff] }
 0x423   : > { %17669 = vmatprep.subr.bf16.mxu0 %v27175_v36  ;;  %v24132_v16 = vpack.c.bf16 %v11003_v17, %v11000_v58  ;;  %v24134_v36 = vsub.f32 %v1579_v3, %v11003_v17  ;;  %v27229_v5 = vand.u32 4294901760, %v24075_v61  ;;  %v15298_v18 = vadd.f32 %v15297_v41, %v15296_v9  ;;  %v18577_v58 = vld [vmem:[%s19586_s2 + $0x40] sm:$0xff] }
 0x424   : > { %v11204_v31 = vsub.f32 %v24032_v39, %v27228_v25  ;;  %v24144_v59 = vpack.c.bf16 %v11198_v21, %v11191_v47  ;;  %v24146_v17 = vsub.f32 %v1562_v56, %v10952_v7  ;;  %v11006_v3 = vand.u32 4294901760, %v24118_v37  ;;  %v27233_v47 = vld [vmem:[#allocation31_spill] sm:$0xff]  ;;  %v18579_v21 = vld [vmem:[%s19586_s2 + $0x48] sm:$0xff] }
 0x425   : > { %10021 = vmatmul.mubr.f32.gmra.mrb[72].mxu0 %v27226_v55  ;;  %27227 = vst [vmem:[#allocation83_spill] sm:$0xff] %v24132_v16  ;;  %v11211_v0 = vsub.f32 %v24075_v61, %v27229_v5  ;;  %v24151_v10 = vpack.c.bf16 %v10955_v62, %v10952_v7  ;;  %v24153_v35 = vsub.f32 %v1563_v11, %v10955_v62  ;;  %v18580_v11 = vld [vmem:[%s19596_s18 + $0x48] sm:$0xff]  ;;  %v18583_v25 = vld [vmem:[%s19593_s22 + $0x48] sm:$0xff] }
 0x426   : > { %17671 = vmatpush3.bf16.msra.mxu0 %v27181_v1  ;;  %10298 = vmatprep.mubr.f32.mxu0 %v27139_v45  ;;  %v24155_v1 = vpack.c.bf16 %v11086_v38, %v11079_v8  ;;  %v7224_v56 = vadd.f32 %v15298_v18, %v23930_v52  ;;  %v1498_v9 = vmul.f32 %v18578_v63, %v18577_v58  ;;  %v15300_v8 = vpop.f32.mrb[51].mxu0  ;;  %v11205_v38 = vand.u32 4294901760, %v11204_v31  ;;  %v18582_v52 = vld [vmem:[%s21472_s13 + $0x40] sm:$0xff]  ;;  %v18584_v5 = vld [vmem:[%s21472_s13 + $0x48] sm:$0xff]  ;;  %v16423_v63 = vpop.f32.mrb[50].mxu1  ;;  %v18591_v61 = vld [vmem:[%s19593_s22 + $0xd8] sm:$0xff] }
 0x427   : > { %17673 = vmatprep.subr.bf16.mxu0 %v27188_v26  ;;  %16462 = vmatmul.mubr.f32.vlgmr.msra.gmra.mrb[76].mxu1 %v27230_v28  ;;  %27231 = vst [vmem:[#allocation86_spill] sm:$0xff] %v24151_v10  ;;  %v11009_v26 = vand.u32 4294901760, %v1581_v14  ;;  %v1499_v7 = vmul.f32 %v18580_v11, %v18579_v21  ;;  %v11212_v62 = vand.u32 4294901760, %v11211_v0  ;;  %v1532_v18 = vmul.f32 %v18584_v5, %v18583_v25  ;;  %v7713_v11 = vpop.f32.mrb[51].mxu1  ;;  %v18587_v5 = vld [vmem:[%s19586_s2 + $0xd8] sm:$0xff]  ;;  %v18592_v39 = vld [vmem:[%s21472_s13 + $0xd8] sm:$0xff] }
 0x428   : > { %27232 = vst [vmem:[#allocation85_spill] sm:$0xff] %v24155_v1  ;;  %16465 = vmatpush3.msra.mxu1 %v23868_v40  ;;  %16466 = vmatprep.mubr.f32.mxu1 %v27233_v47  ;;  %v18581_v40 = vld [vmem:[%s19593_s22 + $0x40] sm:$0xff]  ;;  %v15301_v58 = vadd.f32 %v15300_v8, %v15299_v53  ;;  %v24171_v31 = vsub.f32 %v24118_v37, %v11006_v3  ;;  %v18588_v53 = vld [vmem:[%s19596_s18 + $0xd8] sm:$0xff]  ;;  %v18590_v47 = vld [vmem:[%s21472_s13 + $0xd0] sm:$0xff] }
 0x429   : > { %16469 = vmatprep.subr.mxu1 %v23845_v12  ;;  %v1531_v41 = vmul.f32 %v18582_v52, %v18581_v40  ;;  %v18585_v40 = vld [vmem:[%s19586_s2 + $0xd0] sm:$0xff]  ;;  %v1517_v8 = vmul.f32 %v18588_v53, %v18587_v5  ;;  %v1550_v37 = vmul.f32 %v18592_v39, %v18591_v61  ;;  %v18087_v0 = vadd.f32 %v7713_v11, %v7224_v56  ;;  %v27237_v56 = vld [vmem:[#allocation32_spill] sm:$0xff] }
 0x42a   : > { %17675 = vmatpush3.bf16.msra.mxu0 %v27190_v50  ;;  %v18586_v52 = vld [vmem:[%s19596_s18 + $0xd0] sm:$0xff]  ;;  %v18589_v50 = vld [vmem:[%s19593_s22 + $0xd0] sm:$0xff]  ;;  %v7231_v10 = vadd.f32 %v15301_v58, %v23964_v4  ;;  %v24185_v1 = vpack.c.bf16 %v11009_v26, %v11006_v3  ;;  %v24187_v21 = vsub.f32 %v1581_v14, %v11009_v26  ;;  %v27236_v3 = vand.u32 4294901760, %v24122_v15 }
 0x42b   : > { %17677 = vmatprep.subr.bf16.mxu0 %v27191_v42  ;;  %v1516_v25 = vmul.f32 %v18586_v52, %v18585_v40  ;;  %v1549_v55 = vmul.f32 %v18590_v47, %v18589_v50  ;;  %v24189_v42 = vpack.c.bf16 %v11212_v62, %v11205_v38  ;;  %v24191_v16 = vadd.f32 %v1531_v41, %v1498_v9  ;;  %v27235_v61 = vld [vmem:[#allocation61_spill] sm:$0xff] }
 0x42c   : > { %27234 = vst [vmem:[#allocation88_spill] sm:$0xff] %v24185_v1  ;;  %v24193_v40 = vadd.f32 %v1532_v18, %v1499_v7  ;;  %v26245_v52 = vand.u32 4294901760, %v24129_v2  ;;  %v18086_v47 = vadd.f32 %v16423_v63, %v7231_v10  ;;  %v7725_v39 = vcombine.high %v18087_v0, %v18087_v0  ;;  %v24228_v63 = vld [vmem:[%s19586_s2 + $0x50] sm:$0xff] }
 0x42d   : > { %v7732_v4 = vrot.slane %v18087_v0, %v27235_v61  ;;  %v24201_v14 = vsub.f32 %v24122_v15, %v27236_v3  ;;  %v27238_v26 = vand.u32 4294901760, %v24125_v33  ;;  %v24212_v9 = vadd.f32 %v1550_v37, %v1517_v8  ;;  %27240 = vst [vmem:[#allocation82_spill] sm:$0xff] %v24228_v63  ;;  %v24231_v0 = vld [vmem:[%s19596_s18 + $0x50] sm:$0xff] }
 0x42e   : > { %17679 = vmatpush3.bf16.msra.mxu0 %v27194_v20  ;;  %v24210_v20 = vadd.f32 %v1549_v55, %v1516_v25  ;;  %v26244_v7 = vand.u32 4294901760, %v24134_v36  ;;  %v7774_v38 = vcombine.high %v18086_v47, %v18086_v47  ;;  %v7781_v62 = vrot.slane %v18086_v47, %v27235_v61  ;;  %v27239_v55 = vld [vmem:[#allocation35_spill] sm:$0xff]  ;;  %27241 = vst [vmem:[#allocation87_spill] sm:$0xff] %v24231_v0 }
 0x42f   : > { %17681 = vmatprep.subr.bf16.mxu0 %v27195_v30  ;;  %16467 = vmatmul.mubr.f32.vlgmr.msra.gmra.mrb[76].mxu1 %v27237_v56  ;;  %v24208_v10 = vsub.f32 %v24125_v33, %v27238_v26  ;;  %v7739_v30 = vrot.slane %v7725_v39, %v27235_v61  ;;  %v7740_v41 = vcombine.high %v7732_v4, %v7732_v4 }
 0x430   : > { %14293 = vst.sshfl [vmem:[%s21848_s20 + $0x3] sm:$0x1 pattern:$0x73625140] %v7732_v4  ;;  %16470 = vmatpush3.msra.mxu1 %v23845_v12  ;;  %v7748_v18 = vrot.slane %v7732_v4, %v27235_v61  ;;  %16471 = vmatprep.mubr.f32.mxu1 %v27239_v55  ;;  %v24225_v58 = vsub.f32 %v24129_v2, %v26245_v52  ;;  %v24315_v52 = vld [vmem:[%s19586_s2 + $0xe8] sm:$0xff] }
 0x431   : > { %16474 = vmatprep.subr.mxu1 %v23903_v32  ;;  %v1500_v11 = vmul.f32 %v24231_v0, %v24228_v63  ;;  %v7788_v25 = vrot.slane %v7774_v38, %v27235_v61  ;;  %v7789_v5 = vcombine.high %v7781_v62, %v7781_v62  ;;  %v7797_v53 = vrot.slane %v7781_v62, %v27235_v61 }
 0x432   : > { %14297 = vst.sshfl [vmem:[%s21848_s20 + $0x43] sm:$0x1 pattern:$0x73625140] %v7781_v62  ;;  %v7741_v8 = vcombine.high %v7739_v30, %v7739_v30  ;;  %17683 = vmatpush3.bf16.msra.mxu0 %v27199_v57  ;;  %v7755_v50 = vrot.slane %v7739_v30, %v27235_v61  ;;  %v7762_v37 = vrot.slane %v7740_v41, %v27235_v61  ;;  %27251 = vst [vmem:[#allocation93_spill] sm:$0xff] %v24315_v52 }
 0x433   : > { %14294 = vst.sshfl [vmem:[%s21848_s20 + $0xb] sm:$0x1 pattern:$0x73625140] %v7740_v41  ;;  %v7770_v47 = vcombine.high %v7748_v18, %v7748_v18  ;;  %17685 = vmatprep.subr.bf16.mxu0 %v27201_v34  ;;  %v24247_v39 = vsub.f32 %v24134_v36, %v26244_v7  ;;  %v7790_v4 = vcombine.high %v7788_v25, %v7788_v25  ;;  %v24260_v41 = vld [vmem:[%s21472_s13 + $0x50] sm:$0xff] }
 0x434   : > { %14295 = vst.sshfl [vmem:[%s21848_s20 + $0x23] sm:$0x1 pattern:$0x73625140] %v7739_v30  ;;  %v7804_v3 = vrot.slane %v7788_v25, %v27235_v61  ;;  %v7811_v57 = vrot.slane %v7789_v5, %v27235_v61  ;;  %v7819_v26 = vcombine.high %v7797_v53, %v7797_v53  ;;  %v7769_v38 = vrot.slane %v7741_v8, %v27235_v61  ;;  %v24257_v30 = vld [vmem:[%s19593_s22 + $0x50] sm:$0xff] }
 0x435   : > { %14298 = vst.sshfl [vmem:[%s21848_s20 + $0x4b] sm:$0x1 pattern:$0x73625140] %v7789_v5  ;;  %v7771_v34 = vcombine.high %v7755_v50, %v7755_v50  ;;  %v7772_v62 = vcombine.high %v7762_v37, %v7762_v37  ;;  %7839 = vst [vmem:[%s21848_s20 + $0x13] sm:$0x1] %v7770_v47  ;;  %v1533_v18 = vmul.f32 %v24260_v41, %v24257_v30 }
 0x436   : > { %14299 = vst.sshfl [vmem:[%s21848_s20 + $0x63] sm:$0x1 pattern:$0x73625140] %v7788_v25  ;;  %27242 = vst [vmem:[#allocation84_spill] sm:$0xff] %v24257_v30  ;;  %v7820_v7 = vcombine.high %v7804_v3, %v7804_v3  ;;  %v7821_v5 = vcombine.high %v7811_v57, %v7811_v57  ;;  %17687 = vmatpush3.bf16.msra.mxu0 %v27205_v51  ;;  %v10958_v25 = vand.u32 4294901760, %v24191_v16 }
 0x437   : > { %14296 = vst.sshfl [vmem:[%s21848_s20 + $0x2b] sm:$0x1 pattern:$0x73625140] %v7741_v8  ;;  %27243 = vst [vmem:[#allocation89_spill] sm:$0xff] %v24260_v41  ;;  %v10961_v53 = vand.u32 4294901760, %v24193_v40  ;;  %v7773_v8 = vcombine.high %v7769_v38, %v7769_v38  ;;  %17689 = vmatprep.subr.bf16.mxu0 %v27208_v29 }
 0x438   : > { %7847 = vst [vmem:[%s21848_s20 + $0x53] sm:$0x1] %v7819_v26  ;;  %14300 = vst.sshfl [vmem:[%s21848_s20 + $0x6b] sm:$0x1 pattern:$0x73625140] %v7790_v4  ;;  %v24301_v26 = vadd.f32 %v1533_v18, %v1500_v11  ;;  %v24342_v61 = vsub.f32 %v24191_v16, %v10958_v25 }
 0x439   : > { %7840 = vst [vmem:[%s21848_s20 + $0x1b] sm:$0x1] %v7772_v62  ;;  %7843 = vst [vmem:[%s21848_s20 + $0x33] sm:$0x1] %v7771_v34  ;;  %v27244_v50 = vld [vmem:[#allocation50_spill] sm:$0xff]  ;;  %v11093_v37 = vand.u32 4294901760, %v24201_v14  ;;  %v24339_v56 = vpack.c.bf16 %v10961_v53, %v10958_v25 }
 0x43a   : > { %16472 = vmatmul.mubr.f32.vlgmr.msra.gmra.mrb[76].mxu1 %v27244_v50  ;;  %v11100_v51 = vand.u32 4294901760, %v24208_v10  ;;  %v11012_v47 = vand.u32 4294901760, %v24210_v20  ;;  %7848 = vst [vmem:[%s21848_s20 + $0x5b] sm:$0x1] %v7821_v5  ;;  %7851 = vst [vmem:[%s21848_s20 + $0x73] sm:$0x1] %v7820_v7  ;;  %17691 = vmatpush3.bf16.msra.mxu0 %v27210_v46 }
 0x43b   : > { %16475 = vmatpush3.msra.mxu1 %v23903_v32  ;;  %16476 = vmatprep.mubr.f32.mxu1 %v27222_v23  ;;  %v11015_v4 = vand.u32 4294901760, %v24212_v9  ;;  %v11219_v29 = vand.u32 4294901760, %v24225_v58  ;;  %v24283_v3 = vld [vmem:[%s19586_s2 + $0x58] sm:$0xff]  ;;  %v24291_v7 = vld [vmem:[%s19593_s22 + $0x58] sm:$0xff]  ;;  %7844 = vst [vmem:[%s21848_s20 + $0x3b] sm:$0x1] %v7773_v8 }
 0x43c   : > { %27245 = vst [vmem:[#allocation92_spill] sm:$0xff] %v24283_v3  ;;  %v24286_v14 = vld [vmem:[%s19596_s18 + $0x58] sm:$0xff]  ;;  %27247 = vst [vmem:[#allocation94_spill] sm:$0xff] %v24291_v7  ;;  %v24294_v32 = vld [vmem:[%s21472_s13 + $0x58] sm:$0xff]  ;;  %16479 = vmatprep.subr.mxu1 %v23845_v12  ;;  %v11226_v58 = vand.u32 4294901760, %v24247_v39  ;;  %17693 = vmatprep.subr.bf16.mxu0 %v27211_v54 }
 0x43d   : > { %27246 = vst [vmem:[#allocation95_spill] sm:$0xff] %v24286_v14  ;;  %v1501_v10 = vmul.f32 %v24286_v14, %v24283_v3  ;;  %27248 = vst [vmem:[#allocation97_spill] sm:$0xff] %v24294_v32  ;;  %v1534_v57 = vmul.f32 %v24294_v32, %v24291_v7  ;;  %v24307_v62 = vld [vmem:[%s19586_s2 + $0xe0] sm:$0xff]  ;;  %v24318_v50 = vld [vmem:[%s19596_s18 + $0xe8] sm:$0xff]  ;;  %v24356_v54 = vsub.f32 %v24212_v9, %v11015_v4 }
 0x43e   : > { %27249 = vst [vmem:[#allocation91_spill] sm:$0xff] %v24307_v62  ;;  %v24310_v5 = vld [vmem:[%s19596_s18 + $0xe0] sm:$0xff]  ;;  %27252 = vst [vmem:[#allocation98_spill] sm:$0xff] %v24318_v50  ;;  %v1519_v11 = vmul.f32 %v24318_v50, %v24315_v52  ;;  %v24323_v39 = vld [vmem:[%s19593_s22 + $0xe0] sm:$0xff]  ;;  %v24345_v52 = vsub.f32 %v24193_v40, %v10961_v53  ;;  %v24350_v50 = vpack.c.bf16 %v11015_v4, %v11012_v47  ;;  %v27258_v53 = vand.u32 4294901760, %v24146_v17 }
 0x43f   : > { %27250 = vst [vmem:[#allocation96_spill] sm:$0xff] %v24310_v5  ;;  %v1518_v8 = vmul.f32 %v24310_v5, %v24307_v62  ;;  %27253 = vst [vmem:[#allocation100_spill] sm:$0xff] %v24323_v39  ;;  %v24326_v18 = vld [vmem:[%s21472_s13 + $0xe0] sm:$0xff]  ;;  %v24331_v34 = vld [vmem:[%s19593_s22 + $0xe8] sm:$0xff]  ;;  %v26252_v62 = vand.u32 4294901760, %v24171_v31  ;;  %v24358_v16 = vpack.c.bf16 %v11226_v58, %v11219_v29  ;;  %v24360_v40 = vadd.f32 %v1534_v57, %v1501_v10  ;;  %v15352_v5 = vpop.f32.mrb[52].mxu0 }
 0x440   : > { %27254 = vst [vmem:[#allocation103_spill] sm:$0xff] %v24326_v18  ;;  %v1551_v46 = vmul.f32 %v24326_v18, %v24323_v39  ;;  %27255 = vst [vmem:[#allocation102_spill] sm:$0xff] %v24331_v34  ;;  %v24334_v38 = vld [vmem:[%s21472_s13 + $0xe8] sm:$0xff]  ;;  %v24348_v18 = vpack.c.bf16 %v11100_v51, %v11093_v37  ;;  %v24366_v37 = vsub.f32 %v24146_v17, %v27258_v53  ;;  %17695 = vmatpush3.bf16.msra.mxu0 %v27217_v13  ;;  %v24387_v29 = vld [vmem:[%s19586_s2 + $0x60] sm:$0xff] }
 0x441   : > { %27256 = vst [vmem:[#allocation105_spill] sm:$0xff] %v24334_v38  ;;  %v1552_v55 = vmul.f32 %v24334_v38, %v24331_v34  ;;  %27257 = vst [vmem:[#allocation99_spill] sm:$0xff] %v24339_v56  ;;  %v24353_v38 = vsub.f32 %v24210_v20, %v11012_v47  ;;  %v27259_v20 = vand.u32 4294901760, %v24153_v35  ;;  %17697 = vmatprep.subr.bf16.mxu0 %v23981_v49  ;;  %v24390_v10 = vld [vmem:[%s19596_s18 + $0x60] sm:$0xff]  ;;  %v24395_v57 = vld [vmem:[%s19586_s2 + $0x68] sm:$0xff] }
 0x442   : > { %v24374_v51 = vadd.f32 %v1551_v46, %v1518_v8  ;;  %16477 = vmatmul.mubr.f32.vlgmr.msra.gmra.mrb[76].mxu1 %v27230_v28  ;;  %v24384_v13 = vsub.f32 %v24171_v31, %v26252_v62  ;;  %27260 = vst [vmem:[#allocation104_spill] sm:$0xff] %v24387_v29  ;;  %27261 = vst [vmem:[#allocation101_spill] sm:$0xff] %v24390_v10  ;;  %v24398_v58 = vld [vmem:[%s19596_s18 + $0x68] sm:$0xff]  ;;  %v24408_v46 = vld [vmem:[%s21472_s13 + $0x60] sm:$0xff] }
 0x443   : > { %v24372_v9 = vsub.f32 %v24153_v35, %v27259_v20  ;;  %v24376_v47 = vadd.f32 %v1552_v55, %v1519_v11  ;;  %v1502_v55 = vmul.f32 %v24390_v10, %v24387_v29  ;;  %27262 = vst [vmem:[#allocation106_spill] sm:$0xff] %v24395_v57  ;;  %27263 = vst [vmem:[#allocation108_spill] sm:$0xff] %v24398_v58  ;;  %16480 = vmatpush3.msra.mxu1 %v23845_v12  ;;  %v24405_v11 = vld [vmem:[%s19593_s22 + $0x60] sm:$0xff]  ;;  %v24413_v20 = vld [vmem:[%s19593_s22 + $0x68] sm:$0xff] }
 0x444   : > { %v1503_v8 = vmul.f32 %v24398_v58, %v24395_v57  ;;  %16481 = vmatprep.mubr.f32.mxu1 %v27222_v23  ;;  %27264 = vst [vmem:[#allocation109_spill] sm:$0xff] %v24405_v11  ;;  %27265 = vst [vmem:[#allocation112_spill] sm:$0xff] %v24408_v46  ;;  %v1535_v53 = vmul.f32 %v24408_v46, %v24405_v11  ;;  %v24416_v62 = vld [vmem:[%s21472_s13 + $0x68] sm:$0xff]  ;;  %v24421_v4 = vld [vmem:[%s19586_s2 + $0xf0] sm:$0xff]  ;;  %10300 = vmatmul.mubr.f32.vlgmr.msra.gmra.mrb[74].mxu0 %v27170_v43  ;;  %v27277_v11 = vand.u32 4294901760, %v24187_v21 }
 0x445   : > { %27266 = vst [vmem:[#allocation113_spill] sm:$0xff] %v24413_v20  ;;  %27267 = vst [vmem:[#allocation107_spill] sm:$0xff] %v24416_v62  ;;  %v1536_v12 = vmul.f32 %v24416_v62, %v24413_v20  ;;  %v24424_v25 = vld [vmem:[%s19596_s18 + $0xf0] sm:$0xff]  ;;  %17729 = vmatprep.subr.bf16.mxu1 %v24081_v48  ;;  %v24432_v29 = vld [vmem:[%s19586_s2 + $0xf8] sm:$0xff]  ;;  %17699 = vmatpush3.bf16.msra.mxu0 %v23985_v22 }
 0x446   : > { %27268 = vst [vmem:[#allocation110_spill] sm:$0xff] %v24421_v4  ;;  %27269 = vst [vmem:[#allocation111_spill] sm:$0xff] %v24424_v25  ;;  %v1520_v57 = vmul.f32 %v24424_v25, %v24421_v4  ;;  %v24435_v58 = vld [vmem:[%s19596_s18 + $0xf8] sm:$0xff]  ;;  %v24440_v20 = vld [vmem:[%s19593_s22 + $0xf0] sm:$0xff]  ;;  %10305 = vmatprep.mubr.f32.mxu0 %v27174_v27  ;;  %v11239_v10 = vsub.f32 %v24187_v21, %v27277_v11  ;;  %17701 = vmatprep.subr.bf16.mxu0 %v24009_v24 }
 0x447   : > { %27270 = vst [vmem:[#allocation114_spill] sm:$0xff] %v24432_v29  ;;  %27271 = vst [vmem:[#allocation59_spill] sm:$0xff] %v24435_v58  ;;  %v1521_v62 = vmul.f32 %v24435_v58, %v24432_v29  ;;  %v24443_v23 = vld [vmem:[%s21472_s13 + $0xf0] sm:$0xff]  ;;  %v24448_v48 = vld [vmem:[%s19593_s22 + $0xf8] sm:$0xff]  ;;  %v27276_v29 = vand.u32 4294901760, %v24301_v26  ;;  %v24486_v32 = vadd.f32 %v1535_v53, %v1502_v55  ;;  %v15353_v55 = vpop.f32.mrb[53].mxu0 }
 0x448   : > { %27272 = vst [vmem:[#allocation60_spill] sm:$0xff] %v24440_v20  ;;  %27273 = vst [vmem:[#allocation72_spill] sm:$0xff] %v24443_v23  ;;  %v1553_v4 = vmul.f32 %v24443_v23, %v24440_v20  ;;  %v24451_v46 = vld [vmem:[%s21472_s13 + $0xf8] sm:$0xff]  ;;  %v11107_v23 = vand.u32 4294901760, %v24366_v37  ;;  %v11114_v20 = vand.u32 4294901760, %v24372_v9  ;;  %v24474_v34 = vld [vmem:[%s19596_s18 + $0x70] sm:$0xff]  ;;  %10307 = vmatmul.mubr.f32.gmra.mrb[76].mxu0 %v27178_v60 }
 0x449   : > { %27274 = vst [vmem:[#allocation58_spill] sm:$0xff] %v24448_v48  ;;  %27275 = vst [vmem:[#allocation64_spill] sm:$0xff] %v24451_v46  ;;  %v1554_v25 = vmul.f32 %v24451_v46, %v24448_v48  ;;  %v24460_v58 = vsub.f32 %v24301_v26, %v27276_v29  ;;  %v24471_v29 = vld [vmem:[%s19586_s2 + $0x70] sm:$0xff]  ;;  %v24479_v9 = vld [vmem:[%s19593_s22 + $0x70] sm:$0xff]  ;;  %v24488_v46 = vadd.f32 %v1536_v12, %v1503_v8  ;;  %v11233_v8 = vand.u32 4294901760, %v24384_v13 }
 0x44a   : > { %27278 = vst [vmem:[#allocation67_spill] sm:$0xff] %v24471_v29  ;;  %27279 = vst [vmem:[#allocation68_spill] sm:$0xff] %v24474_v34  ;;  %v1504_v37 = vmul.f32 %v24474_v34, %v24471_v29  ;;  %v24482_v39 = vld [vmem:[%s21472_s13 + $0x70] sm:$0xff]  ;;  %v24491_v48 = vld [vmem:[%s19586_s2 + $0x78] sm:$0xff]  ;;  %v26287_v53 = vand.u32 4294901760, %v24342_v61  ;;  %v24509_v12 = vadd.f32 %v1553_v4, %v1520_v57  ;;  %17703 = vmatpush3.bf16.msra.mxu0 %v24019_v19  ;;  %16482 = vmatmul.mubr.f32.vlgmr.msra.gmra.mrb[76].mxu1 %v27230_v28 }
 0x44b   : > { %27280 = vst [vmem:[#allocation90_spill] sm:$0xff] %v24479_v9  ;;  %27281 = vst [vmem:[#allocation66_spill] sm:$0xff] %v24482_v39  ;;  %v1537_v11 = vmul.f32 %v24482_v39, %v24479_v9  ;;  %v24494_v3 = vld [vmem:[%s19596_s18 + $0x78] sm:$0xff]  ;;  %v24499_v29 = vld [vmem:[%s19593_s22 + $0x78] sm:$0xff]  ;;  %v24511_v39 = vadd.f32 %v1554_v25, %v1521_v62  ;;  %17705 = vmatprep.subr.bf16.mxu0 %v24030_v6  ;;  %v27287_v13 = vand.u32 4294901760, %v24360_v40  ;;  %17731 = vmatpush3.bf16.msra.mxu1 %v24127_v44 }
 0x44c   : > { %27282 = vst [vmem:[#allocation63_spill] sm:$0xff] %v24491_v48  ;;  %27283 = vst [vmem:[#allocation52_spill] sm:$0xff] %v24494_v3  ;;  %v1505_v41 = vmul.f32 %v24494_v3, %v24491_v48  ;;  %v24502_v34 = vld [vmem:[%s21472_s13 + $0x78] sm:$0xff]  ;;  %v15354_v48 = vadd.f32 %v15353_v55, %v15352_v5  ;;  %v11240_v3 = vand.u32 4294901760, %v11239_v10  ;;  %v24524_v62 = vpack.c.bf16 %v11114_v20, %v11107_v23 }
 0x44d   : > { %27284 = vst [vmem:[#allocation53_spill] sm:$0xff] %v24499_v29  ;;  %27285 = vst [vmem:[#allocation55_spill] sm:$0xff] %v24502_v34  ;;  %v1538_v63 = vmul.f32 %v24502_v34, %v24499_v29  ;;  %v27286_v34 = vld [vmem:[#allocation39_spill] sm:$0xff]  ;;  %v24522_v4 = vsub.f32 %v24360_v40, %v27287_v13  ;;  %v24527_v25 = vadd.f32 %v1537_v11, %v1504_v37  ;;  %v27288_v10 = vand.u32 4294901760, %v24374_v51  ;;  %v15355_v13 = vpop.f32.mrb[54].mxu0 }
 0x44e   : > { %11034 = vmatprep.mubr.f32.mxu0 %v27286_v34  ;;  %11285 = vmatprep.mubr.f32.mxu1 %v27139_v45  ;;  %v27290_v23 = vand.u32 4294901760, %v24376_v47  ;;  %v11120_v20 = vsub.f32 %v24342_v61, %v26287_v53  ;;  %v17744_v7 = vpack.c.bf16 %v11240_v3, %v11233_v8  ;;  %v27294_v29 = vld [vmem:[#allocation83_spill] sm:$0xff]  ;;  %v27295_v37 = vand.u32 4294901760, %v24356_v54  ;;  %v27301_v34 = vld [vmem:[#allocation86_spill] sm:$0xff] }
 0x44f   : > { %v24533_v57 = vsub.f32 %v24374_v51, %v27288_v10  ;;  %v24537_v9 = vadd.f32 %v1538_v63, %v1505_v41  ;;  %17733 = vmatprep.subr.bf16.mxu1 %v24144_v59  ;;  %v15356_v63 = vpop.f32.mrb[55].mxu0  ;;  %v27291_v41 = vld [vmem:[#allocation81_spill] sm:$0xff]  ;;  %v15390_v10 = vpop.f32.mrb[52].mxu1  ;;  %v27292_v59 = vand.u32 4294901760, %v24345_v52  ;;  %v27297_v30 = vand.u32 4294901760, %v24486_v32 }
 0x450   : > { %v24544_v44 = vsub.f32 %v24376_v47, %v27290_v23  ;;  %17707 = vmatpush3.bf16.msra.mxu0 %v27291_v41  ;;  %v27293_v23 = vand.u32 4294901760, %v24353_v38  ;;  %v15357_v28 = vadd.f32 %v15356_v63, %v15355_v13  ;;  %v15391_v53 = vpop.f32.mrb[53].mxu1  ;;  %v11253_v11 = vsub.f32 %v24356_v54, %v27295_v37 }
 0x451   : > { %27289 = vst [vmem:[#allocation115_spill] sm:$0xff] %v24533_v57  ;;  %v11127_v55 = vsub.f32 %v24345_v52, %v27292_v59  ;;  %17709 = vmatprep.subr.bf16.mxu0 %v27294_v29  ;;  %v15392_v14 = vadd.f32 %v15391_v53, %v15390_v10  ;;  %v27296_v59 = vld [vmem:[#allocation85_spill] sm:$0xff]  ;;  %v24569_v13 = vsub.f32 %v24486_v32, %v27297_v30  ;;  %v27298_v63 = vand.u32 4294901760, %v24488_v46  ;;  %v15393_v29 = vpop.f32.mrb[54].mxu1 }
 0x452   : > { %v11246_v5 = vsub.f32 %v24353_v38, %v27293_v23  ;;  %17735 = vmatpush3.bf16.msra.mxu1 %v27296_v59  ;;  %v10979_v37 = vand.u32 4294901760, %v24537_v9  ;;  %v27299_v3 = vand.u32 4294901760, %v24509_v12  ;;  %v27300_v10 = vand.u32 4294901760, %v24511_v39 }
 0x453   : > { %v24574_v23 = vsub.f32 %v24488_v46, %v27298_v63  ;;  %17737 = vmatprep.subr.bf16.mxu1 %v24189_v42  ;;  %v24590_v63 = vadd.f32 %v15392_v14, %v15354_v48  ;;  %v11121_v0 = vand.u32 4294901760, %v11120_v20  ;;  %v11128_v42 = vand.u32 4294901760, %v11127_v55  ;;  %v15394_v20 = vpop.f32.mrb[55].mxu1 }
 0x454   : > { %v24581_v53 = vsub.f32 %v24509_v12, %v27299_v3  ;;  %v24586_v59 = vsub.f32 %v24511_v39, %v27300_v10  ;;  %17711 = vmatpush3.bf16.msra.mxu0 %v27301_v34  ;;  %v11247_v45 = vand.u32 4294901760, %v11246_v5  ;;  %v11254_v3 = vand.u32 4294901760, %v11253_v11 }
 0x455   : > { %17713 = vmatprep.subr.bf16.mxu0 %v24185_v1  ;;  %v27302_v41 = vand.u32 4294901760, %v24527_v25  ;;  %v27303_v30 = vand.u32 4294901760, %v24460_v58  ;;  %v27304_v14 = vand.u32 4294901760, %v24522_v4  ;;  %v24607_v5 = vsub.f32 %v24537_v9, %v10979_v37 }
 0x456   : > { %17739 = vmatpush3.bf16.msra.mxu1 %v24348_v18  ;;  %v27305_v1 = vand.u32 4294901760, %v24533_v57  ;;  %v27306_v34 = vand.u32 4294901760, %v24544_v44  ;;  %v27307_v55 = vand.u32 4294901760, %v24301_v26  ;;  %v17748_v9 = vpack.c.bf16 %v11254_v3, %v11247_v45 }
 0x457   : > { %v24597_v10 = vsub.f32 %v24527_v25, %v27302_v41  ;;  %v11134_v8 = vsub.f32 %v24460_v58, %v27303_v30  ;;  %v11141_v48 = vsub.f32 %v24522_v4, %v27304_v14  ;;  %v15395_v41 = vadd.f32 %v15394_v20, %v15393_v29  ;;  %17741 = vmatprep.subr.bf16.mxu1 %v24358_v16 }
 0x458   : > { %v11260_v30 = vsub.f32 %v24533_v57, %v27305_v1  ;;  %v11267_v14 = vsub.f32 %v24544_v44, %v27306_v34  ;;  %17715 = vmatpush3.bf16.msra.mxu0 %v24339_v56  ;;  %v27308_v29 = vand.u32 4294901760, %v24360_v40  ;;  %v27309_v16 = vand.u32 4294901760, %v24374_v51 }
 0x459   : > { %v27310_v1 = vand.u32 4294901760, %v24376_v47  ;;  %v24633_v57 = vadd.f32 %v15395_v41, %v15357_v28  ;;  %17717 = vmatprep.subr.bf16.mxu0 %v24350_v50  ;;  %v17746_v34 = vpack.c.bf16 %v11128_v42, %v11121_v0  ;;  %v11135_v18 = vand.u32 4294901760, %v11134_v8 }
 0x45a   : > { %v24625_v20 = vpack.c.bf16 %v27308_v29, %v27307_v55  ;;  %v11142_v56 = vand.u32 4294901760, %v11141_v48  ;;  %17743 = vmatpush3.bf16.msra.mxu1 %v24524_v62  ;;  %v27311_v26 = vand.u32 4294901760, %v24569_v13  ;;  %v27312_v51 = vand.u32 4294901760, %v24574_v23 }
 0x45b   : > { %v24631_v11 = vpack.c.bf16 %v27310_v1, %v27309_v16  ;;  %v26299_v55 = vand.u32 4294901760, %v24597_v10  ;;  %v26298_v28 = vand.u32 4294901760, %v24607_v5  ;;  %17745 = vmatprep.subr.bf16.mxu1 %v17744_v7  ;;  %v11261_v41 = vand.u32 4294901760, %v11260_v30 }
 0x45c   : > { %v11148_v40 = vsub.f32 %v24569_v13, %v27311_v26  ;;  %v11155_v47 = vsub.f32 %v24574_v23, %v27312_v51  ;;  %v11268_v0 = vand.u32 4294901760, %v11267_v14  ;;  %v27313_v45 = vand.u32 4294901760, %v24581_v53  ;;  %17719 = vmatpush3.bf16.msra.mxu0 %v24625_v20 }
 0x45d   : > { %v27314_v62 = vand.u32 4294901760, %v24586_v59  ;;  %v27315_v3 = vand.u32 4294901760, %v24486_v32  ;;  %v27316_v48 = vand.u32 4294901760, %v24488_v46  ;;  %17721 = vmatprep.subr.bf16.mxu0 %v24631_v11  ;;  %v27317_v7 = vand.u32 4294901760, %v24509_v12 }
 0x45e   : > { %v11274_v8 = vsub.f32 %v24581_v53, %v27313_v45  ;;  %v27318_v30 = vand.u32 4294901760, %v24511_v39  ;;  %v17750_v16 = vpack.c.bf16 %v11142_v56, %v11135_v18  ;;  %17747 = vmatpush3.bf16.msra.mxu1 %v17746_v34  ;;  %v11149_v1 = vand.u32 4294901760, %v11148_v40  ;;  %v27320_v18 = vld [vmem:[#allocation70_spill] sm:$0xff]  ;;  %v27321_v34 = vld [vmem:[#allocation71_spill] sm:$0xff] }
 0x45f   : > { %v11281_v42 = vsub.f32 %v24586_v59, %v27314_v62  ;;  %v24656_v29 = vpack.c.bf16 %v27316_v48, %v27315_v3  ;;  %v11156_v26 = vand.u32 4294901760, %v11155_v47  ;;  %v11162_v32 = vsub.f32 %v24597_v10, %v26299_v55  ;;  %17749 = vmatprep.subr.bf16.mxu1 %v17748_v9 }
 0x460   : > { %v24663_v14 = vpack.c.bf16 %v27318_v30, %v27317_v7  ;;  %v11169_v46 = vsub.f32 %v24607_v5, %v26298_v28  ;;  %v17752_v51 = vpack.c.bf16 %v11268_v0, %v11261_v41  ;;  %v11275_v45 = vand.u32 4294901760, %v11274_v8  ;;  %v27322_v41 = vld [vmem:[#allocation116_spill] sm:$0xff]  ;;  %v27323_v0 = vld [vmem:[#allocation75_spill] sm:$0xff]  ;;  %v27326_v7 = vld [vmem:[#allocation41_spill] sm:$0xff] }
 0x461   : > { %v11282_v12 = vand.u32 4294901760, %v11281_v42  ;;  %17723 = vmatpush3.bf16.msra.mxu0 %v24656_v29  ;;  %v27319_v39 = vand.u32 4294901760, %v24527_v25  ;;  %v17760_v40 = vpack.c.bf16 %v27321_v34, %v27320_v18  ;;  %v17754_v47 = vpack.c.bf16 %v11156_v26, %v11149_v1  ;;  %v27324_v25 = vld [vmem:[#allocation76_spill] sm:$0xff] }
 0x462   : > { %17725 = vmatprep.subr.bf16.mxu0 %v24663_v14  ;;  %17751 = vmatpush3.bf16.msra.mxu1 %v17750_v16  ;;  %v11163_v62 = vand.u32 4294901760, %v11162_v32  ;;  %v11170_v3 = vand.u32 4294901760, %v11169_v46  ;;  %v17762_v8 = vpack.c.bf16 %v27323_v0, %v27322_v41  ;;  %v27327_v30 = vld [vmem:[#allocation80_spill] sm:$0xff]  ;;  %v27328_v16 = vld [vmem:[#allocation74_spill] sm:$0xff]  ;;  %v27330_v32 = vld [vmem:[#allocation77_spill] sm:$0xff]  ;;  %v17780_v55 = vpack.c.bf16 %v24356_v54, %v24353_v38 }
 0x463   : > { %v24674_v56 = vpack.c.bf16 %v10979_v37, %v27319_v39  ;;  %17753 = vmatprep.subr.bf16.mxu1 %v17752_v51  ;;  %v17756_v9 = vpack.c.bf16 %v11282_v12, %v11275_v45  ;;  %v27325_v37 = vld [vmem:[#allocation79_spill] sm:$0xff]  ;;  %v17766_v1 = vpack.c.bf16 %v27328_v16, %v27327_v30  ;;  %v27329_v26 = vld [vmem:[#allocation48_spill] sm:$0xff]  ;;  %v27331_v46 = vld [vmem:[#allocation78_spill] sm:$0xff]  ;;  %v15428_v45 = vpop.f32.mrb[56].mxu0 }
 0x464   : > { %v17764_v42 = vpack.c.bf16 %v27325_v37, %v27324_v25  ;;  %v17758_v48 = vpack.c.bf16 %v11170_v3, %v11163_v62  ;;  %v17768_v51 = vpack.c.bf16 %v27331_v46, %v27330_v32  ;;  %v15429_v12 = vpop.f32.mrb[57].mxu0  ;;  %v27332_v39 = vld [vmem:[#allocation49_spill] sm:$0xff]  ;;  %v27333_v62 = vld [vmem:[#allocation34_spill] sm:$0xff]  ;;  %v17772_v3 = vpack.c.bf16 %v24134_v36, %v24129_v2  ;;  %v27334_v28 = vld [vmem:[#allocation36_spill] sm:$0xff] }
 0x465   : > { %17727 = vmatpush3.bf16.msra.mxu0 %v24674_v56 }
 0x466   : > { %17761 = vmatprep.subr.bf16.mxu0 %v17760_v40  ;;  %17755 = vmatpush3.bf16.msra.mxu1 %v17754_v47  ;;  %v15430_v40 = vadd.f32 %v15429_v12, %v15428_v45  ;;  %v17770_v47 = vpack.c.bf16 %v24125_v33, %v24122_v15  ;;  %v17774_v45 = vpack.c.bf16 %v24153_v35, %v24146_v17 }
 0x467   : > { %17757 = vmatprep.subr.bf16.mxu1 %v17756_v9  ;;  %v17776_v12 = vpack.c.bf16 %v24187_v21, %v24171_v31 }
 0x468   : > { %11040 = vmatmul.mubr.f32.vlgmr.msra.gmra.mrb[78].mxu0 %v27326_v7  ;;  %v8356_v9 = vadd.f32 %v15430_v40, %v24590_v63  ;;  %v18636_v7 = vld [vmem:[%s21472_s13 + $0x100] sm:$0x1] }
 0x469   : > { %17763 = vmatpush3.bf16.msra.mxu0 %v17762_v8  ;;  %11049 = vmatprep.mubr.f32.mxu0 %v27329_v26  ;;  %v15431_v8 = vpop.f32.mrb[58].mxu0  ;;  %v18635_v26 = vld [vmem:[%s19593_s22 + $0x100] sm:$0x1] }
 0x46a   : > { %17765 = vmatprep.subr.bf16.mxu0 %v17764_v42  ;;  %17759 = vmatpush3.bf16.msra.mxu1 %v17758_v48  ;;  %v15432_v42 = vpop.f32.mrb[59].mxu0 }
 0x46b   : > { %17793 = vmatprep.subr.bf16.mxu1 %v23981_v49  ;;  %v15433_v48 = vadd.f32 %v15432_v42, %v15431_v8 }
 0x46c   : > { %11055 = vmatmul.mubr.f32.gmra.mrb[80].mxu0 %v27332_v39 }
 0x46d   : > { %17767 = vmatpush3.bf16.msra.mxu0 %v17766_v1  ;;  %11429 = vmatprep.mubr.f32.mxu0 %v27333_v62  ;;  %v15466_v1 = vpop.f32.mrb[56].mxu1  ;;  %v8365_v63 = vadd.f32 %v15433_v48, %v24633_v57  ;;  %v27335_v48 = vld [vmem:[#allocation81_spill] sm:$0xff]  ;;  %v18634_v62 = vld [vmem:[%s19596_s18 + $0x100] sm:$0x1] }
 0x46e   : > { %11287 = vmatmul.mubr.f32.vlgmr.msra.gmra.mrb[78].mxu1 %v27170_v43  ;;  %17769 = vmatprep.subr.bf16.mxu0 %v17768_v51  ;;  %v15467_v51 = vpop.f32.mrb[57].mxu1 }
 0x46f   : > { %17795 = vmatpush3.bf16.msra.mxu1 %v23985_v22  ;;  %11292 = vmatprep.mubr.f32.mxu1 %v27174_v27  ;;  %v15468_v40 = vadd.f32 %v15467_v51, %v15466_v1  ;;  %v15469_v8 = vpop.f32.mrb[58].mxu1  ;;  %v27336_v1 = vld [vmem:[#allocation83_spill] sm:$0xff] }
 0x470   : > { %17797 = vmatprep.subr.bf16.mxu1 %v24009_v24  ;;  %v15470_v42 = vpop.f32.mrb[59].mxu1 }
 0x471   : > { %17771 = vmatpush3.bf16.msra.mxu0 %v17770_v47  ;;  %v24711_v47 = vadd.f32 %v15468_v40, %v8356_v9  ;;  %v15471_v57 = vadd.f32 %v15470_v42, %v15469_v8  ;;  %v17782_v9 = vpack.c.bf16 %v24522_v4, %v24460_v58  ;;  %v27338_v40 = vld [vmem:[#allocation86_spill] sm:$0xff]  ;;  %v17788_v8 = vpack.c.bf16 %v24586_v59, %v24581_v53 }
 0x472   : > { %17773 = vmatprep.subr.bf16.mxu0 %v17772_v3  ;;  %11294 = vmatmul.mubr.f32.gmra.mrb[80].mxu1 %v27178_v60  ;;  %v17778_v3 = vpack.c.bf16 %v24345_v52, %v24342_v61  ;;  %v27341_v42 = vand.u32 4294901760, %v27320_v18  ;;  %v1555_v60 = vmul.f32 %v18636_v7, %v18635_v26  ;;  %v27345_v18 = vand.u32 4294901760, %v27324_v25 }
 0x473   : > { %17799 = vmatpush3.bf16.msra.mxu1 %v24019_v19  ;;  %11545 = vmatprep.mubr.f32.mxu1 %v27334_v28  ;;  %v24719_v51 = vadd.f32 %v15471_v57, %v8365_v63  ;;  %v27339_v28 = vld [vmem:[#allocation88_spill] sm:$0xff]  ;;  %v17786_v63 = vpack.c.bf16 %v24574_v23, %v24569_v13  ;;  %v27342_v57 = vand.u32 4294901760, %v27321_v34  ;;  %v27346_v34 = vand.u32 4294901760, %v27325_v37 }
 0x474   : > { %17801 = vmatprep.subr.bf16.mxu1 %v24030_v6  ;;  %v27350_v25 = vand.u32 4294901760, %v27328_v16  ;;  %v27351_v26 = vand.u32 4294901760, %v27330_v32  ;;  %v18638_v16 = vld [vmem:[%s19596_s18 + $0x80] sm:$0xff] }
 0x475   : > { %17775 = vmatpush3.bf16.msra.mxu0 %v17774_v45  ;;  %v27337_v45 = vld [vmem:[#allocation115_spill] sm:$0xff] }
 0x476   : > { %17777 = vmatprep.subr.bf16.mxu0 %v17776_v12  ;;  %v17784_v12 = vpack.c.bf16 %v24544_v44, %v27337_v45 }
 0x477   : > { %17803 = vmatpush3.bf16.msra.mxu1 %v27335_v48 }
 0x478   : > { %17805 = vmatprep.subr.bf16.mxu1 %v27336_v1 }
 0x479   : > { %17779 = vmatpush3.bf16.msra.mxu0 %v17778_v3  ;;  %v17790_v3 = vpack.c.bf16 %v24607_v5, %v24597_v10 }
 0x47a   : > { %17781 = vmatprep.subr.bf16.mxu0 %v17780_v55  ;;  %v27340_v55 = vld [vmem:[#allocation99_spill] sm:$0xff] }
 0x47b   : > { %17807 = vmatpush3.bf16.msra.mxu1 %v27338_v40 }
 0x47c   : > { %17809 = vmatprep.subr.bf16.mxu1 %v27339_v28 }
 0x47d   : > { %17783 = vmatpush3.bf16.msra.mxu0 %v17782_v9  ;;  %v17824_v9 = vpack.c.bf16 %v27342_v57, %v27341_v42  ;;  %v17828_v42 = vpack.c.bf16 %v27346_v34, %v27345_v18  ;;  %v27347_v57 = vld [vmem:[#allocation38_spill] sm:$0xff]  ;;  %v27354_v18 = vand.u32 4294901760, %v24122_v15  ;;  %v27355_v34 = vand.u32 4294901760, %v24125_v33 }
 0x47e   : > { %17785 = vmatprep.subr.bf16.mxu0 %v17784_v12  ;;  %v18633_v12 = vld [vmem:[%s19586_s2 + $0x100] sm:$0x1]  ;;  %v18644_v15 = vld [vmem:[%s21472_s13 + $0x88] sm:$0xff] }
 0x47f   : > { %17811 = vmatpush3.bf16.msra.mxu1 %v27340_v55  ;;  %v1522_v39 = vmul.f32 %v18634_v62, %v18633_v12  ;;  %v27352_v62 = vand.u32 4294901760, %v27331_v46  ;;  %v27353_v12 = vld [vmem:[#allocation45_spill] sm:$0xff] }
 0x480   : > { %17813 = vmatprep.subr.bf16.mxu1 %v24350_v50  ;;  %v18640_v46 = vld [vmem:[%s21472_s13 + $0x80] sm:$0xff] }
 0x481   : > { %17787 = vmatpush3.bf16.msra.mxu0 %v17786_v63  ;;  %v27343_v63 = vand.u32 4294901760, %v27322_v41  ;;  %v1588_v7 = vadd.f32 %v1555_v60, %v1522_v39  ;;  %v27348_v41 = vld [vmem:[#allocation44_spill] sm:$0xff] }
 0x482   : > { %17789 = vmatprep.subr.bf16.mxu0 %v17788_v8  ;;  %v27344_v8 = vand.u32 4294901760, %v27323_v0  ;;  %v27349_v0 = vand.u32 4294901760, %v27327_v30  ;;  %v18637_v30 = vld [vmem:[%s19593_s22 + $0x80] sm:$0xff]  ;;  %v18639_v39 = vld [vmem:[%s19586_s2 + $0x80] sm:$0xff] }
 0x483   : > { %17815 = vmatpush3.bf16.msra.mxu1 %v24625_v20  ;;  %v1605_v32 = vmul.f32 %v18638_v16, %v18637_v30  ;;  %v18642_v30 = vld [vmem:[%s19596_s18 + $0x88] sm:$0xff] }
 0x484   : > { %17817 = vmatprep.subr.bf16.mxu1 %v24631_v11  ;;  %v17826_v27 = vpack.c.bf16 %v27344_v8, %v27343_v63  ;;  %v17830_v37 = vpack.c.bf16 %v27350_v25, %v27349_v0  ;;  %v1638_v63 = vmul.f32 %v18640_v46, %v18639_v39  ;;  %v27356_v0 = vld [vmem:[#allocation33_spill] sm:$0xff]  ;;  %v27359_v25 = vand.u32 4294901760, %v24134_v36 }
 0x485   : > { %17791 = vmatpush3.bf16.msra.mxu0 %v17790_v3  ;;  %v17832_v3 = vpack.c.bf16 %v27352_v62, %v27351_v26  ;;  %v18641_v62 = vld [vmem:[%s19593_s22 + $0x88] sm:$0xff]  ;;  %v27362_v36 = vand.u32 4294901760, %v24153_v35 }
 0x486   : > { %17825 = vmatprep.subr.bf16.mxu0 %v17824_v9  ;;  %v15504_v9 = vpop.f32.mrb[60].mxu0 }
 0x487   : > { %17819 = vmatpush3.bf16.msra.mxu1 %v24656_v29  ;;  %v15505_v60 = vpop.f32.mrb[61].mxu0 }
 0x488   : > { %11432 = vmatmul.mubr.f32.vlgmr.msra.gmra.mrb[82].mxu0 %v27347_v57  ;;  %17821 = vmatprep.subr.bf16.mxu1 %v24663_v14  ;;  %v15506_v8 = vadd.f32 %v15505_v60, %v15504_v9  ;;  %v1606_v9 = vmul.f32 %v18642_v30, %v18641_v62  ;;  %v15507_v16 = vpop.f32.mrb[62].mxu0  ;;  %v18646_v62 = vld [vmem:[%s19596_s18] sm:$0xff] }
 0x489   : > { %17827 = vmatpush3.bf16.msra.mxu0 %v17826_v27  ;;  %11438 = vmatprep.mubr.f32.mxu0 %v27348_v41  ;;  %v10931_v27 = vsel %vm1695_vm1, %v1588_v7, 0  ;;  %v27358_v7 = vand.u32 4294901760, %v24129_v2  ;;  %v27361_v2 = vand.u32 4294901760, %v24146_v17  ;;  %v27366_v17 = vand.u32 4294901760, %v24345_v52  ;;  %v27438_v57 = vld [vmem:[#allocation63_spill] sm:$0xff] }
 0x48a   : > { %17829 = vmatprep.subr.bf16.mxu0 %v17828_v42  ;;  %v17834_v42 = vpack.c.bf16 %v27355_v34, %v27354_v18  ;;  %v8652_v33 = vadd.f32 %v15506_v8, %v24711_v47  ;;  %v24794_v46 = vand.u32 4294901760, %v10931_v27  ;;  %v15508_v18 = vpop.f32.mrb[63].mxu0  ;;  %v27363_v47 = vand.u32 4294901760, %v24171_v31  ;;  %v18647_v31 = vld [vmem:[%s19593_s22 + $0x8] sm:$0xff] }
 0x48b   : > { %17823 = vmatpush3.bf16.msra.mxu1 %v24674_v56  ;;  %v17836_v26 = vpack.c.bf16 %v27359_v25, %v27358_v7  ;;  %v17838_v39 = vpack.c.bf16 %v27362_v36, %v27361_v2  ;;  %v27364_v8 = vand.u32 4294901760, %v24187_v21  ;;  %v27365_v34 = vand.u32 4294901760, %v24342_v61  ;;  %v18645_v25 = vld [vmem:[%s19593_s22] sm:$0xff]  ;;  %v18649_v2 = vld [vmem:[%s19586_s2] sm:$0xff]  ;;  %v18651_v61 = vld [vmem:[%s19586_s2 + $0x8] sm:$0xff] }
 0x48c   : > { %11441 = vmatmul.mubr.f32.gmra.mrb[84].mxu0 %v27353_v12  ;;  %17857 = vmatprep.subr.bf16.mxu1 %v23981_v49  ;;  %v27357_v49 = vld [vmem:[#allocation40_spill] sm:$0xff]  ;;  %v24807_v7 = vsub.f32 %v1605_v32, %v1638_v63  ;;  %v1589_v30 = vmul.f32 %v18646_v62, %v18645_v25  ;;  %v18650_v36 = vld [vmem:[%s21472_s13] sm:$0xff]  ;;  %v27368_v63 = vand.u32 4294901760, %v24353_v38  ;;  %v24836_v38 = vsub.f32 %v10931_v27, %v24794_v46  ;;  %v27416_v12 = vld [vmem:[#allocation107_spill] sm:$0xff] }
 0x48d   : > { %17831 = vmatpush3.bf16.msra.mxu0 %v17830_v37  ;;  %11726 = vmatprep.mubr.f32.mxu0 %v27356_v0  ;;  %v18643_v37 = vld [vmem:[%s19586_s2 + $0x88] sm:$0xff]  ;;  %v24805_v35 = vpack.c.bf16 %v27366_v17, %v27365_v34  ;;  %v27369_v34 = vand.u32 4294901760, %v24356_v54  ;;  %v27372_v54 = vand.u32 4294901760, %v27337_v45  ;;  %v27377_v27 = vand.u32 4294901760, %v24586_v59 }
 0x48e   : > { %11549 = vmatmul.mubr.f32.vlgmr.msra.gmra.mrb[82].mxu1 %v27357_v49  ;;  %17833 = vmatprep.subr.bf16.mxu0 %v17832_v3  ;;  %v1639_v60 = vmul.f32 %v18644_v15, %v18643_v37  ;;  %v27360_v3 = vld [vmem:[#allocation46_spill] sm:$0xff]  ;;  %v15509_v37 = vadd.f32 %v15508_v18, %v15507_v16  ;;  %v18648_v15 = vld [vmem:[%s19596_s18 + $0x8] sm:$0xff]  ;;  %v27371_v18 = vand.u32 4294901760, %v24522_v4 }
 0x48f   : > { %17859 = vmatpush3.bf16.msra.mxu1 %v23985_v22  ;;  %11556 = vmatprep.mubr.f32.mxu1 %v27360_v3  ;;  %v17840_v22 = vpack.c.bf16 %v27364_v8, %v27363_v47  ;;  %v1590_v21 = vmul.f32 %v18648_v15, %v18647_v31  ;;  %v1622_v47 = vmul.f32 %v18650_v36, %v18649_v2  ;;  %v18652_v8 = vld [vmem:[%s21472_s13 + $0x8] sm:$0xff]  ;;  %v18655_v2 = vld [vmem:[%s19593_s22 + $0x98] sm:$0xff] }
 0x490   : > { %17861 = vmatprep.subr.bf16.mxu1 %v24009_v24  ;;  %v15542_v24 = vpop.f32.mrb[60].mxu1  ;;  %v1623_v52 = vmul.f32 %v18652_v8, %v18651_v61  ;;  %v27367_v3 = vld [vmem:[#allocation47_spill] sm:$0xff]  ;;  %v24822_v16 = vpack.c.bf16 %v27369_v34, %v27368_v63  ;;  %v24830_v25 = vsub.f32 %v1606_v9, %v1639_v60  ;;  %v8659_v62 = vadd.f32 %v15509_v37, %v24719_v51  ;;  %v18662_v34 = vld [vmem:[%s19596_s18 + $0x10] sm:$0xff] }
 0x491   : > { %17835 = vmatpush3.bf16.msra.mxu0 %v17834_v42  ;;  %v15543_v32 = vpop.f32.mrb[61].mxu1  ;;  %v27370_v42 = vand.u32 4294901760, %v24460_v58  ;;  %v27373_v58 = vand.u32 4294901760, %v24544_v44  ;;  %v27374_v51 = vand.u32 4294901760, %v24569_v13  ;;  %v27376_v9 = vand.u32 4294901760, %v24581_v53  ;;  %v18656_v36 = vld [vmem:[%s19596_s18 + $0x98] sm:$0xff] }
 0x492   : > { %11560 = vmatmul.mubr.f32.gmra.mrb[84].mxu1 %v27367_v3  ;;  %17837 = vmatprep.subr.bf16.mxu0 %v17836_v26  ;;  %v15544_v31 = vadd.f32 %v15543_v32, %v15542_v24  ;;  %v27375_v26 = vand.u32 4294901760, %v24574_v23  ;;  %v27379_v44 = vand.u32 4294901760, %v24607_v5  ;;  %v15545_v13 = vpop.f32.mrb[62].mxu1  ;;  %v12521_v23 = vand.u32 4294901760, %v24807_v7  ;;  %v18653_v24 = vld [vmem:[%s19593_s22 + $0x90] sm:$0xff]  ;;  %v18659_v8 = vld [vmem:[%s19586_s2 + $0x98] sm:$0xff] }
 0x493   : > { %v24828_v17 = vpack.c.bf16 %v27371_v18, %v27370_v42  ;;  %17863 = vmatpush3.bf16.msra.mxu1 %v24019_v19  ;;  %11837 = vmatprep.mubr.f32.mxu1 %v27356_v0  ;;  %v24843_v4 = vpack.c.bf16 %v27373_v58, %v27372_v54  ;;  %v24855_v60 = vpack.c.bf16 %v27377_v27, %v27376_v9  ;;  %v12524_v5 = vand.u32 4294901760, %v24830_v25  ;;  %v18661_v63 = vld [vmem:[%s19593_s22 + $0x10] sm:$0xff]  ;;  %v18663_v18 = vld [vmem:[%s19593_s22 + $0x18] sm:$0xff]  ;;  %v18665_v54 = vld [vmem:[%s19586_s2 + $0x10] sm:$0xff] }
 0x494   : > { %17865 = vmatprep.subr.bf16.mxu1 %v24030_v6  ;;  %v24849_v19 = vpack.c.bf16 %v27375_v26, %v27374_v51  ;;  %v27378_v6 = vand.u32 4294901760, %v24597_v10  ;;  %v24864_v37 = vsub.f32 %v1589_v30, %v1622_v47  ;;  %v24866_v53 = vsub.f32 %v1590_v21, %v1623_v52  ;;  %v15546_v10 = vpop.f32.mrb[63].mxu1  ;;  %v18657_v21 = vld [vmem:[%s19586_s2 + $0x90] sm:$0xff]  ;;  %v18660_v52 = vld [vmem:[%s21472_s13 + $0x98] sm:$0xff]  ;;  %v18666_v58 = vld [vmem:[%s21472_s13 + $0x10] sm:$0xff] }
 0x495   : > { %17839 = vmatpush3.bf16.msra.mxu0 %v17838_v39  ;;  %v24868_v59 = vadd.f32 %v15544_v31, %v8652_v33  ;;  %v18654_v39 = vld [vmem:[%s19596_s18 + $0x90] sm:$0xff]  ;;  %v1608_v30 = vmul.f32 %v18656_v36, %v18655_v2  ;;  %v18658_v33 = vld [vmem:[%s21472_s13 + $0x90] sm:$0xff]  ;;  %v24879_v61 = vand.u32 4294901760, %v24836_v38  ;;  %v1641_v32 = vmul.f32 %v18660_v52, %v18659_v8  ;;  %v18664_v31 = vld [vmem:[%s19596_s18 + $0x18] sm:$0xff] }
 0x496   : > { %v24861_v45 = vpack.c.bf16 %v27379_v44, %v27378_v6  ;;  %17841 = vmatprep.subr.bf16.mxu0 %v17840_v22  ;;  %v1607_v15 = vmul.f32 %v18654_v39, %v18653_v24  ;;  %v1640_v47 = vmul.f32 %v18658_v33, %v18657_v21  ;;  %v15547_v22 = vadd.f32 %v15546_v10, %v15545_v13  ;;  %v18667_v26 = vld [vmem:[%s19586_s2 + $0x18] sm:$0xff]  ;;  %v18668_v9 = vld [vmem:[%s21472_s13 + $0x18] sm:$0xff]  ;;  %v18669_v6 = vld [vmem:[%s19593_s22 + $0xa0] sm:$0xff] }
 0x497   : > { %17867 = vmatpush3.bf16.msra.mxu1 %v27335_v48  ;;  %v1591_v42 = vmul.f32 %v18662_v34, %v18661_v63  ;;  %v1592_v48 = vmul.f32 %v18664_v31, %v18663_v18  ;;  %v1624_v51 = vmul.f32 %v18666_v58, %v18665_v54  ;;  %v1625_v27 = vmul.f32 %v18668_v9, %v18667_v26  ;;  %v18670_v44 = vld [vmem:[%s19596_s18 + $0xa0] sm:$0xff]  ;;  %v18671_v10 = vld [vmem:[%s19593_s22 + $0xa8] sm:$0xff]  ;;  %v18674_v2 = vld [vmem:[%s21472_s13 + $0xa0] sm:$0xff] }
 0x498   : > { %17869 = vmatprep.subr.bf16.mxu1 %v27336_v1  ;;  %v1609_v13 = vmul.f32 %v18670_v44, %v18669_v6  ;;  %v18672_v1 = vld [vmem:[%s19596_s18 + $0xa8] sm:$0xff]  ;;  %v18673_v39 = vld [vmem:[%s19586_s2 + $0xa0] sm:$0xff]  ;;  %v18676_v33 = vld [vmem:[%s21472_s13 + $0xa8] sm:$0xff]  ;;  %v24901_v52 = vadd.f32 %v15547_v22, %v8659_v62  ;;  %v24904_v63 = vpack.c.bf16 %v12524_v5, %v12521_v23  ;;  %v12473_v34 = vand.u32 4294901760, %v24864_v37 }
 0x499   : > { %17843 = vmatpush3.bf16.msra.mxu0 %v24805_v35  ;;  %v1610_v24 = vmul.f32 %v18672_v1, %v18671_v10  ;;  %v1642_v36 = vmul.f32 %v18674_v2, %v18673_v39  ;;  %v18675_v21 = vld [vmem:[%s19586_s2 + $0xa8] sm:$0xff]  ;;  %v24907_v35 = vsub.f32 %v24807_v7, %v12521_v23  ;;  %v12476_v18 = vand.u32 4294901760, %v24866_v53  ;;  %v18679_v54 = vld [vmem:[%s19593_s22 + $0x28] sm:$0xff]  ;;  %v18685_v9 = vld [vmem:[%s19593_s22 + $0xb0] sm:$0xff] }
 0x49a   : > { %v1643_v8 = vmul.f32 %v18676_v33, %v18675_v21  ;;  %17845 = vmatprep.subr.bf16.mxu0 %v24822_v16  ;;  %27380 = vst [vmem:[#allocation62_spill] sm:$0xff] %v24904_v63  ;;  %v24913_v31 = vsub.f32 %v24830_v25, %v12524_v5  ;;  %v11941_v16 = vsub.f32 %v24836_v38, %v24879_v61  ;;  %v18678_v25 = vld [vmem:[%s19596_s18 + $0x20] sm:$0xff]  ;;  %v18680_v58 = vld [vmem:[%s19596_s18 + $0x28] sm:$0xff]  ;;  %v18688_v44 = vld [vmem:[%s19596_s18 + $0xb8] sm:$0xff] }
 0x49b   : > { %17871 = vmatpush3.bf16.msra.mxu1 %v27338_v40  ;;  %v24917_v62 = vsub.f32 %v1607_v15, %v1640_v47  ;;  %v24919_v22 = vsub.f32 %v1608_v30, %v1641_v32  ;;  %v24922_v7 = vsub.f32 %v1591_v42, %v1624_v51  ;;  %v24924_v23 = vsub.f32 %v1592_v48, %v1625_v27  ;;  %v18677_v40 = vld [vmem:[%s19593_s22 + $0x20] sm:$0xff]  ;;  %v18681_v47 = vld [vmem:[%s19586_s2 + $0x20] sm:$0xff]  ;;  %v18683_v48 = vld [vmem:[%s19586_s2 + $0x28] sm:$0xff] }
 0x49c   : > { %17873 = vmatprep.subr.bf16.mxu1 %v27339_v28  ;;  %v1593_v5 = vmul.f32 %v18678_v25, %v18677_v40  ;;  %v1594_v15 = vmul.f32 %v18680_v58, %v18679_v54  ;;  %v24931_v30 = vsub.f32 %v1609_v13, %v1642_v36  ;;  %v24933_v28 = vsub.f32 %v1610_v24, %v1643_v8  ;;  %v18682_v32 = vld [vmem:[%s21472_s13 + $0x20] sm:$0xff]  ;;  %v18684_v51 = vld [vmem:[%s21472_s13 + $0x28] sm:$0xff]  ;;  %v18687_v6 = vld [vmem:[%s19593_s22 + $0xb8] sm:$0xff] }
 0x49d   : > { %17847 = vmatpush3.bf16.msra.mxu0 %v24828_v17  ;;  %v1626_v42 = vmul.f32 %v18682_v32, %v18681_v47  ;;  %v1627_v26 = vmul.f32 %v18684_v51, %v18683_v48  ;;  %v18686_v17 = vld [vmem:[%s19596_s18 + $0xb0] sm:$0xff]  ;;  %v1612_v13 = vmul.f32 %v18688_v44, %v18687_v6  ;;  %v18690_v1 = vld [vmem:[%s21472_s13 + $0xb0] sm:$0xff]  ;;  %v18691_v39 = vld [vmem:[%s19586_s2 + $0xb8] sm:$0xff]  ;;  %v12527_v6 = vand.u32 4294901760, %v24917_v62 }
 0x49e   : > { %17849 = vmatprep.subr.bf16.mxu0 %v24843_v4  ;;  %v1611_v27 = vmul.f32 %v18686_v17, %v18685_v9  ;;  %v18689_v10 = vld [vmem:[%s19586_s2 + $0xb0] sm:$0xff]  ;;  %v18692_v2 = vld [vmem:[%s21472_s13 + $0xb8] sm:$0xff]  ;;  %v18693_v4 = vld [vmem:[%s19593_s22 + $0x30] sm:$0xff]  ;;  %v24958_v9 = vpack.c.bf16 %v12476_v18, %v12473_v34  ;;  %v24961_v17 = vsub.f32 %v24864_v37, %v12473_v34  ;;  %v24968_v44 = vand.u32 4294901760, %v11941_v16 }
 0x49f   : > { %v1644_v24 = vmul.f32 %v18690_v1, %v18689_v10  ;;  %v1645_v36 = vmul.f32 %v18692_v2, %v18691_v39  ;;  %17875 = vmatpush3.bf16.msra.mxu1 %v27340_v55  ;;  %v18694_v21 = vld [vmem:[%s19596_s18 + $0x30] sm:$0xff]  ;;  %v18695_v8 = vld [vmem:[%s19593_s22 + $0x38] sm:$0xff]  ;;  %v18696_v40 = vld [vmem:[%s19596_s18 + $0x38] sm:$0xff]  ;;  %v24964_v55 = vsub.f32 %v24866_v53, %v12476_v18  ;;  %v12530_v10 = vand.u32 4294901760, %v24919_v22 }
 0x4a0   : > { %v1595_v33 = vmul.f32 %v18694_v21, %v18693_v4  ;;  %v1596_v25 = vmul.f32 %v18696_v40, %v18695_v8  ;;  %v18697_v54 = vld [vmem:[%s19586_s2 + $0x30] sm:$0xff]  ;;  %v18698_v58 = vld [vmem:[%s21472_s13 + $0x30] sm:$0xff]  ;;  %v18699_v32 = vld [vmem:[%s19586_s2 + $0x38] sm:$0xff]  ;;  %17877 = vmatprep.subr.bf16.mxu1 %v24350_v50  ;;  %27381 = vst [vmem:[#allocation73_spill] sm:$0xff] %v24958_v9  ;;  %v12479_v50 = vand.u32 4294901760, %v24922_v7  ;;  %v12482_v1 = vand.u32 4294901760, %v24924_v23 }
 0x4a1   : > { %v1628_v47 = vmul.f32 %v18698_v58, %v18697_v54  ;;  %v18700_v48 = vld [vmem:[%s21472_s13 + $0x38] sm:$0xff]  ;;  %17851 = vmatpush3.bf16.msra.mxu0 %v24849_v19  ;;  %v12533_v37 = vand.u32 4294901760, %v24931_v30  ;;  %v12536_v53 = vand.u32 4294901760, %v24933_v28  ;;  %v1659_v19 = vsub.f32 %v1593_v5, %v1626_v42  ;;  %v18702_v4 = vld [vmem:[%s19596_s18 + $0xc0] sm:$0xff]  ;;  %v18703_v8 = vld [vmem:[%s19593_s22 + $0xc8] sm:$0xff] }
 0x4a2   : > { %v1629_v51 = vmul.f32 %v18700_v48, %v18699_v32  ;;  %17853 = vmatprep.subr.bf16.mxu0 %v24855_v60  ;;  %v1660_v34 = vsub.f32 %v1594_v15, %v1627_v26  ;;  %v1677_v18 = vsub.f32 %v1611_v27, %v1644_v24  ;;  %v1678_v16 = vsub.f32 %v1612_v13, %v1645_v36  ;;  %v18701_v60 = vld [vmem:[%s19593_s22 + $0xc0] sm:$0xff]  ;;  %v18704_v40 = vld [vmem:[%s19596_s18 + $0xc8] sm:$0xff]  ;;  %v18705_v5 = vld [vmem:[%s19586_s2 + $0xc0] sm:$0xff] }
 0x4a3   : > { %17879 = vmatpush3.bf16.msra.mxu1 %v24625_v20  ;;  %v24977_v39 = vsub.f32 %v1595_v33, %v1628_v47  ;;  %v1613_v21 = vmul.f32 %v18702_v4, %v18701_v60  ;;  %v1614_v54 = vmul.f32 %v18704_v40, %v18703_v8  ;;  %v18706_v15 = vld [vmem:[%s21472_s13 + $0xc0] sm:$0xff]  ;;  %v18707_v26 = vld [vmem:[%s19586_s2 + $0xc8] sm:$0xff]  ;;  %v18708_v20 = vld [vmem:[%s21472_s13 + $0xc8] sm:$0xff]  ;;  %v24991_v27 = vpack.c.bf16 %v12530_v10, %v12527_v6 }
 0x4a4   : > { %v24979_v2 = vsub.f32 %v1596_v25, %v1629_v51  ;;  %17881 = vmatprep.subr.bf16.mxu1 %v24631_v11  ;;  %v1646_v42 = vmul.f32 %v18706_v15, %v18705_v5  ;;  %v1647_v58 = vmul.f32 %v18708_v20, %v18707_v26  ;;  %v24994_v13 = vsub.f32 %v24917_v62, %v12527_v6  ;;  %v18709_v48 = vld [vmem:[%s19593_s22 + $0x40] sm:$0xff]  ;;  %v18710_v51 = vld [vmem:[%s19596_s18 + $0x40] sm:$0xff]  ;;  %v18715_v40 = vld [vmem:[%s19586_s2 + $0x48] sm:$0xff] }
 0x4a5   : > { %17855 = vmatpush3.bf16.msra.mxu0 %v24861_v45  ;;  %27382 = vst [vmem:[#allocation54_spill] sm:$0xff] %v24991_v27  ;;  %v24997_v11 = vsub.f32 %v24919_v22, %v12530_v10  ;;  %v25000_v24 = vsub.f32 %v24922_v7, %v12479_v50  ;;  %v25003_v36 = vpack.c.bf16 %v12482_v1, %v12479_v50  ;;  %v12485_v45 = vand.u32 4294901760, %v1659_v19  ;;  %v27385_v10 = vld [vmem:[#allocation42_spill] sm:$0xff]  ;;  %v18713_v4 = vld [vmem:[%s19586_s2 + $0x40] sm:$0xff] }
 0x4a6   : > { %16484 = vmatprep.subr.mxu0 %v24794_v46  ;;  %v25006_v33 = vsub.f32 %v24924_v23, %v12482_v1  ;;  %v12488_v25 = vand.u32 4294901760, %v1660_v34  ;;  %v25009_v62 = vpack.c.bf16 %v12536_v53, %v12533_v37  ;;  %v12539_v22 = vand.u32 4294901760, %v1677_v18  ;;  %v18711_v50 = vld [vmem:[%s19593_s22 + $0x48] sm:$0xff]  ;;  %v18712_v1 = vld [vmem:[%s19596_s18 + $0x48] sm:$0xff]  ;;  %v18714_v8 = vld [vmem:[%s21472_s13 + $0x40] sm:$0xff] }
 0x4a7   : > { %27383 = vst [vmem:[#allocation65_spill] sm:$0xff] %v25003_v36  ;;  %17883 = vmatpush3.bf16.msra.mxu1 %v24656_v29  ;;  %v12542_v7 = vand.u32 4294901760, %v1678_v16  ;;  %v26303_v47 = vand.u32 4294901760, %v24977_v39  ;;  %v26302_v23 = vand.u32 4294901760, %v24979_v2  ;;  %v25015_v32 = vsub.f32 %v1613_v21, %v1646_v42  ;;  %v18716_v5 = vld [vmem:[%s21472_s13 + $0x48] sm:$0xff] }
 0x4a8   : > { %27384 = vst [vmem:[#allocation69_spill] sm:$0xff] %v25009_v62  ;;  %11728 = vmatmul.mubr.f32.vlgmr.msra.gmra.mrb[86].mxu0 %v27170_v43  ;;  %17885 = vmatprep.subr.bf16.mxu1 %v24663_v14  ;;  %v25017_v29 = vsub.f32 %v1614_v54, %v1647_v58  ;;  %v1597_v6 = vmul.f32 %v18710_v51, %v18709_v48 }
 0x4a9   : > { %11733 = vmatprep.mubr.f32.mxu0 %v27385_v10  ;;  %16485 = vmatpush3.msra.mxu0 %v24794_v46  ;;  %v1598_v60 = vmul.f32 %v18712_v1, %v18711_v50  ;;  %v1630_v14 = vmul.f32 %v18714_v8, %v18713_v4  ;;  %v1631_v15 = vmul.f32 %v18716_v5, %v18715_v40  ;;  %v18721_v50 = vld [vmem:[%s19586_s2 + $0xd0] sm:$0xff]  ;;  %v18722_v1 = vld [vmem:[%s21472_s13 + $0xd0] sm:$0xff]  ;;  %v18723_v8 = vld [vmem:[%s19586_s2 + $0xd8] sm:$0xff] }
 0x4aa   : > { %16489 = vmatprep.subr.mxu0 %v24968_v44  ;;  %v25031_v21 = vsub.f32 %v24931_v30, %v12533_v37  ;;  %v25034_v54 = vsub.f32 %v24933_v28, %v12536_v53  ;;  %v25036_v42 = vpack.c.bf16 %v12488_v25, %v12485_v45  ;;  %v25038_v26 = vsub.f32 %v1659_v19, %v12485_v45  ;;  %v27388_v37 = vld [vmem:[#allocation43_spill] sm:$0xff]  ;;  %v18724_v40 = vld [vmem:[%s21472_s13 + $0xd8] sm:$0xff] }
 0x4ab   : > { %17887 = vmatpush3.bf16.msra.mxu1 %v24674_v56  ;;  %v25041_v20 = vsub.f32 %v1660_v34, %v12488_v25  ;;  %v25043_v58 = vpack.c.bf16 %v12542_v7, %v12539_v22  ;;  %v25045_v48 = vsub.f32 %v1677_v18, %v12539_v22  ;;  %v25047_v30 = vsub.f32 %v1678_v16, %v12542_v7  ;;  %v18717_v19 = vld [vmem:[%s19593_s22 + $0xd0] sm:$0xff]  ;;  %v18718_v34 = vld [vmem:[%s19596_s18 + $0xd0] sm:$0xff]  ;;  %v18719_v22 = vld [vmem:[%s19593_s22 + $0xd8] sm:$0xff] }
 0x4ac   : > { %27386 = vst [vmem:[#allocation57_spill] sm:$0xff] %v25036_v42  ;;  %11735 = vmatmul.mubr.f32.gmra.mrb[88].mxu0 %v27388_v37  ;;  %17889 = vmatprep.subr.bf16.mxu1 %v24904_v63  ;;  %v25055_v56 = vpack.c.bf16 %v26302_v23, %v26303_v47  ;;  %v1615_v18 = vmul.f32 %v18718_v34, %v18717_v19  ;;  %v27390_v16 = vld [vmem:[#allocation51_spill] sm:$0xff]  ;;  %v27392_v28 = vld [vmem:[#allocation84_spill] sm:$0xff]  ;;  %v27394_v23 = vld [vmem:[#allocation94_spill] sm:$0xff] }
 0x4ad   : > { %27387 = vst [vmem:[#allocation85_spill] sm:$0xff] %v25043_v58  ;;  %16486 = vmatprep.mubr.f32.mxu0 %v27390_v16  ;;  %v25062_v45 = vsub.f32 %v1597_v6, %v1630_v14  ;;  %v25064_v25 = vsub.f32 %v1598_v60, %v1631_v15  ;;  %v18720_v7 = vld [vmem:[%s19596_s18 + $0xd8] sm:$0xff]  ;;  %v1648_v4 = vmul.f32 %v18722_v1, %v18721_v50  ;;  %v27396_v60 = vld [vmem:[#allocation89_spill] sm:$0xff]  ;;  %v27399_v1 = vld [vmem:[#allocation96_spill] sm:$0xff] }
 0x4ae   : > { %27389 = vst [vmem:[#allocation70_spill] sm:$0xff] %v25055_v56  ;;  %v1616_v51 = vmul.f32 %v18720_v7, %v18719_v22  ;;  %11839 = vmatmul.mubr.f32.vlgmr.msra.gmra.mrb[86].mxu1 %v27170_v43  ;;  %v1649_v5 = vmul.f32 %v18724_v40, %v18723_v8  ;;  %v27391_v53 = vld [vmem:[#allocation87_spill] sm:$0xff]  ;;  %v27395_v14 = vld [vmem:[#allocation82_spill] sm:$0xff]  ;;  %v27397_v22 = vld [vmem:[#allocation92_spill] sm:$0xff] }
 0x4af   : > { %v1599_v19 = vmul.f32 %v27392_v28, %v27391_v53  ;;  %v27393_v34 = vld [vmem:[#allocation95_spill] sm:$0xff]  ;;  %v1632_v15 = vmul.f32 %v27396_v60, %v27395_v14  ;;  %17891 = vmatpush3.bf16.msra.mxu1 %v24958_v9  ;;  %11844 = vmatprep.mubr.f32.mxu1 %v27385_v10  ;;  %v27398_v7 = vld [vmem:[#allocation97_spill] sm:$0xff]  ;;  %v27400_v47 = vld [vmem:[#allocation100_spill] sm:$0xff] }
 0x4b0   : > { %v1600_v6 = vmul.f32 %v27394_v23, %v27393_v34  ;;  %v1633_v50 = vmul.f32 %v27398_v7, %v27397_v22  ;;  %v1617_v3 = vmul.f32 %v27400_v47, %v27399_v1  ;;  %v27401_v8 = vld [vmem:[#allocation98_spill] sm:$0xff]  ;;  %v27403_v28 = vld [vmem:[#allocation56_spill] sm:$0xff]  ;;  %17893 = vmatprep.subr.bf16.mxu1 %v24991_v27  ;;  %v27404_v23 = vld [vmem:[#allocation91_spill] sm:$0xff]  ;;  %v15598_v22 = vpop.f32.mrb[64].mxu1 }
 0x4b1   : > { %v27402_v40 = vld [vmem:[#allocation102_spill] sm:$0xff]  ;;  %16487 = vmatmul.mubr.f32.vlgmr.msra.gmra.mrb[90].mxu0 %v27403_v28  ;;  %v27405_v53 = vld [vmem:[#allocation103_spill] sm:$0xff]  ;;  %v27406_v14 = vld [vmem:[#allocation93_spill] sm:$0xff] }
 0x4b2   : > { %v1618_v49 = vmul.f32 %v27402_v40, %v27401_v8  ;;  %v1650_v34 = vmul.f32 %v27405_v53, %v27404_v23  ;;  %v27407_v60 = vld [vmem:[#allocation105_spill] sm:$0xff]  ;;  %16490 = vmatpush3.msra.mxu0 %v24968_v44  ;;  %v27411_v7 = vld [vmem:[#allocation108_spill] sm:$0xff]  ;;  %v27415_v63 = vld [vmem:[#allocation106_spill] sm:$0xff]  ;;  %11846 = vmatmul.mubr.f32.gmra.mrb[88].mxu1 %v27388_v37  ;;  %v15599_v53 = vpop.f32.mrb[65].mxu1 }
 0x4b3   : > { %v1651_v16 = vmul.f32 %v27407_v60, %v27406_v14  ;;  %v27408_v10 = vld [vmem:[#allocation101_spill] sm:$0xff]  ;;  %v27413_v40 = vld [vmem:[#allocation104_spill] sm:$0xff]  ;;  %v1635_v23 = vmul.f32 %v27416_v12, %v27415_v63  ;;  %16494 = vmatprep.subr.mxu0 %v24836_v38  ;;  %v27420_v60 = vand.u32 4294901760, %v25017_v29  ;;  %v25121_v63 = vadd.f32 %v15599_v53, %v15598_v22  ;;  %17895 = vmatpush3.bf16.msra.mxu1 %v25003_v36  ;;  %v27424_v36 = vld [vmem:[#allocation111_spill] sm:$0xff] }
 0x4b4   : > { %v27409_v9 = vld [vmem:[#allocation109_spill] sm:$0xff]  ;;  %v27414_v28 = vld [vmem:[#allocation112_spill] sm:$0xff]  ;;  %17897 = vmatprep.subr.bf16.mxu1 %v25009_v62  ;;  %v27426_v37 = vld [vmem:[#allocation59_spill] sm:$0xff] }
 0x4b5   : > { %v1601_v43 = vmul.f32 %v27409_v9, %v27408_v10  ;;  %v27410_v47 = vld [vmem:[#allocation29_spill] sm:$0xff]  ;;  %v1634_v27 = vmul.f32 %v27414_v28, %v27413_v40  ;;  %v27417_v9 = vand.u32 4294901760, %v24977_v39  ;;  %v27418_v10 = vand.u32 4294901760, %v24979_v2  ;;  %27422 = vst [vmem:[#allocation116_spill] sm:$0xff] %v25121_v63  ;;  %v27423_v40 = vld [vmem:[#allocation39_spill] sm:$0xff]  ;;  %v27427_v62 = vld [vmem:[#allocation58_spill] sm:$0xff] }
 0x4b6   : > { %16491 = vmatprep.mubr.f32.mxu0 %v27410_v47  ;;  %v27412_v1 = vld [vmem:[#allocation113_spill] sm:$0xff]  ;;  %v27419_v28 = vand.u32 4294901760, %v25015_v32  ;;  %12573 = vmatprep.mubr.f32.mxu1 %v27423_v40  ;;  %v25136_v22 = vsub.f32 %v1618_v49, %v1651_v16  ;;  %v15601_v40 = vpop.f32.mrb[66].mxu1  ;;  %v27433_v49 = vld [vmem:[#allocation90_spill] sm:$0xff] }
 0x4b7   : > { %v1602_v8 = vmul.f32 %v27412_v1, %v27411_v7  ;;  %v25108_v44 = vsub.f32 %v24977_v39, %v27417_v9  ;;  %v25113_v14 = vsub.f32 %v24979_v2, %v27418_v10  ;;  %v12497_v7 = vand.u32 4294901760, %v25062_v45  ;;  %17899 = vmatpush3.bf16.msra.mxu1 %v25036_v42 }
 0x4b8   : > { %v25119_v12 = vpack.c.bf16 %v27420_v60, %v27419_v28  ;;  %v12500_v39 = vand.u32 4294901760, %v25064_v25  ;;  %v1681_v1 = vsub.f32 %v1615_v18, %v1648_v4  ;;  %v25128_v2 = vsub.f32 %v1616_v51, %v1649_v5  ;;  %v27425_v18 = vld [vmem:[#allocation60_spill] sm:$0xff]  ;;  %v27428_v5 = vld [vmem:[#allocation110_spill] sm:$0xff]  ;;  %17901 = vmatprep.subr.bf16.mxu1 %v25043_v58 }
 0x4b9   : > { %v25130_v9 = vsub.f32 %v1599_v19, %v1632_v15  ;;  %v25132_v10 = vsub.f32 %v1600_v6, %v1633_v50  ;;  %v25134_v28 = vsub.f32 %v1617_v3, %v1650_v34  ;;  %v25138_v53 = vsub.f32 %v1601_v43, %v1634_v27  ;;  %v27429_v19 = vld [vmem:[#allocation72_spill] sm:$0xff]  ;;  %v27430_v6 = vld [vmem:[#allocation114_spill] sm:$0xff]  ;;  %v15602_v43 = vpop.f32.mrb[67].mxu1 }
 0x4ba   : > { %27421 = vst [vmem:[#allocation71_spill] sm:$0xff] %v25119_v12  ;;  %v25140_v60 = vsub.f32 %v1602_v8, %v1635_v23  ;;  %v1619_v4 = vmul.f32 %v27425_v18, %v27424_v36  ;;  %v1620_v51 = vmul.f32 %v27427_v62, %v27426_v37  ;;  %v1652_v15 = vmul.f32 %v27429_v19, %v27428_v5  ;;  %v27431_v50 = vld [vmem:[#allocation64_spill] sm:$0xff]  ;;  %v27435_v8 = vld [vmem:[#allocation53_spill] sm:$0xff]  ;;  %v27436_v36 = vld [vmem:[#allocation67_spill] sm:$0xff] }
 0x4bb   : > { %v1653_v3 = vmul.f32 %v27431_v50, %v27430_v6  ;;  %v27432_v34 = vld [vmem:[#allocation68_spill] sm:$0xff]  ;;  %v27437_v18 = vld [vmem:[#allocation66_spill] sm:$0xff]  ;;  %v27439_v62 = vld [vmem:[#allocation55_spill] sm:$0xff]  ;;  %v25159_v63 = vadd.f32 %v15602_v43, %v15601_v40  ;;  %v12551_v19 = vand.u32 4294901760, %v1681_v1  ;;  %v26319_v6 = vand.u32 4294901760, %v25128_v2  ;;  %17903 = vmatpush3.bf16.msra.mxu1 %v25055_v56 }
 0x4bc   : > { %v1603_v16 = vmul.f32 %v27433_v49, %v27432_v34  ;;  %v27434_v27 = vld [vmem:[#allocation52_spill] sm:$0xff]  ;;  %v1636_v41 = vmul.f32 %v27437_v18, %v27436_v36  ;;  %v1637_v37 = vmul.f32 %v27439_v62, %v27438_v57  ;;  %v27440_v5 = vld [vmem:[#allocation30_spill] sm:$0xff]  ;;  %v26318_v50 = vand.u32 4294901760, %v25130_v9  ;;  %v27441_v49 = vld [vmem:[#allocation31_spill] sm:$0xff]  ;;  %v16453_v57 = vpop.f32.mrb[64].mxu0  ;;  %17905 = vmatprep.subr.bf16.mxu1 %v25119_v12 }
 0x4bd   : > { %v1604_v23 = vmul.f32 %v27435_v8, %v27434_v27  ;;  %16492 = vmatmul.mubr.f32.vlgmr.msra.gmra.mrb[90].mxu0 %v27440_v5  ;;  %v26317_v34 = vand.u32 4294901760, %v25132_v10  ;;  %v27442_v8 = vand.u32 4294901760, %v25015_v32  ;;  %v27443_v18 = vand.u32 4294901760, %v25017_v29 }
 0x4be   : > { %16495 = vmatpush3.msra.mxu0 %v24836_v38  ;;  %16496 = vmatprep.mubr.f32.mxu0 %v27441_v49  ;;  %v25183_v38 = vsub.f32 %v1619_v4, %v1652_v15  ;;  %v25185_v27 = vsub.f32 %v1620_v51, %v1653_v3  ;;  %v25188_v43 = vpack.c.bf16 %v12500_v39, %v12497_v7 }
 0x4bf   : > { %v25175_v36 = vsub.f32 %v25015_v32, %v27442_v8  ;;  %v25180_v62 = vsub.f32 %v25017_v29, %v27443_v18  ;;  %16499 = vmatprep.subr.mxu0 %v24794_v46  ;;  %v25191_v40 = vsub.f32 %v25062_v45, %v12497_v7  ;;  %v25193_v32 = vsub.f32 %v1603_v16, %v1636_v41  ;;  %v9252_v18 = vpop.f32.mrb[65].mxu0  ;;  %v27456_v16 = vld [vmem:[#allocation61_spill] sm:$0xff] }
 0x4c0   : > { %27444 = vst [vmem:[#allocation75_spill] sm:$0xff] %v25188_v43  ;;  %v25195_v8 = vsub.f32 %v1604_v23, %v1637_v37  ;;  %v18088_v29 = vadd.f32 %v16453_v57, %v24901_v52  ;;  %v25200_v4 = vsub.f32 %v25064_v25, %v12500_v39  ;;  %v25204_v51 = vpack.c.bf16 %v26319_v6, %v12551_v19 }
 0x4c1   : > { %27445 = vst [vmem:[#allocation76_spill] sm:$0xff] %v25191_v40  ;;  %v25206_v15 = vsub.f32 %v1681_v1, %v12551_v19  ;;  %v18089_v45 = vadd.f32 %v9252_v18, %v24868_v59  ;;  %v25213_v41 = vpack.c.bf16 %v26317_v34, %v26318_v50  ;;  %v27450_v52 = vand.u32 4294901760, %v25134_v28  ;;  %17907 = vmatpush3.bf16.msra.mxu1 %v25188_v43 }
 0x4c2   : > { %27446 = vst [vmem:[#allocation79_spill] sm:$0xff] %v25200_v4  ;;  %27447 = vst [vmem:[#allocation80_spill] sm:$0xff] %v25204_v51  ;;  %v27451_v25 = vand.u32 4294901760, %v25136_v22  ;;  %v27453_v39 = vand.u32 4294901760, %v25138_v53  ;;  %v27454_v1 = vand.u32 4294901760, %v25140_v60  ;;  %v9313_v59 = vcombine.high %v18088_v29, %v18088_v29  ;;  %17909 = vmatprep.subr.bf16.mxu1 %v25204_v51  ;;  %v27487_v51 = vld [vmem:[#allocation49_spill] sm:$0xff] }
 0x4c3   : > { %27448 = vst [vmem:[#allocation74_spill] sm:$0xff] %v25206_v15  ;;  %27449 = vst [vmem:[#allocation77_spill] sm:$0xff] %v25213_v41  ;;  %v9320_v23 = vrot.slane %v18088_v29, %v27456_v16  ;;  %v9264_v57 = vcombine.high %v18089_v45, %v18089_v45  ;;  %v9271_v18 = vrot.slane %v18089_v45, %v27456_v16  ;;  %v27457_v29 = vld [vmem:[#allocation32_spill] sm:$0xff] }
 0x4c4   : > { %v25219_v7 = vpack.c.bf16 %v27451_v25, %v27450_v52  ;;  %v25225_v3 = vpack.c.bf16 %v27454_v1, %v27453_v39  ;;  %v9327_v39 = vrot.slane %v9313_v59, %v27456_v16  ;;  %v27458_v59 = vld [vmem:[#allocation35_spill] sm:$0xff] }
 0x4c5   : > { %v9328_v1 = vcombine.high %v9320_v23, %v9320_v23  ;;  %v9336_v34 = vrot.slane %v9320_v23, %v27456_v16  ;;  %14305 = vst.sshfl [vmem:[%s21848_s20 + $0x44] sm:$0x1 pattern:$0x73625140] %v9320_v23  ;;  %16497 = vmatmul.mubr.f32.vlgmr.msra.gmra.mrb[90].mxu0 %v27457_v29  ;;  %v9278_v50 = vrot.slane %v9264_v57, %v27456_v16 }
 0x4c6   : > { %27452 = vst [vmem:[#allocation78_spill] sm:$0xff] %v25219_v7  ;;  %27455 = vst [vmem:[#allocation81_spill] sm:$0xff] %v25225_v3  ;;  %v9279_v19 = vcombine.high %v9271_v18, %v9271_v18  ;;  %v9287_v52 = vrot.slane %v9271_v18, %v27456_v16  ;;  %16500 = vmatpush3.msra.mxu0 %v24794_v46  ;;  %16501 = vmatprep.mubr.f32.mxu0 %v27458_v59 }
 0x4c7   : > { %14301 = vst.sshfl [vmem:[%s21848_s20 + $0x4] sm:$0x1 pattern:$0x73625140] %v9271_v18  ;;  %v9329_v25 = vcombine.high %v9327_v39, %v9327_v39  ;;  %v9343_v37 = vrot.slane %v9327_v39, %v27456_v16  ;;  %v9350_v45 = vrot.slane %v9328_v1, %v27456_v16  ;;  %v9358_v57 = vcombine.high %v9336_v34, %v9336_v34 }
 0x4c8   : > { %14306 = vst.sshfl [vmem:[%s21848_s20 + $0x4c] sm:$0x1 pattern:$0x73625140] %v9328_v1  ;;  %16504 = vmatprep.subr.mxu0 %v24879_v61  ;;  %v9280_v18 = vcombine.high %v9278_v50, %v9278_v50  ;;  %v9294_v6 = vrot.slane %v9278_v50, %v27456_v16  ;;  %v9301_v59 = vrot.slane %v9279_v19, %v27456_v16 }
 0x4c9   : > { %14307 = vst.sshfl [vmem:[%s21848_s20 + $0x64] sm:$0x1 pattern:$0x73625140] %v9327_v39  ;;  %v9309_v23 = vcombine.high %v9287_v52, %v9287_v52  ;;  %17911 = vmatpush3.bf16.msra.mxu1 %v25213_v41  ;;  %v9359_v29 = vcombine.high %v9343_v37, %v9343_v37  ;;  %v9360_v34 = vcombine.high %v9350_v45, %v9350_v45  ;;  %9386 = vst [vmem:[%s21848_s20 + $0x54] sm:$0x1] %v9358_v57 }
 0x4ca   : > { %14302 = vst.sshfl [vmem:[%s21848_s20 + $0xc] sm:$0x1 pattern:$0x73625140] %v9279_v19  ;;  %v27459_v39 = vand.u32 4294901760, %v25128_v2  ;;  %17913 = vmatprep.subr.bf16.mxu1 %v25219_v7  ;;  %v27460_v52 = vand.u32 4294901760, %v25183_v38  ;;  %v9308_v37 = vrot.slane %v9280_v18, %v27456_v16  ;;  %v9310_v45 = vcombine.high %v9294_v6, %v9294_v6 }
 0x4cb   : > { %14303 = vst.sshfl [vmem:[%s21848_s20 + $0x24] sm:$0x1 pattern:$0x73625140] %v9278_v50  ;;  %v27461_v19 = vand.u32 4294901760, %v25185_v27  ;;  %v9311_v57 = vcombine.high %v9301_v59, %v9301_v59  ;;  %v27466_v6 = vand.u32 4294901760, %v24907_v35 }
 0x4cc   : > { %14308 = vst.sshfl [vmem:[%s21848_s20 + $0x6c] sm:$0x1 pattern:$0x73625140] %v9329_v25  ;;  %v25261_v1 = vsub.f32 %v25128_v2, %v27459_v39  ;;  %9378 = vst [vmem:[%s21848_s20 + $0x14] sm:$0x1] %v9309_v23 }
 0x4cd   : > { %v25268_v50 = vpack.c.bf16 %v27461_v19, %v27460_v52  ;;  %14304 = vst.sshfl [vmem:[%s21848_s20 + $0x2c] sm:$0x1 pattern:$0x73625140] %v9280_v18  ;;  %v27463_v25 = vand.u32 4294901760, %v25130_v9  ;;  %v27464_v39 = vand.u32 4294901760, %v25132_v10  ;;  %v12715_v59 = vsub.f32 %v24907_v35, %v27466_v6  ;;  %17915 = vmatpush3.bf16.msra.mxu1 %v25225_v3 }
 0x4ce   : > { %9387 = vst [vmem:[%s21848_s20 + $0x5c] sm:$0x1] %v9360_v34  ;;  %9390 = vst [vmem:[%s21848_s20 + $0x74] sm:$0x1] %v9359_v29  ;;  %v27465_v52 = vand.u32 4294901760, %v25134_v28  ;;  %v9312_v29 = vcombine.high %v9308_v37, %v9308_v37  ;;  %v27469_v18 = vand.u32 4294901760, %v25195_v8 }
 0x4cf   : > { %27462 = vst [vmem:[#allocation83_spill] sm:$0xff] %v25268_v50  ;;  %v25276_v2 = vsub.f32 %v25130_v9, %v27463_v25  ;;  %v25283_v49 = vsub.f32 %v25132_v10, %v27464_v39  ;;  %v27467_v9 = vand.u32 4294901760, %v24913_v31  ;;  %9379 = vst [vmem:[%s21848_s20 + $0x1c] sm:$0x1] %v9311_v57  ;;  %v27468_v10 = vand.u32 4294901760, %v25193_v32  ;;  %v27471_v39 = vld [vmem:[#allocation50_spill] sm:$0xff]  ;;  %17917 = vmatprep.subr.bf16.mxu1 %v25268_v50 }
 0x4d0   : > { %v25288_v19 = vsub.f32 %v25134_v28, %v27465_v52  ;;  %9382 = vst [vmem:[%s21848_s20 + $0x34] sm:$0x1] %v9310_v45  ;;  %v26323_v34 = vand.u32 4294901760, %v24961_v17  ;;  %v26326_v25 = vand.u32 4294901760, %v24964_v55  ;;  %16502 = vmatmul.mubr.f32.vlgmr.msra.gmra.mrb[90].mxu0 %v27471_v39  ;;  %v27472_v52 = vand.u32 4294901760, %v25136_v22  ;;  %v27481_v16 = vld [vmem:[#allocation41_spill] sm:$0xff] }
 0x4d1   : > { %v12722_v23 = vsub.f32 %v24913_v31, %v27467_v9  ;;  %v25303_v28 = vpack.c.bf16 %v27469_v18, %v27468_v10  ;;  %v17952_v45 = vpack.c.bf16 %v24913_v31, %v24907_v35  ;;  %9383 = vst [vmem:[%s21848_s20 + $0x3c] sm:$0x1] %v9312_v29  ;;  %v27473_v9 = vand.u32 4294901760, %v25138_v53  ;;  %16505 = vmatpush3.msra.mxu0 %v24879_v61  ;;  %v27483_v41 = vld [vmem:[#allocation48_spill] sm:$0xff] }
 0x4d2   : > { %v25311_v37 = vsub.f32 %v25136_v22, %v27472_v52  ;;  %v27474_v18 = vand.u32 4294901760, %v25140_v60  ;;  %16506 = vmatprep.mubr.f32.mxu0 %v27410_v47  ;;  %v17954_v52 = vpack.c.bf16 %v24964_v55, %v24961_v17  ;;  %16509 = vmatprep.subr.mxu0 %v24794_v46  ;;  %v17956_v29 = vpack.c.bf16 %v24997_v11, %v24994_v13 }
 0x4d3   : > { %27470 = vst [vmem:[#allocation115_spill] sm:$0xff] %v25303_v28  ;;  %v25322_v10 = vsub.f32 %v25138_v53, %v27473_v9  ;;  %v17958_v53 = vpack.c.bf16 %v25006_v33, %v25000_v24  ;;  %v12716_v9 = vand.u32 4294901760, %v12715_v59  ;;  %v12723_v6 = vand.u32 4294901760, %v12722_v23  ;;  %17919 = vmatpush3.bf16.msra.mxu1 %v25303_v28 }
 0x4d4   : > { %v25327_v22 = vsub.f32 %v25140_v60, %v27474_v18  ;;  %v27475_v60 = vand.u32 4294901760, %v25183_v38  ;;  %v12603_v61 = vsub.f32 %v24961_v17, %v26323_v34  ;;  %v12610_v57 = vsub.f32 %v24964_v55, %v26326_v25  ;;  %17953 = vmatprep.subr.bf16.mxu1 %v17952_v45 }
 0x4d5   : > { %v27476_v59 = vand.u32 4294901760, %v24994_v13  ;;  %v27478_v34 = vand.u32 4294901760, %v25185_v27  ;;  %v27479_v25 = vand.u32 4294901760, %v25193_v32  ;;  %v17920_v28 = vpack.c.bf16 %v12723_v6, %v12716_v9 }
 0x4d6   : > { %v25341_v18 = vsub.f32 %v25183_v38, %v27475_v60  ;;  %v27477_v38 = vand.u32 4294901760, %v24997_v11  ;;  %12579 = vmatmul.mubr.f32.vlgmr.msra.gmra.mrb[90].mxu1 %v27481_v16  ;;  %v27482_v7 = vand.u32 4294901760, %v25000_v24  ;;  %v27484_v9 = vand.u32 4294901760, %v25006_v33 }
 0x4d7   : > { %v12729_v23 = vsub.f32 %v24994_v13, %v27476_v59  ;;  %v25362_v50 = vsub.f32 %v25185_v27, %v27478_v34  ;;  %v25367_v45 = vsub.f32 %v25193_v32, %v27479_v25  ;;  %v27480_v59 = vand.u32 4294901760, %v25195_v8  ;;  %17955 = vmatpush3.bf16.msra.mxu1 %v17954_v52  ;;  %12588 = vmatprep.mubr.f32.mxu1 %v27483_v41 }
 0x4d8   : > { %v12736_v60 = vsub.f32 %v24997_v11, %v27477_v38  ;;  %v17960_v38 = vpack.c.bf16 %v25034_v54, %v25031_v21  ;;  %v17962_v27 = vpack.c.bf16 %v25041_v20, %v25038_v26  ;;  %v26340_v34 = vand.u32 4294901760, %v25034_v54  ;;  %16507 = vmatmul.mubr.f32.vlgmr.msra.gmra.mrb[90].mxu0 %v27440_v5  ;;  %17957 = vmatprep.subr.bf16.mxu1 %v17956_v29 }
 0x4d9   : > { %v25372_v39 = vsub.f32 %v25195_v8, %v27480_v59  ;;  %v12604_v32 = vand.u32 4294901760, %v12603_v61  ;;  %v12611_v25 = vand.u32 4294901760, %v12610_v57  ;;  %v12617_v8 = vsub.f32 %v25000_v24, %v27482_v7  ;;  %v15674_v61 = vpop.f32.mrb[68].mxu1  ;;  %16510 = vmatpush3.msra.mxu0 %v24794_v46  ;;  %16511 = vmatprep.mubr.f32.mxu0 %v27410_v47 }
 0x4da   : > { %v12730_v16 = vand.u32 4294901760, %v12729_v23  ;;  %v12737_v6 = vand.u32 4294901760, %v12736_v60  ;;  %v12624_v3 = vsub.f32 %v25006_v33, %v27484_v9  ;;  %v27485_v52 = vand.u32 4294901760, %v25031_v21  ;;  %v15675_v60 = vpop.f32.mrb[69].mxu1  ;;  %17921 = vmatprep.subr.bf16.mxu0 %v17920_v28  ;;  %12594 = vmatmul.mubr.f32.gmra.mrb[92].mxu1 %v27487_v51 }
 0x4db   : > { %v17964_v41 = vpack.c.bf16 %v25047_v30, %v25045_v48  ;;  %v17966_v7 = vpack.c.bf16 %v25113_v14, %v25108_v44  ;;  %v12750_v9 = vsub.f32 %v25034_v54, %v26340_v34  ;;  %v27486_v46 = vand.u32 4294901760, %v25038_v26  ;;  %17959 = vmatpush3.bf16.msra.mxu1 %v17958_v53  ;;  %v27489_v34 = vld [vmem:[#allocation34_spill] sm:$0xff]  ;;  %v15677_v59 = vpop.f32.mrb[70].mxu1 }
 0x4dc   : > { %v12743_v57 = vsub.f32 %v25031_v21, %v27485_v52  ;;  %v25410_v43 = vadd.f32 %v15675_v60, %v15674_v61  ;;  %v17922_v23 = vpack.c.bf16 %v12611_v25, %v12604_v32  ;;  %v12618_v29 = vand.u32 4294901760, %v12617_v8  ;;  %12968 = vmatprep.mubr.f32.mxu1 %v27489_v34  ;;  %17961 = vmatprep.subr.bf16.mxu1 %v17960_v38 }
 0x4dd   : > { %v12631_v52 = vsub.f32 %v25038_v26, %v27486_v46  ;;  %v27488_v28 = vand.u32 4294901760, %v25041_v20  ;;  %v17924_v56 = vpack.c.bf16 %v12737_v6, %v12730_v16  ;;  %v12625_v46 = vand.u32 4294901760, %v12624_v3  ;;  %v15678_v3 = vpop.f32.mrb[71].mxu1 }
 0x4de   : > { %v12744_v58 = vand.u32 4294901760, %v12743_v57  ;;  %v17968_v47 = vpack.c.bf16 %v25180_v62, %v25175_v36  ;;  %v27490_v51 = vand.u32 4294901760, %v25045_v48  ;;  %v27491_v32 = vand.u32 4294901760, %v25047_v30 }
 0x4df   : > { %v12638_v12 = vsub.f32 %v25041_v20, %v27488_v28  ;;  %v12751_v38 = vand.u32 4294901760, %v12750_v9  ;;  %v12632_v16 = vand.u32 4294901760, %v12631_v52  ;;  %v27492_v6 = vand.u32 4294901760, %v25108_v44  ;;  %17963 = vmatpush3.bf16.msra.mxu1 %v17962_v27 }
 0x4e0   : > { %v12757_v53 = vsub.f32 %v25045_v48, %v27490_v51  ;;  %v12764_v25 = vsub.f32 %v25047_v30, %v27491_v32  ;;  %v27493_v61 = vand.u32 4294901760, %v25113_v14  ;;  %v25432_v51 = vadd.f32 %v15678_v3, %v15677_v59  ;;  %16512 = vmatmul.mubr.f32.vlgmr.msra.gmra.mrb[90].mxu0 %v27440_v5  ;;  %17965 = vmatprep.subr.bf16.mxu1 %v17964_v41 }
 0x4e1   : > { %v12645_v57 = vsub.f32 %v25108_v44, %v27492_v6  ;;  %v12639_v28 = vand.u32 4294901760, %v12638_v12  ;;  %v26345_v32 = vand.u32 4294901760, %v25191_v40  ;;  %v17926_v9 = vpack.c.bf16 %v12625_v46, %v12618_v29  ;;  %17923 = vmatpush3.bf16.msra.mxu0 %v17922_v23  ;;  %12824 = vmatprep.mubr.f32.mxu0 %v27356_v0  ;;  %v15636_v23 = vpop.f32.mrb[66].mxu0 }
 0x4e2   : > { %v12652_v60 = vsub.f32 %v25113_v14, %v27493_v61  ;;  %v17970_v52 = vpack.c.bf16 %v25200_v4, %v25191_v40  ;;  %v12758_v27 = vand.u32 4294901760, %v12757_v53  ;;  %v12765_v12 = vand.u32 4294901760, %v12764_v25  ;;  %17925 = vmatprep.subr.bf16.mxu0 %v17924_v56  ;;  %v15637_v56 = vpop.f32.mrb[67].mxu0 }
 0x4e3   : > { %v27494_v59 = vand.u32 4294901760, %v25175_v36  ;;  %v27495_v61 = vand.u32 4294901760, %v25180_v62  ;;  %v17928_v41 = vpack.c.bf16 %v12751_v38, %v12744_v58  ;;  %v12646_v29 = vand.u32 4294901760, %v12645_v57  ;;  %17967 = vmatpush3.bf16.msra.mxu1 %v17966_v7 }
 0x4e4   : > { %v12653_v46 = vand.u32 4294901760, %v12652_v60  ;;  %v17972_v34 = vpack.c.bf16 %v25261_v1, %v25206_v15  ;;  %v17930_v53 = vpack.c.bf16 %v12639_v28, %v12632_v16  ;;  %v12659_v25 = vsub.f32 %v25191_v40, %v26345_v32  ;;  %17969 = vmatprep.subr.bf16.mxu1 %v17968_v47  ;;  %v15639_v40 = vpop.f32.mrb[68].mxu0 }
 0x4e5   : > { %v12771_v3 = vsub.f32 %v25175_v36, %v27494_v59  ;;  %v12778_v8 = vsub.f32 %v25180_v62, %v27495_v61  ;;  %v27496_v59 = vand.u32 4294901760, %v25200_v4  ;;  %v17974_v58 = vpack.c.bf16 %v25283_v49, %v25276_v2  ;;  %17927 = vmatpush3.bf16.msra.mxu0 %v17926_v9 }
 0x4e6   : > { %v27497_v38 = vand.u32 4294901760, %v25206_v15  ;;  %v27498_v16 = vand.u32 4294901760, %v25261_v1  ;;  %v15638_v28 = vadd.f32 %v15637_v56, %v15636_v23  ;;  %17929 = vmatprep.subr.bf16.mxu0 %v17928_v41  ;;  %v17934_v47 = vpack.c.bf16 %v12653_v46, %v12646_v29 }
 0x4e7   : > { %v12666_v61 = vsub.f32 %v25200_v4, %v27496_v59  ;;  %v17932_v59 = vpack.c.bf16 %v12765_v12, %v12758_v27  ;;  %v12772_v32 = vand.u32 4294901760, %v12771_v3  ;;  %v12779_v6 = vand.u32 4294901760, %v12778_v8  ;;  %17971 = vmatpush3.bf16.msra.mxu1 %v17970_v52  ;;  %v15640_v8 = vpop.f32.mrb[69].mxu0 }
 0x4e8   : > { %v12785_v7 = vsub.f32 %v25206_v15, %v27497_v38  ;;  %v12792_v57 = vsub.f32 %v25261_v1, %v27498_v16  ;;  %v17976_v5 = vpack.c.bf16 %v25311_v37, %v25288_v19  ;;  %v12798_v42 = vand.u32 4294901760, %v25288_v19  ;;  %v27499_v15 = vld [vmem:[#allocation116_spill] sm:$0xff]  ;;  %17973 = vmatprep.subr.bf16.mxu1 %v17972_v34 }
 0x4e9   : > { %v12805_v38 = vand.u32 4294901760, %v25311_v37  ;;  %v9750_v4 = vadd.f32 %v15638_v28, %v27499_v15  ;;  %v12660_v16 = vand.u32 4294901760, %v12659_v25  ;;  %v12667_v60 = vand.u32 4294901760, %v12666_v61  ;;  %17931 = vmatpush3.bf16.msra.mxu0 %v17930_v53 }
 0x4ea   : > { %v27500_v9 = vand.u32 4294901760, %v25276_v2  ;;  %v12786_v12 = vand.u32 4294901760, %v12785_v7  ;;  %v12793_v3 = vand.u32 4294901760, %v12792_v57  ;;  %v27501_v41 = vand.u32 4294901760, %v25283_v49  ;;  %17933 = vmatprep.subr.bf16.mxu0 %v17932_v59 }
 0x4eb   : > { %v12686_v46 = vand.u32 4294901760, %v25322_v10  ;;  %v15641_v23 = vadd.f32 %v15640_v8, %v15639_v40  ;;  %v17936_v15 = vpack.c.bf16 %v12779_v6, %v12772_v32  ;;  %v12693_v52 = vand.u32 4294901760, %v25327_v22  ;;  %17975 = vmatpush3.bf16.msra.mxu1 %v17974_v58 }
 0x4ec   : > { %v12673_v27 = vsub.f32 %v25276_v2, %v27500_v9  ;;  %v12680_v29 = vsub.f32 %v25283_v49, %v27501_v41  ;;  %v25480_v25 = vadd.f32 %v25410_v43, %v9750_v4  ;;  %v12799_v34 = vsub.f32 %v25288_v19, %v12798_v42  ;;  %17977 = vmatprep.subr.bf16.mxu1 %v17976_v5 }
 0x4ed   : > { %v12806_v61 = vsub.f32 %v25311_v37, %v12805_v38  ;;  %v12812_v56 = vand.u32 4294901760, %v25341_v18  ;;  %v12819_v40 = vand.u32 4294901760, %v25362_v50  ;;  %v9757_v32 = vadd.f32 %v15641_v23, %v25159_v63  ;;  %17935 = vmatpush3.bf16.msra.mxu0 %v17934_v47  ;;  %v27543_v37 = vld [vmem:[#allocation70_spill] sm:$0xff] }
 0x4ee   : > { %v17938_v6 = vpack.c.bf16 %v12667_v60, %v12660_v16  ;;  %v17978_v43 = vpack.c.bf16 %v25327_v22, %v25322_v10  ;;  %v17980_v4 = vpack.c.bf16 %v25362_v50, %v25341_v18  ;;  %v17940_v53 = vpack.c.bf16 %v12793_v3, %v12786_v12  ;;  %17937 = vmatprep.subr.bf16.mxu0 %v17936_v15 }
 0x4ef   : > { %v12674_v7 = vand.u32 4294901760, %v12673_v27  ;;  %v12681_v57 = vand.u32 4294901760, %v12680_v29  ;;  %v12687_v28 = vsub.f32 %v25322_v10, %v12686_v46  ;;  %v25499_v59 = vadd.f32 %v25432_v51, %v9757_v32 }
 0x4f0   : > { %v12694_v63 = vsub.f32 %v25327_v22, %v12693_v52  ;;  %v12700_v58 = vand.u32 4294901760, %v25367_v45  ;;  %v12707_v60 = vand.u32 4294901760, %v25372_v39  ;;  %v12800_v5 = vand.u32 4294901760, %v12799_v34  ;;  %17979 = vmatpush3.bf16.msra.mxu1 %v17978_v43 }
 0x4f1   : > { %v12807_v16 = vand.u32 4294901760, %v12806_v61  ;;  %v12813_v9 = vsub.f32 %v25341_v18, %v12812_v56  ;;  %v12820_v51 = vsub.f32 %v25362_v50, %v12819_v40  ;;  %v17982_v47 = vpack.c.bf16 %v25372_v39, %v25367_v45  ;;  %17981 = vmatprep.subr.bf16.mxu1 %v17980_v4  ;;  %17939 = vmatpush3.bf16.msra.mxu0 %v17938_v6  ;;  %v27545_v18 = vld [vmem:[#allocation75_spill] sm:$0xff]  ;;  %v27546_v50 = vld [vmem:[#allocation80_spill] sm:$0xff] }
 0x4f2   : > { %v17942_v27 = vpack.c.bf16 %v12681_v57, %v12674_v7  ;;  %v27502_v8 = vand.u32 4294901760, %v24907_v35  ;;  %v27503_v12 = vand.u32 4294901760, %v24913_v31  ;;  %v12688_v41 = vand.u32 4294901760, %v12687_v28  ;;  %17941 = vmatprep.subr.bf16.mxu0 %v17940_v53 }
 0x4f3   : > { %v12695_v29 = vand.u32 4294901760, %v12694_v63  ;;  %v12701_v23 = vsub.f32 %v25367_v45, %v12700_v58  ;;  %v12708_v15 = vsub.f32 %v25372_v39, %v12707_v60  ;;  %v17944_v34 = vpack.c.bf16 %v12807_v16, %v12800_v5  ;;  %v27508_v63 = vld [vmem:[#allocation38_spill] sm:$0xff]  ;;  %v27549_v39 = vld [vmem:[#allocation81_spill] sm:$0xff]  ;;  %v27550_v45 = vld [vmem:[#allocation83_spill] sm:$0xff] }
 0x4f4   : > { %v18016_v3 = vpack.c.bf16 %v27503_v12, %v27502_v8  ;;  %v12814_v61 = vand.u32 4294901760, %v12813_v9  ;;  %v12821_v32 = vand.u32 4294901760, %v12820_v51  ;;  %17983 = vmatpush3.bf16.msra.mxu1 %v17982_v47  ;;  %v27504_v35 = vand.u32 4294901760, %v24961_v17  ;;  %v15750_v47 = vpop.f32.mrb[72].mxu1  ;;  %v18725_v8 = vld [vmem:[%s19593_s22 + $0x100] sm:$0x1] }
 0x4f5   : > { %v27505_v31 = vand.u32 4294901760, %v24964_v55  ;;  %v27506_v43 = vand.u32 4294901760, %v24994_v13  ;;  %v27507_v4 = vand.u32 4294901760, %v24997_v11  ;;  %17943 = vmatpush3.bf16.msra.mxu0 %v17942_v27  ;;  %v17946_v57 = vpack.c.bf16 %v12695_v29, %v12688_v41  ;;  %v27511_v11 = vld [vmem:[#allocation44_spill] sm:$0xff]  ;;  %v18728_v29 = vld [vmem:[%s21472_s13 + $0x100] sm:$0x1] }
 0x4f6   : > { %18017 = vmatprep.subr.bf16.mxu1 %v18016_v3  ;;  %v12702_v53 = vand.u32 4294901760, %v12701_v23  ;;  %v12709_v28 = vand.u32 4294901760, %v12708_v15  ;;  %17945 = vmatprep.subr.bf16.mxu0 %v17944_v34  ;;  %v17948_v17 = vpack.c.bf16 %v12821_v32, %v12814_v61  ;;  %v27509_v55 = vand.u32 4294901760, %v25000_v24  ;;  %v18726_v12 = vld [vmem:[%s19596_s18 + $0x100] sm:$0x1]  ;;  %v27514_v23 = vld [vmem:[#allocation45_spill] sm:$0xff] }
 0x4f7   : > { %v18018_v6 = vpack.c.bf16 %v27505_v31, %v27504_v35  ;;  %v18020_v7 = vpack.c.bf16 %v27507_v4, %v27506_v43  ;;  %12971 = vmatmul.mubr.f32.vlgmr.msra.gmra.mrb[94].mxu1 %v27508_v63  ;;  %v27510_v13 = vand.u32 4294901760, %v25006_v33  ;;  %v27512_v16 = vand.u32 4294901760, %v25031_v21  ;;  %v18727_v41 = vld [vmem:[%s19586_s2 + $0x100] sm:$0x1]  ;;  %v15751_v33 = vpop.f32.mrb[73].mxu1  ;;  %v27519_v43 = vld [vmem:[#allocation62_spill] sm:$0xff] }
 0x4f8   : > { %12977 = vmatprep.mubr.f32.mxu1 %v27511_v11  ;;  %v27513_v9 = vand.u32 4294901760, %v25034_v54  ;;  %v17950_v27 = vpack.c.bf16 %v12709_v28, %v12702_v53  ;;  %v1621_v3 = vmul.f32 %v18726_v12, %v18725_v8  ;;  %v1654_v24 = vmul.f32 %v18728_v29, %v18727_v41  ;;  %v15753_v31 = vpop.f32.mrb[74].mxu1  ;;  %v27522_v53 = vld [vmem:[#allocation37_spill] sm:$0xff]  ;;  %v27530_v11 = vld [vmem:[#allocation79_spill] sm:$0xff]  ;;  %v27537_v29 = vld [vmem:[#allocation36_spill] sm:$0xff] }
 0x4f9   : > { %18019 = vmatpush3.bf16.msra.mxu1 %v18018_v6  ;;  %v18022_v5 = vpack.c.bf16 %v27510_v13, %v27509_v55  ;;  %17947 = vmatpush3.bf16.msra.mxu0 %v17946_v57  ;;  %v15752_v15 = vadd.f32 %v15751_v33, %v15750_v47  ;;  %v27515_v21 = vand.u32 4294901760, %v25038_v26  ;;  %v27516_v54 = vand.u32 4294901760, %v25041_v20  ;;  %v15754_v4 = vpop.f32.mrb[75].mxu1  ;;  %v27525_v63 = vld [vmem:[#allocation73_spill] sm:$0xff]  ;;  %v27527_v13 = vld [vmem:[#allocation54_spill] sm:$0xff] }
 0x4fa   : > { %18021 = vmatprep.subr.bf16.mxu1 %v18020_v7  ;;  %v18024_v51 = vpack.c.bf16 %v27513_v9, %v27512_v16  ;;  %17949 = vmatprep.subr.bf16.mxu0 %v17948_v17  ;;  %v27517_v61 = vand.u32 4294901760, %v25045_v48  ;;  %v27518_v32 = vand.u32 4294901760, %v25047_v30  ;;  %v1687_v6 = vsub.f32 %v1621_v3, %v1654_v24  ;;  %v27526_v17 = vld [vmem:[#allocation42_spill] sm:$0xff]  ;;  %v27536_v41 = vld [vmem:[#allocation65_spill] sm:$0xff] }
 0x4fb   : > { %12980 = vmatmul.mubr.f32.gmra.mrb[96].mxu1 %v27514_v23  ;;  %v18026_v34 = vpack.c.bf16 %v27516_v54, %v27515_v21  ;;  %v15755_v7 = vadd.f32 %v15754_v4, %v15753_v31  ;;  %v27520_v26 = vand.u32 4294901760, %v25108_v44  ;;  %v27521_v20 = vand.u32 4294901760, %v25113_v14  ;;  %v15712_v44 = vpop.f32.mrb[70].mxu0  ;;  %v27528_v14 = vld [vmem:[#allocation76_spill] sm:$0xff]  ;;  %v27538_v24 = vld [vmem:[#allocation69_spill] sm:$0xff] }
 0x4fc   : > { %13265 = vmatprep.mubr.f32.mxu1 %v27356_v0  ;;  %v18028_v35 = vpack.c.bf16 %v27518_v32, %v27517_v61  ;;  %v27523_v48 = vand.u32 4294901760, %v25175_v36  ;;  %v27524_v30 = vand.u32 4294901760, %v25180_v62  ;;  %v12470_v55 = vsel %vm1695_vm1, %v1687_v6, 0  ;;  %v15713_v36 = vpop.f32.mrb[71].mxu0  ;;  %v27533_v62 = vld [vmem:[#allocation74_spill] sm:$0xff]  ;;  %v27541_v31 = vld [vmem:[#allocation57_spill] sm:$0xff] }
 0x4fd   : > { %18023 = vmatpush3.bf16.msra.mxu1 %v18022_v5  ;;  %17951 = vmatpush3.bf16.msra.mxu0 %v17950_v27  ;;  %v18030_v57 = vpack.c.bf16 %v27521_v20, %v27520_v26  ;;  %v27529_v5 = vand.u32 4294901760, %v27528_v14  ;;  %v27531_v16 = vand.u32 4294901760, %v27530_v11  ;;  %v27534_v47 = vand.u32 4294901760, %v27533_v62  ;;  %v15715_v23 = vpop.f32.mrb[72].mxu0  ;;  %v27542_v6 = vld [vmem:[#allocation85_spill] sm:$0xff]  ;;  %v27555_v4 = vld [vmem:[#allocation40_spill] sm:$0xff] }
 0x4fe   : > { %18025 = vmatprep.subr.bf16.mxu1 %v18024_v51  ;;  %17985 = vmatprep.subr.bf16.mxu0 %v27519_v43  ;;  %v18032_v28 = vpack.c.bf16 %v27524_v30, %v27523_v48  ;;  %v27532_v51 = vld [vmem:[#allocation43_spill] sm:$0xff]  ;;  %v27535_v27 = vand.u32 4294901760, %v25261_v1  ;;  %v25579_v12 = vand.u32 4294901760, %v12470_v55  ;;  %v15714_v3 = vadd.f32 %v15713_v36, %v15712_v44  ;;  %v15716_v1 = vpop.f32.mrb[73].mxu0  ;;  %v27561_v62 = vld [vmem:[#allocation32_spill] sm:$0xff] }
 0x4ff   : > { %v18034_v9 = vpack.c.bf16 %v27531_v16, %v27529_v5  ;;  %v27539_v21 = vand.u32 4294901760, %v25276_v2  ;;  %v27540_v54 = vand.u32 4294901760, %v25283_v49  ;;  %v18040_v61 = vpack.c.bf16 %v12805_v38, %v12798_v42  ;;  %v27557_v20 = vld [vmem:[#allocation47_spill] sm:$0xff] }
 0x500   : > { %12826 = vmatmul.mubr.f32.vlgmr.msra.gmra.mrb[92].mxu0 %v27522_v53  ;;  %v18036_v8 = vpack.c.bf16 %v27535_v27, %v27534_v47  ;;  %v10012_v33 = vadd.f32 %v15714_v3, %v25480_v25  ;;  %v13478_v32 = vsub.f32 %v12470_v55, %v25579_v12  ;;  %v18042_v49 = vpack.c.bf16 %v12693_v52, %v12686_v46  ;;  %v27547_v52 = vld [vmem:[#allocation77_spill] sm:$0xff] }
 0x501   : > { %18027 = vmatpush3.bf16.msra.mxu1 %v18026_v34  ;;  %17987 = vmatpush3.bf16.msra.mxu0 %v27525_v63  ;;  %v18038_v34 = vpack.c.bf16 %v27540_v54, %v27539_v21  ;;  %v18044_v42 = vpack.c.bf16 %v12819_v40, %v12812_v56  ;;  %v18046_v10 = vpack.c.bf16 %v12707_v60, %v12700_v58  ;;  %v27548_v56 = vld [vmem:[#allocation78_spill] sm:$0xff]  ;;  %v27551_v40 = vld [vmem:[#allocation51_spill] sm:$0xff]  ;;  %v27553_v58 = vld [vmem:[#allocation56_spill] sm:$0xff] }
 0x502   : > { %18029 = vmatprep.subr.bf16.mxu1 %v18028_v35  ;;  %12831 = vmatprep.mubr.f32.mxu0 %v27526_v17  ;;  %v15717_v35 = vadd.f32 %v15716_v1, %v15715_v23  ;;  %v10191_v25 = vadd.f32 %v15752_v15, %v10012_v33  ;;  %v25605_v19 = vand.u32 4294901760, %v13478_v32  ;;  %v27544_v15 = vld [vmem:[#allocation71_spill] sm:$0xff]  ;;  %v27554_v60 = vld [vmem:[#allocation29_spill] sm:$0xff] }
 0x503   : > { %17989 = vmatprep.subr.bf16.mxu0 %v27527_v13 }
 0x504   : > { %12833 = vmatmul.mubr.f32.gmra.mrb[94].mxu0 %v27532_v51  ;;  %v10023_v2 = vadd.f32 %v15717_v35, %v25499_v59  ;;  %v13480_v22 = vsub.f32 %v13478_v32, %v25605_v19  ;;  %v27552_v59 = vld [vmem:[#allocation115_spill] sm:$0xff] }
 0x505   : > { %18031 = vmatpush3.bf16.msra.mxu1 %v18030_v57  ;;  %17991 = vmatpush3.bf16.msra.mxu0 %v27536_v41 }
 0x506   : > { %18033 = vmatprep.subr.bf16.mxu1 %v18032_v28  ;;  %13084 = vmatprep.mubr.f32.mxu0 %v27537_v29  ;;  %v10198_v38 = vadd.f32 %v15755_v7, %v10023_v2  ;;  %v13481_v46 = vand.u32 4294901760, %v13480_v22  ;;  %v27556_v7 = vld [vmem:[#allocation46_spill] sm:$0xff]  ;;  %v27562_v29 = vld [vmem:[#allocation35_spill] sm:$0xff] }
 0x507   : > { %17993 = vmatprep.subr.bf16.mxu0 %v27538_v24 }
 0x509   : > { %18035 = vmatpush3.bf16.msra.mxu1 %v18034_v9  ;;  %17995 = vmatpush3.bf16.msra.mxu0 %v27541_v31  ;;  %v27560_v9 = vld [vmem:[#allocation61_spill] sm:$0xff] }
 0x50a   : > { %18037 = vmatprep.subr.bf16.mxu1 %v18036_v8  ;;  %17997 = vmatprep.subr.bf16.mxu0 %v27542_v6 }
 0x50d   : > { %18039 = vmatpush3.bf16.msra.mxu1 %v18038_v34  ;;  %17999 = vmatpush3.bf16.msra.mxu0 %v27543_v37 }
 0x50e   : > { %18041 = vmatprep.subr.bf16.mxu1 %v18040_v61  ;;  %18001 = vmatprep.subr.bf16.mxu0 %v27544_v15 }
 0x511   : > { %18043 = vmatpush3.bf16.msra.mxu1 %v18042_v49  ;;  %18003 = vmatpush3.bf16.msra.mxu0 %v27545_v18 }
 0x512   : > { %18045 = vmatprep.subr.bf16.mxu1 %v18044_v42  ;;  %18005 = vmatprep.subr.bf16.mxu0 %v27546_v50 }
 0x515   : > { %18047 = vmatpush3.bf16.msra.mxu1 %v18046_v10  ;;  %18007 = vmatpush3.bf16.msra.mxu0 %v27547_v52 }
 0x516   : > { %16514 = vmatprep.subr.mxu1 %v25579_v12  ;;  %18009 = vmatprep.subr.bf16.mxu0 %v27548_v56 }
 0x517   : > { %v15788_v26 = vpop.f32.mrb[74].mxu0 }
 0x518   : > { %13267 = vmatmul.mubr.f32.vlgmr.msra.gmra.mrb[98].mxu1 %v27522_v53  ;;  %v15789_v57 = vpop.f32.mrb[75].mxu0 }
 0x519   : > { %16515 = vmatpush3.msra.mxu1 %v25579_v12  ;;  %13272 = vmatprep.mubr.f32.mxu1 %v27526_v17  ;;  %v15790_v48 = vadd.f32 %v15789_v57, %v15788_v26 }
 0x51a   : > { %16519 = vmatprep.subr.mxu1 %v13481_v46  ;;  %18011 = vmatpush3.bf16.msra.mxu0 %v27549_v39 }
 0x51b   : > { %18013 = vmatprep.subr.bf16.mxu0 %v27550_v45  ;;  %v15791_v30 = vpop.f32.mrb[76].mxu0  ;;  %v10302_v28 = vadd.f32 %v15790_v48, %v10191_v25 }
 0x51c   : > { %13274 = vmatmul.mubr.f32.gmra.mrb[100].mxu1 %v27532_v51  ;;  %v15792_v55 = vpop.f32.mrb[77].mxu0 }
 0x51d   : > { %16516 = vmatprep.mubr.f32.mxu1 %v27551_v40  ;;  %v16483_v44 = vpop.f32.mrb[76].mxu1 }
 0x51e   : > { %18015 = vmatpush3.bf16.msra.mxu0 %v27552_v59 }
 0x51f   : > { %18049 = vmatprep.subr.bf16.mxu0 %v27519_v43  ;;  %v27558_v43 = vld [vmem:[#allocation30_spill] sm:$0xff] }
 0x520   : > { %16517 = vmatmul.mubr.f32.vlgmr.msra.gmra.mrb[102].mxu1 %v27553_v58 }
 0x521   : > { %16520 = vmatpush3.msra.mxu1 %v13481_v46  ;;  %16521 = vmatprep.mubr.f32.mxu1 %v27554_v60 }
 0x522   : > { %13088 = vmatmul.mubr.f32.vlgmr.msra.gmra.mrb[96].mxu0 %v27555_v4  ;;  %16524 = vmatprep.subr.mxu1 %v13478_v32 }
 0x523   : > { %18051 = vmatpush3.bf16.msra.mxu0 %v27525_v63  ;;  %13095 = vmatprep.mubr.f32.mxu0 %v27556_v7  ;;  %v27559_v63 = vld [vmem:[#allocation31_spill] sm:$0xff] }
 0x524   : > { %18053 = vmatprep.subr.bf16.mxu0 %v27527_v13  ;;  %v15793_v13 = vadd.f32 %v15792_v55, %v15791_v30 }
 0x526   : > { %13099 = vmatmul.mubr.f32.gmra.mrb[98].mxu0 %v27557_v20  ;;  %v10309_v14 = vadd.f32 %v15793_v13, %v10198_v38  ;;  %v27563_v38 = vld [vmem:[#allocation50_spill] sm:$0xff] }
 0x527   : > { %18055 = vmatpush3.bf16.msra.mxu0 %v27536_v41  ;;  %13376 = vmatprep.mubr.f32.mxu0 %v27356_v0  ;;  %v10791_v0 = vpop.f32.mrb[77].mxu1 }
 0x528   : > { %18057 = vmatprep.subr.bf16.mxu0 %v27538_v24  ;;  %16522 = vmatmul.mubr.f32.vlgmr.msra.gmra.mrb[102].mxu1 %v27558_v43  ;;  %v18091_v5 = vadd.f32 %v10791_v0, %v10302_v28  ;;  %v18090_v11 = vadd.f32 %v16483_v44, %v10309_v14 }
 0x529   : > { %16525 = vmatpush3.msra.mxu1 %v13478_v32  ;;  %16526 = vmatprep.mubr.f32.mxu1 %v27559_v63 }
 0x52a   : > { %16529 = vmatprep.subr.mxu1 %v25579_v12  ;;  %v10803_v16 = vcombine.high %v18091_v5, %v18091_v5  ;;  %v10810_v36 = vrot.slane %v18091_v5, %v27560_v9  ;;  %v10852_v47 = vcombine.high %v18090_v11, %v18090_v11  ;;  %v10859_v27 = vrot.slane %v18090_v11, %v27560_v9 }
 0x52b   : > { %18059 = vmatpush3.bf16.msra.mxu0 %v27541_v31 }
 0x52c   : > { %18061 = vmatprep.subr.bf16.mxu0 %v27542_v6  ;;  %v10817_v8 = vrot.slane %v10803_v16, %v27560_v9  ;;  %v10818_v3 = vcombine.high %v10810_v36, %v10810_v36  ;;  %14309 = vst.sshfl [vmem:[%s21848_s20 + $0x5] sm:$0x1 pattern:$0x73625140] %v10810_v36  ;;  %v10826_v41 = vrot.slane %v10810_v36, %v27560_v9 }
 0x52d   : > { %v10866_v24 = vrot.slane %v10852_v47, %v27560_v9  ;;  %v10867_v33 = vcombine.high %v10859_v27, %v10859_v27  ;;  %v10875_v23 = vrot.slane %v10859_v27, %v27560_v9  ;;  %14313 = vst.sshfl [vmem:[%s21848_s20 + $0x45] sm:$0x1 pattern:$0x73625140] %v10859_v27 }
 0x52e   : > { %v10819_v21 = vcombine.high %v10817_v8, %v10817_v8  ;;  %14310 = vst.sshfl [vmem:[%s21848_s20 + $0xd] sm:$0x1 pattern:$0x73625140] %v10818_v3  ;;  %v10833_v54 = vrot.slane %v10817_v8, %v27560_v9  ;;  %v10840_v34 = vrot.slane %v10818_v3, %v27560_v9  ;;  %v10848_v1 = vcombine.high %v10826_v41, %v10826_v41 }
 0x52f   : > { %18063 = vmatpush3.bf16.msra.mxu0 %v27543_v37  ;;  %14311 = vst.sshfl [vmem:[%s21848_s20 + $0x25] sm:$0x1 pattern:$0x73625140] %v10817_v8  ;;  %v10868_v61 = vcombine.high %v10866_v24, %v10866_v24  ;;  %v10882_v32 = vrot.slane %v10866_v24, %v27560_v9  ;;  %v10889_v35 = vrot.slane %v10867_v33, %v27560_v9 }
 0x530   : > { %18065 = vmatprep.subr.bf16.mxu0 %v27544_v15  ;;  %16527 = vmatmul.mubr.f32.vlgmr.msra.gmra.mrb[102].mxu1 %v27561_v62  ;;  %v10897_v31 = vcombine.high %v10875_v23, %v10875_v23  ;;  %14314 = vst.sshfl [vmem:[%s21848_s20 + $0x4d] sm:$0x1 pattern:$0x73625140] %v10867_v33  ;;  %v10847_v25 = vrot.slane %v10819_v21, %v27560_v9  ;;  %10917 = vst [vmem:[%s21848_s20 + $0x15] sm:$0x1] %v10848_v1 }
 0x531   : > { %16530 = vmatpush3.msra.mxu1 %v25579_v12  ;;  %16531 = vmatprep.mubr.f32.mxu1 %v27562_v29  ;;  %14315 = vst.sshfl [vmem:[%s21848_s20 + $0x65] sm:$0x1 pattern:$0x73625140] %v10866_v24  ;;  %v10849_v6 = vcombine.high %v10833_v54, %v10833_v54  ;;  %v10850_v2 = vcombine.high %v10840_v34, %v10840_v34 }
 0x532   : > { %16534 = vmatprep.subr.mxu1 %v25605_v19  ;;  %14312 = vst.sshfl [vmem:[%s21848_s20 + $0x2d] sm:$0x1 pattern:$0x73625140] %v10819_v21  ;;  %v10898_v49 = vcombine.high %v10882_v32, %v10882_v32  ;;  %v10899_v42 = vcombine.high %v10889_v35, %v10889_v35  ;;  %10925 = vst [vmem:[%s21848_s20 + $0x55] sm:$0x1] %v10897_v31  ;;  %v10851_v37 = vcombine.high %v10847_v25, %v10847_v25 }
 0x533   : > { %18067 = vmatpush3.bf16.msra.mxu0 %v27545_v18  ;;  %14316 = vst.sshfl [vmem:[%s21848_s20 + $0x6d] sm:$0x1 pattern:$0x73625140] %v10868_v61  ;;  %10918 = vst [vmem:[%s21848_s20 + $0x1d] sm:$0x1] %v10850_v2 }
 0x534   : > { %18069 = vmatprep.subr.bf16.mxu0 %v27546_v50  ;;  %10921 = vst [vmem:[%s21848_s20 + $0x35] sm:$0x1] %v10849_v6  ;;  %10926 = vst [vmem:[%s21848_s20 + $0x5d] sm:$0x1] %v10899_v42 }
 0x535   : > { %10929 = vst [vmem:[%s21848_s20 + $0x75] sm:$0x1] %v10898_v49  ;;  %10922 = vst [vmem:[%s21848_s20 + $0x3d] sm:$0x1] %v10851_v37 }
 0x537   : > { %18071 = vmatpush3.bf16.msra.mxu0 %v27547_v52 }
 0x538   : > { %18073 = vmatprep.subr.bf16.mxu0 %v27548_v56  ;;  %16532 = vmatmul.mubr.f32.vlgmr.msra.gmra.mrb[102].mxu1 %v27563_v38 }
 0x539   : > { %16535 = vmatpush3.msra.mxu1 %v25605_v19  ;;  %16536 = vmatprep.mubr.f32.mxu1 %v27554_v60 }
 0x53a   : > { %16539 = vmatprep.subr.mxu1 %v25579_v12 }
 0x53b   : > { %18075 = vmatpush3.bf16.msra.mxu0 %v27549_v39  ;;  %v15844_v19 = vpop.f32.mrb[78].mxu0 }
 0x53c   : > { %18077 = vmatprep.subr.bf16.mxu0 %v27550_v45  ;;  %v15845_v15 = vpop.f32.mrb[79].mxu0 }
 0x53d   : > { %v15846_v10 = vadd.f32 %v15845_v15, %v15844_v19 }
 0x53f   : > { %18079 = vmatpush3.bf16.msra.mxu0 %v27552_v59  ;;  %v15847_v22 = vpop.f32.mrb[80].mxu0 }
 0x540   : > { %16537 = vmatmul.mubr.f32.vlgmr.msra.gmra.mrb[102].mxu1 %v27558_v43  ;;  %v15848_v18 = vpop.f32.mrb[81].mxu0 }
 0x541   : > { %16540 = vmatpush3.msra.mxu1 %v25579_v12  ;;  %16541 = vmatprep.mubr.f32.mxu1 %v27554_v60  ;;  %v15882_v50 = vpop.f32.mrb[78].mxu1  ;;  %v15849_v46 = vadd.f32 %v15848_v18, %v15847_v22 }
 0x542   : > { %13378 = vmatmul.mubr.f32.vlgmr.msra.gmra.mrb[100].mxu0 %v27522_v53  ;;  %v15883_v52 = vpop.f32.mrb[79].mxu1 }
 0x543   : > { %13383 = vmatprep.mubr.f32.mxu0 %v27526_v17  ;;  %v15884_v56 = vadd.f32 %v15883_v52, %v15882_v50 }
 0x545   : > { %v11289_v12 = vadd.f32 %v15884_v56, %v15846_v10  ;;  %v15885_v39 = vpop.f32.mrb[80].mxu1 }
 0x546   : > { %13385 = vmatmul.mubr.f32.gmra.mrb[102].mxu0 %v27532_v51  ;;  %v15886_v45 = vpop.f32.mrb[81].mxu1 }
 0x547   : > { %v15887_v40 = vadd.f32 %v15886_v45, %v15885_v39 }
 0x548   : > { %16542 = vmatmul.mubr.f32.vlgmr.msra.gmra.mrb[102].mxu1 %v27558_v43 }
 0x549   : > { %v11296_v53 = vadd.f32 %v15887_v40, %v15849_v46 }
 0x55b   : > { %v15920_v59 = vpop.f32.mrb[82].mxu0 }
 0x55c   : > { %v15921_v17 = vpop.f32.mrb[83].mxu0 }
 0x55d   : > { %v15922_v58 = vadd.f32 %v15921_v17, %v15920_v59 }
 0x55f   : > { %v11434_v60 = vadd.f32 %v15922_v58, %v11289_v12  ;;  %v15923_v51 = vpop.f32.mrb[84].mxu0 }
 0x560   : > { %v15924_v4 = vpop.f32.mrb[85].mxu0 }
 0x561   : > { %v15925_v7 = vadd.f32 %v15924_v4, %v15923_v51  ;;  %v15958_v26 = vpop.f32.mrb[82].mxu1 }
 0x562   : > { %v15959_v20 = vpop.f32.mrb[83].mxu1 }
 0x563   : > { %v11443_v57 = vadd.f32 %v15925_v7, %v11296_v53  ;;  %v15960_v48 = vadd.f32 %v15959_v20, %v15958_v26 }
 0x565   : > { %v11551_v43 = vadd.f32 %v15960_v48, %v11434_v60  ;;  %v15961_v30 = vpop.f32.mrb[84].mxu1 }
 0x566   : > { %v15962_v28 = vpop.f32.mrb[85].mxu1 }
 0x567   : > { %v15963_v63 = vadd.f32 %v15962_v28, %v15961_v30 }
 0x569   : > { %v11562_v55 = vadd.f32 %v15963_v63, %v11443_v57 }
 0x57b   : > { %v15996_v13 = vpop.f32.mrb[86].mxu0 }
 0x57c   : > { %v15997_v44 = vpop.f32.mrb[87].mxu0 }
 0x57d   : > { %v15998_v0 = vadd.f32 %v15997_v44, %v15996_v13 }
 0x57f   : > { %v11730_v14 = vadd.f32 %v15998_v0, %v11551_v43  ;;  %v15999_v5 = vpop.f32.mrb[88].mxu0 }
 0x580   : > { %v16000_v11 = vpop.f32.mrb[89].mxu0 }
 0x581   : > { %v16001_v16 = vadd.f32 %v16000_v11, %v15999_v5  ;;  %v16034_v36 = vpop.f32.mrb[86].mxu1 }
 0x582   : > { %v16035_v62 = vpop.f32.mrb[87].mxu1 }
 0x583   : > { %v11737_v47 = vadd.f32 %v16001_v16, %v11562_v55  ;;  %v16036_v27 = vadd.f32 %v16035_v62, %v16034_v36 }
 0x585   : > { %v16037_v8 = vpop.f32.mrb[88].mxu1  ;;  %v11841_v3 = vadd.f32 %v16036_v27, %v11730_v14 }
 0x586   : > { %v16038_v41 = vpop.f32.mrb[89].mxu1 }
 0x587   : > { %v16039_v29 = vadd.f32 %v16038_v41, %v16037_v8 }
 0x589   : > { %v11848_v24 = vadd.f32 %v16039_v29, %v11737_v47 }
 0x5a9   : > { %v16090_v33 = vpop.f32.mrb[90].mxu1 }
 0x5aa   : > { %v16091_v23 = vpop.f32.mrb[91].mxu1 }
 0x5ab   : > { %v16092_v21 = vadd.f32 %v16091_v23, %v16090_v33 }
 0x5ad   : > { %v16093_v54 = vpop.f32.mrb[92].mxu1 }
 0x5ae   : > { %v16094_v34 = vpop.f32.mrb[93].mxu1 }
 0x5af   : > { %v16095_v1 = vadd.f32 %v16094_v34, %v16093_v54 }
 0x5b3   : > { %v16513_v61 = vpop.f32.mrb[90].mxu0 }
 0x5b4   : > { %v18092_v32 = vadd.f32 %v16513_v61, %v11848_v24  ;;  %v12330_v35 = vpop.f32.mrb[91].mxu0 }
 0x5b5   : > { %v18093_v31 = vadd.f32 %v12330_v35, %v11841_v3 }
 0x5b6   : > { %v12391_v25 = vcombine.high %v18092_v32, %v18092_v32  ;;  %v12398_v6 = vrot.slane %v18092_v32, %v27560_v9 }
 0x5b7   : > { %v12342_v2 = vcombine.high %v18093_v31, %v18093_v31  ;;  %v12349_v49 = vrot.slane %v18093_v31, %v27560_v9 }
 0x5b8   : > { %v12405_v42 = vrot.slane %v12391_v25, %v27560_v9  ;;  %v12406_v37 = vcombine.high %v12398_v6, %v12398_v6  ;;  %v12414_v38 = vrot.slane %v12398_v6, %v27560_v9  ;;  %14321 = vst.sshfl [vmem:[%s21848_s20 + $0x46] sm:$0x1 pattern:$0x73625140] %v12398_v6 }
 0x5b9   : > { %v12356_v19 = vrot.slane %v12342_v2, %v27560_v9  ;;  %v12357_v15 = vcombine.high %v12349_v49, %v12349_v49  ;;  %v12365_v10 = vrot.slane %v12349_v49, %v27560_v9  ;;  %14317 = vst.sshfl [vmem:[%s21848_s20 + $0x6] sm:$0x1 pattern:$0x73625140] %v12349_v49 }
 0x5ba   : > { %v12407_v22 = vcombine.high %v12405_v42, %v12405_v42  ;;  %v12421_v18 = vrot.slane %v12405_v42, %v27560_v9  ;;  %v12428_v50 = vrot.slane %v12406_v37, %v27560_v9  ;;  %v12436_v46 = vcombine.high %v12414_v38, %v12414_v38  ;;  %14322 = vst.sshfl [vmem:[%s21848_s20 + $0x4e] sm:$0x1 pattern:$0x73625140] %v12406_v37 }
 0x5bb   : > { %14323 = vst.sshfl [vmem:[%s21848_s20 + $0x66] sm:$0x1 pattern:$0x73625140] %v12405_v42  ;;  %v12358_v52 = vcombine.high %v12356_v19, %v12356_v19  ;;  %v12372_v56 = vrot.slane %v12356_v19, %v27560_v9  ;;  %v12379_v12 = vrot.slane %v12357_v15, %v27560_v9  ;;  %v12387_v39 = vcombine.high %v12365_v10, %v12365_v10 }
 0x5bc   : > { %14318 = vst.sshfl [vmem:[%s21848_s20 + $0xe] sm:$0x1 pattern:$0x73625140] %v12357_v15  ;;  %v12437_v45 = vcombine.high %v12421_v18, %v12421_v18  ;;  %v12438_v40 = vcombine.high %v12428_v50, %v12428_v50  ;;  %12464 = vst [vmem:[%s21848_s20 + $0x56] sm:$0x1] %v12436_v46 }
 0x5bd   : > { %14319 = vst.sshfl [vmem:[%s21848_s20 + $0x26] sm:$0x1 pattern:$0x73625140] %v12356_v19  ;;  %v12386_v53 = vrot.slane %v12358_v52, %v27560_v9  ;;  %v12388_v59 = vcombine.high %v12372_v56, %v12372_v56  ;;  %v12389_v17 = vcombine.high %v12379_v12, %v12379_v12  ;;  %12456 = vst [vmem:[%s21848_s20 + $0x16] sm:$0x1] %v12387_v39 }
 0x5be   : > { %14324 = vst.sshfl [vmem:[%s21848_s20 + $0x6e] sm:$0x1 pattern:$0x73625140] %v12407_v22  ;;  %12465 = vst [vmem:[%s21848_s20 + $0x5e] sm:$0x1] %v12438_v40 }
 0x5bf   : > { %14320 = vst.sshfl [vmem:[%s21848_s20 + $0x2e] sm:$0x1 pattern:$0x73625140] %v12358_v52  ;;  %12468 = vst [vmem:[%s21848_s20 + $0x76] sm:$0x1] %v12437_v45  ;;  %v12390_v58 = vcombine.high %v12386_v53, %v12386_v53 }
 0x5c0   : > { %12457 = vst [vmem:[%s21848_s20 + $0x1e] sm:$0x1] %v12389_v17  ;;  %12460 = vst [vmem:[%s21848_s20 + $0x36] sm:$0x1] %v12388_v59 }
 0x5c1   : > { %12461 = vst [vmem:[%s21848_s20 + $0x3e] sm:$0x1] %v12390_v58 }
 0x5ca   : > { %v16166_v60 = vpop.f32.mrb[94].mxu1 }
 0x5cb   : > { %v16167_v51 = vpop.f32.mrb[95].mxu1 }
 0x5cc   : > { %v16168_v4 = vadd.f32 %v16167_v51, %v16166_v60 }
 0x5ce   : > { %v16169_v7 = vpop.f32.mrb[96].mxu1 }
 0x5cf   : > { %v16170_v26 = vpop.f32.mrb[97].mxu1 }
 0x5d0   : > { %v16171_v20 = vadd.f32 %v16170_v26, %v16169_v7 }
 0x5d3   : > { %v16128_v57 = vpop.f32.mrb[92].mxu0 }
 0x5d4   : > { %v16129_v48 = vpop.f32.mrb[93].mxu0 }
 0x5d5   : > { %v16130_v43 = vadd.f32 %v16129_v48, %v16128_v57 }
 0x5d7   : > { %v12828_v30 = vadd.f32 %v16130_v43, %v16092_v21  ;;  %v16131_v28 = vpop.f32.mrb[94].mxu0 }
 0x5d8   : > { %v16132_v63 = vpop.f32.mrb[95].mxu0 }
 0x5d9   : > { %v16133_v55 = vadd.f32 %v16132_v63, %v16131_v28  ;;  %v12973_v13 = vadd.f32 %v16168_v4, %v12828_v30 }
 0x5db   : > { %v12835_v44 = vadd.f32 %v16133_v55, %v16095_v1 }
 0x5dd   : > { %v12982_v0 = vadd.f32 %v16171_v20, %v12835_v44 }
 0x5eb   : > { %v16242_v14 = vpop.f32.mrb[98].mxu1 }
 0x5ec   : > { %v16243_v5 = vpop.f32.mrb[99].mxu1 }
 0x5ed   : > { %v16244_v11 = vadd.f32 %v16243_v5, %v16242_v14 }
 0x5ef   : > { %v16245_v16 = vpop.f32.mrb[100].mxu1 }
 0x5f0   : > { %v16246_v36 = vpop.f32.mrb[101].mxu1 }
 0x5f1   : > { %v16247_v62 = vadd.f32 %v16246_v36, %v16245_v16 }
 0x5f5   : > { %v16204_v47 = vpop.f32.mrb[96].mxu0 }
 0x5f6   : > { %v16205_v27 = vpop.f32.mrb[97].mxu0 }
 0x5f7   : > { %v16206_v8 = vadd.f32 %v16205_v27, %v16204_v47 }
 0x5f9   : > { %v13090_v3 = vadd.f32 %v16206_v8, %v12973_v13  ;;  %v16207_v41 = vpop.f32.mrb[98].mxu0 }
 0x5fa   : > { %v16208_v29 = vpop.f32.mrb[99].mxu0 }
 0x5fb   : > { %v16209_v24 = vadd.f32 %v16208_v29, %v16207_v41  ;;  %v13269_v33 = vadd.f32 %v16244_v11, %v13090_v3 }
 0x5fd   : > { %v13101_v23 = vadd.f32 %v16209_v24, %v12982_v0 }
 0x5ff   : > { %v13276_v21 = vadd.f32 %v16247_v62, %v13101_v23 }
 0x615   : > { %v16280_v54 = vpop.f32.mrb[100].mxu0 }
 0x616   : > { %v16281_v34 = vpop.f32.mrb[101].mxu0 }
 0x617   : > { %v16282_v1 = vadd.f32 %v16281_v34, %v16280_v54 }
 0x619   : > { %v16283_v61 = vpop.f32.mrb[102].mxu0  ;;  %v13380_v32 = vadd.f32 %v16282_v1, %v13269_v33 }
 0x61a   : > { %v16284_v35 = vpop.f32.mrb[103].mxu0 }
 0x61b   : > { %v16285_v31 = vadd.f32 %v16284_v35, %v16283_v61  ;;  %v16543_v25 = vpop.f32.mrb[102].mxu1 }
 0x61c   : > { %v13869_v6 = vpop.f32.mrb[103].mxu1 }
 0x61d   : > { %v13387_v2 = vadd.f32 %v16285_v31, %v13276_v21  ;;  %v18095_v49 = vadd.f32 %v13869_v6, %v13380_v32 }
 0x61f   : > { %v18094_v42 = vadd.f32 %v16543_v25, %v13387_v2  ;;  %v13881_v37 = vcombine.high %v18095_v49, %v18095_v49  ;;  %v13888_v38 = vrot.slane %v18095_v49, %v27560_v9 }
 0x621   : > { %v13930_v19 = vcombine.high %v18094_v42, %v18094_v42  ;;  %v13937_v15 = vrot.slane %v18094_v42, %v27560_v9  ;;  %v13895_v10 = vrot.slane %v13881_v37, %v27560_v9  ;;  %v13896_v22 = vcombine.high %v13888_v38, %v13888_v38  ;;  %14325 = vst.sshfl [vmem:[%s21848_s20 + $0x7] sm:$0x1 pattern:$0x73625140] %v13888_v38 }
 0x622   : > { %v13904_v18 = vrot.slane %v13888_v38, %v27560_v9 }
 0x623   : > { %v13944_v50 = vrot.slane %v13930_v19, %v27560_v9  ;;  %v13945_v46 = vcombine.high %v13937_v15, %v13937_v15  ;;  %v13953_v52 = vrot.slane %v13937_v15, %v27560_v9  ;;  %14329 = vst.sshfl [vmem:[%s21848_s20 + $0x47] sm:$0x1 pattern:$0x73625140] %v13937_v15  ;;  %v13897_v56 = vcombine.high %v13895_v10, %v13895_v10 }
 0x624   : > { %14326 = vst.sshfl [vmem:[%s21848_s20 + $0xf] sm:$0x1 pattern:$0x73625140] %v13896_v22  ;;  %v13911_v12 = vrot.slane %v13895_v10, %v27560_v9  ;;  %v13918_v39 = vrot.slane %v13896_v22, %v27560_v9  ;;  %v13926_v45 = vcombine.high %v13904_v18, %v13904_v18 }
 0x625   : > { %14327 = vst.sshfl [vmem:[%s21848_s20 + $0x27] sm:$0x1 pattern:$0x73625140] %v13895_v10  ;;  %v13946_v40 = vcombine.high %v13944_v50, %v13944_v50  ;;  %v13960_v53 = vrot.slane %v13944_v50, %v27560_v9  ;;  %v13967_v59 = vrot.slane %v13945_v46, %v27560_v9  ;;  %v13975_v17 = vcombine.high %v13953_v52, %v13953_v52 }
 0x626   : > { %14330 = vst.sshfl [vmem:[%s21848_s20 + $0x4f] sm:$0x1 pattern:$0x73625140] %v13945_v46  ;;  %v13925_v58 = vrot.slane %v13897_v56, %v27560_v9  ;;  %v13927_v60 = vcombine.high %v13911_v12, %v13911_v12  ;;  %v13928_v51 = vcombine.high %v13918_v39, %v13918_v39  ;;  %13995 = vst [vmem:[%s21848_s20 + $0x17] sm:$0x1] %v13926_v45 }
 0x627   : > { %14331 = vst.sshfl [vmem:[%s21848_s20 + $0x67] sm:$0x1 pattern:$0x73625140] %v13944_v50  ;;  %v13976_v4 = vcombine.high %v13960_v53, %v13960_v53  ;;  %v13977_v7 = vcombine.high %v13967_v59, %v13967_v59  ;;  %14003 = vst [vmem:[%s21848_s20 + $0x57] sm:$0x1] %v13975_v17 }
 0x628   : > { %14328 = vst.sshfl [vmem:[%s21848_s20 + $0x2f] sm:$0x1 pattern:$0x73625140] %v13897_v56  ;;  %v13929_v9 = vcombine.high %v13925_v58, %v13925_v58  ;;  %13996 = vst [vmem:[%s21848_s20 + $0x1f] sm:$0x1] %v13928_v51 }
 0x629   : > { %14332 = vst.sshfl [vmem:[%s21848_s20 + $0x6f] sm:$0x1 pattern:$0x73625140] %v13946_v40  ;;  %13999 = vst [vmem:[%s21848_s20 + $0x37] sm:$0x1] %v13927_v60 }
 0x62a   : > { %14004 = vst [vmem:[%s21848_s20 + $0x5f] sm:$0x1] %v13977_v7  ;;  %14007 = vst [vmem:[%s21848_s20 + $0x77] sm:$0x1] %v13976_v4 }
 0x62b   : > { %14000 = vst [vmem:[%s21848_s20 + $0x3f] sm:$0x1] %v13929_v9 }
 0x62c   : > { %19010 = shalt.err (!%p19007_p13)
}
 0x62d   : > { %s19011_s21 = scalar_lea.hbm %s25743_s1, 1920  ;;  %s19015_s26 = scalar_lea.hbm %s25805_s9, 3840 }
 0x62e   : > { %p19012_p5 = scmp.ne.s32.totalorder %s25743_s1, %s19011_s21  ;;  %p19016_p1 = scmp.lt.u32.totalorder %s25743_s1, %s25805_s9 }
 0x62f   : > { %p19017_p6 = scmp.lt.u32.totalorder %s19015_s26, %s19011_s21  ;;  %p19019_p3 = scmp.lt.u32.totalorder %s19011_s21, %s25743_s1 }
 0x630   : > { %p19013_p9 = pnand %p19012_p5, %p27564_p10 }
 0x631   : > { %p19018_p7 = por %p19017_p6, %p19016_p1 }
 0x632   : > { %p19014_p8 = pneg %p19013_p9 }
 0x633   : > { %p19020_p4 = por %p19019_p3, %p19018_p7 }
 0x635   : > { %p19021_p12 = pnand %p19020_p4, %p19014_p8 }
 0x637   : > { %19024 = shalt.err (!%p19021_p12)
}
 0x638   : > { %s19097_s22 = smov 128   ;;  %s19098_s11 = smov 256  }
 0x639   : > { %s19099_s18 = smov 8  }
 0x63a   : > { %18206 = dma.vmem_to_hbm [thread:$0]  (%p27564_p10), %s25747_s12, 1920, %s25743_s1, %s14009_s27, %s19097_s22, %s19098_s11, %s19099_s18  }
 0x63b PF: > { %s27565_s13 = sld [smem:[#allocation28_spill]]  ;;  %s27566_s23 = sld [smem:[#allocation25_spill]] }
 0x63c   : > { %s14036_s20 = sand.u32 1, %s19067_s30  }
 0x63d   : > { %s14037_s19 = scalar_lea.sflag [#allocation4], %s14036_s20 }
 0x641   : > { %p27567_p2 = scmp.ne.s32.totalorder %s27565_s13, 0  ;;  %p27568_p0 = scmp.ge.s32.totalorder %s27566_s23, 2 }
 0x643   : > { %p18238_p11 = pnand %p27568_p0, %p27567_p2 }
 0x645   : > { %19062 = dma.done.wait (!%p18238_p11), %s14037_s19, 1920  }
 0x646   : > { %19064 = vsyncadd (!%p18238_p11), %s14037_s19, 4294965376  ;;  %s27569_s12 = sld [smem:[#allocation26_spill]]  ;;  %s27570_s16 = sld [smem:[#allocation24_spill]] }
 0x647   : > { %s27571_s11 = sld [smem:[#allocation27_spill]]  ;;  %s27572_s30 = smov %s19071_s10 }
 0x64c   : > { %p32_p13 = scmp.ge.s32.totalorder %s27569_s12, 4   ;;  %s27573_s10 = smov %s27570_s16 }
 0x64e   :  { %34 = sbr.rel (!%p32_p13) target bundleno = 18 (0x12), region = 189 }
 0x655   :  { %14042 = vsyncpa [#allocation3], 1 }
 0x656   :  { %14044 = vsyncpa [#allocation3 + $0x1], 1 }
 0x657   :  { %14045 = vsyncpa [#allocation6], 1 }
 0x658   :  { %14047 = vsyncpa [#allocation6 + $0x1], 1 }
 0x659   :  { %14048 = vsyncpa [#allocation9], 1 }
 0x65a   :  { %14050 = vsyncpa [#allocation9 + $0x1], 1 }
 0x65b   :  { %14051 = vsyncpa [#allocation12], 1 }
 0x65c   :  { %14053 = vsyncpa [#allocation12 + $0x1], 1 }
 0x65d   :  { %14054 = vsyncpa [#allocation15], 1 }
 0x65e   :  { %14056 = vsyncpa [#allocation15 + $0x1], 1 }
 0x65f   :  { %14057 = vsyncpa [#allocation4], 1 }
 0x660   :  { %14059 = vsyncpa [#allocation4 + $0x1], 1 }

</bundles_post_ra>
